<compile_context>
chip_gen: v5e
topology: v5e:2x2
jax: 0.10.0
libtpu: 0.0.40
codegen_flags: <defaults>
</compile_context>

<pallas_src>
import jax
import jax.numpy as jnp
from jax.experimental import pallas as pl
from jax.experimental.pallas import tpu as pltpu

INPUT_SIZE = 28
HIDDEN = 28 * 3            # 84  -- logical hidden size (matches PyTorch)
HP = 128                   # padded hidden size (lane aligned)
FP = 128                   # padded input-feature size (lane aligned)
G4 = 4 * HP                # 512 -- padded gate width
NUM_CLASSES = 10

# PyTorch LSTM gate order is [i, f, g, o]; the kernel uses [i, f, o, g] so the
# three sigmoid gates are contiguous.
GATE_ORDER = (0, 1, 3, 2)


# ----------------------------- Pallas kernel ------------------------------- #

def _lstm_act(gates, c):
    """Fused LSTM nonlinearity for gate layout [i | f | o | g] (HP lanes each)."""
    s = jax.nn.sigmoid(gates[:, :3 * HP])
    g = jnp.tanh(gates[:, 3 * HP:])
    i = s[:, 0 * HP:1 * HP]
    f = s[:, 1 * HP:2 * HP]
    o = s[:, 2 * HP:3 * HP]
    c_new = f * c + i * g
    h_new = o * jnp.tanh(c_new)
    return h_new, c_new


def lstm_kernel(x_ref,      # (B, T, INPUT_SIZE)
                wih0_ref,   # (FP, G4)   layer-0 input weights (zero-padded rows)
                b0_ref,     # (1, G4)    b_ih0 + b_hh0
                w2_ref,     # (3*HP, G4) row-stacked [Whh0; Wih1; Whh1]
                b1_ref,     # (1, G4)    b_ih1 + b_hh1
                wout_ref,   # (HP, NUM_CLASSES)
                bout_ref,   # (1, NUM_CLASSES)
                out_ref,    # (B, NUM_CLASSES)
                addt_ref):  # (T+1, 2B, G4) scratch: per-step stacked gate addend
    B, T, F = x_ref.shape
    B2 = 2 * B

    # ---- Prologue: batched layer-0 input projection (single MXU call, off
    # the recurrent critical path).  Rows are batch-major: row = b*T + t.
    xf = jnp.concatenate([x_ref[b] for b in range(B)], axis=0)          # (B*T, F)
    xf = jnp.concatenate(
        [xf, jnp.zeros((B * T, FP - F), jnp.float32)], axis=1)          # (B*T, FP)
    gin = jnp.dot(xf, wih0_ref[...], preferred_element_type=jnp.float32)
    gin = gin + b0_ref[...]                                             # (B*T, G4)

    # Per-step additive gate term, pre-stacked for both wavefront cells:
    #   addt[k, 0:B ] = gin[t=k] for k < T, zeros at k = T (epilogue)
    #   addt[k, B:2B] = zeros at k = 0 (keeps layer-1 state at 0), b1 for k >= 1
    b1_rows = jnp.broadcast_to(b1_ref[...], (B, G4))
    zero_rows = jnp.zeros((B, G4), jnp.float32)
    for k in range(T + 1):
        if k < T:
            top = jnp.concatenate(
                [gin[b * T + k:b * T + k + 1, :] for b in range(B)], axis=0)
        else:
            top = zero_rows
        bot = zero_rows if k == 0 else b1_rows
        addt_ref[k] = jnp.concatenate([top, bot], axis=0)               # (2B, G4)

    w2 = w2_ref[...]
    zB = jnp.zeros((B, HP), jnp.float32)

    # ---- Wavefront step 0: layer-0 at t=0 (zero initial state => gates are
    # exactly gin[0]); layer-1 rows see all-zero gates, so their (h, c) stay
    # exactly zero (g-gate = tanh(0) = 0).
    h_st, c_st = _lstm_act(addt_ref[0], jnp.zeros((B2, HP), jnp.float32))

    # ---- Wavefront steps 1..T: ONE fused matmul + ONE fused elementwise pass
    # per step updates layer-0 at t=k and layer-1 at t=k-1 together.
    # h_st/c_st rows 0:B hold layer-0 state, rows B:2B hold layer-1 state.
    for k in range(1, T + 1):
        h0p = h_st[0:B]
        h1p = h_st[B:B2]
        x2 = jnp.concatenate(
            [jnp.concatenate([h0p, zB, zB], axis=1),
             jnp.concatenate([zB, h0p, h1p], axis=1)], axis=0)          # (2B, 3HP)
        gates = (jnp.dot(x2, w2, preferred_element_type=jnp.float32)
                 + addt_ref[k])                                         # (2B, G4)
        h_st, c_st = _lstm_act(gates, c_st)

    # ---- Epilogue: Linear on the final layer-1 hidden state.  Padded lanes
    # of h are zero and padded rows of wout are zero, so no leakage; the junk
    # layer-0 rows produced at k=T are sliced away.
    logits = jnp.dot(h_st, wout_ref[...], preferred_element_type=jnp.float32)
    out_ref[...] = logits[B:B2, :] + bout_ref[...]


# ------------------------------ Host wrapper ------------------------------- #

def rnn_forward(x, params):
    """x: (B, T, 28) float32, batch-first as in the PyTorch module."""
    B, T, F = x.shape
    assert F == INPUT_SIZE
    x = x.astype(jnp.float32)

    vmem = pl.BlockSpec(memory_space=pltpu.MemorySpace.VMEM)
    cost = pl.CostEstimate(
        flops=2 * (T * B * FP * G4                    # input projection
                   + T * (2 * B) * (3 * HP) * G4      # fused recurrent matmuls
                   + (2 * B) * HP * NUM_CLASSES),     # output head
        transcendentals=(T + 1) * (2 * B) * 5 * HP,
        bytes_accessed=4 * (x.size + params["wih0_p"].size
                            + params["b0_p"].size + params["w2_p"].size
                            + params["b1_p"].size + params["wout_p"].size
                            + params["bout_p"].size + B * NUM_CLASSES),
    )

    return pl.pallas_call(
        lstm_kernel,
        out_shape=jax.ShapeDtypeStruct((B, NUM_CLASSES), jnp.float32),
        in_specs=[vmem] * 7,
        out_specs=vmem,
        scratch_shapes=[pltpu.VMEM((T + 1, 2 * B, G4), jnp.float32)],
        cost_estimate=cost,
    )(x, params["wih0_p"], params["b0_p"], params["w2_p"],
      params["b1_p"], params["wout_p"], params["bout_p"])


# --------------------------- Parameter handling ---------------------------- #

def _pad_gate_cols(w_t):
    """(K, 4*HIDDEN) -> (K, G4): reorder gates to [i,f,o,g], pad 84 -> 128."""
    blocks = [jnp.pad(w_t[:, g * HIDDEN:(g + 1) * HIDDEN],
                      ((0, 0), (0, HP - HIDDEN))) for g in GATE_ORDER]
    return jnp.concatenate(blocks, axis=1)


def _pad_gate_vec(b):
    """(4*HIDDEN,) -> (G4,): reorder gates to [i,f,o,g], pad 84 -> 128."""
    blocks = [jnp.pad(b[g * HIDDEN:(g + 1) * HIDDEN], (0, HP - HIDDEN))
              for g in GATE_ORDER]
    return jnp.concatenate(blocks)


def _pad_rows(w, rows):
    return jnp.pad(w, ((0, rows - w.shape[0]), (0, 0)))


def init_params(key):
    """Deterministic init with PyTorch LSTM/Linear shapes + padded copies."""
    k = jax.random.split(key, 10)
    s = 1.0 / jnp.sqrt(HIDDEN)
    u = lambda kk, shape: jax.random.uniform(kk, shape, jnp.float32, -s, s)
    # PyTorch stores weight_ih_l* as (4H, in); transpose for x @ W^T.
    w_ih0 = u(k[0], (4 * HIDDEN, INPUT_SIZE))
    w_hh0 = u(k[1], (4 * HIDDEN, HIDDEN))
    b_ih0 = u(k[2], (4 * HIDDEN,))
    b_hh0 = u(k[3], (4 * HIDDEN,))
    w_ih1 = u(k[4], (4 * HIDDEN, HIDDEN))
    w_hh1 = u(k[5], (4 * HIDDEN, HIDDEN))
    b_ih1 = u(k[6], (4 * HIDDEN,))
    b_hh1 = u(k[7], (4 * HIDDEN,))
    w_out = u(k[8], (NUM_CLASSES, HIDDEN))
    b_out = u(k[9], (NUM_CLASSES,))

    p = {
        # Unpadded, PyTorch-semantic tensors (used by the pure-JAX reference).
        "wih0_t": w_ih0.T, "whh0_t": w_hh0.T, "b0": (b_ih0 + b_hh0)[None, :],
        "wih1_t": w_ih1.T, "whh1_t": w_hh1.T, "b1": (b_ih1 + b_hh1)[None, :],
        "wout_t": w_out.T, "bout": b_out[None, :],
    }
    # Lane-aligned, gate-reordered padded copies for the kernel.
    p["wih0_p"] = _pad_rows(_pad_gate_cols(w_ih0.T), FP)           # (128, 512)
    p["b0_p"] = _pad_gate_vec(b_ih0 + b_hh0)[None, :]              # (1, 512)
    whh0_p = _pad_rows(_pad_gate_cols(w_hh0.T), HP)                # (128, 512)
    wih1_p = _pad_rows(_pad_gate_cols(w_ih1.T), HP)                # (128, 512)
    whh1_p = _pad_rows(_pad_gate_cols(w_hh1.T), HP)                # (128, 512)
    p["w2_p"] = jnp.concatenate([whh0_p, wih1_p, whh1_p], axis=0)  # (384, 512)
    p["b1_p"] = _pad_gate_vec(b_ih1 + b_hh1)[None, :]              # (1, 512)
    p["wout_p"] = _pad_rows(w_out.T, HP)                           # (128, 10)
    p["bout_p"] = b_out[None, :]                                   # (1, 10)
    return p


# ------------------------------- Reference --------------------------------- #

def _ref_cell(x_t, h, c, w_ih_t, w_hh_t, b):
    gates = x_t @ w_ih_t + h @ w_hh_t + b
    i = jax.nn.sigmoid(gates[:, 0 * HIDDEN:1 * HIDDEN])
    f = jax.nn.sigmoid(gates[:, 1 * HIDDEN:2 * HIDDEN])
    g = jnp.tanh(gates[:, 2 * HIDDEN:3 * HIDDEN])
    o = jax.nn.sigmoid(gates[:, 3 * HIDDEN:4 * HIDDEN])
    c_new = f * c + i * g
    return o * jnp.tanh(c_new), c_new


def rnn_reference(x, p):
    """Pure-JAX reference mirroring PyTorch nn.LSTM(2 layers) + Linear."""
    B, T, _ = x.shape
    h0 = c0 = h1 = c1 = jnp.zeros((B, HIDDEN), jnp.float32)
    for t in range(T):
        h0, c0 = _ref_cell(x[:, t, :], h0, c0,
                           p["wih0_t"], p["whh0_t"], p["b0"])
        h1, c1 = _ref_cell(h0, h1, c1, p["wih1_t"], p["whh1_t"], p["b1"])
    return h1 @ p["wout_t"] + p["bout"]


# ---------------------------------- Main ------------------------------------ #

if __name__ == "__main__":
    key = jax.random.PRNGKey(0)
    kx, kp = jax.random.split(key)
    B, T = 2, 8
    x = jax.random.normal(kx, (B, T, INPUT_SIZE), jnp.float32)
    params = init_params(kp)

    out = jax.block_until_ready(rnn_forward(x, params))
    ref = rnn_reference(x, params)
    assert out.shape == (B, NUM_CLASSES)
    assert jnp.allclose(out, ref, atol=5e-4, rtol=5e-4), \
        float(jnp.max(jnp.abs(out - ref)))
    print("KERNEL_OK")
</pallas_src>

<mosaic_0001>
module attributes {stable_mosaic.version = 11 : i64} {
  func.func @lstm_kernel(%arg0: memref<2x8x28xf32, #tpu.memory_space<vmem>>, %arg1: memref<128x512xf32, #tpu.memory_space<vmem>>, %arg2: memref<1x512xf32, #tpu.memory_space<vmem>>, %arg3: memref<384x512xf32, #tpu.memory_space<vmem>>, %arg4: memref<1x512xf32, #tpu.memory_space<vmem>>, %arg5: memref<128x10xf32, #tpu.memory_space<vmem>>, %arg6: memref<1x10xf32, #tpu.memory_space<vmem>>, %arg7: memref<2x10xf32, #tpu.memory_space<vmem>>, %arg8: memref<9x4x512xf32, #tpu.memory_space<vmem>>) attributes {dimension_semantics = [], scalar_prefetch = 0 : i64, scratch_operands = 1 : i64, tpu.core_type = #tpu.core_type<tc>} {
    %c0 = arith.constant 0 : index
    %c0_0 = arith.constant 0 : index
    %c0_1 = arith.constant 0 : index
    %0 = vector.load %arg0[%c0, %c0_0, %c0_1] : memref<2x8x28xf32, #tpu.memory_space<vmem>>, vector<1x8x28xf32>
    %1 = vector.shape_cast %0 : vector<1x8x28xf32> to vector<8x28xf32>
    %c1 = arith.constant 1 : index
    %c0_2 = arith.constant 0 : index
    %c0_3 = arith.constant 0 : index
    %2 = vector.load %arg0[%c1, %c0_2, %c0_3] : memref<2x8x28xf32, #tpu.memory_space<vmem>>, vector<1x8x28xf32>
    %3 = vector.shape_cast %2 : vector<1x8x28xf32> to vector<8x28xf32>
    %4 = tpu.concatenate %1, %3 in 0 : vector<8x28xf32>, vector<8x28xf32> -> vector<16x28xf32>
    %cst = arith.constant 0.000000e+00 : f32
    %5 = vector.broadcast %cst : f32 to vector<16x100xf32>
    %6 = tpu.concatenate %4, %5 in 1 : vector<16x28xf32>, vector<16x100xf32> -> vector<16x128xf32>
    %c0_4 = arith.constant 0 : index
    %c0_5 = arith.constant 0 : index
    %7 = vector.load %arg1[%c0_4, %c0_5] : memref<128x512xf32, #tpu.memory_space<vmem>>, vector<128x512xf32>
    %cst_6 = arith.constant dense<0.000000e+00> : vector<16x512xf32>
    %8 = tpu.matmul %6, %7, %cst_6 {dimension_numbers = #tpu.dot_dimension_numbers<[1], [0], [0], [1], [0, 0, 1, 1], [], []>} : vector<16x128xf32>, vector<128x512xf32>, vector<16x512xf32> -> vector<16x512xf32>
    %c0_7 = arith.constant 0 : index
    %c0_8 = arith.constant 0 : index
    %9 = vector.load %arg2[%c0_7, %c0_8] : memref<1x512xf32, #tpu.memory_space<vmem>>, vector<1x512xf32>
    %10 = vector.broadcast %9 : vector<1x512xf32> to vector<16x512xf32>
    %11 = arith.addf %8, %10 : vector<16x512xf32>
    %c0_9 = arith.constant 0 : index
    %c0_10 = arith.constant 0 : index
    %12 = vector.load %arg4[%c0_9, %c0_10] : memref<1x512xf32, #tpu.memory_space<vmem>>, vector<1x512xf32>
    %13 = vector.shape_cast %12 : vector<1x512xf32> to vector<1x512xf32>
    %14 = vector.broadcast %13 : vector<1x512xf32> to vector<2x512xf32>
    %cst_11 = arith.constant 0.000000e+00 : f32
    %15 = vector.broadcast %cst_11 : f32 to vector<2x512xf32>
    %16 = vector.extract_strided_slice %11 {offsets = [0, 0], sizes = [1, 512], strides = [1, 1]} : vector<16x512xf32> to vector<1x512xf32>
    %17 = vector.extract_strided_slice %11 {offsets = [8, 0], sizes = [1, 512], strides = [1, 1]} : vector<16x512xf32> to vector<1x512xf32>
    %18 = tpu.concatenate %16, %17 in 0 : vector<1x512xf32>, vector<1x512xf32> -> vector<2x512xf32>
    %19 = tpu.concatenate %18, %15 in 0 : vector<2x512xf32>, vector<2x512xf32> -> vector<4x512xf32>
    %c0_12 = arith.constant 0 : index
    %c0_13 = arith.constant 0 : index
    %c0_14 = arith.constant 0 : index
    %20 = vector.load %arg8[%c0_12, %c0_13, %c0_14] : memref<9x4x512xf32, #tpu.memory_space<vmem>>, vector<1x4x512xf32>
    %21 = vector.shape_cast %20 : vector<1x4x512xf32> to vector<4x512xf32>
    %22 = vector.shape_cast %19 : vector<4x512xf32> to vector<1x4x512xf32>
    tpu.vector_store %arg8[%c0_12, %c0_13, %c0_14], %22 {strides = array<i32>} : memref<9x4x512xf32, #tpu.memory_space<vmem>>, vector<1x4x512xf32>,
    %23 = vector.extract_strided_slice %11 {offsets = [1, 0], sizes = [1, 512], strides = [1, 1]} : vector<16x512xf32> to vector<1x512xf32>
    %24 = vector.extract_strided_slice %11 {offsets = [9, 0], sizes = [1, 512], strides = [1, 1]} : vector<16x512xf32> to vector<1x512xf32>
    %25 = tpu.concatenate %23, %24 in 0 : vector<1x512xf32>, vector<1x512xf32> -> vector<2x512xf32>
    %26 = tpu.concatenate %25, %14 in 0 : vector<2x512xf32>, vector<2x512xf32> -> vector<4x512xf32>
    %c1_15 = arith.constant 1 : index
    %c0_16 = arith.constant 0 : index
    %c0_17 = arith.constant 0 : index
    %27 = vector.load %arg8[%c1_15, %c0_16, %c0_17] : memref<9x4x512xf32, #tpu.memory_space<vmem>>, vector<1x4x512xf32>
    %28 = vector.shape_cast %27 : vector<1x4x512xf32> to vector<4x512xf32>
    %29 = vector.shape_cast %26 : vector<4x512xf32> to vector<1x4x512xf32>
    tpu.vector_store %arg8[%c1_15, %c0_16, %c0_17], %29 {strides = array<i32>} : memref<9x4x512xf32, #tpu.memory_space<vmem>>, vector<1x4x512xf32>,
    %30 = vector.extract_strided_slice %11 {offsets = [2, 0], sizes = [1, 512], strides = [1, 1]} : vector<16x512xf32> to vector<1x512xf32>
    %31 = vector.extract_strided_slice %11 {offsets = [10, 0], sizes = [1, 512], strides = [1, 1]} : vector<16x512xf32> to vector<1x512xf32>
    %32 = tpu.concatenate %30, %31 in 0 : vector<1x512xf32>, vector<1x512xf32> -> vector<2x512xf32>
    %33 = tpu.concatenate %32, %14 in 0 : vector<2x512xf32>, vector<2x512xf32> -> vector<4x512xf32>
    %c2 = arith.constant 2 : index
    %c0_18 = arith.constant 0 : index
    %c0_19 = arith.constant 0 : index
    %34 = vector.load %arg8[%c2, %c0_18, %c0_19] : memref<9x4x512xf32, #tpu.memory_space<vmem>>, vector<1x4x512xf32>
    %35 = vector.shape_cast %34 : vector<1x4x512xf32> to vector<4x512xf32>
    %36 = vector.shape_cast %33 : vector<4x512xf32> to vector<1x4x512xf32>
    tpu.vector_store %arg8[%c2, %c0_18, %c0_19], %36 {strides = array<i32>} : memref<9x4x512xf32, #tpu.memory_space<vmem>>, vector<1x4x512xf32>,
    %37 = vector.extract_strided_slice %11 {offsets = [3, 0], sizes = [1, 512], strides = [1, 1]} : vector<16x512xf32> to vector<1x512xf32>
    %38 = vector.extract_strided_slice %11 {offsets = [11, 0], sizes = [1, 512], strides = [1, 1]} : vector<16x512xf32> to vector<1x512xf32>
    %39 = tpu.concatenate %37, %38 in 0 : vector<1x512xf32>, vector<1x512xf32> -> vector<2x512xf32>
    %40 = tpu.concatenate %39, %14 in 0 : vector<2x512xf32>, vector<2x512xf32> -> vector<4x512xf32>
    %c3 = arith.constant 3 : index
    %c0_20 = arith.constant 0 : index
    %c0_21 = arith.constant 0 : index
    %41 = vector.load %arg8[%c3, %c0_20, %c0_21] : memref<9x4x512xf32, #tpu.memory_space<vmem>>, vector<1x4x512xf32>
    %42 = vector.shape_cast %41 : vector<1x4x512xf32> to vector<4x512xf32>
    %43 = vector.shape_cast %40 : vector<4x512xf32> to vector<1x4x512xf32>
    tpu.vector_store %arg8[%c3, %c0_20, %c0_21], %43 {strides = array<i32>} : memref<9x4x512xf32, #tpu.memory_space<vmem>>, vector<1x4x512xf32>,
    %44 = vector.extract_strided_slice %11 {offsets = [4, 0], sizes = [1, 512], strides = [1, 1]} : vector<16x512xf32> to vector<1x512xf32>
    %45 = vector.extract_strided_slice %11 {offsets = [12, 0], sizes = [1, 512], strides = [1, 1]} : vector<16x512xf32> to vector<1x512xf32>
    %46 = tpu.concatenate %44, %45 in 0 : vector<1x512xf32>, vector<1x512xf32> -> vector<2x512xf32>
    %47 = tpu.concatenate %46, %14 in 0 : vector<2x512xf32>, vector<2x512xf32> -> vector<4x512xf32>
    %c4 = arith.constant 4 : index
    %c0_22 = arith.constant 0 : index
    %c0_23 = arith.constant 0 : index
    %48 = vector.load %arg8[%c4, %c0_22, %c0_23] : memref<9x4x512xf32, #tpu.memory_space<vmem>>, vector<1x4x512xf32>
    %49 = vector.shape_cast %48 : vector<1x4x512xf32> to vector<4x512xf32>
    %50 = vector.shape_cast %47 : vector<4x512xf32> to vector<1x4x512xf32>
    tpu.vector_store %arg8[%c4, %c0_22, %c0_23], %50 {strides = array<i32>} : memref<9x4x512xf32, #tpu.memory_space<vmem>>, vector<1x4x512xf32>,
    %51 = vector.extract_strided_slice %11 {offsets = [5, 0], sizes = [1, 512], strides = [1, 1]} : vector<16x512xf32> to vector<1x512xf32>
    %52 = vector.extract_strided_slice %11 {offsets = [13, 0], sizes = [1, 512], strides = [1, 1]} : vector<16x512xf32> to vector<1x512xf32>
    %53 = tpu.concatenate %51, %52 in 0 : vector<1x512xf32>, vector<1x512xf32> -> vector<2x512xf32>
    %54 = tpu.concatenate %53, %14 in 0 : vector<2x512xf32>, vector<2x512xf32> -> vector<4x512xf32>
    %c5 = arith.constant 5 : index
    %c0_24 = arith.constant 0 : index
    %c0_25 = arith.constant 0 : index
    %55 = vector.load %arg8[%c5, %c0_24, %c0_25] : memref<9x4x512xf32, #tpu.memory_space<vmem>>, vector<1x4x512xf32>
    %56 = vector.shape_cast %55 : vector<1x4x512xf32> to vector<4x512xf32>
    %57 = vector.shape_cast %54 : vector<4x512xf32> to vector<1x4x512xf32>
    tpu.vector_store %arg8[%c5, %c0_24, %c0_25], %57 {strides = array<i32>} : memref<9x4x512xf32, #tpu.memory_space<vmem>>, vector<1x4x512xf32>,
    %58 = vector.extract_strided_slice %11 {offsets = [6, 0], sizes = [1, 512], strides = [1, 1]} : vector<16x512xf32> to vector<1x512xf32>
    %59 = vector.extract_strided_slice %11 {offsets = [14, 0], sizes = [1, 512], strides = [1, 1]} : vector<16x512xf32> to vector<1x512xf32>
    %60 = tpu.concatenate %58, %59 in 0 : vector<1x512xf32>, vector<1x512xf32> -> vector<2x512xf32>
    %61 = tpu.concatenate %60, %14 in 0 : vector<2x512xf32>, vector<2x512xf32> -> vector<4x512xf32>
    %c6 = arith.constant 6 : index
    %c0_26 = arith.constant 0 : index
    %c0_27 = arith.constant 0 : index
    %62 = vector.load %arg8[%c6, %c0_26, %c0_27] : memref<9x4x512xf32, #tpu.memory_space<vmem>>, vector<1x4x512xf32>
    %63 = vector.shape_cast %62 : vector<1x4x512xf32> to vector<4x512xf32>
    %64 = vector.shape_cast %61 : vector<4x512xf32> to vector<1x4x512xf32>
    tpu.vector_store %arg8[%c6, %c0_26, %c0_27], %64 {strides = array<i32>} : memref<9x4x512xf32, #tpu.memory_space<vmem>>, vector<1x4x512xf32>,
    %65 = vector.extract_strided_slice %11 {offsets = [7, 0], sizes = [1, 512], strides = [1, 1]} : vector<16x512xf32> to vector<1x512xf32>
    %66 = vector.extract_strided_slice %11 {offsets = [15, 0], sizes = [1, 512], strides = [1, 1]} : vector<16x512xf32> to vector<1x512xf32>
    %67 = tpu.concatenate %65, %66 in 0 : vector<1x512xf32>, vector<1x512xf32> -> vector<2x512xf32>
    %68 = tpu.concatenate %67, %14 in 0 : vector<2x512xf32>, vector<2x512xf32> -> vector<4x512xf32>
    %c7 = arith.constant 7 : index
    %c0_28 = arith.constant 0 : index
    %c0_29 = arith.constant 0 : index
    %69 = vector.load %arg8[%c7, %c0_28, %c0_29] : memref<9x4x512xf32, #tpu.memory_space<vmem>>, vector<1x4x512xf32>
    %70 = vector.shape_cast %69 : vector<1x4x512xf32> to vector<4x512xf32>
    %71 = vector.shape_cast %68 : vector<4x512xf32> to vector<1x4x512xf32>
    tpu.vector_store %arg8[%c7, %c0_28, %c0_29], %71 {strides = array<i32>} : memref<9x4x512xf32, #tpu.memory_space<vmem>>, vector<1x4x512xf32>,
    %72 = tpu.concatenate %15, %14 in 0 : vector<2x512xf32>, vector<2x512xf32> -> vector<4x512xf32>
    %c8 = arith.constant 8 : index
    %c0_30 = arith.constant 0 : index
    %c0_31 = arith.constant 0 : index
    %73 = vector.load %arg8[%c8, %c0_30, %c0_31] : memref<9x4x512xf32, #tpu.memory_space<vmem>>, vector<1x4x512xf32>
    %74 = vector.shape_cast %73 : vector<1x4x512xf32> to vector<4x512xf32>
    %75 = vector.shape_cast %72 : vector<4x512xf32> to vector<1x4x512xf32>
    tpu.vector_store %arg8[%c8, %c0_30, %c0_31], %75 {strides = array<i32>} : memref<9x4x512xf32, #tpu.memory_space<vmem>>, vector<1x4x512xf32>,
    %c0_32 = arith.constant 0 : index
    %c0_33 = arith.constant 0 : index
    %76 = vector.load %arg3[%c0_32, %c0_33] : memref<384x512xf32, #tpu.memory_space<vmem>>, vector<384x512xf32>
    %cst_34 = arith.constant 0.000000e+00 : f32
    %77 = vector.broadcast %cst_34 : f32 to vector<2x128xf32>
    %c0_35 = arith.constant 0 : index
    %c0_36 = arith.constant 0 : index
    %c0_37 = arith.constant 0 : index
    %78 = vector.load %arg8[%c0_35, %c0_36, %c0_37] : memref<9x4x512xf32, #tpu.memory_space<vmem>>, vector<1x4x512xf32>
    %79 = vector.shape_cast %78 : vector<1x4x512xf32> to vector<4x512xf32>
    %cst_38 = arith.constant 0.000000e+00 : f32
    %80 = vector.broadcast %cst_38 : f32 to vector<4x128xf32>
    %81 = vector.extract_strided_slice %79 {offsets = [0, 0], sizes = [4, 384], strides = [1, 1]} : vector<4x512xf32> to vector<4x384xf32>
    %82 = arith.negf %81 : vector<4x384xf32>
    %83 = math.exp %82 : vector<4x384xf32>
    %cst_39 = arith.constant 1.000000e+00 : f32
    %84 = vector.broadcast %cst_39 : f32 to vector<4x384xf32>
    %85 = arith.addf %84, %83 : vector<4x384xf32>
    %86 = arith.divf %84, %85 : vector<4x384xf32>
    %87 = vector.extract_strided_slice %79 {offsets = [0, 384], sizes = [4, 128], strides = [1, 1]} : vector<4x512xf32> to vector<4x128xf32>
    %88 = math.tanh %87 : vector<4x128xf32>
    %89 = vector.extract_strided_slice %86 {offsets = [0, 0], sizes = [4, 128], strides = [1, 1]} : vector<4x384xf32> to vector<4x128xf32>
    %90 = vector.extract_strided_slice %86 {offsets = [0, 128], sizes = [4, 128], strides = [1, 1]} : vector<4x384xf32> to vector<4x128xf32>
    %91 = vector.extract_strided_slice %86 {offsets = [0, 256], sizes = [4, 128], strides = [1, 1]} : vector<4x384xf32> to vector<4x128xf32>
    %92 = arith.mulf %90, %80 : vector<4x128xf32>
    %93 = arith.mulf %89, %88 : vector<4x128xf32>
    %94 = arith.addf %92, %93 : vector<4x128xf32>
    %95 = math.tanh %94 : vector<4x128xf32>
    %96 = arith.mulf %91, %95 : vector<4x128xf32>
    %97 = vector.extract_strided_slice %96 {offsets = [0, 0], sizes = [2, 128], strides = [1, 1]} : vector<4x128xf32> to vector<2x128xf32>
    %98 = vector.extract_strided_slice %96 {offsets = [2, 0], sizes = [2, 128], strides = [1, 1]} : vector<4x128xf32> to vector<2x128xf32>
    %99 = tpu.concatenate %97, %77, %77 in 1 : vector<2x128xf32>, vector<2x128xf32>, vector<2x128xf32> -> vector<2x384xf32>
    %100 = tpu.concatenate %77, %97, %98 in 1 : vector<2x128xf32>, vector<2x128xf32>, vector<2x128xf32> -> vector<2x384xf32>
    %101 = tpu.concatenate %99, %100 in 0 : vector<2x384xf32>, vector<2x384xf32> -> vector<4x384xf32>
    %cst_40 = arith.constant dense<0.000000e+00> : vector<4x512xf32>
    %102 = tpu.matmul %101, %76, %cst_40 {dimension_numbers = #tpu.dot_dimension_numbers<[1], [0], [0], [1], [0, 0, 1, 1], [], []>} : vector<4x384xf32>, vector<384x512xf32>, vector<4x512xf32> -> vector<4x512xf32>
    %c1_41 = arith.constant 1 : index
    %c0_42 = arith.constant 0 : index
    %c0_43 = arith.constant 0 : index
    %103 = vector.load %arg8[%c1_41, %c0_42, %c0_43] : memref<9x4x512xf32, #tpu.memory_space<vmem>>, vector<1x4x512xf32>
    %104 = vector.shape_cast %103 : vector<1x4x512xf32> to vector<4x512xf32>
    %105 = arith.addf %102, %104 : vector<4x512xf32>
    %106 = vector.extract_strided_slice %105 {offsets = [0, 0], sizes = [4, 384], strides = [1, 1]} : vector<4x512xf32> to vector<4x384xf32>
    %107 = arith.negf %106 : vector<4x384xf32>
    %108 = math.exp %107 : vector<4x384xf32>
    %cst_44 = arith.constant 1.000000e+00 : f32
    %109 = vector.broadcast %cst_44 : f32 to vector<4x384xf32>
    %110 = arith.addf %109, %108 : vector<4x384xf32>
    %111 = arith.divf %109, %110 : vector<4x384xf32>
    %112 = vector.extract_strided_slice %105 {offsets = [0, 384], sizes = [4, 128], strides = [1, 1]} : vector<4x512xf32> to vector<4x128xf32>
    %113 = math.tanh %112 : vector<4x128xf32>
    %114 = vector.extract_strided_slice %111 {offsets = [0, 0], sizes = [4, 128], strides = [1, 1]} : vector<4x384xf32> to vector<4x128xf32>
    %115 = vector.extract_strided_slice %111 {offsets = [0, 128], sizes = [4, 128], strides = [1, 1]} : vector<4x384xf32> to vector<4x128xf32>
    %116 = vector.extract_strided_slice %111 {offsets = [0, 256], sizes = [4, 128], strides = [1, 1]} : vector<4x384xf32> to vector<4x128xf32>
    %117 = arith.mulf %115, %94 : vector<4x128xf32>
    %118 = arith.mulf %114, %113 : vector<4x128xf32>
    %119 = arith.addf %117, %118 : vector<4x128xf32>
    %120 = math.tanh %119 : vector<4x128xf32>
    %121 = arith.mulf %116, %120 : vector<4x128xf32>
    %122 = vector.extract_strided_slice %121 {offsets = [0, 0], sizes = [2, 128], strides = [1, 1]} : vector<4x128xf32> to vector<2x128xf32>
    %123 = vector.extract_strided_slice %121 {offsets = [2, 0], sizes = [2, 128], strides = [1, 1]} : vector<4x128xf32> to vector<2x128xf32>
    %124 = tpu.concatenate %122, %77, %77 in 1 : vector<2x128xf32>, vector<2x128xf32>, vector<2x128xf32> -> vector<2x384xf32>
    %125 = tpu.concatenate %77, %122, %123 in 1 : vector<2x128xf32>, vector<2x128xf32>, vector<2x128xf32> -> vector<2x384xf32>
    %126 = tpu.concatenate %124, %125 in 0 : vector<2x384xf32>, vector<2x384xf32> -> vector<4x384xf32>
    %cst_45 = arith.constant dense<0.000000e+00> : vector<4x512xf32>
    %127 = tpu.matmul %126, %76, %cst_45 {dimension_numbers = #tpu.dot_dimension_numbers<[1], [0], [0], [1], [0, 0, 1, 1], [], []>} : vector<4x384xf32>, vector<384x512xf32>, vector<4x512xf32> -> vector<4x512xf32>
    %c2_46 = arith.constant 2 : index
    %c0_47 = arith.constant 0 : index
    %c0_48 = arith.constant 0 : index
    %128 = vector.load %arg8[%c2_46, %c0_47, %c0_48] : memref<9x4x512xf32, #tpu.memory_space<vmem>>, vector<1x4x512xf32>
    %129 = vector.shape_cast %128 : vector<1x4x512xf32> to vector<4x512xf32>
    %130 = arith.addf %127, %129 : vector<4x512xf32>
    %131 = vector.extract_strided_slice %130 {offsets = [0, 0], sizes = [4, 384], strides = [1, 1]} : vector<4x512xf32> to vector<4x384xf32>
    %132 = arith.negf %131 : vector<4x384xf32>
    %133 = math.exp %132 : vector<4x384xf32>
    %cst_49 = arith.constant 1.000000e+00 : f32
    %134 = vector.broadcast %cst_49 : f32 to vector<4x384xf32>
    %135 = arith.addf %134, %133 : vector<4x384xf32>
    %136 = arith.divf %134, %135 : vector<4x384xf32>
    %137 = vector.extract_strided_slice %130 {offsets = [0, 384], sizes = [4, 128], strides = [1, 1]} : vector<4x512xf32> to vector<4x128xf32>
    %138 = math.tanh %137 : vector<4x128xf32>
    %139 = vector.extract_strided_slice %136 {offsets = [0, 0], sizes = [4, 128], strides = [1, 1]} : vector<4x384xf32> to vector<4x128xf32>
    %140 = vector.extract_strided_slice %136 {offsets = [0, 128], sizes = [4, 128], strides = [1, 1]} : vector<4x384xf32> to vector<4x128xf32>
    %141 = vector.extract_strided_slice %136 {offsets = [0, 256], sizes = [4, 128], strides = [1, 1]} : vector<4x384xf32> to vector<4x128xf32>
    %142 = arith.mulf %140, %119 : vector<4x128xf32>
    %143 = arith.mulf %139, %138 : vector<4x128xf32>
    %144 = arith.addf %142, %143 : vector<4x128xf32>
    %145 = math.tanh %144 : vector<4x128xf32>
    %146 = arith.mulf %141, %145 : vector<4x128xf32>
    %147 = vector.extract_strided_slice %146 {offsets = [0, 0], sizes = [2, 128], strides = [1, 1]} : vector<4x128xf32> to vector<2x128xf32>
    %148 = vector.extract_strided_slice %146 {offsets = [2, 0], sizes = [2, 128], strides = [1, 1]} : vector<4x128xf32> to vector<2x128xf32>
    %149 = tpu.concatenate %147, %77, %77 in 1 : vector<2x128xf32>, vector<2x128xf32>, vector<2x128xf32> -> vector<2x384xf32>
    %150 = tpu.concatenate %77, %147, %148 in 1 : vector<2x128xf32>, vector<2x128xf32>, vector<2x128xf32> -> vector<2x384xf32>
    %151 = tpu.concatenate %149, %150 in 0 : vector<2x384xf32>, vector<2x384xf32> -> vector<4x384xf32>
    %cst_50 = arith.constant dense<0.000000e+00> : vector<4x512xf32>
    %152 = tpu.matmul %151, %76, %cst_50 {dimension_numbers = #tpu.dot_dimension_numbers<[1], [0], [0], [1], [0, 0, 1, 1], [], []>} : vector<4x384xf32>, vector<384x512xf32>, vector<4x512xf32> -> vector<4x512xf32>
    %c3_51 = arith.constant 3 : index
    %c0_52 = arith.constant 0 : index
    %c0_53 = arith.constant 0 : index
    %153 = vector.load %arg8[%c3_51, %c0_52, %c0_53] : memref<9x4x512xf32, #tpu.memory_space<vmem>>, vector<1x4x512xf32>
    %154 = vector.shape_cast %153 : vector<1x4x512xf32> to vector<4x512xf32>
    %155 = arith.addf %152, %154 : vector<4x512xf32>
    %156 = vector.extract_strided_slice %155 {offsets = [0, 0], sizes = [4, 384], strides = [1, 1]} : vector<4x512xf32> to vector<4x384xf32>
    %157 = arith.negf %156 : vector<4x384xf32>
    %158 = math.exp %157 : vector<4x384xf32>
    %cst_54 = arith.constant 1.000000e+00 : f32
    %159 = vector.broadcast %cst_54 : f32 to vector<4x384xf32>
    %160 = arith.addf %159, %158 : vector<4x384xf32>
    %161 = arith.divf %159, %160 : vector<4x384xf32>
    %162 = vector.extract_strided_slice %155 {offsets = [0, 384], sizes = [4, 128], strides = [1, 1]} : vector<4x512xf32> to vector<4x128xf32>
    %163 = math.tanh %162 : vector<4x128xf32>
    %164 = vector.extract_strided_slice %161 {offsets = [0, 0], sizes = [4, 128], strides = [1, 1]} : vector<4x384xf32> to vector<4x128xf32>
    %165 = vector.extract_strided_slice %161 {offsets = [0, 128], sizes = [4, 128], strides = [1, 1]} : vector<4x384xf32> to vector<4x128xf32>
    %166 = vector.extract_strided_slice %161 {offsets = [0, 256], sizes = [4, 128], strides = [1, 1]} : vector<4x384xf32> to vector<4x128xf32>
    %167 = arith.mulf %165, %144 : vector<4x128xf32>
    %168 = arith.mulf %164, %163 : vector<4x128xf32>
    %169 = arith.addf %167, %168 : vector<4x128xf32>
    %170 = math.tanh %169 : vector<4x128xf32>
    %171 = arith.mulf %166, %170 : vector<4x128xf32>
    %172 = vector.extract_strided_slice %171 {offsets = [0, 0], sizes = [2, 128], strides = [1, 1]} : vector<4x128xf32> to vector<2x128xf32>
    %173 = vector.extract_strided_slice %171 {offsets = [2, 0], sizes = [2, 128], strides = [1, 1]} : vector<4x128xf32> to vector<2x128xf32>
    %174 = tpu.concatenate %172, %77, %77 in 1 : vector<2x128xf32>, vector<2x128xf32>, vector<2x128xf32> -> vector<2x384xf32>
    %175 = tpu.concatenate %77, %172, %173 in 1 : vector<2x128xf32>, vector<2x128xf32>, vector<2x128xf32> -> vector<2x384xf32>
    %176 = tpu.concatenate %174, %175 in 0 : vector<2x384xf32>, vector<2x384xf32> -> vector<4x384xf32>
    %cst_55 = arith.constant dense<0.000000e+00> : vector<4x512xf32>
    %177 = tpu.matmul %176, %76, %cst_55 {dimension_numbers = #tpu.dot_dimension_numbers<[1], [0], [0], [1], [0, 0, 1, 1], [], []>} : vector<4x384xf32>, vector<384x512xf32>, vector<4x512xf32> -> vector<4x512xf32>
    %c4_56 = arith.constant 4 : index
    %c0_57 = arith.constant 0 : index
    %c0_58 = arith.constant 0 : index
    %178 = vector.load %arg8[%c4_56, %c0_57, %c0_58] : memref<9x4x512xf32, #tpu.memory_space<vmem>>, vector<1x4x512xf32>
    %179 = vector.shape_cast %178 : vector<1x4x512xf32> to vector<4x512xf32>
    %180 = arith.addf %177, %179 : vector<4x512xf32>
    %181 = vector.extract_strided_slice %180 {offsets = [0, 0], sizes = [4, 384], strides = [1, 1]} : vector<4x512xf32> to vector<4x384xf32>
    %182 = arith.negf %181 : vector<4x384xf32>
    %183 = math.exp %182 : vector<4x384xf32>
    %cst_59 = arith.constant 1.000000e+00 : f32
    %184 = vector.broadcast %cst_59 : f32 to vector<4x384xf32>
    %185 = arith.addf %184, %183 : vector<4x384xf32>
    %186 = arith.divf %184, %185 : vector<4x384xf32>
    %187 = vector.extract_strided_slice %180 {offsets = [0, 384], sizes = [4, 128], strides = [1, 1]} : vector<4x512xf32> to vector<4x128xf32>
    %188 = math.tanh %187 : vector<4x128xf32>
    %189 = vector.extract_strided_slice %186 {offsets = [0, 0], sizes = [4, 128], strides = [1, 1]} : vector<4x384xf32> to vector<4x128xf32>
    %190 = vector.extract_strided_slice %186 {offsets = [0, 128], sizes = [4, 128], strides = [1, 1]} : vector<4x384xf32> to vector<4x128xf32>
    %191 = vector.extract_strided_slice %186 {offsets = [0, 256], sizes = [4, 128], strides = [1, 1]} : vector<4x384xf32> to vector<4x128xf32>
    %192 = arith.mulf %190, %169 : vector<4x128xf32>
    %193 = arith.mulf %189, %188 : vector<4x128xf32>
    %194 = arith.addf %192, %193 : vector<4x128xf32>
    %195 = math.tanh %194 : vector<4x128xf32>
    %196 = arith.mulf %191, %195 : vector<4x128xf32>
    %197 = vector.extract_strided_slice %196 {offsets = [0, 0], sizes = [2, 128], strides = [1, 1]} : vector<4x128xf32> to vector<2x128xf32>
    %198 = vector.extract_strided_slice %196 {offsets = [2, 0], sizes = [2, 128], strides = [1, 1]} : vector<4x128xf32> to vector<2x128xf32>
    %199 = tpu.concatenate %197, %77, %77 in 1 : vector<2x128xf32>, vector<2x128xf32>, vector<2x128xf32> -> vector<2x384xf32>
    %200 = tpu.concatenate %77, %197, %198 in 1 : vector<2x128xf32>, vector<2x128xf32>, vector<2x128xf32> -> vector<2x384xf32>
    %201 = tpu.concatenate %199, %200 in 0 : vector<2x384xf32>, vector<2x384xf32> -> vector<4x384xf32>
    %cst_60 = arith.constant dense<0.000000e+00> : vector<4x512xf32>
    %202 = tpu.matmul %201, %76, %cst_60 {dimension_numbers = #tpu.dot_dimension_numbers<[1], [0], [0], [1], [0, 0, 1, 1], [], []>} : vector<4x384xf32>, vector<384x512xf32>, vector<4x512xf32> -> vector<4x512xf32>
    %c5_61 = arith.constant 5 : index
    %c0_62 = arith.constant 0 : index
    %c0_63 = arith.constant 0 : index
    %203 = vector.load %arg8[%c5_61, %c0_62, %c0_63] : memref<9x4x512xf32, #tpu.memory_space<vmem>>, vector<1x4x512xf32>
    %204 = vector.shape_cast %203 : vector<1x4x512xf32> to vector<4x512xf32>
    %205 = arith.addf %202, %204 : vector<4x512xf32>
    %206 = vector.extract_strided_slice %205 {offsets = [0, 0], sizes = [4, 384], strides = [1, 1]} : vector<4x512xf32> to vector<4x384xf32>
    %207 = arith.negf %206 : vector<4x384xf32>
    %208 = math.exp %207 : vector<4x384xf32>
    %cst_64 = arith.constant 1.000000e+00 : f32
    %209 = vector.broadcast %cst_64 : f32 to vector<4x384xf32>
    %210 = arith.addf %209, %208 : vector<4x384xf32>
    %211 = arith.divf %209, %210 : vector<4x384xf32>
    %212 = vector.extract_strided_slice %205 {offsets = [0, 384], sizes = [4, 128], strides = [1, 1]} : vector<4x512xf32> to vector<4x128xf32>
    %213 = math.tanh %212 : vector<4x128xf32>
    %214 = vector.extract_strided_slice %211 {offsets = [0, 0], sizes = [4, 128], strides = [1, 1]} : vector<4x384xf32> to vector<4x128xf32>
    %215 = vector.extract_strided_slice %211 {offsets = [0, 128], sizes = [4, 128], strides = [1, 1]} : vector<4x384xf32> to vector<4x128xf32>
    %216 = vector.extract_strided_slice %211 {offsets = [0, 256], sizes = [4, 128], strides = [1, 1]} : vector<4x384xf32> to vector<4x128xf32>
    %217 = arith.mulf %215, %194 : vector<4x128xf32>
    %218 = arith.mulf %214, %213 : vector<4x128xf32>
    %219 = arith.addf %217, %218 : vector<4x128xf32>
    %220 = math.tanh %219 : vector<4x128xf32>
    %221 = arith.mulf %216, %220 : vector<4x128xf32>
    %222 = vector.extract_strided_slice %221 {offsets = [0, 0], sizes = [2, 128], strides = [1, 1]} : vector<4x128xf32> to vector<2x128xf32>
    %223 = vector.extract_strided_slice %221 {offsets = [2, 0], sizes = [2, 128], strides = [1, 1]} : vector<4x128xf32> to vector<2x128xf32>
    %224 = tpu.concatenate %222, %77, %77 in 1 : vector<2x128xf32>, vector<2x128xf32>, vector<2x128xf32> -> vector<2x384xf32>
    %225 = tpu.concatenate %77, %222, %223 in 1 : vector<2x128xf32>, vector<2x128xf32>, vector<2x128xf32> -> vector<2x384xf32>
    %226 = tpu.concatenate %224, %225 in 0 : vector<2x384xf32>, vector<2x384xf32> -> vector<4x384xf32>
    %cst_65 = arith.constant dense<0.000000e+00> : vector<4x512xf32>
    %227 = tpu.matmul %226, %76, %cst_65 {dimension_numbers = #tpu.dot_dimension_numbers<[1], [0], [0], [1], [0, 0, 1, 1], [], []>} : vector<4x384xf32>, vector<384x512xf32>, vector<4x512xf32> -> vector<4x512xf32>
    %c6_66 = arith.constant 6 : index
    %c0_67 = arith.constant 0 : index
    %c0_68 = arith.constant 0 : index
    %228 = vector.load %arg8[%c6_66, %c0_67, %c0_68] : memref<9x4x512xf32, #tpu.memory_space<vmem>>, vector<1x4x512xf32>
    %229 = vector.shape_cast %228 : vector<1x4x512xf32> to vector<4x512xf32>
    %230 = arith.addf %227, %229 : vector<4x512xf32>
    %231 = vector.extract_strided_slice %230 {offsets = [0, 0], sizes = [4, 384], strides = [1, 1]} : vector<4x512xf32> to vector<4x384xf32>
    %232 = arith.negf %231 : vector<4x384xf32>
    %233 = math.exp %232 : vector<4x384xf32>
    %cst_69 = arith.constant 1.000000e+00 : f32
    %234 = vector.broadcast %cst_69 : f32 to vector<4x384xf32>
    %235 = arith.addf %234, %233 : vector<4x384xf32>
    %236 = arith.divf %234, %235 : vector<4x384xf32>
    %237 = vector.extract_strided_slice %230 {offsets = [0, 384], sizes = [4, 128], strides = [1, 1]} : vector<4x512xf32> to vector<4x128xf32>
    %238 = math.tanh %237 : vector<4x128xf32>
    %239 = vector.extract_strided_slice %236 {offsets = [0, 0], sizes = [4, 128], strides = [1, 1]} : vector<4x384xf32> to vector<4x128xf32>
    %240 = vector.extract_strided_slice %236 {offsets = [0, 128], sizes = [4, 128], strides = [1, 1]} : vector<4x384xf32> to vector<4x128xf32>
    %241 = vector.extract_strided_slice %236 {offsets = [0, 256], sizes = [4, 128], strides = [1, 1]} : vector<4x384xf32> to vector<4x128xf32>
    %242 = arith.mulf %240, %219 : vector<4x128xf32>
    %243 = arith.mulf %239, %238 : vector<4x128xf32>
    %244 = arith.addf %242, %243 : vector<4x128xf32>
    %245 = math.tanh %244 : vector<4x128xf32>
    %246 = arith.mulf %241, %245 : vector<4x128xf32>
    %247 = vector.extract_strided_slice %246 {offsets = [0, 0], sizes = [2, 128], strides = [1, 1]} : vector<4x128xf32> to vector<2x128xf32>
    %248 = vector.extract_strided_slice %246 {offsets = [2, 0], sizes = [2, 128], strides = [1, 1]} : vector<4x128xf32> to vector<2x128xf32>
    %249 = tpu.concatenate %247, %77, %77 in 1 : vector<2x128xf32>, vector<2x128xf32>, vector<2x128xf32> -> vector<2x384xf32>
    %250 = tpu.concatenate %77, %247, %248 in 1 : vector<2x128xf32>, vector<2x128xf32>, vector<2x128xf32> -> vector<2x384xf32>
    %251 = tpu.concatenate %249, %250 in 0 : vector<2x384xf32>, vector<2x384xf32> -> vector<4x384xf32>
    %cst_70 = arith.constant dense<0.000000e+00> : vector<4x512xf32>
    %252 = tpu.matmul %251, %76, %cst_70 {dimension_numbers = #tpu.dot_dimension_numbers<[1], [0], [0], [1], [0, 0, 1, 1], [], []>} : vector<4x384xf32>, vector<384x512xf32>, vector<4x512xf32> -> vector<4x512xf32>
    %c7_71 = arith.constant 7 : index
    %c0_72 = arith.constant 0 : index
    %c0_73 = arith.constant 0 : index
    %253 = vector.load %arg8[%c7_71, %c0_72, %c0_73] : memref<9x4x512xf32, #tpu.memory_space<vmem>>, vector<1x4x512xf32>
    %254 = vector.shape_cast %253 : vector<1x4x512xf32> to vector<4x512xf32>
    %255 = arith.addf %252, %254 : vector<4x512xf32>
    %256 = vector.extract_strided_slice %255 {offsets = [0, 0], sizes = [4, 384], strides = [1, 1]} : vector<4x512xf32> to vector<4x384xf32>
    %257 = arith.negf %256 : vector<4x384xf32>
    %258 = math.exp %257 : vector<4x384xf32>
    %cst_74 = arith.constant 1.000000e+00 : f32
    %259 = vector.broadcast %cst_74 : f32 to vector<4x384xf32>
    %260 = arith.addf %259, %258 : vector<4x384xf32>
    %261 = arith.divf %259, %260 : vector<4x384xf32>
    %262 = vector.extract_strided_slice %255 {offsets = [0, 384], sizes = [4, 128], strides = [1, 1]} : vector<4x512xf32> to vector<4x128xf32>
    %263 = math.tanh %262 : vector<4x128xf32>
    %264 = vector.extract_strided_slice %261 {offsets = [0, 0], sizes = [4, 128], strides = [1, 1]} : vector<4x384xf32> to vector<4x128xf32>
    %265 = vector.extract_strided_slice %261 {offsets = [0, 128], sizes = [4, 128], strides = [1, 1]} : vector<4x384xf32> to vector<4x128xf32>
    %266 = vector.extract_strided_slice %261 {offsets = [0, 256], sizes = [4, 128], strides = [1, 1]} : vector<4x384xf32> to vector<4x128xf32>
    %267 = arith.mulf %265, %244 : vector<4x128xf32>
    %268 = arith.mulf %264, %263 : vector<4x128xf32>
    %269 = arith.addf %267, %268 : vector<4x128xf32>
    %270 = math.tanh %269 : vector<4x128xf32>
    %271 = arith.mulf %266, %270 : vector<4x128xf32>
    %272 = vector.extract_strided_slice %271 {offsets = [0, 0], sizes = [2, 128], strides = [1, 1]} : vector<4x128xf32> to vector<2x128xf32>
    %273 = vector.extract_strided_slice %271 {offsets = [2, 0], sizes = [2, 128], strides = [1, 1]} : vector<4x128xf32> to vector<2x128xf32>
    %274 = tpu.concatenate %272, %77, %77 in 1 : vector<2x128xf32>, vector<2x128xf32>, vector<2x128xf32> -> vector<2x384xf32>
    %275 = tpu.concatenate %77, %272, %273 in 1 : vector<2x128xf32>, vector<2x128xf32>, vector<2x128xf32> -> vector<2x384xf32>
    %276 = tpu.concatenate %274, %275 in 0 : vector<2x384xf32>, vector<2x384xf32> -> vector<4x384xf32>
    %cst_75 = arith.constant dense<0.000000e+00> : vector<4x512xf32>
    %277 = tpu.matmul %276, %76, %cst_75 {dimension_numbers = #tpu.dot_dimension_numbers<[1], [0], [0], [1], [0, 0, 1, 1], [], []>} : vector<4x384xf32>, vector<384x512xf32>, vector<4x512xf32> -> vector<4x512xf32>
    %c8_76 = arith.constant 8 : index
    %c0_77 = arith.constant 0 : index
    %c0_78 = arith.constant 0 : index
    %278 = vector.load %arg8[%c8_76, %c0_77, %c0_78] : memref<9x4x512xf32, #tpu.memory_space<vmem>>, vector<1x4x512xf32>
    %279 = vector.shape_cast %278 : vector<1x4x512xf32> to vector<4x512xf32>
    %280 = arith.addf %277, %279 : vector<4x512xf32>
    %281 = vector.extract_strided_slice %280 {offsets = [0, 0], sizes = [4, 384], strides = [1, 1]} : vector<4x512xf32> to vector<4x384xf32>
    %282 = arith.negf %281 : vector<4x384xf32>
    %283 = math.exp %282 : vector<4x384xf32>
    %cst_79 = arith.constant 1.000000e+00 : f32
    %284 = vector.broadcast %cst_79 : f32 to vector<4x384xf32>
    %285 = arith.addf %284, %283 : vector<4x384xf32>
    %286 = arith.divf %284, %285 : vector<4x384xf32>
    %287 = vector.extract_strided_slice %280 {offsets = [0, 384], sizes = [4, 128], strides = [1, 1]} : vector<4x512xf32> to vector<4x128xf32>
    %288 = math.tanh %287 : vector<4x128xf32>
    %289 = vector.extract_strided_slice %286 {offsets = [0, 0], sizes = [4, 128], strides = [1, 1]} : vector<4x384xf32> to vector<4x128xf32>
    %290 = vector.extract_strided_slice %286 {offsets = [0, 128], sizes = [4, 128], strides = [1, 1]} : vector<4x384xf32> to vector<4x128xf32>
    %291 = vector.extract_strided_slice %286 {offsets = [0, 256], sizes = [4, 128], strides = [1, 1]} : vector<4x384xf32> to vector<4x128xf32>
    %292 = arith.mulf %290, %269 : vector<4x128xf32>
    %293 = arith.mulf %289, %288 : vector<4x128xf32>
    %294 = arith.addf %292, %293 : vector<4x128xf32>
    %295 = math.tanh %294 : vector<4x128xf32>
    %296 = arith.mulf %291, %295 : vector<4x128xf32>
    %c0_80 = arith.constant 0 : index
    %c0_81 = arith.constant 0 : index
    %297 = vector.load %arg5[%c0_80, %c0_81] : memref<128x10xf32, #tpu.memory_space<vmem>>, vector<128x10xf32>
    %cst_82 = arith.constant dense<0.000000e+00> : vector<4x10xf32>
    %298 = tpu.matmul %296, %297, %cst_82 {dimension_numbers = #tpu.dot_dimension_numbers<[1], [0], [0], [1], [0, 0, 1, 1], [], []>} : vector<4x128xf32>, vector<128x10xf32>, vector<4x10xf32> -> vector<4x10xf32>
    %299 = vector.extract_strided_slice %298 {offsets = [2, 0], sizes = [2, 10], strides = [1, 1]} : vector<4x10xf32> to vector<2x10xf32>
    %c0_83 = arith.constant 0 : index
    %c0_84 = arith.constant 0 : index
    %300 = vector.load %arg6[%c0_83, %c0_84] : memref<1x10xf32, #tpu.memory_space<vmem>>, vector<1x10xf32>
    %301 = vector.broadcast %300 : vector<1x10xf32> to vector<2x10xf32>
    %302 = arith.addf %299, %301 : vector<2x10xf32>
    %c0_85 = arith.constant 0 : index
    %c0_86 = arith.constant 0 : index
    %303 = vector.load %arg7[%c0_85, %c0_86] : memref<2x10xf32, #tpu.memory_space<vmem>>, vector<2x10xf32>
    tpu.vector_store %arg7[%c0_85, %c0_86], %302 {strides = array<i32>} : memref<2x10xf32, #tpu.memory_space<vmem>>, vector<2x10xf32>,
    return
  }
}

</mosaic_0001>

<bundles_post_ra>
// kernel: tpu_custom_call.1
= control target key start
LH: loop header
LB: loop body
LE: loop exit
PB: predicated region body
PF: predicated region fallthrough
CT: control target
= control target key end

     0   :  { %12 = vsyncpa [#allocation4], 0  ;;  %s8083_s0 = inlined_call_operand.vmem [shape: f32[2,8,28], index: 0, kind: input, shape index: {}]   ;;  %s8084_s1 = inlined_call_operand.hbm [shape: f32[128,512], index: 1, kind: input, shape index: {}]   ;;  %s8085_s2 = inlined_call_operand.vmem [shape: f32[1,512], index: 2, kind: input, shape index: {}]   ;;  %s8086_s3 = inlined_call_operand.hbm [shape: f32[384,512], index: 3, kind: input, shape index: {}]   ;;  %s8087_s4 = inlined_call_operand.vmem [shape: f32[1,512], index: 4, kind: input, shape index: {}]   ;;  %s8088_s5 = inlined_call_operand.vmem [shape: f32[128,10], index: 5, kind: input, shape index: {}]   ;;  %s8089_s6 = inlined_call_operand.vmem [shape: f32[1,10], index: 6, kind: input, shape index: {}]   ;;  %s8090_s7 = inlined_call_operand.hbm [shape: f32[2,10], index: 7, kind: output, shape index: {}]  }
   0x1   :  { %13 = vsyncpa [#allocation7], 0 }
   0x2   :  { %14 = vsyncpa [#allocation5], 0  ;;  %s21_s26 = sshll.u32 %s8084_s1, 4  ;;  %s4526_s27 = smov [#allocation3]   ;;  %s22_s26 = int_to_ptr.hbm [resolvable:$true] %s21_s26 }
   0x3   :  { %s23_s28 = sshll.u32 %s4526_s27, 4  ;;  %s36_s8 = sshll.u32 %s8086_s3, 4  ;;  %s24_s28 = int_to_ptr.vmem [resolvable:$true] %s23_s28  ;;  %s37_s8 = int_to_ptr.hbm [resolvable:$true] %s36_s8 }
   0x4   :  { %s4527_s9 = smov 512   ;;  %s4528_s10 = smov 32  }
   0x5   :  { %29 = dma.hbm_to_vmem [thread:$0]  %s22_s26, 8192, %s24_s28, [#allocation4], %s4527_s9, %s4527_s9, %s4528_s10  }
   0x6   :  { %s4529_s11 = smov [#allocation6]  }
   0x7   :  { %s38_s12 = sshll.u32 %s4529_s11, 4  ;;  %s39_s12 = int_to_ptr.vmem [resolvable:$true] %s38_s12 }
   0x8   :  { %44 = dma.hbm_to_vmem [thread:$0]  %s37_s8, 24576, %s39_s12, [#allocation7], %s4527_s9, %s4527_s9, %s4528_s10  }
   0x9   :  { %4520 = dma.done.wait [#allocation4], 8192  }
   0xa   :  { %4521 = vsyncadd [#allocation4], 4294959104 }
   0xb   :  { %4522 = dma.done.wait [#allocation7], 24576  }
   0xc   :  { %4523 = vsyncadd [#allocation7], 4294942720  ;;  %v125_v0 = vld [vmem:[#allocation3 + $0x1e0] sm:$0xff]  ;;  %v126_v1 = vld [vmem:[#allocation3 + $0x1e8] sm:$0xff]  ;;  %vm62_vm0 = vcmask 228352   ;;  %vm253_vm1 = vcmask 1040384  }
   0xd   :  { %v127_v2 = vld [vmem:[#allocation3 + $0x1f0] sm:$0xff]  ;;  %139 = vmatpush.msra.mxu0 %v125_v0  ;;  %162 = vmatpush.msra.mxu1 %v126_v1  ;;  %v128_v3 = vld [vmem:[#allocation3 + $0x1f8] sm:$0xff]  ;;  %v121_v4 = vld [vmem:[#allocation3 + $0x1c0] sm:$0xff]  ;;  %vm258_vm2 = vcmask 1041408   ;;  %vm269_vm3 = vcmask 1043456   ;;  %s4531_s21 = smov [#allocation8]  }
   0xe   :  { %v122_v5 = vld [vmem:[#allocation3 + $0x1c8] sm:$0xff]  ;;  %185 = vmatpush.msra.mxu2 %v127_v2  ;;  %208 = vmatpush.msra.mxu3 %v128_v3  ;;  %v123_v6 = vld [vmem:[#allocation3 + $0x1d0] sm:$0xff]  ;;  %v124_v7 = vld [vmem:[#allocation3 + $0x1d8] sm:$0xff]  ;;  %s3461_s22 = sshll.u32 %s4531_s21, 4  ;;  %s3463_s25 = sshll.u32 %s8090_s7, 4  ;;  %s3462_s22 = int_to_ptr.vmem [resolvable:$true] %s3461_s22  ;;  %s3464_s25 = int_to_ptr.hbm [resolvable:$true] %s3463_s25 }
   0xf   :  { %v117_v8 = vld [vmem:[#allocation3 + $0x1a0] sm:$0xff]  ;;  %140 = vmatpush.msra.mxu0 %v121_v4  ;;  %163 = vmatpush.msra.mxu1 %v122_v5  ;;  %v118_v9 = vld [vmem:[#allocation3 + $0x1a8] sm:$0xff]  ;;  %v119_v10 = vld [vmem:[#allocation3 + $0x1b0] sm:$0xff] }
  0x10   :  { %v120_v11 = vld [vmem:[#allocation3 + $0x1b8] sm:$0xff]  ;;  %186 = vmatpush.msra.mxu2 %v123_v6  ;;  %209 = vmatpush.msra.mxu3 %v124_v7  ;;  %v113_v12 = vld [vmem:[#allocation3 + $0x180] sm:$0xff]  ;;  %v114_v13 = vld [vmem:[#allocation3 + $0x188] sm:$0xff] }
  0x11   :  { %141 = vmatpush.msra.mxu0 %v117_v8  ;;  %164 = vmatpush.msra.mxu1 %v118_v9  ;;  %v115_v14 = vld [vmem:[#allocation3 + $0x190] sm:$0xff]  ;;  %v116_v15 = vld [vmem:[#allocation3 + $0x198] sm:$0xff]  ;;  %v109_v16 = vld [vmem:[#allocation3 + $0x160] sm:$0xff] }
  0x12   :  { %187 = vmatpush.msra.mxu2 %v119_v10  ;;  %210 = vmatpush.msra.mxu3 %v120_v11  ;;  %v110_v17 = vld [vmem:[#allocation3 + $0x168] sm:$0xff]  ;;  %v111_v18 = vld [vmem:[#allocation3 + $0x170] sm:$0xff]  ;;  %v112_v19 = vld [vmem:[#allocation3 + $0x178] sm:$0xff] }
  0x13   :  { %142 = vmatpush.msra.mxu0 %v113_v12  ;;  %165 = vmatpush.msra.mxu1 %v114_v13  ;;  %v105_v20 = vld [vmem:[#allocation3 + $0x140] sm:$0xff]  ;;  %v106_v21 = vld [vmem:[#allocation3 + $0x148] sm:$0xff]  ;;  %v107_v22 = vld [vmem:[#allocation3 + $0x150] sm:$0xff] }
  0x14   :  { %188 = vmatpush.msra.mxu2 %v115_v14  ;;  %211 = vmatpush.msra.mxu3 %v116_v15  ;;  %v108_v23 = vld [vmem:[#allocation3 + $0x158] sm:$0xff]  ;;  %v101_v24 = vld [vmem:[#allocation3 + $0x120] sm:$0xff]  ;;  %v102_v25 = vld [vmem:[#allocation3 + $0x128] sm:$0xff] }
  0x15   :  { %143 = vmatpush.msra.mxu0 %v109_v16  ;;  %166 = vmatpush.msra.mxu1 %v110_v17  ;;  %v103_v26 = vld [vmem:[#allocation3 + $0x130] sm:$0xff]  ;;  %v104_v27 = vld [vmem:[#allocation3 + $0x138] sm:$0xff]  ;;  %v97_v28 = vld [vmem:[#allocation3 + $0x100] sm:$0xff] }
  0x16   :  { %189 = vmatpush.msra.mxu2 %v111_v18  ;;  %212 = vmatpush.msra.mxu3 %v112_v19  ;;  %v98_v29 = vld [vmem:[#allocation3 + $0x108] sm:$0xff]  ;;  %v99_v30 = vld [vmem:[#allocation3 + $0x110] sm:$0xff]  ;;  %v100_v31 = vld [vmem:[#allocation3 + $0x118] sm:$0xff] }
  0x17   :  { %144 = vmatpush.msra.mxu0 %v105_v20  ;;  %167 = vmatpush.msra.mxu1 %v106_v21  ;;  %v93_v32 = vld [vmem:[#allocation3 + $0xe0] sm:$0xff]  ;;  %v94_v33 = vld [vmem:[#allocation3 + $0xe8] sm:$0xff]  ;;  %v95_v34 = vld [vmem:[#allocation3 + $0xf0] sm:$0xff] }
  0x18   :  { %190 = vmatpush.msra.mxu2 %v107_v22  ;;  %213 = vmatpush.msra.mxu3 %v108_v23  ;;  %v96_v35 = vld [vmem:[#allocation3 + $0xf8] sm:$0xff]  ;;  %v89_v36 = vld [vmem:[#allocation3 + $0xc0] sm:$0xff]  ;;  %v90_v37 = vld [vmem:[#allocation3 + $0xc8] sm:$0xff] }
  0x19   :  { %145 = vmatpush.msra.mxu0 %v101_v24  ;;  %168 = vmatpush.msra.mxu1 %v102_v25  ;;  %v91_v38 = vld [vmem:[#allocation3 + $0xd0] sm:$0xff]  ;;  %v92_v39 = vld [vmem:[#allocation3 + $0xd8] sm:$0xff]  ;;  %v85_v40 = vld [vmem:[#allocation3 + $0xa0] sm:$0xff] }
  0x1a   :  { %191 = vmatpush.msra.mxu2 %v103_v26  ;;  %214 = vmatpush.msra.mxu3 %v104_v27  ;;  %v86_v41 = vld [vmem:[#allocation3 + $0xa8] sm:$0xff]  ;;  %v87_v42 = vld [vmem:[#allocation3 + $0xb0] sm:$0xff]  ;;  %v88_v43 = vld [vmem:[#allocation3 + $0xb8] sm:$0xff] }
  0x1b   :  { %146 = vmatpush.msra.mxu0 %v97_v28  ;;  %169 = vmatpush.msra.mxu1 %v98_v29  ;;  %v81_v44 = vld [vmem:[#allocation3 + $0x80] sm:$0xff]  ;;  %v82_v45 = vld [vmem:[#allocation3 + $0x88] sm:$0xff]  ;;  %v83_v46 = vld [vmem:[#allocation3 + $0x90] sm:$0xff] }
  0x1c   :  { %192 = vmatpush.msra.mxu2 %v99_v30  ;;  %215 = vmatpush.msra.mxu3 %v100_v31  ;;  %v84_v47 = vld [vmem:[#allocation3 + $0x98] sm:$0xff]  ;;  %v77_v48 = vld [vmem:[#allocation3 + $0x60] sm:$0xff]  ;;  %v78_v49 = vld [vmem:[#allocation3 + $0x68] sm:$0xff] }
  0x1d   :  { %147 = vmatpush.msra.mxu0 %v93_v32  ;;  %170 = vmatpush.msra.mxu1 %v94_v33  ;;  %v79_v50 = vld [vmem:[#allocation3 + $0x70] sm:$0xff]  ;;  %v80_v51 = vld [vmem:[#allocation3 + $0x78] sm:$0xff]  ;;  %v73_v52 = vld [vmem:[#allocation3 + $0x40] sm:$0xff] }
  0x1e   :  { %193 = vmatpush.msra.mxu2 %v95_v34  ;;  %216 = vmatpush.msra.mxu3 %v96_v35  ;;  %v74_v53 = vld [vmem:[#allocation3 + $0x48] sm:$0xff]  ;;  %v75_v54 = vld [vmem:[#allocation3 + $0x50] sm:$0xff]  ;;  %v76_v55 = vld [vmem:[#allocation3 + $0x58] sm:$0xff] }
  0x1f   :  { %148 = vmatpush.msra.mxu0 %v89_v36  ;;  %171 = vmatpush.msra.mxu1 %v90_v37  ;;  %v69_v56 = vld [vmem:[#allocation3 + $0x20] sm:$0xff]  ;;  %v70_v57 = vld [vmem:[#allocation3 + $0x28] sm:$0xff]  ;;  %v71_v58 = vld [vmem:[#allocation3 + $0x30] sm:$0xff] }
  0x20   :  { %194 = vmatpush.msra.mxu2 %v91_v38  ;;  %217 = vmatpush.msra.mxu3 %v92_v39  ;;  %v72_v59 = vld [vmem:[#allocation3 + $0x38] sm:$0xff]  ;;  %v65_v60 = vld [vmem:[#allocation3] sm:$0xff]  ;;  %v66_v61 = vld [vmem:[#allocation3 + $0x8] sm:$0xff] }
  0x21   :  { %149 = vmatpush.msra.mxu0 %v85_v40  ;;  %172 = vmatpush.msra.mxu1 %v86_v41  ;;  %v67_v62 = vld [vmem:[#allocation3 + $0x10] sm:$0xff]  ;;  %v68_v63 = vld [vmem:[#allocation3 + $0x18] sm:$0xff]  ;;  %v3474_v1 = vld [vmem:[%s8083_s0 + $0x8] sm:$0xff] }
  0x22   :  { %195 = vmatpush.msra.mxu2 %v87_v42  ;;  %218 = vmatpush.msra.mxu3 %v88_v43  ;;  %v59_v0 = vld [vmem:[%s8083_s0] sm:$0xff]  ;;  %v608_v2 = vld [vmem:[#allocation6 + $0x1e0] sm:$0xff]  ;;  %v609_v3 = vld [vmem:[#allocation6 + $0x1e8] sm:$0xff] }
  0x23   :  { %150 = vmatpush.msra.mxu0 %v81_v44  ;;  %173 = vmatpush.msra.mxu1 %v82_v45  ;;  %v672_v4 = vld [vmem:[#allocation6 + $0x3e0] sm:$0xff]  ;;  %v605_v6 = vld [vmem:[#allocation6 + $0x1c8] sm:$0xff]  ;;  %v4587_v37 = vld [vmem:[%s8085_s2] sm:$0xf] }
  0x24   :  { %196 = vmatpush.msra.mxu2 %v83_v46  ;;  %219 = vmatpush.msra.mxu3 %v84_v47  ;;  %v604_v5 = vld [vmem:[#allocation6 + $0x1c0] sm:$0xff]  ;;  %v601_v9 = vld [vmem:[#allocation6 + $0x1a8] sm:$0xff]  ;;  %v131_v40 = vperm.slane %v4587_v37, 0  ;;  %vm5004_vm12 = vmneg %vm258_vm2 }
  0x25   :  { %151 = vmatpush.msra.mxu0 %v77_v48  ;;  %174 = vmatpush.msra.mxu1 %v78_v49  ;;  %v668_v7 = vld [vmem:[#allocation6 + $0x3c0] sm:$0xff]  ;;  %v597_v12 = vld [vmem:[#allocation6 + $0x188] sm:$0xff] }
  0x26   :  { %197 = vmatpush.msra.mxu2 %v79_v50  ;;  %220 = vmatpush.msra.mxu3 %v80_v51  ;;  %v600_v8 = vld [vmem:[#allocation6 + $0x1a0] sm:$0xff]  ;;  %v593_v16 = vld [vmem:[#allocation6 + $0x168] sm:$0xff]  ;;  %v132_v51 = vperm.slane %v4587_v37, 1 }
  0x27   :  { %152 = vmatpush.msra.mxu0 %v73_v52  ;;  %175 = vmatpush.msra.mxu1 %v74_v53  ;;  %v664_v10 = vld [vmem:[#allocation6 + $0x3a0] sm:$0xff]  ;;  %v589_v20 = vld [vmem:[#allocation6 + $0x148] sm:$0xff]  ;;  %v4596_v52 = vld [vmem:[%s8087_s4] sm:$0xf] }
  0x28   :  { %198 = vmatpush.msra.mxu2 %v75_v54  ;;  %221 = vmatpush.msra.mxu3 %v76_v55  ;;  %v596_v11 = vld [vmem:[#allocation6 + $0x180] sm:$0xff]  ;;  %v585_v24 = vld [vmem:[#allocation6 + $0x128] sm:$0xff] }
  0x29   :  { %153 = vmatpush.msra.mxu0 %v69_v56  ;;  %176 = vmatpush.msra.mxu1 %v70_v57  ;;  %v660_v13 = vld [vmem:[#allocation6 + $0x380] sm:$0xff]  ;;  %v581_v29 = vld [vmem:[#allocation6 + $0x108] sm:$0xff] }
  0x2a   :  { %199 = vmatpush.msra.mxu2 %v71_v58  ;;  %222 = vmatpush.msra.mxu3 %v72_v59  ;;  %v736_v14 = vld [vmem:[#allocation6 + $0x5e0] sm:$0xff]  ;;  %v577_v34 = vld [vmem:[#allocation6 + $0xe8] sm:$0xff]  ;;  %v133_v58 = vperm.slane %v4587_v37, 2 }
  0x2b   :  { %154 = vmatpush.msra.mxu0 %v65_v60  ;;  %177 = vmatpush.msra.mxu1 %v66_v61  ;;  %v592_v15 = vld [vmem:[#allocation6 + $0x160] sm:$0xff]  ;;  %v573_v39 = vld [vmem:[#allocation6 + $0xc8] sm:$0xff]  ;;  %v134_v61 = vperm.slane %v4587_v37, 3 }
  0x2c   :  { %200 = vmatpush.msra.mxu2 %v67_v62  ;;  %223 = vmatpush.msra.mxu3 %v68_v63  ;;  %v656_v17 = vld [vmem:[#allocation6 + $0x360] sm:$0xff]  ;;  %v569_v44 = vld [vmem:[#allocation6 + $0xa8] sm:$0xff]  ;;  %v4603_v62 = vperm.slane %v4596_v52, 0 }
  0x2d   :  { %3475 = vmatmul.msk.f32.vlgmr.msra.gmra.mxu0 %vm62_vm0, %v59_v0  ;;  %3477 = vmatmul.msk.f32.vlgmr.msra.gmra.mxu1 %vm62_vm0, %v59_v0  ;;  %v732_v18 = vld [vmem:[#allocation6 + $0x5c0] sm:$0xff]  ;;  %v565_v49 = vld [vmem:[#allocation6 + $0x88] sm:$0xff] }
  0x2e   :  { %3479 = vmatmul.msk.f32.vlgmr.msra.gmra.mxu2 %vm62_vm0, %v59_v0  ;;  %3481 = vmatmul.msk.f32.vlgmr.msra.gmra.mxu3 %vm62_vm0, %v59_v0  ;;  %v588_v19 = vld [vmem:[#allocation6 + $0x140] sm:$0xff]  ;;  %v561_v57 = vld [vmem:[#allocation6 + $0x68] sm:$0xff]  ;;  %8547 = vst [vmem:[#allocation12_spill] sm:$0xff] %v4603_v62 }
  0x2f   :  { %821 = vmatpush.msrb.mxu0 %v608_v2  ;;  %881 = vmatpush.msrb.mxu3 %v609_v3  ;;  %v652_v21 = vld [vmem:[#allocation6 + $0x340] sm:$0xff]  ;;  %v4718_v37 = vld [vmem:[#allocation6 + $0x548] sm:$0xff] }
  0x30   :  { %841 = vmatpush.msrb.mxu1 %v672_v4  ;;  %861 = vmatpush.msrb.mxu2 %v736_v14  ;;  %v728_v22 = vld [vmem:[#allocation6 + $0x5a0] sm:$0xff]  ;;  %v553_v14 = vld [vmem:[#allocation6 + $0x28] sm:$0xff] }
  0x31   :  { %822 = vmatpush.msrb.mxu0 %v604_v5  ;;  %882 = vmatpush.msrb.mxu3 %v605_v6  ;;  %v584_v23 = vld [vmem:[#allocation6 + $0x120] sm:$0xff] }
  0x32   :  { %842 = vmatpush.msrb.mxu1 %v668_v7  ;;  %862 = vmatpush.msrb.mxu2 %v732_v18  ;;  %v648_v25 = vld [vmem:[#allocation6 + $0x320] sm:$0xff] }
  0x33   :  { %823 = vmatpush.msrb.mxu0 %v600_v8  ;;  %883 = vmatpush.msrb.mxu3 %v601_v9  ;;  %v724_v26 = vld [vmem:[#allocation6 + $0x580] sm:$0xff] }
  0x34   :  { %843 = vmatpush.msrb.mxu1 %v664_v10  ;;  %863 = vmatpush.msrb.mxu2 %v728_v22  ;;  %v580_v28 = vld [vmem:[#allocation6 + $0x100] sm:$0xff] }
  0x35   :  { %3476 = vmatmul.msk.f32.gmra.mxu0 %vm62_vm0, %v3474_v1  ;;  %3478 = vmatmul.msk.f32.gmra.mxu1 %vm62_vm0, %v3474_v1  ;;  %v644_v30 = vld [vmem:[#allocation6 + $0x300] sm:$0xff] }
  0x36   :  { %3480 = vmatmul.msk.f32.gmra.mxu2 %vm62_vm0, %v3474_v1  ;;  %3482 = vmatmul.msk.f32.gmra.mxu3 %vm62_vm0, %v3474_v1  ;;  %v720_v31 = vld [vmem:[#allocation6 + $0x560] sm:$0xff]  ;;  %v557_v1 = vld [vmem:[#allocation6 + $0x48] sm:$0xff] }
  0x37   :  { %824 = vmatpush.msrb.mxu0 %v596_v11  ;;  %884 = vmatpush.msrb.mxu3 %v597_v12  ;;  %v576_v33 = vld [vmem:[#allocation6 + $0xe0] sm:$0xff] }
  0x38   :  { %844 = vmatpush.msrb.mxu1 %v660_v13  ;;  %864 = vmatpush.msrb.mxu2 %v724_v26  ;;  %v640_v35 = vld [vmem:[#allocation6 + $0x2e0] sm:$0xff] }
  0x39   :  { %825 = vmatpush.msrb.mxu0 %v592_v15  ;;  %885 = vmatpush.msrb.mxu3 %v593_v16  ;;  %v716_v36 = vld [vmem:[#allocation6 + $0x540] sm:$0xff] }
  0x3a   :  { %845 = vmatpush.msrb.mxu1 %v656_v17  ;;  %865 = vmatpush.msrb.mxu2 %v720_v31  ;;  %v572_v38 = vld [vmem:[#allocation6 + $0xc0] sm:$0xff] }
  0x3b   :  { %826 = vmatpush.msrb.mxu0 %v588_v19  ;;  %886 = vmatpush.msrb.mxu3 %v589_v20  ;;  %v636_v41 = vld [vmem:[#allocation6 + $0x2c0] sm:$0xff] }
  0x3c   :  { %846 = vmatpush.msrb.mxu1 %v652_v21  ;;  %866 = vmatpush.msrb.mxu2 %v716_v36  ;;  %v712_v42 = vld [vmem:[#allocation6 + $0x520] sm:$0xff] }
  0x3d   :  { %827 = vmatpush.msrb.mxu0 %v584_v23  ;;  %887 = vmatpush.msrb.mxu3 %v585_v24  ;;  %v568_v43 = vld [vmem:[#allocation6 + $0xa0] sm:$0xff] }
  0x3e   :  { %847 = vmatpush.msrb.mxu1 %v648_v25  ;;  %867 = vmatpush.msrb.mxu2 %v712_v42  ;;  %v632_v45 = vld [vmem:[#allocation6 + $0x2a0] sm:$0xff] }
  0x3f   :  { %828 = vmatpush.msrb.mxu0 %v580_v28  ;;  %888 = vmatpush.msrb.mxu3 %v581_v29  ;;  %v708_v46 = vld [vmem:[#allocation6 + $0x500] sm:$0xff] }
  0x40   :  { %848 = vmatpush.msrb.mxu1 %v644_v30  ;;  %868 = vmatpush.msrb.mxu2 %v708_v46  ;;  %v564_v48 = vld [vmem:[#allocation6 + $0x80] sm:$0xff]  ;;  %v4631_v30 = vperm.slane %v4596_v52, 1  ;;  %v669_v46 = vld [vmem:[#allocation6 + $0x3c8] sm:$0xff] }
  0x41   :  { %829 = vmatpush.msrb.mxu0 %v576_v33  ;;  %889 = vmatpush.msrb.mxu3 %v577_v34  ;;  %v628_v53 = vld [vmem:[#allocation6 + $0x280] sm:$0xff]  ;;  %v673_v33 = vld [vmem:[#allocation6 + $0x3e8] sm:$0xff] }
  0x42   :  { %849 = vmatpush.msrb.mxu1 %v640_v35  ;;  %v704_v54 = vld [vmem:[#allocation6 + $0x4e0] sm:$0xff]  ;;  %8548 = vst [vmem:[#allocation13_spill] sm:$0xff] %v4631_v30 }
  0x43   :  { %830 = vmatpush.msrb.mxu0 %v572_v38  ;;  %890 = vmatpush.msrb.mxu3 %v573_v39  ;;  %v560_v56 = vld [vmem:[#allocation6 + $0x60] sm:$0xff]  ;;  %v674_v39 = vld [vmem:[#allocation6 + $0x3f0] sm:$0xff] }
  0x44   :  { %850 = vmatpush.msrb.mxu1 %v636_v41  ;;  %869 = vmatpush.msrb.mxu2 %v704_v54  ;;  %v624_v59 = vld [vmem:[#allocation6 + $0x260] sm:$0xff]  ;;  %v733_v54 = vld [vmem:[#allocation6 + $0x5c8] sm:$0xff] }
  0x45   :  { %831 = vmatpush.msrb.mxu0 %v568_v43  ;;  %891 = vmatpush.msrb.mxu3 %v569_v44  ;;  %v700_v60 = vld [vmem:[#allocation6 + $0x4c0] sm:$0xff] }
  0x46   :  { %851 = vmatpush.msrb.mxu1 %v632_v45  ;;  %870 = vmatpush.msrb.mxu2 %v700_v60  ;;  %v556_v0 = vld [vmem:[#allocation6 + $0x40] sm:$0xff] }
  0x47   :  { %832 = vmatpush.msrb.mxu0 %v564_v48  ;;  %892 = vmatpush.msrb.mxu3 %v565_v49  ;;  %v620_v6 = vld [vmem:[#allocation6 + $0x240] sm:$0xff] }
  0x48   :  { %852 = vmatpush.msrb.mxu1 %v628_v53  ;;  %v696_v7 = vld [vmem:[#allocation6 + $0x4a0] sm:$0xff] }
  0x49   :  { %833 = vmatpush.msrb.mxu0 %v560_v56  ;;  %893 = vmatpush.msrb.mxu3 %v561_v57  ;;  %v552_v13 = vld [vmem:[#allocation6 + $0x20] sm:$0xff] }
  0x4a   :  { %853 = vmatpush.msrb.mxu1 %v624_v59  ;;  %871 = vmatpush.msrb.mxu2 %v696_v7  ;;  %v616_v20 = vld [vmem:[#allocation6 + $0x220] sm:$0xff]  ;;  %v729_v7 = vld [vmem:[#allocation6 + $0x5a8] sm:$0xff] }
  0x4b   :  { %834 = vmatpush.msrb.mxu0 %v556_v0  ;;  %894 = vmatpush.msrb.mxu3 %v557_v1  ;;  %v692_v21 = vld [vmem:[#allocation6 + $0x480] sm:$0xff]  ;;  %v665_v0 = vld [vmem:[#allocation6 + $0x3a8] sm:$0xff]  ;;  %v666_v1 = vld [vmem:[#allocation6 + $0x3b0] sm:$0xff] }
  0x4c   :  { %854 = vmatpush.msrb.mxu1 %v620_v6  ;;  %872 = vmatpush.msrb.mxu2 %v692_v21  ;;  %v548_v26 = vld [vmem:[#allocation6] sm:$0xff]  ;;  %v662_v21 = vld [vmem:[#allocation6 + $0x390] sm:$0xff] }
  0x4d   :  { %835 = vmatpush.msrb.mxu0 %v552_v13  ;;  %895 = vmatpush.msrb.mxu3 %v553_v14  ;;  %v612_v31 = vld [vmem:[#allocation6 + $0x200] sm:$0xff]  ;;  %v661_v13 = vld [vmem:[#allocation6 + $0x388] sm:$0xff] }
  0x4e   :  { %855 = vmatpush.msrb.mxu1 %v616_v20  ;;  %v684_v45 = vld [vmem:[#allocation6 + $0x440] sm:$0xff] }
  0x4f   :  { %836 = vmatpush.msrb.mxu0 %v548_v26  ;;  %v680_v56 = vld [vmem:[#allocation6 + $0x420] sm:$0xff] }
  0x50   :  { %856 = vmatpush.msrb.mxu1 %v612_v31  ;;  %v657_v31 = vld [vmem:[#allocation6 + $0x368] sm:$0xff] }
  0x51   :  { %901 = vmatpush.msra.mxu0 %v673_v33 }
  0x53   :  { %902 = vmatpush.msra.mxu0 %v669_v46  ;;  %v4710_v46 = vld [vmem:[#allocation6 + $0x348] sm:$0xff] }
  0x55   :  { %903 = vmatpush.msra.mxu0 %v665_v0 }
  0x57   :  { %904 = vmatpush.msra.mxu0 %v661_v13  ;;  %v4764_v13 = vld [vmem:[#allocation6 + $0x2e8] sm:$0xff] }
  0x59   :  { %905 = vmatpush.msra.mxu0 %v657_v31  ;;  %v4787_v31 = vld [vmem:[#allocation6 + $0x2d0] sm:$0xff] }
  0x5b   :  { %906 = vmatpush.msra.mxu0 %v4710_v46 }
  0xaa   :  { %v156_v27 = vpop.f32.mrf.mxu0  ;;  %v179_v32 = vpop.f32.mrf.mxu1 }
  0xab   :  { %v4590_v50 = vadd.f32 %v156_v27, %v131_v40  ;;  %v4608_v5 = vadd.f32 %v179_v32, %v132_v51  ;;  %v549_v27 = vld [vmem:[#allocation6 + $0x8] sm:$0xff]  ;;  %v688_v32 = vld [vmem:[#allocation6 + $0x460] sm:$0xff] }
  0xac   :  { %896 = vmatpush.msrb.mxu3 %v549_v27  ;;  %873 = vmatpush.msrb.mxu2 %v688_v32 }
  0xad   :  { %v346_v2 = vrot.slane %v4590_v50, 3  ;;  %v383_v3 = vrot.slane %v4590_v50, 4  ;;  %v420_v4 = vrot.slane %v4590_v50, 5  ;;  %v457_v15 = vrot.slane %v4590_v50, 6 }
  0xae   :  { %v494_v22 = vrot.slane %v4590_v50, 7  ;;  %v347_v28 = vrot.slane %v4608_v5, 3  ;;  %v384_v34 = vrot.slane %v4608_v5, 4  ;;  %v421_v35 = vrot.slane %v4608_v5, 5  ;;  %961 = vmatpush.msra.mxu3 %v674_v39  ;;  %874 = vmatpush.msrb.mxu2 %v684_v45 }
  0xaf   :  { %v458_v36 = vrot.slane %v4608_v5, 6  ;;  %v495_v41 = vrot.slane %v4608_v5, 7 }
  0xb0   :  { %875 = vmatpush.msrb.mxu2 %v680_v56  ;;  %v4733_v56 = vld [vmem:[#allocation6 + $0x528] sm:$0xff] }
  0xb1   :  { %v202_v8 = vpop.f32.mrf.mxu2  ;;  %v225_v17 = vpop.f32.mrf.mxu3 }
  0xb2   :  { %v159_v47 = vpop.f32.mrf.mxu0  ;;  %v182_v63 = vpop.f32.mrf.mxu1  ;;  %v4617_v16 = vadd.f32 %v202_v8, %v133_v58  ;;  %v4642_v42 = vadd.f32 %v225_v17, %v134_v61 }
  0xb3   :  { %v4598_v55 = vadd.f32 %v159_v47, %v131_v40  ;;  %v4620_v19 = vadd.f32 %v182_v63, %v132_v51  ;;  %v737_v40 = vld [vmem:[#allocation6 + $0x5e8] sm:$0xff]  ;;  %v670_v47 = vld [vmem:[#allocation6 + $0x3d0] sm:$0xff] }
  0xb4   :  { %v282_v48 = vrot.slane %v4617_v16, 1  ;;  %921 = vmatpush.msra.mxu1 %v737_v40  ;;  %962 = vmatpush.msra.mxu3 %v670_v47  ;;  %v311_v0 = vrot.slane %v4617_v16, 2 }
  0xb5   :  { %v354_v9 = vrot.slane %v4598_v55, 2  ;;  %v391_v10 = vrot.slane %v4598_v55, 3  ;;  %v428_v11 = vrot.slane %v4598_v55, 4  ;;  %v465_v12 = vrot.slane %v4598_v55, 5 }
  0xb6   :  { %v502_v18 = vrot.slane %v4598_v55, 6  ;;  %v355_v43 = vrot.slane %v4620_v19, 2  ;;  %v392_v44 = vrot.slane %v4620_v19, 3  ;;  %v429_v51 = vrot.slane %v4620_v19, 4  ;;  %922 = vmatpush.msra.mxu1 %v733_v54  ;;  %963 = vmatpush.msra.mxu3 %v666_v1 }
  0xb7   :  { %v362_v23 = vsel %vm253_vm1, %v346_v2, %v354_v9  ;;  %v399_v24 = vsel %vm253_vm1, %v383_v3, %v391_v10  ;;  %v436_v25 = vsel %vm253_vm1, %v420_v4, %v428_v11  ;;  %v4628_v29 = vsel %vm253_vm1, %v457_v15, %v465_v12  ;;  %v676_v12 = vld [vmem:[#allocation6 + $0x400] sm:$0xff] }
  0xb8   :  { %v4637_v38 = vsel %vm253_vm1, %v494_v22, %v502_v18  ;;  %v366_v49 = vsel %vm258_vm2, %v362_v23, %v4603_v62  ;;  %v466_v53 = vrot.slane %v4620_v19, 5  ;;  %v403_v57 = vsel %vm258_vm2, %v399_v24, %v4603_v62  ;;  %v725_v22 = vld [vmem:[#allocation6 + $0x588] sm:$0xff]  ;;  %923 = vmatpush.msra.mxu1 %v729_v7  ;;  %876 = vmatpush.msrb.mxu2 %v676_v12  ;;  %v4762_v12 = vld [vmem:[#allocation6 + $0x170] sm:$0xff] }
  0xb9   :  { %v363_v59 = vsel %vm253_vm1, %v347_v28, %v355_v43  ;;  %v400_v60 = vsel %vm253_vm1, %v384_v34, %v392_v44  ;;  %v503_v63 = vrot.slane %v4620_v19, 6  ;;  %v437_v4 = vsel %vm253_vm1, %v421_v35, %v429_v51  ;;  %v205_v20 = vpop.f32.mrf.mxu2  ;;  %v228_v27 = vpop.f32.mrf.mxu3  ;;  %v610_v28 = vld [vmem:[#allocation6 + $0x1f0] sm:$0xff]  ;;  %964 = vmatpush.msra.mxu3 %v662_v21  ;;  %v4723_v51 = vld [vmem:[#allocation6 + $0x328] sm:$0xff] }
  0xba   :  { %v367_v2 = vsel %vm258_vm2, %v363_v59, %v4631_v30  ;;  %v404_v3 = vsel %vm258_vm2, %v400_v60, %v4631_v30  ;;  %v474_v6 = vsel %vm253_vm1, %v458_v36, %v466_v53  ;;  %v441_v10 = vsel %vm258_vm2, %v437_v4, %v4631_v30  ;;  %v658_v34 = vld [vmem:[#allocation6 + $0x370] sm:$0xff]  ;;  %924 = vmatpush.msra.mxu1 %v725_v22  ;;  %v4749_v4 = vld [vmem:[#allocation6 + $0x308] sm:$0xff] }
  0xbb   :  { %v374_v8 = vrot.slane %v367_v2, 4  ;;  %v411_v9 = vrot.slane %v404_v3, 4  ;;  %v478_v11 = vsel %vm258_vm2, %v474_v6, %v4631_v30  ;;  %v440_v14 = vsel %vm258_vm2, %v436_v25, %v4603_v62  ;;  %941 = vmatpush.msra.mxu2 %v610_v28  ;;  %965 = vmatpush.msra.mxu3 %v658_v34  ;;  %v4783_v28 = vld [vmem:[#allocation6 + $0x2c8] sm:$0xff] }
  0xbc   :  { %v448_v15 = vrot.slane %v441_v10, 4  ;;  %v485_v17 = vrot.slane %v478_v11, 4  ;;  %v511_v18 = vsel %vm253_vm1, %v495_v41, %v503_v63  ;;  %v477_v23 = vsel %vm258_vm2, %v4628_v29, %v4603_v62  ;;  %v721_v41 = vld [vmem:[#allocation6 + $0x568] sm:$0xff]  ;;  %v4742_v63 = vld [vmem:[#allocation6 + $0x190] sm:$0xff]  ;;  %907 = vmatpush.msra.mxu0 %v4723_v51 }
  0xbd   :  { %v4673_v24 = vsel %vm269_vm3, %v366_v49, %v374_v8  ;;  %v4676_v26 = vsel %vm269_vm3, %v403_v57, %v411_v9  ;;  %v515_v25 = vsel %vm258_vm2, %v511_v18, %v4631_v30  ;;  %v283_v35 = vrot.slane %v4642_v42, 1  ;;  %v4716_v49 = vld [vmem:[#allocation6 + $0x350] sm:$0xff]  ;;  %925 = vmatpush.msra.mxu1 %v721_v41  ;;  %v4757_v9 = vld [vmem:[#allocation6 + $0x508] sm:$0xff] }
  0xbe   :  { %v4681_v32 = vsel %vm269_vm3, %v440_v14, %v448_v15  ;;  %v4684_v33 = vsel %vm269_vm3, %v477_v23, %v485_v17  ;;  %v522_v29 = vrot.slane %v515_v25, 4  ;;  %v514_v36 = vsel %vm258_vm2, %v4637_v38, %v4603_v62  ;;  %966 = vmatpush.msra.mxu3 %v4716_v49  ;;  %v4755_v8 = vld [vmem:[#allocation6 + $0x310] sm:$0xff]  ;;  %908 = vmatpush.msra.mxu0 %v4749_v4 }
  0xbf   :  { %v246_v39 = vrot.slane %v4620_v19, 7  ;;  %v4693_v40 = vadd.f32 %v205_v20, %v133_v58  ;;  %v4699_v44 = vperm.slane %v4596_v52, 2  ;;  %v4703_v45 = vadd.f32 %v228_v27, %v134_v61  ;;  %v4708_v58 = vld [vmem:[#allocation6 + $0x1d0] sm:$0xff]  ;;  %926 = vmatpush.msra.mxu1 %v4718_v37  ;;  %v4773_v20 = vld [vmem:[#allocation6 + $0x4e8] sm:$0xff] }
  0xc0   :  { %v4696_v43 = vsel %vm269_vm3, %v514_v36, %v522_v29  ;;  %v4706_v38 = vperm.slane %v4596_v52, 3  ;;  %v312_v61 = vrot.slane %v4642_v42, 2  ;;  %v4721_v52 = vld [vmem:[#allocation6 + $0x1b0] sm:$0xff]  ;;  %942 = vmatpush.msra.mxu2 %v4708_v58  ;;  %v245_v1 = vrot.slane %v4598_v55, 7  ;;  %909 = vmatpush.msra.mxu0 %v4764_v13  ;;  %v4789_v29 = vld [vmem:[#allocation6 + $0x4c8] sm:$0xff] }
  0xc1   :  { %8549 = vst [vmem:[#allocation14_spill] sm:$0xff] %v4699_v44  ;;  %v290_v47 = vsel %vm253_vm1, %v282_v48, %v4693_v40  ;;  %v255_v53 = vsel %vm253_vm1, %v4608_v5, %v246_v39  ;;  %v291_v54 = vsel %vm253_vm1, %v283_v35, %v4703_v45  ;;  %v4731_v48 = vld [vmem:[#allocation6 + $0x330] sm:$0xff]  ;;  %v320_v60 = vrot.slane %v4703_v45, 1  ;;  %927 = vmatpush.msra.mxu1 %v4733_v56  ;;  %v4795_v36 = vld [vmem:[#allocation6 + $0x2a8] sm:$0xff] }
  0xc2   :  { %8550 = vst [vmem:[#allocation15_spill] sm:$0xff] %v4706_v38  ;;  %v294_v57 = vsel %vm258_vm2, %v290_v47, %v4699_v44  ;;  %v295_v59 = vsel %vm258_vm2, %v291_v54, %v4706_v38  ;;  %v319_v2 = vrot.slane %v4693_v40, 1  ;;  %943 = vmatpush.msra.mxu2 %v4721_v52  ;;  %v260_v6 = vsel %vm258_vm2, %v255_v53, 0.0  ;;  %967 = vmatpush.msra.mxu3 %v4731_v48  ;;  %v4771_v18 = vld [vmem:[#allocation6 + $0x2f0] sm:$0xff]  ;;  %v4807_v54 = vld [vmem:[#allocation6 + $0x4a8] sm:$0xff] }
  0xc3   :  { %v301_v3 = vrot.slane %v295_v59, 4  ;;  %v328_v7 = vsel %vm253_vm1, %v312_v61, %v320_v60  ;;  %v247_v10 = vrot.slane %v4693_v40, 7  ;;  %v349_v14 = vrot.slane %v4642_v42, 3  ;;  %928 = vmatpush.msra.mxu1 %v4757_v9  ;;  %v4781_v27 = vld [vmem:[#allocation6 + $0x150] sm:$0xff]  ;;  %8551 = vst [vmem:[#allocation16_spill] sm:$0xff] %v4795_v36  ;;  %910 = vmatpush.msra.mxu0 %v4783_v28 }
  0xc4   :  { %944 = vmatpush.msra.mxu2 %v4742_v63  ;;  %v248_v15 = vrot.slane %v4703_v45, 7  ;;  %v332_v17 = vsel %vm258_vm2, %v328_v7, %v4706_v38  ;;  %v254_v21 = vsel %vm253_vm1, %v4590_v50, %v245_v1  ;;  %v267_v22 = vrot.slane %v260_v6, 4  ;;  %968 = vmatpush.msra.mxu3 %v4755_v8  ;;  %v4793_v35 = vld [vmem:[#allocation6 + $0x130] sm:$0xff]  ;;  %8553 = vst [vmem:[#allocation18_spill] sm:$0xff] %v4807_v54  ;;  %v4817_v1 = vld [vmem:[#allocation6 + $0x288] sm:$0xff] }
  0xc5   :  { %v303_v11 = vsel %vm269_vm3, %v294_v57, %v301_v3  ;;  %v327_v23 = vsel %vm253_vm1, %v311_v0, %v319_v2  ;;  %v357_v25 = vrot.slane %v4703_v45, 2  ;;  %v338_v34 = vrot.slane %v332_v17, 4  ;;  %929 = vmatpush.msra.mxu1 %v4773_v20  ;;  %v4805_v53 = vld [vmem:[#allocation6 + $0x2b0] sm:$0xff]  ;;  %8554 = vst [vmem:[#allocation19_spill] sm:$0xff] %v4817_v1  ;;  %911 = vmatpush.msra.mxu0 %v4795_v36  ;;  %v4825_v7 = vld [vmem:[#allocation6 + $0x488] sm:$0xff] }
  0xc6   :  { %812 = vst [vmem:[#allocation1 + $0x10] ss:$2 sm:$0xff] %v303_v11  ;;  %945 = vmatpush.msra.mxu2 %v4762_v12  ;;  %969 = vmatpush.msra.mxu3 %v4771_v18  ;;  %v256_v39 = vsel %vm253_vm1, %v4617_v16, %v247_v10  ;;  %v348_v41 = vrot.slane %v4617_v16, 3  ;;  %v259_v47 = vsel %vm258_vm2, %v254_v21, 0.0  ;;  %v331_v61 = vsel %vm258_vm2, %v327_v23, %v4699_v44  ;;  %v4815_v0 = vld [vmem:[#allocation6 + $0x110] sm:$0xff]  ;;  %v4829_v11 = vld [vmem:[#allocation6 + $0x268] sm:$0xff] }
  0xc7   :  { %8552 = vst [vmem:[#allocation17_spill] sm:$0xff] %v4805_v53  ;;  %v257_v57 = vsel %vm253_vm1, %v4642_v42, %v248_v15  ;;  %v356_v59 = vrot.slane %v4693_v40, 2  ;;  %v365_v60 = vsel %vm253_vm1, %v349_v14, %v357_v25  ;;  %930 = vmatpush.msra.mxu1 %v4789_v29  ;;  %v4819_v2 = vld [vmem:[#allocation6 + $0x290] sm:$0xff]  ;;  %v270_v6 = vsel %vm269_vm3, %v259_v47, %v267_v22 }
  0xc8   :  { %946 = vmatpush.msra.mxu2 %v4781_v27  ;;  %970 = vmatpush.msra.mxu3 %v4787_v31  ;;  %8555 = vst [vmem:[#allocation20_spill] sm:$0xff] %v4819_v2  ;;  %v262_v3 = vsel %vm258_vm2, %v257_v57, 0.0  ;;  %v4827_v10 = vld [vmem:[#allocation6 + $0xf0] sm:$0xff]  ;;  %v261_v14 = vsel %vm258_vm2, %v256_v39, 0.0  ;;  %v340_v17 = vsel %vm269_vm3, %v331_v61, %v338_v34  ;;  %v369_v22 = vsel %vm258_vm2, %v365_v60, %v4706_v38  ;;  %v4845_v39 = vld [vmem:[#allocation6 + $0x468] sm:$0xff] }
  0xc9   :  { %8556 = vst [vmem:[#allocation21_spill] sm:$0xff] %v4825_v7  ;;  %v268_v15 = vrot.slane %v262_v3, 4  ;;  %931 = vmatpush.msra.mxu1 %v4807_v54  ;;  %912 = vmatpush.msra.mxu0 %v4817_v1  ;;  %v4843_v25 = vld [vmem:[#allocation6 + $0x270] sm:$0xff]  ;;  %v3483_v47 = vmul.f32 -1.442695, %v270_v6  ;;  %v386_v61 = vrot.slane %v4642_v42, 4  ;;  %v364_v57 = vsel %vm253_vm1, %v348_v41, %v356_v59 }
  0xca   :  { %947 = vmatpush.msra.mxu2 %v4793_v35  ;;  %8557 = vst [vmem:[#allocation22_spill] sm:$0xff] %v4827_v10  ;;  %971 = vmatpush.msra.mxu3 %v4805_v53  ;;  %v394_v3 = vrot.slane %v4703_v45, 3  ;;  %v4855_v60 = vld [vmem:[#allocation6 + $0xd0] sm:$0xff]  ;;  %v375_v41 = vrot.slane %v369_v22, 4  ;;  %v385_v22 = vrot.slane %v4617_v16, 4 }
  0xcb   :  { %8558 = vst [vmem:[#allocation23_spill] sm:$0xff] %v4829_v11  ;;  %v4848_v34 = vsel %vm269_vm3, %v261_v14, %v268_v15  ;;  %932 = vmatpush.msra.mxu1 %v4825_v7  ;;  %913 = vmatpush.msra.mxu0 %v4829_v11  ;;  %v4862_v6 = vld [vmem:[#allocation6 + $0x250] sm:$0xff]  ;;  %v4864_v14 = vld [vmem:[#allocation6 + $0x448] sm:$0xff]  ;;  %3652 = vpow2.f32 %v3483_v47 }
  0xcc   :  { %948 = vmatpush.msra.mxu2 %v4815_v0  ;;  %8561 = vst [vmem:[#allocation26_spill] sm:$0xff] %v4843_v25  ;;  %972 = vmatpush.msra.mxu3 %v4819_v2  ;;  %v4868_v59 = vld [vmem:[#allocation6 + $0xb0] sm:$0xff]  ;;  %v4870_v15 = vld [vmem:[#allocation6 + $0x228] sm:$0xff] }
  0xcd   :  { %v4833_v21 = vld.sshfl [vmem:[#allocation1 + $0x10] sm:$0xff pattern:$0x75316420]  ;;  %v4835_v23 = vld.sshfl [vmem:[#allocation1 + $0x18] sm:$0xff pattern:$0x75316420]  ;;  %933 = vmatpush.msra.mxu1 %v4845_v39 }
  0xce   :  { %8559 = vst [vmem:[#allocation24_spill] sm:$0xff] %v4833_v21  ;;  %949 = vmatpush.msra.mxu2 %v4827_v10  ;;  %973 = vmatpush.msra.mxu3 %v4843_v25  ;;  %v368_v21 = vsel %vm258_vm2, %v364_v57, %v4699_v44  ;;  %v4876_v11 = vld [vmem:[#allocation6 + $0x230] sm:$0xff]  ;;  %v4878_v47 = vld [vmem:[#allocation6 + $0x428] sm:$0xff]  ;;  %v402_v25 = vsel %vm253_vm1, %v386_v61, %v394_v3 }
  0xcf   :  { %8560 = vst [vmem:[#allocation25_spill] sm:$0xff] %v4835_v23  ;;  %v3484_v23 = vmul.f32 -1.442695, %v4848_v34  ;;  %934 = vmatpush.msra.mxu1 %v4864_v14  ;;  %v4887_v57 = vld [vmem:[#allocation6 + $0x208] sm:$0xff]  ;;  %v377_v7 = vsel %vm269_vm3, %v368_v21, %v375_v41  ;;  %v406_v3 = vsel %vm258_vm2, %v402_v25, %v4706_v38  ;;  %v422_v25 = vrot.slane %v4617_v16, 5 }
  0xd0   :  { %1139 = vst [vmem:[#allocation1 + $0x10] ss:$2 sm:$0xff] %v340_v17  ;;  %v4857_v17 = vld [vmem:[#allocation6 + $0x248] sm:$0xff]  ;;  %950 = vmatpush.msra.mxu2 %v4855_v60  ;;  %974 = vmatpush.msra.mxu3 %v4862_v6 }
  0xd1   :  { %8562 = vst [vmem:[#allocation27_spill] sm:$0xff] %v4845_v39  ;;  %3654 = vpow2.f32 %v3484_v23  ;;  %914 = vmatpush.msra.mxu0 %v4857_v17  ;;  %v393_v39 = vrot.slane %v4693_v40, 3  ;;  %v4885_v23 = vld [vmem:[#allocation6 + $0x90] sm:$0xff]  ;;  %935 = vmatpush.msra.mxu1 %v4878_v47  ;;  %v3653_v61 = vpop.eup %3652 }
  0xd2   :  { %8563 = vst [vmem:[#allocation28_spill] sm:$0xff] %v4855_v60  ;;  %951 = vmatpush.msra.mxu2 %v4868_v59  ;;  %975 = vmatpush.msra.mxu3 %v4876_v11  ;;  %v748_v41 = vadd.f32 1.0, %v3653_v61 }
  0xd3   :  { %8564 = vst [vmem:[#allocation29_spill] sm:$0xff] %v4857_v17  ;;  %915 = vmatpush.msra.mxu0 %v4870_v15  ;;  %v4891_v17 = vld [vmem:[#allocation6 + $0x210] sm:$0xff]  ;;  %v401_v21 = vsel %vm253_vm1, %v385_v22, %v393_v39  ;;  %v430_v39 = vrot.slane %v4693_v40, 4 }
  0xd4   :  { %8565 = vst [vmem:[#allocation30_spill] sm:$0xff] %v4862_v6  ;;  %952 = vmatpush.msra.mxu2 %v4885_v23  ;;  %976 = vmatpush.msra.mxu3 %v4891_v17  ;;  %3656 = vrcp.f32 %v748_v41  ;;  %vm755_vm5 = vweird.f32 %v748_v41 }
  0xd5   :  { %8566 = vst [vmem:[#allocation31_spill] sm:$0xff] %v4864_v14  ;;  %916 = vmatpush.msra.mxu0 %v4887_v57 }
  0xd6   :  { %8567 = vst [vmem:[#allocation32_spill] sm:$0xff] %v4868_v59 }
  0xd7   :  { %8568 = vst [vmem:[#allocation33_spill] sm:$0xff] %v4870_v15  ;;  %v4894_v2 = vld.sshfl [vmem:[#allocation1 + $0x10] sm:$0xff pattern:$0x75316420]  ;;  %v3655_v15 = vpop.eup %3654 }
  0xd8   :  { %8569 = vst [vmem:[#allocation34_spill] sm:$0xff] %v4876_v11  ;;  %v4896_v60 = vld.sshfl [vmem:[#allocation1 + $0x18] sm:$0xff pattern:$0x75316420]  ;;  %v412_v11 = vrot.slane %v406_v3, 4 }
  0xd9   :  { %8570 = vst [vmem:[#allocation35_spill] sm:$0xff] %v4878_v47  ;;  %v4908_v47 = vadd.f32 1.0, %v3655_v15  ;;  %v4921_v15 = vld [vmem:[#allocation6 + $0x408] sm:$0xff]  ;;  %v4923_v3 = vld [vmem:[#allocation6 + $0x70] sm:$0xff] }
  0xda   :  { %8571 = vst [vmem:[#allocation36_spill] sm:$0xff] %v4885_v23  ;;  %936 = vmatpush.msra.mxu1 %v4921_v15  ;;  %953 = vmatpush.msra.mxu2 %v4923_v3  ;;  %v761_v23 = vand.u32 2147483648, %v748_v41 }
  0xdb   :  { %8572 = vst [vmem:[#allocation37_spill] sm:$0xff] %v4887_v57  ;;  %3658 = vrcp.f32 %v4908_v47  ;;  %vm770_vm9 = vweird.f32 %v4908_v47 }
  0xdc   :  { %8573 = vst [vmem:[#allocation38_spill] sm:$0xff] %v4891_v17 }
  0xdd   :  { %8574 = vst [vmem:[#allocation39_spill] sm:$0xff] %v4894_v2  ;;  %v431_v2 = vrot.slane %v4703_v45, 4 }
  0xde   :  { %8575 = vst [vmem:[#allocation40_spill] sm:$0xff] %v4896_v60  ;;  %v423_v60 = vrot.slane %v4642_v42, 5 }
  0xdf   :  { %1466 = vst [vmem:[#allocation1 + $0x10] ss:$2 sm:$0xff] %v377_v7  ;;  %v405_v7 = vsel %vm258_vm2, %v401_v21, %v4699_v44  ;;  %v3657_v21 = vpop.eup %3656 }
  0xe0   :  { %v439_v22 = vsel %vm253_vm1, %v423_v60, %v431_v2  ;;  %v414_v61 = vsel %vm269_vm3, %v405_v7, %v412_v11  ;;  %8578 = vst [vmem:[#allocation43_spill] sm:$0xff] %v4921_v15  ;;  %v438_v11 = vsel %vm253_vm1, %v422_v25, %v430_v39  ;;  %v751_v60 = vmul.f32 %v3657_v21, %v748_v41  ;;  %v4932_v7 = vld [vmem:[#allocation6 + $0x50] sm:$0xff] }
  0xe1   :  { %8579 = vst [vmem:[#allocation44_spill] sm:$0xff] %v4923_v3  ;;  %v443_v14 = vsel %vm258_vm2, %v439_v22, %v4706_v38  ;;  %v4929_v2 = vpop.eup %3658  ;;  %954 = vmatpush.msra.mxu2 %v4932_v7  ;;  %v468_v22 = vrot.slane %v4703_v45, 5  ;;  %v4938_v15 = vld [vmem:[#allocation6 + $0x30] sm:$0xff]  ;;  %v442_v3 = vsel %vm258_vm2, %v438_v11, %v4699_v44  ;;  %vm756_vm4 = vweird.f32 %v3657_v21 }
  0xe2   :  { %8580 = vst [vmem:[#allocation45_spill] sm:$0xff] %v4932_v7  ;;  %v752_v6 = vsub.f32 1.0, %v751_v60  ;;  %v766_v25 = vmul.f32 %v4929_v2, %v4908_v47  ;;  %v759_v39 = vand.u32 2147483647, %v748_v41  ;;  %v4945_v7 = vld [vmem:[#allocation6 + $0x10] sm:$0xff]  ;;  %v467_v60 = vrot.slane %v4693_v40, 5  ;;  %vm757_vm6 = vmor %vm755_vm5, %vm756_vm4 }
  0xe3   :  { %8581 = vst [vmem:[#allocation46_spill] sm:$0xff] %v4938_v15  ;;  %955 = vmatpush.msra.mxu2 %v4938_v15  ;;  %v762_v15 = vor.u32 1.1754944e-38, %v761_v23  ;;  %vm771_vm8 = vweird.f32 %v4929_v2 }
  0xe4   :  { %8582 = vst [vmem:[#allocation47_spill] sm:$0xff] %v4945_v7  ;;  %v767_v53 = vsub.f32 1.0, %v766_v25  ;;  %vm760_vm7 = vcmp.eq.f32.partialorder %v759_v39, 8.507059e+37  ;;  %v497_v25 = vrot.slane %v4642_v42, 7  ;;  %vm772_vm10 = vmor %vm770_vm9, %vm771_vm8  ;;  %v281_v39 = vrot.slane %v4608_v5, 1 }
  0xe5   :  { %956 = vmatpush.msra.mxu2 %v4945_v7 }
  0xe6   :  { %v4917_v17 = vld.sshfl [vmem:[#allocation1 + $0x10] sm:$0xff pattern:$0x75316420]  ;;  %v4919_v57 = vld.sshfl [vmem:[#allocation1 + $0x18] sm:$0xff pattern:$0x75316420] }
  0xe7   :  { %8576 = vst [vmem:[#allocation41_spill] sm:$0xff] %v4917_v17  ;;  %v449_v17 = vrot.slane %v443_v14, 4  ;;  %v459_v14 = vrot.slane %v4617_v16, 6 }
  0xe8   :  { %8577 = vst [vmem:[#allocation42_spill] sm:$0xff] %v4919_v57  ;;  %v781_v57 = vrot.slane %v4848_v34, 4  ;;  %v753_v34 = vmul.f32 %v3657_v21, %v752_v6 }
  0xe9   :  { %1793 = vst [vmem:[#allocation1 + $0x10] ss:$2 sm:$0xff] %v414_v61  ;;  %v460_v61 = vrot.slane %v4642_v42, 6  ;;  %v451_v11 = vsel %vm269_vm3, %v442_v3, %v449_v17  ;;  %v768_v3 = vmul.f32 %v4929_v2, %v767_v53  ;;  %v774_v42 = vand.u32 2147483647, %v4908_v47 }
  0xea   :  { %3660 = vtanh.f32 %v781_v57  ;;  %v754_v54 = vadd.f32 %v3657_v21, %v753_v34 }
  0xeb   :  { %v476_v1 = vsel %vm253_vm1, %v460_v61, %v468_v22  ;;  %vm775_vm11 = vcmp.eq.f32.partialorder %v774_v42, 8.507059e+37  ;;  %v5012_v42 = vld [vmem:[#allocation6 + $0x1f8] sm:$0xff] }
  0xec   :  { %v758_v10 = vsel %vm757_vm6, %v3657_v21, %v754_v54  ;;  %v480_v57 = vsel %vm258_vm2, %v476_v1, %v4706_v38  ;;  %v505_v54 = vrot.slane %v4703_v45, 6  ;;  %v769_v1 = vadd.f32 %v4929_v2, %v768_v3 }
  0xed   :  { %v763_v7 = vsel %vm760_vm7, %v762_v15, %v758_v10  ;;  %v486_v61 = vrot.slane %v480_v57, 4  ;;  %v496_v45 = vrot.slane %v4617_v16, 7 }
  0xee   :  { %v785_v36 = vrot.slane %v763_v7, 4  ;;  %v773_v34 = vsel %vm772_vm10, %v4929_v2, %v769_v1  ;;  %v4989_v2 = vld [vmem:[#allocation6 + $0x5f0] sm:$0xff] }
  0xf0   :  { %v4950_v59 = vld.sshfl [vmem:[#allocation1 + $0x10] sm:$0xff pattern:$0x75316420]  ;;  %v4954_v6 = vld.sshfl [vmem:[#allocation1 + $0x18] sm:$0xff pattern:$0x75316420]  ;;  %v3661_v17 = vpop.eup %3660 }
  0xf1   :  { %8583 = vst [vmem:[#allocation48_spill] sm:$0xff] %v4950_v59  ;;  %v475_v59 = vsel %vm253_vm1, %v459_v14, %v467_v60  ;;  %v787_v41 = vmul.f32 0.0, %v785_v36  ;;  %v788_v22 = vmul.f32 %v3661_v17, %v763_v7  ;;  %v776_v36 = vand.u32 2147483648, %v4908_v47 }
  0xf2   :  { %8584 = vst [vmem:[#allocation49_spill] sm:$0xff] %v4954_v6  ;;  %v479_v23 = vsel %vm258_vm2, %v475_v59, %v4699_v44  ;;  %v504_v59 = vrot.slane %v4693_v40, 6  ;;  %v513_v7 = vsel %vm253_vm1, %v497_v25, %v505_v54  ;;  %v289_v40 = vsel %vm253_vm1, %v281_v39, %v4620_v19 }
  0xf3   :  { %2120 = vst [vmem:[#allocation1 + $0x10] ss:$2 sm:$0xff] %v451_v11  ;;  %v4964_v21 = vadd.f32 %v788_v22, %v787_v41  ;;  %v488_v53 = vsel %vm269_vm3, %v479_v23, %v486_v61  ;;  %v777_v14 = vor.u32 1.1754944e-38, %v776_v36  ;;  %v517_v60 = vsel %vm258_vm2, %v513_v7, %v4706_v38  ;;  %v4991_v41 = vld [vmem:[#allocation6 + $0x5f8] sm:$0xff] }
  0xf4   :  { %v4530_v11 = vmov 0.0   ;;  %v512_v16 = vsel %vm253_vm1, %v496_v45, %v504_v59  ;;  %v523_v61 = vrot.slane %v517_v60, 4  ;;  %v293_v23 = vsel %vm258_vm2, %v289_v40, %v4631_v30  ;;  %v5014_v45 = vld [vmem:[#allocation6 + $0x5d0] sm:$0xff]  ;;  %v5019_v7 = vld [vmem:[#allocation6 + $0x5d8] sm:$0xff] }
  0xf5   :  { %3662 = vtanh.f32 %v4964_v21  ;;  %v4984_v57 = vrot.slane %v4530_v11, 6  ;;  %v778_v17 = vsel %vm775_vm11, %v777_v14, %v773_v34  ;;  %v516_v22 = vsel %vm258_vm2, %v512_v16, %v4699_v44  ;;  %v5029_v60 = vld [vmem:[#allocation6 + $0x1d8] sm:$0xff]  ;;  %v5086_v44 = vld [vmem:[#allocation6 + $0x550] sm:$0xff] }
  0xf6   :  { %v280_v36 = vrot.slane %v4590_v50, 1  ;;  %v310_v59 = vrot.slane %v4608_v5, 2  ;;  %v300_v14 = vrot.slane %v293_v23, 4  ;;  %v5031_v5 = vld [vmem:[#allocation6 + $0x5b0] sm:$0xff]  ;;  %v5041_v40 = vld [vmem:[#allocation6 + $0x1b8] sm:$0xff]  ;;  %8594 = vst [vmem:[#allocation57_spill] sm:$0xff] %v5086_v44 }
  0xf7   :  { %v5090_v38 = vld [vmem:[#allocation6 + $0x558] sm:$0xff] }
  0xf8   :  { %v288_v39 = vsel %vm253_vm1, %v280_v36, %v4598_v55  ;;  %v5056_v36 = vld [vmem:[#allocation6 + $0x198] sm:$0xff]  ;;  %8595 = vst [vmem:[#allocation58_spill] sm:$0xff] %v5090_v38 }
  0xfa   :  { %v4968_v10 = vld.sshfl [vmem:[#allocation1 + $0x10] sm:$0xff pattern:$0x75316420]  ;;  %v4973_v15 = vld.sshfl [vmem:[#allocation1 + $0x18] sm:$0xff pattern:$0x75316420] }
  0xfb   :  { %8585 = vst [vmem:[#allocation50_spill] sm:$0xff] %v4968_v10  ;;  %v3663_v47 = vpop.eup %3662  ;;  %v5112_v10 = vld [vmem:[#allocation6 + $0x510] sm:$0xff] }
  0xfc   :  { %8586 = vst [vmem:[#allocation51_spill] sm:$0xff] %v4973_v15  ;;  %v791_v3 = vmul.f32 %v3663_v47, %v778_v17  ;;  %v5037_v47 = vld [vmem:[#allocation6 + $0x5b8] sm:$0xff]  ;;  %v5043_v17 = vld [vmem:[#allocation6 + $0x590] sm:$0xff] }
  0xfd   :  { %2447 = vst [vmem:[#allocation1 + $0x10] ss:$2 sm:$0xff] %v488_v53  ;;  %v318_v53 = vrot.slane %v4620_v19, 1  ;;  %v525_v19 = vsel %vm269_vm3, %v516_v22, %v523_v61  ;;  %v5049_v61 = vld [vmem:[#allocation6 + $0x598] sm:$0xff]  ;;  %v317_v22 = vrot.slane %v4598_v55, 1  ;;  %v309_v55 = vrot.slane %v4590_v50, 2 }
  0xfe   :  { %793 = vst [vmem:[#allocation1] ss:$2 sm:$0xff] %v791_v3  ;;  %v4999_v25 = vsel %vm258_vm2, %v791_v3, %v4984_v57  ;;  %v5001_v54 = vrot.slane %v791_v3, 6  ;;  %v292_v3 = vsel %vm258_vm2, %v288_v39, %v4603_v62  ;;  %v5069_v39 = vld [vmem:[#allocation6 + $0x570] sm:$0xff]  ;;  %v5084_v50 = vld [vmem:[#allocation6 + $0x178] sm:$0xff] }
  0xff   :  { %837 = vmatmul.f32.vlgmr.msrb.gmra.mxu0 %v4999_v25  ;;  %897 = vmatmul.f32.vlgmr.msrb.gmra.mxu3 %v4999_v25  ;;  %v326_v16 = vsel %vm253_vm1, %v310_v59, %v318_v53  ;;  %v302_v23 = vsel %vm269_vm3, %v292_v3, %v300_v14  ;;  %v5058_v59 = vld [vmem:[#allocation6 + $0x3f8] sm:$0xff]  ;;  %8591 = vst [vmem:[#allocation54_spill] sm:$0xff] %v5069_v39 }
 0x100   :  { %981 = vmatpush.msrb.mxu0 %v4989_v2  ;;  %1041 = vmatpush.msrb.mxu3 %v4991_v41  ;;  %v5071_v14 = vld [vmem:[#allocation6 + $0x578] sm:$0xff]  ;;  %v325_v3 = vsel %vm253_vm1, %v309_v55, %v317_v22  ;;  %8593 = vst [vmem:[#allocation56_spill] sm:$0xff] %v5084_v50  ;;  %v5100_v55 = vld [vmem:[#allocation6 + $0x530] sm:$0xff] }
 0x101   :  { %3487 = vmatmul.msk.f32.vlgmr.msrb.gmra.mxu1 %vm5004_vm12, %v5001_v54  ;;  %8592 = vst [vmem:[#allocation55_spill] sm:$0xff] %v5071_v14  ;;  %v5092_v22 = vld [vmem:[#allocation6 + $0x3b8] sm:$0xff] }
 0x102   :  { %1001 = vmatpush.msrb.mxu1 %v5012_v42  ;;  %982 = vmatpush.msrb.mxu0 %v5014_v45  ;;  %8597 = vst [vmem:[#allocation60_spill] sm:$0xff] %v5100_v55  ;;  %v5110_v15 = vld [vmem:[#allocation6 + $0x398] sm:$0xff] }
 0x103   :  { %1042 = vmatpush.msrb.mxu3 %v5019_v7  ;;  %8600 = vst [vmem:[#allocation63_spill] sm:$0xff] %v5112_v10 }
 0x104   :  { %v5021_v34 = vld.sshfl [vmem:[#allocation1 + $0x10] sm:$0xff pattern:$0x75316420]  ;;  %v5033_v11 = vld.sshfl [vmem:[#allocation1 + $0x18] sm:$0xff pattern:$0x75316420]  ;;  %1002 = vmatpush.msrb.mxu1 %v5029_v60  ;;  %983 = vmatpush.msrb.mxu0 %v5031_v5 }
 0x105   :  { %8589 = vst [vmem:[#allocation52_spill] sm:$0xff] %v5021_v34  ;;  %v5053_v53 = vld.sshfl [vmem:[#allocation1] sm:$0xff pattern:$0x75316420]  ;;  %1043 = vmatpush.msrb.mxu3 %v5037_v47 }
 0x106   :  { %8590 = vst [vmem:[#allocation53_spill] sm:$0xff] %v5033_v11  ;;  %1003 = vmatpush.msrb.mxu1 %v5041_v40  ;;  %984 = vmatpush.msrb.mxu0 %v5043_v17  ;;  %v329_v11 = vsel %vm258_vm2, %v325_v3, %v4603_v62  ;;  %v5108_v34 = vld [vmem:[#allocation6 + $0x138] sm:$0xff]  ;;  %v5133_v62 = vld [vmem:[#allocation6 + $0x4f0] sm:$0xff] }
 0x107   :  { %2774 = vst [vmem:[#allocation1 + $0x10] ss:$2 sm:$0xff] %v525_v19  ;;  %v330_v19 = vsel %vm258_vm2, %v326_v16, %v4631_v30  ;;  %1044 = vmatpush.msrb.mxu3 %v5049_v61  ;;  %3489 = vmatmul.msk.f32.vlgmr.msrb.gmra.mxu2 %vm5004_vm12, %v5053_v53  ;;  %v5075_v16 = vld [vmem:[#allocation6 + $0x3d8] sm:$0xff] }
 0x108   :  { %810 = vst [vmem:[#allocation1] ss:$2 sm:$0xff] %v302_v23  ;;  %1004 = vmatpush.msrb.mxu1 %v5056_v36  ;;  %1021 = vmatpush.msrb.mxu2 %v5058_v59  ;;  %v337_v23 = vrot.slane %v330_v19, 4  ;;  %v5098_v19 = vld [vmem:[#allocation6 + $0x158] sm:$0xff] }
 0x109   :  { %3491 = vmatmul.msk.f32.vlgmr.msra.gmra.mxu0 %vm5004_vm12, %v5001_v54  ;;  %3495 = vmatmul.msk.f32.vlgmr.msra.gmra.mxu3 %vm5004_vm12, %v5001_v54  ;;  %8596 = vst [vmem:[#allocation59_spill] sm:$0xff] %v5098_v19  ;;  %v5102_v30 = vld [vmem:[#allocation6 + $0x538] sm:$0xff] }
 0x10a   :  { %985 = vmatpush.msrb.mxu0 %v5069_v39  ;;  %1045 = vmatpush.msrb.mxu3 %v5071_v14  ;;  %8598 = vst [vmem:[#allocation61_spill] sm:$0xff] %v5102_v30  ;;  %v339_v6 = vsel %vm269_vm3, %v329_v11, %v337_v23  ;;  %v5123_v3 = vld [vmem:[#allocation6 + $0x518] sm:$0xff] }
 0x10b   :  { %3493 = vmatmul.msk.f32.vlgmr.msra.gmra.mxu1 %vm5004_vm12, %v5053_v53  ;;  %1022 = vmatpush.msrb.mxu2 %v5075_v16  ;;  %8599 = vst [vmem:[#allocation62_spill] sm:$0xff] %v5108_v34  ;;  %v5127_v11 = vld [vmem:[#allocation6 + $0x118] sm:$0xff] }
 0x10c   :  { %1005 = vmatpush.msrb.mxu1 %v5084_v50  ;;  %986 = vmatpush.msrb.mxu0 %v5086_v44  ;;  %8601 = vst [vmem:[#allocation64_spill] sm:$0xff] %v5123_v3  ;;  %v5129_v23 = vld [vmem:[#allocation6 + $0x378] sm:$0xff] }
 0x10d   :  { %1046 = vmatpush.msrb.mxu3 %v5090_v38  ;;  %1023 = vmatpush.msrb.mxu2 %v5092_v22  ;;  %8602 = vst [vmem:[#allocation65_spill] sm:$0xff] %v5127_v11  ;;  %v5155_v38 = vld [vmem:[#allocation6 + $0x4b0] sm:$0xff]  ;;  %v5161_v44 = vld [vmem:[#allocation6 + $0xb8] sm:$0xff] }
 0x10e   :  { %1006 = vmatpush.msrb.mxu1 %v5098_v19  ;;  %987 = vmatpush.msrb.mxu0 %v5100_v55  ;;  %8603 = vst [vmem:[#allocation66_spill] sm:$0xff] %v5129_v23  ;;  %v5139_v55 = vld [vmem:[#allocation6 + $0xf8] sm:$0xff]  ;;  %v5145_v19 = vld [vmem:[#allocation6 + $0x4d0] sm:$0xff] }
 0x10f   :  { %v5115_v14 = vld.sshfl [vmem:[#allocation1] sm:$0xff pattern:$0x75316420]  ;;  %v5117_v39 = vld.sshfl [vmem:[#allocation1 + $0x8] sm:$0xff pattern:$0x75316420]  ;;  %1047 = vmatpush.msrb.mxu3 %v5102_v30  ;;  %1024 = vmatpush.msrb.mxu2 %v5110_v15 }
 0x110   :  { %1137 = vst [vmem:[#allocation1] ss:$2 sm:$0xff] %v339_v6  ;;  %1007 = vmatpush.msrb.mxu1 %v5108_v34  ;;  %988 = vmatpush.msrb.mxu0 %v5112_v10  ;;  %v5135_v6 = vld [vmem:[#allocation6 + $0x4f8] sm:$0xff] }
 0x111   :  { %8604 = vst [vmem:[#allocation67_spill] sm:$0xff] %v5133_v62  ;;  %1048 = vmatpush.msrb.mxu3 %v5123_v3  ;;  %957 = vmatmul.f32.vlgmr.msra.gmra.mxu2 %v4999_v25  ;;  %v5141_v30 = vld [vmem:[#allocation6 + $0x358] sm:$0xff] }
 0x112   :  { %8605 = vst [vmem:[#allocation68_spill] sm:$0xff] %v5135_v6  ;;  %1008 = vmatpush.msrb.mxu1 %v5127_v11  ;;  %1025 = vmatpush.msrb.mxu2 %v5129_v23  ;;  %v5147_v34 = vld [vmem:[#allocation6 + $0x4d8] sm:$0xff] }
 0x113   :  { %8606 = vst [vmem:[#allocation69_spill] sm:$0xff] %v5139_v55  ;;  %989 = vmatpush.msrb.mxu0 %v5133_v62  ;;  %1049 = vmatpush.msrb.mxu3 %v5135_v6  ;;  %v5151_v10 = vld [vmem:[#allocation6 + $0xd8] sm:$0xff] }
 0x114   :  { %8607 = vst [vmem:[#allocation70_spill] sm:$0xff] %v5145_v19  ;;  %v5153_v3 = vld [vmem:[#allocation6 + $0x338] sm:$0xff]  ;;  %1009 = vmatpush.msrb.mxu1 %v5139_v55  ;;  %1026 = vmatpush.msrb.mxu2 %v5141_v30  ;;  %v5174_v55 = vld [vmem:[#allocation6 + $0x490] sm:$0xff] }
 0x115   :  { %8608 = vst [vmem:[#allocation71_spill] sm:$0xff] %v5147_v34  ;;  %v5159_v11 = vld [vmem:[#allocation6 + $0x4b8] sm:$0xff]  ;;  %990 = vmatpush.msrb.mxu0 %v5145_v19  ;;  %1050 = vmatpush.msrb.mxu3 %v5147_v34 }
 0x116   :  { %8609 = vst [vmem:[#allocation72_spill] sm:$0xff] %v5151_v10  ;;  %v5163_v50 = vld [vmem:[#allocation6 + $0x318] sm:$0xff]  ;;  %1010 = vmatpush.msrb.mxu1 %v5151_v10  ;;  %1027 = vmatpush.msrb.mxu2 %v5153_v3 }
 0x117   :  { %8610 = vst [vmem:[#allocation73_spill] sm:$0xff] %v5155_v38  ;;  %v5165_v23 = vld.sshfl [vmem:[#allocation1] sm:$0xff pattern:$0x75316420]  ;;  %991 = vmatpush.msrb.mxu0 %v5155_v38  ;;  %1051 = vmatpush.msrb.mxu3 %v5159_v11 }
 0x118   :  { %8611 = vst [vmem:[#allocation74_spill] sm:$0xff] %v5159_v11  ;;  %v5167_v62 = vld.sshfl [vmem:[#allocation1 + $0x8] sm:$0xff pattern:$0x75316420]  ;;  %v5176_v6 = vld [vmem:[#allocation6 + $0x498] sm:$0xff]  ;;  %1011 = vmatpush.msrb.mxu1 %v5161_v44  ;;  %1028 = vmatpush.msrb.mxu2 %v5163_v50  ;;  %v5198_v11 = vld [vmem:[#allocation6 + $0x450] sm:$0xff] }
 0x119   :  { %8612 = vst [vmem:[#allocation75_spill] sm:$0xff] %v5161_v44  ;;  %v5188_v10 = vld [vmem:[#allocation6 + $0x478] sm:$0xff]  ;;  %992 = vmatpush.msrb.mxu0 %v5174_v55  ;;  %1052 = vmatpush.msrb.mxu3 %v5176_v6 }
 0x11a   :  { %8613 = vst [vmem:[#allocation76_spill] sm:$0xff] %v5163_v50  ;;  %v5192_v34 = vld [vmem:[#allocation6 + $0x78] sm:$0xff] }
 0x11b   :  { %8614 = vst [vmem:[#allocation77_spill] sm:$0xff] %v5165_v23  ;;  %v5180_v23 = vld [vmem:[#allocation6 + $0x98] sm:$0xff]  ;;  %1053 = vmatpush.msrb.mxu3 %v5188_v10 }
 0x11c   :  { %8615 = vst [vmem:[#allocation78_spill] sm:$0xff] %v5167_v62  ;;  %v5182_v62 = vld [vmem:[#allocation6 + $0x2f8] sm:$0xff]  ;;  %1012 = vmatpush.msrb.mxu1 %v5180_v23 }
 0x11d   :  { %1464 = vst [vmem:[#allocation1] ss:$2 sm:$0xff] %v4673_v24  ;;  %v5186_v24 = vld [vmem:[#allocation6 + $0x470] sm:$0xff]  ;;  %v5194_v38 = vld [vmem:[#allocation6 + $0x2d8] sm:$0xff]  ;;  %1029 = vmatpush.msrb.mxu2 %v5182_v62 }
 0x11e   :  { %8616 = vst [vmem:[#allocation79_spill] sm:$0xff] %v5174_v55  ;;  %v5200_v44 = vld [vmem:[#allocation6 + $0x458] sm:$0xff]  ;;  %993 = vmatpush.msrb.mxu0 %v5186_v24  ;;  %1013 = vmatpush.msrb.mxu1 %v5192_v34 }
 0x11f   :  { %8617 = vst [vmem:[#allocation80_spill] sm:$0xff] %v5176_v6  ;;  %v5204_v19 = vld [vmem:[#allocation6 + $0x58] sm:$0xff]  ;;  %v5208_v6 = vld [vmem:[#allocation6 + $0x430] sm:$0xff]  ;;  %1030 = vmatpush.msrb.mxu2 %v5194_v38  ;;  %1054 = vmatpush.msrb.mxu3 %v5200_v44 }
 0x120   :  { %8618 = vst [vmem:[#allocation81_spill] sm:$0xff] %v5180_v23  ;;  %v5206_v55 = vld [vmem:[#allocation6 + $0x2b8] sm:$0xff]  ;;  %994 = vmatpush.msrb.mxu0 %v5198_v11  ;;  %1014 = vmatpush.msrb.mxu1 %v5204_v19 }
 0x121   :  { %8619 = vst [vmem:[#allocation82_spill] sm:$0xff] %v5182_v62  ;;  %v5212_v23 = vld [vmem:[#allocation6 + $0x438] sm:$0xff]  ;;  %1031 = vmatpush.msrb.mxu2 %v5206_v55 }
 0x122   :  { %8620 = vst [vmem:[#allocation83_spill] sm:$0xff] %v5186_v24  ;;  %v5214_v62 = vld [vmem:[#allocation6 + $0x38] sm:$0xff]  ;;  %995 = vmatpush.msrb.mxu0 %v5208_v6  ;;  %1055 = vmatpush.msrb.mxu3 %v5212_v23 }
 0x123   :  { %8621 = vst [vmem:[#allocation84_spill] sm:$0xff] %v5188_v10  ;;  %v5216_v50 = vld [vmem:[#allocation6 + $0x298] sm:$0xff]  ;;  %1015 = vmatpush.msrb.mxu1 %v5214_v62 }
 0x124   :  { %8622 = vst [vmem:[#allocation85_spill] sm:$0xff] %v5192_v34  ;;  %v5220_v10 = vld.sshfl [vmem:[#allocation1] sm:$0xff pattern:$0x75316420]  ;;  %v5226_v34 = vld [vmem:[#allocation6 + $0x410] sm:$0xff]  ;;  %1032 = vmatpush.msrb.mxu2 %v5216_v50 }
 0x125   :  { %8623 = vst [vmem:[#allocation86_spill] sm:$0xff] %v5194_v38  ;;  %v5222_v24 = vld.sshfl [vmem:[#allocation1 + $0x8] sm:$0xff pattern:$0x75316420]  ;;  %v5228_v38 = vld [vmem:[#allocation6 + $0x418] sm:$0xff]  ;;  %996 = vmatpush.msrb.mxu0 %v5226_v34 }
 0x126   :  { %8624 = vst [vmem:[#allocation87_spill] sm:$0xff] %v5198_v11  ;;  %v5233_v11 = vld [vmem:[#allocation6 + $0x18] sm:$0xff]  ;;  %1056 = vmatpush.msrb.mxu3 %v5228_v38  ;;  %3497 = vmatmul.msk.f32.vlgmr.msrb.gmra.mxu0 %vm5004_vm12, %v5053_v53 }
 0x127   :  { %8625 = vst [vmem:[#allocation88_spill] sm:$0xff] %v5212_v23  ;;  %1016 = vmatpush.msrb.mxu1 %v5233_v11  ;;  %3501 = vmatmul.msk.f32.vlgmr.msrb.gmra.mxu3 %vm5004_vm12, %v5053_v53  ;;  %v5265_v23 = vld [vmem:[#allocation6 + $0x218] sm:$0xff]  ;;  %v5267_v53 = vld [vmem:[#allocation6 + $0x3e0] sm:$0xff] }
 0x128   :  { %8626 = vst [vmem:[#allocation89_spill] sm:$0xff] %v5214_v62  ;;  %1017 = vmatmul.f32.vlgmr.msrb.gmra.mxu1 %v4999_v25  ;;  %v5270_v25 = vld [vmem:[#allocation6 + $0x1c0] sm:$0xff] }
 0x129   :  { %8627 = vst [vmem:[#allocation90_spill] sm:$0xff] %v5220_v10  ;;  %v5252_v10 = vld [vmem:[#allocation6 + $0x238] sm:$0xff]  ;;  %1168 = vmatpush.msra.mxu1 %v5267_v53 }
 0x12a   :  { %8628 = vst [vmem:[#allocation91_spill] sm:$0xff] %v5222_v24  ;;  %v5237_v24 = vld [vmem:[#allocation6 + $0x278] sm:$0xff] }
 0x12b   :  { %8629 = vst [vmem:[#allocation92_spill] sm:$0xff] %v5226_v34  ;;  %1033 = vmatpush.msrb.mxu2 %v5237_v24  ;;  %v5254_v34 = vld [vmem:[#allocation6 + $0x1e0] sm:$0xff] }
 0x12c   :  { %8630 = vst [vmem:[#allocation93_spill] sm:$0xff] %v5228_v38  ;;  %1148 = vmatpush.msra.mxu0 %v5254_v34  ;;  %v5258_v38 = vld [vmem:[#allocation6 + $0x1e8] sm:$0xff] }
 0x12d   :  { %1791 = vst [vmem:[#allocation1] ss:$2 sm:$0xff] %v4676_v26  ;;  %v5245_v26 = vld [vmem:[#allocation6 + $0x258] sm:$0xff]  ;;  %1208 = vmatpush.msra.mxu3 %v5258_v38 }
 0x12e   :  { %8631 = vst [vmem:[#allocation94_spill] sm:$0xff] %v5233_v11  ;;  %1034 = vmatpush.msrb.mxu2 %v5245_v26  ;;  %1149 = vmatpush.msra.mxu0 %v5270_v25 }
 0x12f   :  { %8632 = vst [vmem:[#allocation95_spill] sm:$0xff] %v5254_v34  ;;  %v5275_v34 = vld [vmem:[#allocation6 + $0x1c8] sm:$0xff] }
 0x130   :  { %8633 = vst [vmem:[#allocation96_spill] sm:$0xff] %v5258_v38  ;;  %1035 = vmatpush.msrb.mxu2 %v5252_v10  ;;  %1209 = vmatpush.msra.mxu3 %v5275_v34 }
 0x131   :  { %8636 = vst [vmem:[#allocation99_spill] sm:$0xff] %v5267_v53  ;;  %v5285_v53 = vld [vmem:[#allocation6 + $0x1a8] sm:$0xff] }
 0x132   :  { %8637 = vst [vmem:[#allocation100_spill] sm:$0xff] %v5270_v25  ;;  %1036 = vmatpush.msrb.mxu2 %v5265_v23  ;;  %1210 = vmatpush.msra.mxu3 %v5285_v53 }
 0x133   :  { %8638 = vst [vmem:[#allocation101_spill] sm:$0xff] %v5275_v34  ;;  %3499 = vmatmul.msk.f32.vlgmr.msrb.gmra.mxu2 %vm5004_vm12, %v5001_v54  ;;  %v5294_v34 = vld [vmem:[#allocation6 + $0x5e0] sm:$0xff] }
 0x134   :  { %v5261_v11 = vld.sshfl [vmem:[#allocation1] sm:$0xff pattern:$0x75316420]  ;;  %v5263_v62 = vld.sshfl [vmem:[#allocation1 + $0x8] sm:$0xff pattern:$0x75316420]  ;;  %1188 = vmatpush.msra.mxu2 %v5294_v34 }
 0x135   :  { %8634 = vst [vmem:[#allocation97_spill] sm:$0xff] %v5261_v11  ;;  %v5278_v11 = vld [vmem:[#allocation6 + $0x3c0] sm:$0xff] }
 0x136   :  { %8635 = vst [vmem:[#allocation98_spill] sm:$0xff] %v5263_v62  ;;  %1169 = vmatpush.msra.mxu1 %v5278_v11  ;;  %v5281_v62 = vld [vmem:[#allocation6 + $0x1a0] sm:$0xff] }
 0x137   :  { %2118 = vst [vmem:[#allocation1] ss:$2 sm:$0xff] %v4681_v32  ;;  %1150 = vmatpush.msra.mxu0 %v5281_v62  ;;  %v5291_v32 = vld [vmem:[#allocation6 + $0x3a0] sm:$0xff] }
 0x138   :  { %8639 = vst [vmem:[#allocation102_spill] sm:$0xff] %v5278_v11  ;;  %1170 = vmatpush.msra.mxu1 %v5291_v32  ;;  %v5297_v11 = vld [vmem:[#allocation6 + $0x180] sm:$0xff] }
 0x139   :  { %8640 = vst [vmem:[#allocation103_spill] sm:$0xff] %v5281_v62  ;;  %1151 = vmatpush.msra.mxu0 %v5297_v11  ;;  %v5300_v62 = vld [vmem:[#allocation6 + $0x188] sm:$0xff]  ;;  %v5306_v54 = vld [vmem:[#allocation6 + $0x5c0] sm:$0xff] }
 0x13a   :  { %8641 = vst [vmem:[#allocation104_spill] sm:$0xff] %v5285_v53  ;;  %1211 = vmatpush.msra.mxu3 %v5300_v62  ;;  %v5303_v53 = vld [vmem:[#allocation6 + $0x380] sm:$0xff]  ;;  %1189 = vmatpush.msra.mxu2 %v5306_v54 }
 0x13b   :  { %8642 = vst [vmem:[#allocation105_spill] sm:$0xff] %v5291_v32  ;;  %1171 = vmatpush.msra.mxu1 %v5303_v53  ;;  %v5309_v32 = vld [vmem:[#allocation6 + $0x160] sm:$0xff] }
 0x13c   :  { %8643 = vst [vmem:[#allocation106_spill] sm:$0xff] %v5297_v11  ;;  %1152 = vmatpush.msra.mxu0 %v5309_v32  ;;  %v5316_v11 = vld [vmem:[#allocation6 + $0x168] sm:$0xff] }
 0x13d   :  { %8644 = vst [vmem:[#allocation107_spill] sm:$0xff] %v5300_v62  ;;  %1212 = vmatpush.msra.mxu3 %v5316_v11  ;;  %v5319_v62 = vld [vmem:[#allocation6 + $0x360] sm:$0xff] }
 0x13e   :  { %8645 = vst [vmem:[#allocation108_spill] sm:$0xff] %v5303_v53  ;;  %v5312_v25 = vld.sshfl [vmem:[#allocation1] sm:$0xff pattern:$0x75316420]  ;;  %1172 = vmatpush.msra.mxu1 %v5319_v62  ;;  %v5323_v53 = vld [vmem:[#allocation6 + $0x5a0] sm:$0xff] }
 0x13f   :  { %8646 = vst [vmem:[#allocation109_spill] sm:$0xff] %v5306_v54  ;;  %v5314_v38 = vld.sshfl [vmem:[#allocation1 + $0x8] sm:$0xff pattern:$0x75316420]  ;;  %1190 = vmatpush.msra.mxu2 %v5323_v53 }
 0x140   :  { %8647 = vst [vmem:[#allocation110_spill] sm:$0xff] %v5309_v32  ;;  %v5326_v54 = vld [vmem:[#allocation6 + $0x140] sm:$0xff]  ;;  %v5353_v32 = vld [vmem:[#allocation6 + $0x108] sm:$0xff] }
 0x141   :  { %8648 = vst [vmem:[#allocation111_spill] sm:$0xff] %v5312_v25  ;;  %1153 = vmatpush.msra.mxu0 %v5326_v54  ;;  %v5329_v25 = vld [vmem:[#allocation6 + $0x148] sm:$0xff] }
 0x142   :  { %8649 = vst [vmem:[#allocation112_spill] sm:$0xff] %v5314_v38  ;;  %1213 = vmatpush.msra.mxu3 %v5329_v25  ;;  %v5332_v38 = vld [vmem:[#allocation6 + $0x340] sm:$0xff] }
 0x143   :  { %8650 = vst [vmem:[#allocation113_spill] sm:$0xff] %v5316_v11  ;;  %1173 = vmatpush.msra.mxu1 %v5332_v38  ;;  %v5335_v11 = vld [vmem:[#allocation6 + $0x580] sm:$0xff] }
 0x144   :  { %8651 = vst [vmem:[#allocation114_spill] sm:$0xff] %v5319_v62  ;;  %1191 = vmatpush.msra.mxu2 %v5335_v11  ;;  %v5341_v62 = vld [vmem:[#allocation6 + $0x128] sm:$0xff] }
 0x145   :  { %2445 = vst [vmem:[#allocation1] ss:$2 sm:$0xff] %v4684_v33  ;;  %v5338_v33 = vld [vmem:[#allocation6 + $0x120] sm:$0xff]  ;;  %1214 = vmatpush.msra.mxu3 %v5341_v62 }
 0x146   :  { %8652 = vst [vmem:[#allocation115_spill] sm:$0xff] %v5326_v54  ;;  %1154 = vmatpush.msra.mxu0 %v5338_v33  ;;  %v5344_v54 = vld [vmem:[#allocation6 + $0x320] sm:$0xff] }
 0x147   :  { %8653 = vst [vmem:[#allocation116_spill] sm:$0xff] %v5329_v25  ;;  %1174 = vmatpush.msra.mxu1 %v5344_v54  ;;  %v5347_v25 = vld [vmem:[#allocation6 + $0x560] sm:$0xff]  ;;  %1215 = vmatpush.msra.mxu3 %v5353_v32 }
 0x148   :  { %8654 = vst [vmem:[#allocation117_spill] sm:$0xff] %v5332_v38  ;;  %1192 = vmatpush.msra.mxu2 %v5347_v25  ;;  %v5350_v38 = vld [vmem:[#allocation6 + $0x100] sm:$0xff] }
 0x149   :  { %8655 = vst [vmem:[#allocation118_spill] sm:$0xff] %v5335_v11  ;;  %1155 = vmatpush.msra.mxu0 %v5350_v38 }
 0x14a   :  { %8656 = vst [vmem:[#allocation119_spill] sm:$0xff] %v5338_v33  ;;  %v5356_v33 = vld [vmem:[#allocation6 + $0x300] sm:$0xff] }
 0x14b   :  { %8657 = vst [vmem:[#allocation120_spill] sm:$0xff] %v5341_v62  ;;  %1175 = vmatpush.msra.mxu1 %v5356_v33  ;;  %v5359_v62 = vld [vmem:[#allocation6 + $0x540] sm:$0xff] }
 0x14c   :  { %8658 = vst [vmem:[#allocation121_spill] sm:$0xff] %v5344_v54  ;;  %1193 = vmatpush.msra.mxu2 %v5359_v62  ;;  %v5362_v54 = vld [vmem:[#allocation6 + $0xe0] sm:$0xff] }
 0x14d   :  { %8659 = vst [vmem:[#allocation122_spill] sm:$0xff] %v5347_v25  ;;  %1156 = vmatpush.msra.mxu0 %v5362_v54  ;;  %v5365_v25 = vld.sshfl [vmem:[#allocation1] sm:$0xff pattern:$0x75316420] }
 0x14e   :  { %8660 = vst [vmem:[#allocation123_spill] sm:$0xff] %v5350_v38  ;;  %v5367_v11 = vld.sshfl [vmem:[#allocation1 + $0x8] sm:$0xff pattern:$0x75316420]  ;;  %v5369_v38 = vld [vmem:[#allocation6 + $0xe8] sm:$0xff] }
 0x14f   :  { %8661 = vst [vmem:[#allocation124_spill] sm:$0xff] %v5353_v32  ;;  %1216 = vmatpush.msra.mxu3 %v5369_v38  ;;  %v5372_v32 = vld [vmem:[#allocation6 + $0x2e0] sm:$0xff] }
 0x150   :  { %8662 = vst [vmem:[#allocation125_spill] sm:$0xff] %v5356_v33  ;;  %1176 = vmatpush.msra.mxu1 %v5372_v32  ;;  %v5376_v33 = vld [vmem:[#allocation6 + $0x520] sm:$0xff] }
 0x151   :  { %8663 = vst [vmem:[#allocation126_spill] sm:$0xff] %v5359_v62  ;;  %1194 = vmatpush.msra.mxu2 %v5376_v33  ;;  %v5379_v62 = vld [vmem:[#allocation6 + $0xc0] sm:$0xff] }
 0x152   :  { %8664 = vst [vmem:[#allocation127_spill] sm:$0xff] %v5362_v54  ;;  %1157 = vmatpush.msra.mxu0 %v5379_v62  ;;  %v5406_v54 = vld [vmem:[#allocation6 + $0x88] sm:$0xff] }
 0x153   :  { %8665 = vst [vmem:[#allocation128_spill] sm:$0xff] %v5365_v25  ;;  %v5382_v25 = vld [vmem:[#allocation6 + $0xc8] sm:$0xff] }
 0x154   :  { %8666 = vst [vmem:[#allocation129_spill] sm:$0xff] %v5367_v11  ;;  %1217 = vmatpush.msra.mxu3 %v5382_v25  ;;  %v5385_v11 = vld [vmem:[#allocation6 + $0x2c0] sm:$0xff] }
 0x155   :  { %8667 = vst [vmem:[#allocation130_spill] sm:$0xff] %v5369_v38  ;;  %1177 = vmatpush.msra.mxu1 %v5385_v11  ;;  %v5388_v38 = vld [vmem:[#allocation6 + $0x500] sm:$0xff] }
 0x156   :  { %8668 = vst [vmem:[#allocation131_spill] sm:$0xff] %v5372_v32  ;;  %1195 = vmatpush.msra.mxu2 %v5388_v38  ;;  %v5394_v32 = vld [vmem:[#allocation6 + $0xa8] sm:$0xff] }
 0x157   :  { %2772 = vst [vmem:[#allocation1] ss:$2 sm:$0xff] %v4696_v43  ;;  %v5391_v43 = vld [vmem:[#allocation6 + $0xa0] sm:$0xff]  ;;  %1218 = vmatpush.msra.mxu3 %v5394_v32 }
 0x158   :  { %8669 = vst [vmem:[#allocation132_spill] sm:$0xff] %v5379_v62  ;;  %1158 = vmatpush.msra.mxu0 %v5391_v43  ;;  %v5397_v62 = vld [vmem:[#allocation6 + $0x2a0] sm:$0xff] }
 0x159   :  { %8670 = vst [vmem:[#allocation133_spill] sm:$0xff] %v5382_v25  ;;  %1178 = vmatpush.msra.mxu1 %v5397_v62  ;;  %v5400_v25 = vld [vmem:[#allocation6 + $0x4e0] sm:$0xff]  ;;  %1219 = vmatpush.msra.mxu3 %v5406_v54 }
 0x15a   :  { %8671 = vst [vmem:[#allocation134_spill] sm:$0xff] %v5385_v11  ;;  %1196 = vmatpush.msra.mxu2 %v5400_v25  ;;  %v5403_v11 = vld [vmem:[#allocation6 + $0x80] sm:$0xff] }
 0x15b   :  { %8672 = vst [vmem:[#allocation135_spill] sm:$0xff] %v5391_v43  ;;  %1159 = vmatpush.msra.mxu0 %v5403_v11  ;;  %v5409_v43 = vld [vmem:[#allocation6 + $0x280] sm:$0xff] }
 0x15c   :  { %8673 = vst [vmem:[#allocation136_spill] sm:$0xff] %v5394_v32  ;;  %1179 = vmatpush.msra.mxu1 %v5409_v43  ;;  %v5412_v32 = vld [vmem:[#allocation6 + $0x4c0] sm:$0xff] }
 0x15d   :  { %8674 = vst [vmem:[#allocation137_spill] sm:$0xff] %v5397_v62  ;;  %1197 = vmatpush.msra.mxu2 %v5412_v32  ;;  %v5415_v62 = vld [vmem:[#allocation6 + $0x60] sm:$0xff] }
 0x15e   :  { %8675 = vst [vmem:[#allocation138_spill] sm:$0xff] %v5400_v25  ;;  %1160 = vmatpush.msra.mxu0 %v5415_v62  ;;  %v5418_v25 = vld [vmem:[#allocation6 + $0x68] sm:$0xff] }
 0x15f   :  { %8676 = vst [vmem:[#allocation139_spill] sm:$0xff] %v5403_v11  ;;  %1220 = vmatpush.msra.mxu3 %v5418_v25  ;;  %v5421_v11 = vld [vmem:[#allocation6 + $0x260] sm:$0xff] }
 0x160   :  { %8677 = vst [vmem:[#allocation140_spill] sm:$0xff] %v5406_v54  ;;  %1180 = vmatpush.msra.mxu1 %v5421_v11  ;;  %v5424_v54 = vld [vmem:[#allocation6 + $0x4a0] sm:$0xff] }
 0x161   :  { %8678 = vst [vmem:[#allocation141_spill] sm:$0xff] %v5409_v43  ;;  %1198 = vmatpush.msra.mxu2 %v5424_v54  ;;  %v5427_v43 = vld [vmem:[#allocation6 + $0x40] sm:$0xff] }
 0x162   :  { %8679 = vst [vmem:[#allocation142_spill] sm:$0xff] %v5412_v32  ;;  %1161 = vmatpush.msra.mxu0 %v5427_v43  ;;  %v5430_v32 = vld [vmem:[#allocation6 + $0x48] sm:$0xff] }
 0x163   :  { %8680 = vst [vmem:[#allocation143_spill] sm:$0xff] %v5415_v62  ;;  %1221 = vmatpush.msra.mxu3 %v5430_v32  ;;  %v5433_v62 = vld [vmem:[#allocation6 + $0x240] sm:$0xff] }
 0x164   :  { %8681 = vst [vmem:[#allocation144_spill] sm:$0xff] %v5418_v25  ;;  %1181 = vmatpush.msra.mxu1 %v5433_v62  ;;  %v5436_v25 = vld [vmem:[#allocation6 + $0x480] sm:$0xff] }
 0x165   :  { %8682 = vst [vmem:[#allocation145_spill] sm:$0xff] %v5421_v11  ;;  %1199 = vmatpush.msra.mxu2 %v5436_v25  ;;  %v5439_v11 = vld [vmem:[#allocation6 + $0x20] sm:$0xff] }
 0x166   :  { %8683 = vst [vmem:[#allocation146_spill] sm:$0xff] %v5424_v54  ;;  %1162 = vmatpush.msra.mxu0 %v5439_v11  ;;  %v5442_v54 = vld [vmem:[#allocation6 + $0x28] sm:$0xff] }
 0x167   :  { %8684 = vst [vmem:[#allocation147_spill] sm:$0xff] %v5427_v43  ;;  %1222 = vmatpush.msra.mxu3 %v5442_v54  ;;  %v5445_v43 = vld [vmem:[#allocation6 + $0x220] sm:$0xff] }
 0x168   :  { %8685 = vst [vmem:[#allocation148_spill] sm:$0xff] %v5430_v32  ;;  %1182 = vmatpush.msra.mxu1 %v5445_v43  ;;  %v5448_v32 = vld [vmem:[#allocation6 + $0x460] sm:$0xff] }
 0x169   :  { %8686 = vst [vmem:[#allocation149_spill] sm:$0xff] %v5433_v62  ;;  %1200 = vmatpush.msra.mxu2 %v5448_v32  ;;  %v5451_v62 = vld [vmem:[#allocation6] sm:$0xff] }
 0x16a   :  { %8687 = vst [vmem:[#allocation150_spill] sm:$0xff] %v5436_v25  ;;  %1163 = vmatpush.msra.mxu0 %v5451_v62  ;;  %v5454_v25 = vld [vmem:[#allocation6 + $0x8] sm:$0xff] }
 0x16b   :  { %8688 = vst [vmem:[#allocation151_spill] sm:$0xff] %v5439_v11  ;;  %1223 = vmatpush.msra.mxu3 %v5454_v25  ;;  %v5457_v11 = vld [vmem:[#allocation6 + $0x200] sm:$0xff] }
 0x16c   :  { %8689 = vst [vmem:[#allocation152_spill] sm:$0xff] %v5442_v54  ;;  %1183 = vmatpush.msra.mxu1 %v5457_v11  ;;  %v5460_v54 = vld [vmem:[#allocation6 + $0x440] sm:$0xff] }
 0x16d   :  { %8690 = vst [vmem:[#allocation153_spill] sm:$0xff] %v5445_v43  ;;  %1201 = vmatpush.msra.mxu2 %v5460_v54  ;;  %v5463_v43 = vld [vmem:[#allocation6 + $0x3e8] sm:$0xff] }
 0x16e   :  { %8691 = vst [vmem:[#allocation154_spill] sm:$0xff] %v5448_v32  ;;  %1228 = vmatpush.msrb.mxu0 %v5463_v43  ;;  %v5466_v32 = vld [vmem:[#allocation6 + $0x3f0] sm:$0xff] }
 0x16f   :  { %8692 = vst [vmem:[#allocation155_spill] sm:$0xff] %v5451_v62  ;;  %1288 = vmatpush.msrb.mxu3 %v5466_v32  ;;  %v5469_v62 = vld [vmem:[#allocation6 + $0x5e8] sm:$0xff] }
 0x170   :  { %8693 = vst [vmem:[#allocation156_spill] sm:$0xff] %v5454_v25  ;;  %1248 = vmatpush.msrb.mxu1 %v5469_v62  ;;  %v5472_v25 = vld [vmem:[#allocation6 + $0x420] sm:$0xff] }
 0x171   :  { %8694 = vst [vmem:[#allocation157_spill] sm:$0xff] %v5457_v11  ;;  %1202 = vmatpush.msra.mxu2 %v5472_v25  ;;  %v5475_v11 = vld [vmem:[#allocation6 + $0x3c8] sm:$0xff] }
 0x172   :  { %8695 = vst [vmem:[#allocation158_spill] sm:$0xff] %v5460_v54  ;;  %1229 = vmatpush.msrb.mxu0 %v5475_v11  ;;  %v5478_v54 = vld [vmem:[#allocation6 + $0x3d0] sm:$0xff] }
 0x173   :  { %8696 = vst [vmem:[#allocation159_spill] sm:$0xff] %v5463_v43  ;;  %1289 = vmatpush.msrb.mxu3 %v5478_v54  ;;  %v5481_v43 = vld [vmem:[#allocation6 + $0x5c8] sm:$0xff] }
 0x174   :  { %8697 = vst [vmem:[#allocation160_spill] sm:$0xff] %v5466_v32  ;;  %1249 = vmatpush.msrb.mxu1 %v5481_v43  ;;  %v5484_v32 = vld [vmem:[#allocation6 + $0x400] sm:$0xff] }
 0x175   :  { %8698 = vst [vmem:[#allocation161_spill] sm:$0xff] %v5469_v62  ;;  %1203 = vmatpush.msra.mxu2 %v5484_v32  ;;  %v5487_v62 = vld [vmem:[#allocation6 + $0x3a8] sm:$0xff] }
 0x176   :  { %8699 = vst [vmem:[#allocation162_spill] sm:$0xff] %v5472_v25  ;;  %1230 = vmatpush.msrb.mxu0 %v5487_v62  ;;  %v5490_v25 = vld [vmem:[#allocation6 + $0x1f0] sm:$0xff] }
 0x177   :  { %8700 = vst [vmem:[#allocation163_spill] sm:$0xff] %v5475_v11  ;;  %1268 = vmatpush.msrb.mxu2 %v5490_v25  ;;  %v5493_v11 = vld [vmem:[#allocation6 + $0x3b0] sm:$0xff] }
 0x178   :  { %8701 = vst [vmem:[#allocation164_spill] sm:$0xff] %v5478_v54  ;;  %1290 = vmatpush.msrb.mxu3 %v5493_v11  ;;  %v5496_v54 = vld [vmem:[#allocation6 + $0x5a8] sm:$0xff] }
 0x179   :  { %8702 = vst [vmem:[#allocation165_spill] sm:$0xff] %v5481_v43  ;;  %1250 = vmatpush.msrb.mxu1 %v5496_v54  ;;  %v5499_v43 = vld [vmem:[#allocation6 + $0x388] sm:$0xff]  ;;  %1269 = vmatpush.msrb.mxu2 %v4708_v58 }
 0x17a   :  { %8703 = vst [vmem:[#allocation166_spill] sm:$0xff] %v5484_v32  ;;  %1231 = vmatpush.msrb.mxu0 %v5499_v43  ;;  %v5503_v32 = vld [vmem:[#allocation6 + $0x390] sm:$0xff]  ;;  %v8709_v58 = vld [vmem:[#allocation16_spill] sm:$0xff] }
 0x17b   :  { %8704 = vst [vmem:[#allocation167_spill] sm:$0xff] %v5487_v62  ;;  %1291 = vmatpush.msrb.mxu3 %v5503_v32  ;;  %v5506_v62 = vld [vmem:[#allocation6 + $0x588] sm:$0xff]  ;;  %1270 = vmatpush.msrb.mxu2 %v4721_v52  ;;  %v8713_v52 = vld [vmem:[#allocation19_spill] sm:$0xff] }
 0x17c   :  { %8705 = vst [vmem:[#allocation168_spill] sm:$0xff] %v5490_v25  ;;  %1251 = vmatpush.msrb.mxu1 %v5506_v62  ;;  %v5509_v25 = vld [vmem:[#allocation6 + $0x368] sm:$0xff] }
 0x17d   :  { %8706 = vst [vmem:[#allocation169_spill] sm:$0xff] %v5496_v54  ;;  %1232 = vmatpush.msrb.mxu0 %v5509_v25  ;;  %v5513_v54 = vld [vmem:[#allocation6 + $0x370] sm:$0xff]  ;;  %1271 = vmatpush.msrb.mxu2 %v4742_v63  ;;  %v8717_v63 = vld [vmem:[#allocation23_spill] sm:$0xff] }
 0x17e   :  { %8707 = vst [vmem:[#allocation170_spill] sm:$0xff] %v5499_v43  ;;  %1292 = vmatpush.msrb.mxu3 %v5513_v54  ;;  %v5516_v43 = vld [vmem:[#allocation6 + $0x568] sm:$0xff] }
 0x17f   :  { %8708 = vst [vmem:[#allocation171_spill] sm:$0xff] %v5516_v43  ;;  %1252 = vmatpush.msrb.mxu1 %v5516_v43  ;;  %1233 = vmatpush.msrb.mxu0 %v4710_v46  ;;  %v8710_v46 = vld [vmem:[#allocation22_spill] sm:$0xff] }
 0x180   :  { %1293 = vmatpush.msrb.mxu3 %v4716_v49  ;;  %1272 = vmatpush.msrb.mxu2 %v4762_v12  ;;  %v8711_v49 = vld [vmem:[#allocation17_spill] sm:$0xff] }
 0x181   :  { %1253 = vmatpush.msrb.mxu1 %v4718_v37  ;;  %1234 = vmatpush.msrb.mxu0 %v4723_v51  ;;  %v8712_v37 = vld [vmem:[#allocation18_spill] sm:$0xff]  ;;  %v8714_v51 = vld [vmem:[#allocation28_spill] sm:$0xff]  ;;  %v8721_v12 = vld [vmem:[#allocation29_spill] sm:$0xff] }
 0x182   :  { %1294 = vmatpush.msrb.mxu3 %v4731_v48  ;;  %1273 = vmatpush.msrb.mxu2 %v4781_v27  ;;  %v8715_v48 = vld [vmem:[#allocation20_spill] sm:$0xff]  ;;  %v8725_v27 = vld [vmem:[#allocation33_spill] sm:$0xff] }
 0x183   :  { %1254 = vmatpush.msrb.mxu1 %v4733_v56  ;;  %1235 = vmatpush.msrb.mxu0 %v4749_v4  ;;  %v8716_v56 = vld [vmem:[#allocation21_spill] sm:$0xff]  ;;  %v8718_v4 = vld [vmem:[#allocation32_spill] sm:$0xff] }
 0x184   :  { %1295 = vmatpush.msrb.mxu3 %v4755_v8  ;;  %1274 = vmatpush.msrb.mxu2 %v4793_v35  ;;  %v8719_v8 = vld [vmem:[#allocation26_spill] sm:$0xff]  ;;  %v8729_v35 = vld [vmem:[#allocation37_spill] sm:$0xff] }
 0x185   :  { %1255 = vmatpush.msrb.mxu1 %v4757_v9  ;;  %1236 = vmatpush.msrb.mxu0 %v4764_v13  ;;  %v8720_v9 = vld [vmem:[#allocation27_spill] sm:$0xff]  ;;  %v8722_v13 = vld [vmem:[#allocation36_spill] sm:$0xff] }
 0x186   :  { %1296 = vmatpush.msrb.mxu3 %v4771_v18  ;;  %1275 = vmatpush.msrb.mxu2 %v4815_v0  ;;  %v8723_v18 = vld [vmem:[#allocation30_spill] sm:$0xff]  ;;  %v8730_v0 = vld [vmem:[#allocation45_spill] sm:$0xff] }
 0x187   :  { %1256 = vmatpush.msrb.mxu1 %v4773_v20  ;;  %1237 = vmatpush.msrb.mxu0 %v4783_v28  ;;  %v8724_v20 = vld [vmem:[#allocation31_spill] sm:$0xff]  ;;  %v8726_v28 = vld [vmem:[#allocation44_spill] sm:$0xff] }
 0x188   :  { %1297 = vmatpush.msrb.mxu3 %v4787_v31  ;;  %1276 = vmatpush.msrb.mxu2 %v8710_v46  ;;  %v8727_v31 = vld [vmem:[#allocation34_spill] sm:$0xff]  ;;  %v8732_v46 = vld [vmem:[#allocation43_spill] sm:$0xff] }
 0x189   :  { %1257 = vmatpush.msrb.mxu1 %v4789_v29  ;;  %1238 = vmatpush.msrb.mxu0 %v8709_v58  ;;  %v8728_v29 = vld [vmem:[#allocation35_spill] sm:$0xff]  ;;  %v8731_v58 = vld [vmem:[#allocation38_spill] sm:$0xff] }
 0x18a   :  { %1298 = vmatpush.msrb.mxu3 %v8711_v49  ;;  %1277 = vmatpush.msrb.mxu2 %v8714_v51  ;;  %v8733_v49 = vld [vmem:[#allocation46_spill] sm:$0xff]  ;;  %v858_v51 = vpop.f32.mrf.mxu1 }
 0x18b   :  { %1258 = vmatpush.msrb.mxu1 %v8712_v37  ;;  %1239 = vmatpush.msrb.mxu0 %v8713_v52  ;;  %v8734_v37 = vld [vmem:[#allocation47_spill] sm:$0xff]  ;;  %v838_v52 = vpop.f32.mrf.mxu0 }
 0x18c   :  { %1299 = vmatpush.msrb.mxu3 %v8715_v48  ;;  %1278 = vmatpush.msrb.mxu2 %v8718_v4  ;;  %v898_v48 = vpop.f32.mrf.mxu3 }
 0x18d   :  { %1259 = vmatpush.msrb.mxu1 %v8716_v56  ;;  %1240 = vmatpush.msrb.mxu0 %v8717_v63  ;;  %v899_v56 = vadd.f32 %v898_v48, %v5117_v39  ;;  %v839_v63 = vadd.f32 %v838_v52, %v5115_v14  ;;  %v8735_v39 = vld [vmem:[#allocation24_spill] sm:$0xff] }
 0x18e   :  { %1300 = vmatpush.msrb.mxu3 %v8719_v8  ;;  %1279 = vmatpush.msrb.mxu2 %v8722_v13 }
 0x18f   :  { %1260 = vmatpush.msrb.mxu1 %v8720_v9  ;;  %1241 = vmatpush.msrb.mxu0 %v8721_v12  ;;  %v859_v12 = vadd.f32 %v858_v51, %v839_v63 }
 0x190   :  { %1301 = vmatpush.msrb.mxu3 %v8723_v18  ;;  %1280 = vmatpush.msrb.mxu2 %v8726_v28  ;;  %v878_v18 = vpop.f32.mrf.mxu2 }
 0x191   :  { %1261 = vmatpush.msrb.mxu1 %v8724_v20  ;;  %1242 = vmatpush.msrb.mxu0 %v8725_v27  ;;  %v879_v27 = vadd.f32 %v878_v18, %v859_v12 }
 0x192   :  { %1302 = vmatpush.msrb.mxu3 %v8727_v31  ;;  %1281 = vmatpush.msrb.mxu2 %v8730_v0  ;;  %v938_v9 = vpop.f32.mrf.mxu1 }
 0x193   :  { %1262 = vmatpush.msrb.mxu1 %v8728_v29  ;;  %1243 = vmatpush.msrb.mxu0 %v8729_v35  ;;  %v918_v4 = vpop.f32.mrf.mxu0  ;;  %v3502_v28 = vmul.f32 -1.442695, %v879_v27  ;;  %v8736_v27 = vld [vmem:[#allocation25_spill] sm:$0xff] }
 0x194   :  { %1303 = vmatpush.msrb.mxu3 %v8731_v58  ;;  %1282 = vmatpush.msrb.mxu2 %v8733_v49  ;;  %v919_v8 = vadd.f32 %v918_v4, %v899_v56  ;;  %v978_v14 = vpop.f32.mrf.mxu3 }
 0x195   :  { %1263 = vmatpush.msrb.mxu1 %v8732_v46 }
 0x196   :  { %1283 = vmatpush.msrb.mxu2 %v8734_v37  ;;  %v939_v13 = vadd.f32 %v938_v9, %v919_v8 }
 0x198   :  { %v3503_v20 = vmul.f32 -1.442695, %v939_v13  ;;  %v958_v0 = vpop.f32.mrf.mxu2 }
 0x199   :  { %v959_v46 = vadd.f32 %v958_v0, %v8735_v39 }
 0x19a   :  { %3664 = vpow2.f32 %v3503_v20 }
 0x19b   :  { %3666 = vpow2.f32 %v3502_v28  ;;  %v979_v49 = vadd.f32 %v978_v14, %v959_v46 }
 0x1a0   :  { %v3665_v31 = vpop.eup %3664 }
 0x1a1   :  { %v3667_v29 = vpop.eup %3666  ;;  %v1071_v35 = vadd.f32 1.0, %v3665_v31 }
 0x1a2   :  { %v1070_v58 = vadd.f32 1.0, %v3667_v29 }
 0x1a3   :  { %3668 = vrcp.f32 %v1071_v35  ;;  %v998_v37 = vpop.f32.mrf.mxu0  ;;  %v1099_v14 = vand.u32 2147483648, %v1071_v35  ;;  %vm1093_vm14 = vweird.f32 %v1071_v35 }
 0x1a4   :  { %3670 = vrcp.f32 %v1070_v58  ;;  %v999_v51 = vadd.f32 %v998_v37, %v979_v49  ;;  %v1097_v37 = vand.u32 2147483647, %v1071_v35  ;;  %vm1078_vm1 = vweird.f32 %v1070_v58 }
 0x1a5   :  { %v1018_v12 = vpop.f32.mrf.mxu1 }
 0x1a6   :  { %v3504_v56 = vmul.f32 -1.442695, %v999_v51  ;;  %v1019_v28 = vadd.f32 %v1018_v12, %v8736_v27  ;;  %vm1098_vm5 = vcmp.eq.f32.partialorder %v1097_v37, 8.507059e+37 }
 0x1a8   :  { %3672 = vpow2.f32 %v3504_v56  ;;  %v1084_v56 = vand.u32 2147483648, %v1070_v58 }
 0x1a9   :  { %v3669_v52 = vpop.eup %3668 }
 0x1aa   :  { %v3671_v48 = vpop.eup %3670  ;;  %v1089_v63 = vmul.f32 %v3669_v52, %v1071_v35  ;;  %vm1094_vm13 = vweird.f32 %v3669_v52  ;;  %v1058_v46 = vpop.f32.mrf.mxu3  ;;  %v1085_v27 = vor.u32 1.1754944e-38, %v1084_v56 }
 0x1ab   :  { %v1074_v4 = vmul.f32 %v3671_v48, %v1070_v58  ;;  %vm1079_vm15 = vweird.f32 %v3671_v48  ;;  %vm1095_vm0 = vmor %vm1093_vm14, %vm1094_vm13 }
 0x1ac   :  { %v1090_v8 = vsub.f32 1.0, %v1089_v63  ;;  %vm1080_vm4 = vmor %vm1078_vm1, %vm1079_vm15 }
 0x1ad   :  { %v1075_v9 = vsub.f32 1.0, %v1074_v4  ;;  %v1082_v4 = vand.u32 2147483647, %v1070_v58 }
 0x1ae   :  { %v3673_v13 = vpop.eup %3672  ;;  %v1091_v18 = vmul.f32 %v3669_v52, %v1090_v8 }
 0x1af   :  { %v1072_v20 = vadd.f32 1.0, %v3673_v13  ;;  %v1076_v31 = vmul.f32 %v3671_v48, %v1075_v9  ;;  %v1100_v9 = vor.u32 1.1754944e-38, %v1099_v14  ;;  %vm1083_vm6 = vcmp.eq.f32.partialorder %v1082_v4, 8.507059e+37  ;;  %v8758_v4 = vld [vmem:[#allocation72_spill] sm:$0xff] }
 0x1b0   :  { %v1092_v39 = vadd.f32 %v3669_v52, %v1091_v18 }
 0x1b1   :  { %3674 = vrcp.f32 %v1072_v20  ;;  %v1077_v51 = vadd.f32 %v3671_v48, %v1076_v31  ;;  %v1114_v58 = vand.u32 2147483648, %v1072_v20  ;;  %vm1108_vm8 = vweird.f32 %v1072_v20 }
 0x1b2   :  { %v1096_v8 = vsel %vm1095_vm0, %v3669_v52, %v1092_v39  ;;  %v1112_v52 = vand.u32 2147483647, %v1072_v20 }
 0x1b3   :  { %v1081_v13 = vsel %vm1080_vm4, %v3671_v48, %v1077_v51  ;;  %v1115_v39 = vor.u32 1.1754944e-38, %v1114_v58  ;;  %v8780_v58 = vld [vmem:[#allocation102_spill] sm:$0xff] }
 0x1b4   :  { %v1086_v31 = vsel %vm1083_vm6, %v1085_v27, %v1081_v13  ;;  %vm1113_vm10 = vcmp.eq.f32.partialorder %v1112_v52, 8.507059e+37  ;;  %v8762_v13 = vld [vmem:[#allocation79_spill] sm:$0xff]  ;;  %v8764_v27 = vld [vmem:[#allocation81_spill] sm:$0xff] }
 0x1b5   :  { %v8781_v52 = vld [vmem:[#allocation103_spill] sm:$0xff] }
 0x1b6   :  { %v1038_v29 = vpop.f32.mrf.mxu2 }
 0x1b7   :  { %v1039_v0 = vadd.f32 %v1038_v29, %v1019_v28  ;;  %v3675_v63 = vpop.eup %3674  ;;  %v1101_v28 = vsel %vm1098_vm5, %v1100_v9, %v1096_v8  ;;  %v8759_v8 = vld [vmem:[#allocation73_spill] sm:$0xff]  ;;  %v8760_v9 = vld [vmem:[#allocation74_spill] sm:$0xff] }
 0x1b8   :  { %v1104_v12 = vmul.f32 %v3675_v63, %v1072_v20  ;;  %vm1109_vm7 = vweird.f32 %v3675_v63  ;;  %v8756_v20 = vld [vmem:[#allocation70_spill] sm:$0xff] }
 0x1b9   :  { %v1059_v49 = vadd.f32 %v1058_v46, %v1039_v0  ;;  %v1119_v0 = vmul.f32 %v1101_v28, %v4964_v21  ;;  %vm1110_vm9 = vmor %vm1108_vm8, %vm1109_vm7  ;;  %v8765_v28 = vld [vmem:[#allocation83_spill] sm:$0xff] }
 0x1ba   :  { %v1105_v18 = vsub.f32 1.0, %v1104_v12  ;;  %v8761_v12 = vld [vmem:[#allocation75_spill] sm:$0xff] }
 0x1bb   :  { %3676 = vtanh.f32 %v1059_v49 }
 0x1bc   :  { %v1106_v35 = vmul.f32 %v3675_v63, %v1105_v18  ;;  %v8763_v18 = vld [vmem:[#allocation80_spill] sm:$0xff] }
 0x1be   :  { %v1107_v43 = vadd.f32 %v3675_v63, %v1106_v35  ;;  %v8768_v35 = vld [vmem:[#allocation87_spill] sm:$0xff] }
 0x1c0   :  { %v1111_v48 = vsel %vm1110_vm9, %v3675_v63, %v1107_v43  ;;  %v8755_v43 = vld [vmem:[#allocation86_spill] sm:$0xff]  ;;  %v8757_v63 = vld [vmem:[#allocation71_spill] sm:$0xff] }
 0x1c1   :  { %v3677_v29 = vpop.eup %3676  ;;  %v1116_v37 = vsel %vm1113_vm10, %v1115_v39, %v1111_v48  ;;  %v8782_v48 = vld [vmem:[#allocation104_spill] sm:$0xff]  ;;  %v8784_v39 = vld [vmem:[#allocation118_spill] sm:$0xff] }
 0x1c2   :  { %v1120_v46 = vmul.f32 %v3677_v29, %v1086_v31  ;;  %v8766_v29 = vld [vmem:[#allocation84_spill] sm:$0xff] }
 0x1c3   :  { %v8771_v31 = vld [vmem:[#allocation92_spill] sm:$0xff] }
 0x1c4   :  { %v5570_v49 = vadd.f32 %v1120_v46, %v1119_v0  ;;  %v8778_v0 = vld [vmem:[#allocation100_spill] sm:$0xff]  ;;  %v8779_v46 = vld [vmem:[#allocation101_spill] sm:$0xff] }
 0x1c6   :  { %3678 = vtanh.f32 %v5570_v49 }
 0x1cc   :  { %v3679_v14 = vpop.eup %3678 }
 0x1cd   :  { %v5573_v51 = vmul.f32 %v3679_v14, %v1116_v37  ;;  %v8785_v14 = vld [vmem:[#allocation106_spill] sm:$0xff]  ;;  %v8786_v37 = vld [vmem:[#allocation107_spill] sm:$0xff] }
 0x1cf   :  { %3509 = vmatmul.msk.f32.vlgmr.msra.gmra.mxu2 %vm5004_vm12, %v5573_v51  ;;  %v5581_v21 = vsel %vm258_vm2, %v5573_v51, %v4984_v57  ;;  %v5584_v56 = vrot.slane %v5573_v51, 6 }
 0x1d0   :  { %1348 = vmatpush.msra.mxu2 %v5058_v59  ;;  %1164 = vmatmul.f32.vlgmr.msra.gmra.mxu0 %v5581_v21  ;;  %v8751_v59 = vld [vmem:[#allocation82_spill] sm:$0xff] }
 0x1d1   :  { %1224 = vmatmul.f32.vlgmr.msra.gmra.mxu3 %v5581_v21  ;;  %1308 = vmatpush.msra.mxu0 %v4989_v2  ;;  %v8737_v2 = vld [vmem:[#allocation66_spill] sm:$0xff] }
 0x1d2   :  { %1368 = vmatpush.msra.mxu3 %v4991_v41  ;;  %3507 = vmatmul.msk.f32.vlgmr.msra.gmra.mxu1 %vm5004_vm12, %v5584_v56  ;;  %v8738_v41 = vld [vmem:[#allocation54_spill] sm:$0xff] }
 0x1d3   :  { %1328 = vmatpush.msra.mxu1 %v5012_v42  ;;  %1349 = vmatpush.msra.mxu2 %v5075_v16  ;;  %v8740_v42 = vld [vmem:[#allocation56_spill] sm:$0xff]  ;;  %v8752_v16 = vld [vmem:[#allocation67_spill] sm:$0xff] }
 0x1d4   :  { %1309 = vmatpush.msra.mxu0 %v5014_v45  ;;  %1369 = vmatpush.msra.mxu3 %v5019_v7  ;;  %v8741_v45 = vld [vmem:[#allocation57_spill] sm:$0xff]  ;;  %v8742_v7 = vld [vmem:[#allocation58_spill] sm:$0xff] }
 0x1d5   :  { %1329 = vmatpush.msra.mxu1 %v5029_v60  ;;  %1350 = vmatpush.msra.mxu2 %v5092_v22  ;;  %v8743_v60 = vld [vmem:[#allocation59_spill] sm:$0xff]  ;;  %v8753_v22 = vld [vmem:[#allocation68_spill] sm:$0xff] }
 0x1d6   :  { %1310 = vmatpush.msra.mxu0 %v5031_v5  ;;  %1370 = vmatpush.msra.mxu3 %v5037_v47  ;;  %v8744_v5 = vld [vmem:[#allocation60_spill] sm:$0xff]  ;;  %v8745_v47 = vld [vmem:[#allocation61_spill] sm:$0xff] }
 0x1d7   :  { %1330 = vmatpush.msra.mxu1 %v5041_v40  ;;  %1351 = vmatpush.msra.mxu2 %v5110_v15  ;;  %v8739_v15 = vld [vmem:[#allocation55_spill] sm:$0xff]  ;;  %v8746_v40 = vld [vmem:[#allocation62_spill] sm:$0xff] }
 0x1d8   :  { %1311 = vmatpush.msra.mxu0 %v5043_v17  ;;  %1371 = vmatpush.msra.mxu3 %v5049_v61  ;;  %v8747_v17 = vld [vmem:[#allocation76_spill] sm:$0xff]  ;;  %v8748_v61 = vld [vmem:[#allocation63_spill] sm:$0xff] }
 0x1d9   :  { %1284 = vmatmul.f32.vlgmr.msrb.gmra.mxu2 %v5581_v21  ;;  %1331 = vmatpush.msra.mxu1 %v5056_v36  ;;  %v8749_v36 = vld [vmem:[#allocation64_spill] sm:$0xff] }
 0x1da   :  { %1352 = vmatpush.msra.mxu2 %v8737_v2  ;;  %3511 = vmatmul.msk.f32.vlgmr.msrb.gmra.mxu0 %vm5004_vm12, %v5584_v56  ;;  %v8790_v2 = vld [vmem:[#allocation113_spill] sm:$0xff] }
 0x1db   :  { %3515 = vmatmul.msk.f32.vlgmr.msrb.gmra.mxu3 %vm5004_vm12, %v5584_v56  ;;  %1312 = vmatpush.msra.mxu0 %v8738_v41  ;;  %v8792_v41 = vld [vmem:[#allocation126_spill] sm:$0xff] }
 0x1dc   :  { %1372 = vmatpush.msra.mxu3 %v8739_v15  ;;  %3513 = vmatmul.msk.f32.vlgmr.msrb.gmra.mxu1 %vm5004_vm12, %v5573_v51  ;;  %v8793_v15 = vld [vmem:[#allocation115_spill] sm:$0xff] }
 0x1dd   :  { %1332 = vmatpush.msra.mxu1 %v8740_v42  ;;  %1353 = vmatpush.msra.mxu2 %v5141_v30  ;;  %v8750_v30 = vld [vmem:[#allocation65_spill] sm:$0xff]  ;;  %v8794_v42 = vld [vmem:[#allocation116_spill] sm:$0xff] }
 0x1de   :  { %1313 = vmatpush.msra.mxu0 %v8741_v45  ;;  %1373 = vmatpush.msra.mxu3 %v8742_v7  ;;  %v8795_v45 = vld [vmem:[#allocation117_spill] sm:$0xff]  ;;  %v8796_v7 = vld [vmem:[#allocation119_spill] sm:$0xff] }
 0x1df   :  { %1333 = vmatpush.msra.mxu1 %v8743_v60  ;;  %1354 = vmatpush.msra.mxu2 %v5153_v3  ;;  %v8754_v3 = vld [vmem:[#allocation69_spill] sm:$0xff]  ;;  %v8797_v60 = vld [vmem:[#allocation120_spill] sm:$0xff] }
 0x1e0   :  { %1314 = vmatpush.msra.mxu0 %v8744_v5  ;;  %1374 = vmatpush.msra.mxu3 %v8745_v47  ;;  %v8798_v5 = vld [vmem:[#allocation121_spill] sm:$0xff]  ;;  %v8799_v47 = vld [vmem:[#allocation123_spill] sm:$0xff] }
 0x1e1   :  { %1334 = vmatpush.msra.mxu1 %v8746_v40  ;;  %1355 = vmatpush.msra.mxu2 %v8747_v17  ;;  %v8800_v40 = vld [vmem:[#allocation124_spill] sm:$0xff]  ;;  %v8801_v17 = vld [vmem:[#allocation125_spill] sm:$0xff] }
 0x1e2   :  { %1315 = vmatpush.msra.mxu0 %v8748_v61  ;;  %1375 = vmatpush.msra.mxu3 %v8749_v36  ;;  %v8802_v61 = vld [vmem:[#allocation138_spill] sm:$0xff]  ;;  %v8803_v36 = vld [vmem:[#allocation127_spill] sm:$0xff] }
 0x1e3   :  { %1335 = vmatpush.msra.mxu1 %v8750_v30  ;;  %1356 = vmatpush.msra.mxu2 %v8751_v59  ;;  %v8804_v30 = vld [vmem:[#allocation130_spill] sm:$0xff] }
 0x1e4   :  { %1316 = vmatpush.msra.mxu0 %v8752_v16  ;;  %1376 = vmatpush.msra.mxu3 %v8753_v22  ;;  %v8806_v59 = vld [vmem:[#allocation142_spill] sm:$0xff]  ;;  %v8807_v16 = vld [vmem:[#allocation132_spill] sm:$0xff]  ;;  %v8808_v22 = vld [vmem:[#allocation133_spill] sm:$0xff] }
 0x1e5   :  { %1336 = vmatpush.msra.mxu1 %v8754_v3  ;;  %1357 = vmatpush.msra.mxu2 %v8755_v43  ;;  %v8810_v3 = vld [vmem:[#allocation146_spill] sm:$0xff]  ;;  %v8811_v43 = vld [vmem:[#allocation135_spill] sm:$0xff] }
 0x1e6   :  { %1317 = vmatpush.msra.mxu0 %v8756_v20  ;;  %1377 = vmatpush.msra.mxu3 %v8757_v63  ;;  %v8812_v20 = vld [vmem:[#allocation136_spill] sm:$0xff]  ;;  %v8813_v63 = vld [vmem:[#allocation137_spill] sm:$0xff] }
 0x1e7   :  { %1337 = vmatpush.msra.mxu1 %v8758_v4  ;;  %1358 = vmatpush.msra.mxu2 %v5206_v55  ;;  %v8767_v55 = vld [vmem:[#allocation85_spill] sm:$0xff]  ;;  %v8814_v4 = vld [vmem:[#allocation150_spill] sm:$0xff] }
 0x1e8   :  { %1318 = vmatpush.msra.mxu0 %v8759_v8  ;;  %1378 = vmatpush.msra.mxu3 %v8760_v9  ;;  %v8815_v8 = vld [vmem:[#allocation139_spill] sm:$0xff]  ;;  %v8816_v9 = vld [vmem:[#allocation140_spill] sm:$0xff] }
 0x1e9   :  { %1338 = vmatpush.msra.mxu1 %v8761_v12  ;;  %1359 = vmatpush.msra.mxu2 %v5216_v50  ;;  %v8769_v50 = vld [vmem:[#allocation88_spill] sm:$0xff]  ;;  %v8817_v12 = vld [vmem:[#allocation141_spill] sm:$0xff] }
 0x1ea   :  { %1319 = vmatpush.msra.mxu0 %v8762_v13  ;;  %1379 = vmatpush.msra.mxu3 %v8763_v18  ;;  %v8818_v13 = vld [vmem:[#allocation154_spill] sm:$0xff]  ;;  %v8819_v18 = vld [vmem:[#allocation143_spill] sm:$0xff] }
 0x1eb   :  { %1339 = vmatpush.msra.mxu1 %v8764_v27  ;;  %1360 = vmatpush.msra.mxu2 %v5237_v24  ;;  %v8770_v24 = vld [vmem:[#allocation89_spill] sm:$0xff]  ;;  %v8820_v27 = vld [vmem:[#allocation144_spill] sm:$0xff] }
 0x1ec   :  { %1320 = vmatpush.msra.mxu0 %v8765_v28  ;;  %1380 = vmatpush.msra.mxu3 %v8766_v29  ;;  %v8821_v28 = vld [vmem:[#allocation145_spill] sm:$0xff]  ;;  %v8822_v29 = vld [vmem:[#allocation158_spill] sm:$0xff] }
 0x1ed   :  { %1340 = vmatpush.msra.mxu1 %v8767_v55  ;;  %1361 = vmatpush.msra.mxu2 %v5245_v26  ;;  %v8772_v26 = vld [vmem:[#allocation93_spill] sm:$0xff]  ;;  %v8823_v55 = vld [vmem:[#allocation147_spill] sm:$0xff] }
 0x1ee   :  { %1321 = vmatpush.msra.mxu0 %v8768_v35  ;;  %1381 = vmatpush.msra.mxu3 %v5200_v44  ;;  %v8773_v44 = vld [vmem:[#allocation94_spill] sm:$0xff]  ;;  %v8824_v35 = vld [vmem:[#allocation148_spill] sm:$0xff] }
 0x1ef   :  { %1341 = vmatpush.msra.mxu1 %v5204_v19  ;;  %1362 = vmatpush.msra.mxu2 %v5252_v10  ;;  %v8774_v10 = vld [vmem:[#allocation95_spill] sm:$0xff]  ;;  %v8775_v19 = vld [vmem:[#allocation96_spill] sm:$0xff] }
 0x1f0   :  { %1322 = vmatpush.msra.mxu0 %v5208_v6  ;;  %1382 = vmatpush.msra.mxu3 %v8769_v50  ;;  %v8777_v6 = vld [vmem:[#allocation109_spill] sm:$0xff] }
 0x1f1   :  { %1342 = vmatpush.msra.mxu1 %v8770_v24  ;;  %1363 = vmatpush.msra.mxu2 %v5265_v23  ;;  %v8776_v23 = vld [vmem:[#allocation99_spill] sm:$0xff]  ;;  %v8825_v50 = vld [vmem:[#allocation149_spill] sm:$0xff]  ;;  %v8826_v24 = vld [vmem:[#allocation162_spill] sm:$0xff] }
 0x1f2   :  { %1323 = vmatpush.msra.mxu0 %v8771_v31  ;;  %3519 = vmatmul.msk.f32.vlgmr.msra.gmra.mxu2 %vm5004_vm12, %v5584_v56  ;;  %v8789_v56 = vld [vmem:[#allocation110_spill] sm:$0xff]  ;;  %v8827_v31 = vld [vmem:[#allocation151_spill] sm:$0xff] }
 0x1f3   :  { %1383 = vmatpush.msra.mxu3 %v8772_v26  ;;  %3517 = vmatmul.msk.f32.vlgmr.msra.gmra.mxu0 %vm5004_vm12, %v5573_v51  ;;  %v8828_v26 = vld [vmem:[#allocation152_spill] sm:$0xff] }
 0x1f4   :  { %1343 = vmatpush.msra.mxu1 %v8773_v44  ;;  %3521 = vmatmul.msk.f32.vlgmr.msra.gmra.mxu3 %vm5004_vm12, %v5573_v51  ;;  %v8787_v51 = vld [vmem:[#allocation108_spill] sm:$0xff]  ;;  %v8829_v44 = vld [vmem:[#allocation153_spill] sm:$0xff] }
 0x1f5   :  { %1344 = vmatmul.f32.vlgmr.msra.gmra.mxu1 %v5581_v21  ;;  %1515 = vmatpush.msrb.mxu2 %v5294_v34  ;;  %v8783_v34 = vld [vmem:[#allocation105_spill] sm:$0xff]  ;;  %v8788_v21 = vld [vmem:[#allocation122_spill] sm:$0xff] }
 0x1f6   :  { %1475 = vmatpush.msrb.mxu0 %v8774_v10  ;;  %1535 = vmatpush.msrb.mxu3 %v8775_v19  ;;  %v8830_v10 = vld [vmem:[#allocation166_spill] sm:$0xff]  ;;  %v8831_v19 = vld [vmem:[#allocation155_spill] sm:$0xff] }
 0x1f7   :  { %1495 = vmatpush.msrb.mxu1 %v8776_v23  ;;  %1516 = vmatpush.msrb.mxu2 %v8777_v6  ;;  %v8832_v23 = vld [vmem:[#allocation156_spill] sm:$0xff] }
 0x1f8   :  { %1476 = vmatpush.msrb.mxu0 %v8778_v0  ;;  %1536 = vmatpush.msrb.mxu3 %v8779_v46  ;;  %v8833_v6 = vld [vmem:[#allocation168_spill] sm:$0xff]  ;;  %v8834_v0 = vld [vmem:[#allocation157_spill] sm:$0xff]  ;;  %v8835_v46 = vld [vmem:[#allocation159_spill] sm:$0xff] }
 0x1f9   :  { %1496 = vmatpush.msrb.mxu1 %v8780_v58  ;;  %1517 = vmatpush.msrb.mxu2 %v5323_v53  ;;  %v8791_v53 = vld [vmem:[#allocation114_spill] sm:$0xff]  ;;  %v8836_v58 = vld [vmem:[#allocation160_spill] sm:$0xff] }
 0x1fa   :  { %1477 = vmatpush.msrb.mxu0 %v8781_v52  ;;  %1537 = vmatpush.msrb.mxu3 %v8782_v48  ;;  %v8837_v52 = vld [vmem:[#allocation161_spill] sm:$0xff] }
 0x1fb   :  { %1497 = vmatpush.msrb.mxu1 %v8783_v34  ;;  %1518 = vmatpush.msrb.mxu2 %v8784_v39  ;;  %v5743_v48 = vld [vmem:[#allocation6 + $0x1d0] sm:$0xff]  ;;  %v8838_v34 = vld [vmem:[#allocation163_spill] sm:$0xff]  ;;  %v8839_v39 = vld [vmem:[#allocation164_spill] sm:$0xff] }
 0x1fc   :  { %1478 = vmatpush.msrb.mxu0 %v8785_v14  ;;  %1538 = vmatpush.msrb.mxu3 %v8786_v37  ;;  %v8840_v14 = vld [vmem:[#allocation165_spill] sm:$0xff] }
 0x1fd   :  { %1498 = vmatpush.msrb.mxu1 %v8787_v51  ;;  %1519 = vmatpush.msrb.mxu2 %v8788_v21  ;;  %v5749_v37 = vld [vmem:[#allocation6 + $0x1b0] sm:$0xff]  ;;  %v8841_v51 = vld [vmem:[#allocation167_spill] sm:$0xff] }
 0x1fe   :  { %1479 = vmatpush.msrb.mxu0 %v8789_v56  ;;  %1539 = vmatpush.msrb.mxu3 %v8790_v2  ;;  %v8842_v21 = vld [vmem:[#allocation169_spill] sm:$0xff]  ;;  %v8843_v2 = vld [vmem:[#allocation170_spill] sm:$0xff] }
 0x1ff   :  { %1499 = vmatpush.msrb.mxu1 %v8791_v53  ;;  %1520 = vmatpush.msrb.mxu2 %v8792_v41  ;;  %v5755_v56 = vld [vmem:[#allocation6 + $0x190] sm:$0xff] }
 0x200   :  { %1480 = vmatpush.msrb.mxu0 %v8793_v15  ;;  %1540 = vmatpush.msrb.mxu3 %v8794_v42  ;;  %v5761_v53 = vld [vmem:[#allocation6 + $0x170] sm:$0xff]  ;;  %v5770_v15 = vld [vmem:[#allocation6 + $0x348] sm:$0xff] }
 0x201   :  { %1500 = vmatpush.msrb.mxu1 %v8795_v45  ;;  %1521 = vmatpush.msrb.mxu2 %v5376_v33  ;;  %v8805_v33 = vld [vmem:[#allocation131_spill] sm:$0xff]  ;;  %v5767_v41 = vld [vmem:[#allocation6 + $0x150] sm:$0xff]  ;;  %v5788_v45 = vld [vmem:[#allocation6 + $0x528] sm:$0xff] }
 0x202   :  { %1481 = vmatpush.msrb.mxu0 %v8796_v7  ;;  %1541 = vmatpush.msrb.mxu3 %v8797_v60  ;;  %v5785_v42 = vld [vmem:[#allocation6 + $0x330] sm:$0xff]  ;;  %v5794_v60 = vld [vmem:[#allocation6 + $0x308] sm:$0xff] }
 0x203   :  { %1501 = vmatpush.msrb.mxu1 %v8798_v5  ;;  %1522 = vmatpush.msrb.mxu2 %v5388_v38  ;;  %v8809_v38 = vld [vmem:[#allocation134_spill] sm:$0xff] }
 0x204   :  { %1482 = vmatpush.msrb.mxu0 %v8799_v47  ;;  %1542 = vmatpush.msrb.mxu3 %v8800_v40  ;;  %v5791_v7 = vld [vmem:[#allocation6 + $0x110] sm:$0xff]  ;;  %v5800_v47 = vld [vmem:[#allocation6 + $0x508] sm:$0xff] }
 0x205   :  { %1502 = vmatpush.msrb.mxu1 %v8801_v17  ;;  %1523 = vmatpush.msrb.mxu2 %v8802_v61  ;;  %v5797_v5 = vld [vmem:[#allocation6 + $0x310] sm:$0xff]  ;;  %v5806_v17 = vld [vmem:[#allocation6 + $0x2e8] sm:$0xff] }
 0x206   :  { %1483 = vmatpush.msrb.mxu0 %v8803_v36  ;;  %1543 = vmatpush.msrb.mxu3 %v8804_v30  ;;  %v5803_v40 = vld [vmem:[#allocation6 + $0xf0] sm:$0xff]  ;;  %v5812_v36 = vld [vmem:[#allocation6 + $0x4e8] sm:$0xff] }
 0x207   :  { %1503 = vmatpush.msrb.mxu1 %v8805_v33  ;;  %1524 = vmatpush.msrb.mxu2 %v8806_v59  ;;  %v5809_v61 = vld [vmem:[#allocation6 + $0x2f0] sm:$0xff]  ;;  %v5818_v33 = vld [vmem:[#allocation6 + $0x2c8] sm:$0xff] }
 0x208   :  { %1484 = vmatpush.msrb.mxu0 %v8807_v16  ;;  %1544 = vmatpush.msrb.mxu3 %v8808_v22  ;;  %v5815_v30 = vld [vmem:[#allocation6 + $0xd0] sm:$0xff]  ;;  %v5824_v16 = vld [vmem:[#allocation6 + $0x4c8] sm:$0xff] }
 0x209   :  { %1504 = vmatpush.msrb.mxu1 %v8809_v38  ;;  %1525 = vmatpush.msrb.mxu2 %v8810_v3  ;;  %v5821_v59 = vld [vmem:[#allocation6 + $0x2d0] sm:$0xff]  ;;  %v5830_v38 = vld [vmem:[#allocation6 + $0x2a8] sm:$0xff] }
 0x20a   :  { %1485 = vmatpush.msrb.mxu0 %v8811_v43  ;;  %1545 = vmatpush.msrb.mxu3 %v8812_v20  ;;  %v5827_v22 = vld [vmem:[#allocation6 + $0xb0] sm:$0xff]  ;;  %v5836_v43 = vld [vmem:[#allocation6 + $0x4a8] sm:$0xff] }
 0x20b   :  { %1505 = vmatpush.msrb.mxu1 %v8813_v63  ;;  %1526 = vmatpush.msrb.mxu2 %v8814_v4  ;;  %v5833_v3 = vld [vmem:[#allocation6 + $0x2b0] sm:$0xff]  ;;  %v5842_v63 = vld [vmem:[#allocation6 + $0x288] sm:$0xff] }
 0x20c   :  { %1486 = vmatpush.msrb.mxu0 %v8815_v8  ;;  %1546 = vmatpush.msrb.mxu3 %v8816_v9  ;;  %v5839_v20 = vld [vmem:[#allocation6 + $0x90] sm:$0xff]  ;;  %v5848_v8 = vld [vmem:[#allocation6 + $0x488] sm:$0xff] }
 0x20d   :  { %1506 = vmatpush.msrb.mxu1 %v8817_v12  ;;  %1527 = vmatpush.msrb.mxu2 %v8818_v13  ;;  %v5845_v4 = vld [vmem:[#allocation6 + $0x290] sm:$0xff]  ;;  %v5854_v12 = vld [vmem:[#allocation6 + $0x268] sm:$0xff] }
 0x20e   :  { %1487 = vmatpush.msrb.mxu0 %v8819_v18  ;;  %1547 = vmatpush.msrb.mxu3 %v8820_v27  ;;  %v5851_v9 = vld [vmem:[#allocation6 + $0x70] sm:$0xff]  ;;  %v5860_v18 = vld [vmem:[#allocation6 + $0x468] sm:$0xff] }
 0x20f   :  { %1507 = vmatpush.msrb.mxu1 %v8821_v28  ;;  %1528 = vmatpush.msrb.mxu2 %v8822_v29  ;;  %v5857_v13 = vld [vmem:[#allocation6 + $0x270] sm:$0xff]  ;;  %8845 = vst [vmem:[#allocation16_spill] sm:$0xff] %v5860_v18  ;;  %v5866_v28 = vld [vmem:[#allocation6 + $0x248] sm:$0xff] }
 0x210   :  { %1488 = vmatpush.msrb.mxu0 %v8823_v55  ;;  %1548 = vmatpush.msrb.mxu3 %v8824_v35  ;;  %v5863_v27 = vld [vmem:[#allocation6 + $0x50] sm:$0xff]  ;;  %8847 = vst [vmem:[#allocation17_spill] sm:$0xff] %v5866_v28  ;;  %v5872_v55 = vld [vmem:[#allocation6 + $0x448] sm:$0xff] }
 0x211   :  { %1508 = vmatpush.msrb.mxu1 %v8825_v50  ;;  %1529 = vmatpush.msrb.mxu2 %v8826_v24  ;;  %8846 = vst [vmem:[#allocation22_spill] sm:$0xff] %v5863_v27  ;;  %v5869_v29 = vld [vmem:[#allocation6 + $0x250] sm:$0xff]  ;;  %v5878_v50 = vld [vmem:[#allocation6 + $0x228] sm:$0xff] }
 0x212   :  { %1489 = vmatpush.msrb.mxu0 %v8827_v31  ;;  %1549 = vmatpush.msrb.mxu3 %v8828_v26  ;;  %8848 = vst [vmem:[#allocation18_spill] sm:$0xff] %v5869_v29  ;;  %v5875_v35 = vld [vmem:[#allocation6 + $0x30] sm:$0xff]  ;;  %v5884_v31 = vld [vmem:[#allocation6 + $0x428] sm:$0xff] }
 0x213   :  { %1509 = vmatpush.msrb.mxu1 %v8829_v44  ;;  %1530 = vmatpush.msrb.mxu2 %v8830_v10  ;;  %8849 = vst [vmem:[#allocation19_spill] sm:$0xff] %v5872_v55  ;;  %v5881_v24 = vld [vmem:[#allocation6 + $0x230] sm:$0xff]  ;;  %v5890_v44 = vld [vmem:[#allocation6 + $0x208] sm:$0xff] }
 0x214   :  { %1490 = vmatpush.msrb.mxu0 %v8831_v19  ;;  %1550 = vmatpush.msrb.mxu3 %v8832_v23  ;;  %8850 = vst [vmem:[#allocation28_spill] sm:$0xff] %v5875_v35  ;;  %v5887_v26 = vld [vmem:[#allocation6 + $0x10] sm:$0xff]  ;;  %v5896_v19 = vld [vmem:[#allocation6 + $0x408] sm:$0xff] }
 0x215   :  { %1595 = vmatpush.msra.mxu2 %v8833_v6  ;;  %1510 = vmatpush.msrb.mxu1 %v8834_v0  ;;  %8851 = vst [vmem:[#allocation20_spill] sm:$0xff] %v5878_v50  ;;  %v5893_v10 = vld [vmem:[#allocation6 + $0x210] sm:$0xff] }
 0x216   :  { %1555 = vmatpush.msra.mxu0 %v8835_v46  ;;  %1615 = vmatpush.msra.mxu3 %v8836_v58  ;;  %8852 = vst [vmem:[#allocation21_spill] sm:$0xff] %v5881_v24  ;;  %v8858_v6 = vld [vmem:[#allocation77_spill] sm:$0xff] }
 0x217   :  { %1575 = vmatpush.msra.mxu1 %v8837_v52  ;;  %1596 = vmatpush.msra.mxu2 %v5743_v48  ;;  %8853 = vst [vmem:[#allocation23_spill] sm:$0xff] %v5884_v31 }
 0x218   :  { %1556 = vmatpush.msra.mxu0 %v8838_v34  ;;  %1616 = vmatpush.msra.mxu3 %v8839_v39  ;;  %8854 = vst [vmem:[#allocation32_spill] sm:$0xff] %v5887_v26 }
 0x219   :  { %1576 = vmatpush.msra.mxu1 %v8840_v14  ;;  %1597 = vmatpush.msra.mxu2 %v5749_v37  ;;  %8855 = vst [vmem:[#allocation26_spill] sm:$0xff] %v5890_v44 }
 0x21a   :  { %1557 = vmatpush.msra.mxu0 %v8841_v51  ;;  %1617 = vmatpush.msra.mxu3 %v5493_v11  ;;  %v8844_v11 = vld [vmem:[#allocation171_spill] sm:$0xff]  ;;  %8856 = vst [vmem:[#allocation27_spill] sm:$0xff] %v5893_v10  ;;  %v8859_v51 = vld [vmem:[#allocation78_spill] sm:$0xff] }
 0x21b   :  { %1577 = vmatpush.msra.mxu1 %v8842_v21  ;;  %1598 = vmatpush.msra.mxu2 %v5755_v56  ;;  %8857 = vst [vmem:[#allocation29_spill] sm:$0xff] %v5896_v19 }
 0x21c   :  { %1558 = vmatpush.msra.mxu0 %v8843_v2  ;;  %1618 = vmatpush.msra.mxu3 %v5503_v32  ;;  %v5773_v32 = vld [vmem:[#allocation6 + $0x350] sm:$0xff] }
 0x21d   :  { %1578 = vmatpush.msra.mxu1 %v5506_v62  ;;  %1599 = vmatpush.msra.mxu2 %v5761_v53  ;;  %v5776_v62 = vld [vmem:[#allocation6 + $0x548] sm:$0xff] }
 0x21e   :  { %1559 = vmatpush.msra.mxu0 %v5509_v25  ;;  %1619 = vmatpush.msra.mxu3 %v5513_v54  ;;  %v5779_v25 = vld [vmem:[#allocation6 + $0x130] sm:$0xff]  ;;  %v5782_v54 = vld [vmem:[#allocation6 + $0x328] sm:$0xff] }
 0x21f   :  { %1579 = vmatpush.msra.mxu1 %v8844_v11  ;;  %1600 = vmatpush.msra.mxu2 %v5767_v41 }
 0x220   :  { %1560 = vmatpush.msra.mxu0 %v5770_v15  ;;  %1620 = vmatpush.msra.mxu3 %v5773_v32 }
 0x221   :  { %1580 = vmatpush.msra.mxu1 %v5776_v62  ;;  %1601 = vmatpush.msra.mxu2 %v5779_v25 }
 0x222   :  { %1561 = vmatpush.msra.mxu0 %v5782_v54  ;;  %1621 = vmatpush.msra.mxu3 %v5785_v42 }
 0x223   :  { %1581 = vmatpush.msra.mxu1 %v5788_v45  ;;  %1602 = vmatpush.msra.mxu2 %v5791_v7 }
 0x224   :  { %1562 = vmatpush.msra.mxu0 %v5794_v60  ;;  %1622 = vmatpush.msra.mxu3 %v5797_v5 }
 0x225   :  { %1582 = vmatpush.msra.mxu1 %v5800_v47  ;;  %1603 = vmatpush.msra.mxu2 %v5803_v40 }
 0x226   :  { %1563 = vmatpush.msra.mxu0 %v5806_v17  ;;  %1623 = vmatpush.msra.mxu3 %v5809_v61 }
 0x227   :  { %1583 = vmatpush.msra.mxu1 %v5812_v36  ;;  %1604 = vmatpush.msra.mxu2 %v5815_v30 }
 0x228   :  { %1564 = vmatpush.msra.mxu0 %v5818_v33  ;;  %1624 = vmatpush.msra.mxu3 %v5821_v59 }
 0x229   :  { %1584 = vmatpush.msra.mxu1 %v5824_v16  ;;  %1605 = vmatpush.msra.mxu2 %v5827_v22 }
 0x22a   :  { %1565 = vmatpush.msra.mxu0 %v5830_v38  ;;  %1625 = vmatpush.msra.mxu3 %v5833_v3 }
 0x22b   :  { %1585 = vmatpush.msra.mxu1 %v5836_v43  ;;  %1606 = vmatpush.msra.mxu2 %v5839_v20 }
 0x22c   :  { %1566 = vmatpush.msra.mxu0 %v5842_v63  ;;  %1626 = vmatpush.msra.mxu3 %v5845_v4 }
 0x22d   :  { %1586 = vmatpush.msra.mxu1 %v5848_v8  ;;  %1607 = vmatpush.msra.mxu2 %v5851_v9 }
 0x22e   :  { %1567 = vmatpush.msra.mxu0 %v5854_v12  ;;  %1627 = vmatpush.msra.mxu3 %v5857_v13 }
 0x22f   :  { %1587 = vmatpush.msra.mxu1 %v5860_v18  ;;  %1608 = vmatpush.msra.mxu2 %v5863_v27 }
 0x230   :  { %1568 = vmatpush.msra.mxu0 %v5866_v28  ;;  %1628 = vmatpush.msra.mxu3 %v5869_v29 }
 0x231   :  { %1588 = vmatpush.msra.mxu1 %v5872_v55  ;;  %1609 = vmatpush.msra.mxu2 %v5875_v35 }
 0x232   :  { %1569 = vmatpush.msra.mxu0 %v5878_v50  ;;  %1629 = vmatpush.msra.mxu3 %v5881_v24  ;;  %v8861_v50 = vld [vmem:[#allocation40_spill] sm:$0xff] }
 0x233   :  { %1589 = vmatpush.msra.mxu1 %v5884_v31  ;;  %1610 = vmatpush.msra.mxu2 %v5887_v26 }
 0x234   :  { %1570 = vmatpush.msra.mxu0 %v5890_v44  ;;  %1630 = vmatpush.msra.mxu3 %v5893_v10 }
 0x235   :  { %1590 = vmatpush.msra.mxu1 %v5896_v19 }
 0x24d   :  { %v1165_v23 = vpop.f32.mrf.mxu0 }
 0x24e   :  { %v1166_v0 = vadd.f32 %v1165_v23, %v8858_v6 }
 0x24f   :  { %v1185_v46 = vpop.f32.mrf.mxu1 }
 0x250   :  { %v1186_v58 = vadd.f32 %v1185_v46, %v1166_v0  ;;  %v8860_v46 = vld [vmem:[#allocation39_spill] sm:$0xff] }
 0x252   :  { %v1205_v52 = vpop.f32.mrf.mxu2 }
 0x253   :  { %v1206_v34 = vadd.f32 %v1205_v52, %v1186_v58 }
 0x254   :  { %v1225_v39 = vpop.f32.mrf.mxu3 }
 0x255   :  { %v3522_v14 = vmul.f32 -1.442695, %v1206_v34  ;;  %v1226_v21 = vadd.f32 %v1225_v39, %v8859_v51 }
 0x257   :  { %3680 = vpow2.f32 %v3522_v14  ;;  %v1245_v2 = vpop.f32.mrf.mxu0 }
 0x258   :  { %v1246_v11 = vadd.f32 %v1245_v2, %v1226_v21 }
 0x259   :  { %v1265_v44 = vpop.f32.mrf.mxu1 }
 0x25a   :  { %v1266_v10 = vadd.f32 %v1265_v44, %v1246_v11 }
 0x25c   :  { %v3523_v26 = vmul.f32 -1.442695, %v1266_v10  ;;  %v1285_v6 = vpop.f32.mrf.mxu2 }
 0x25d   :  { %v3681_v31 = vpop.eup %3680  ;;  %v1286_v58 = vadd.f32 %v1285_v6, %v8860_v46 }
 0x25e   :  { %3682 = vpow2.f32 %v3523_v26  ;;  %v1397_v19 = vadd.f32 1.0, %v3681_v31  ;;  %v1305_v52 = vpop.f32.mrf.mxu3 }
 0x25f   :  { %v1306_v51 = vadd.f32 %v1305_v52, %v1286_v58 }
 0x260   :  { %3684 = vrcp.f32 %v1397_v19  ;;  %v1411_v58 = vand.u32 2147483648, %v1397_v19  ;;  %vm1405_vm0 = vweird.f32 %v1397_v19 }
 0x264   :  { %v3683_v24 = vpop.eup %3682 }
 0x265   :  { %v1398_v23 = vadd.f32 1.0, %v3683_v24 }
 0x266   :  { %v3685_v0 = vpop.eup %3684 }
 0x267   :  { %3686 = vrcp.f32 %v1398_v23  ;;  %v1401_v39 = vmul.f32 %v3685_v0, %v1397_v19  ;;  %v1426_v27 = vand.u32 2147483648, %v1398_v23  ;;  %vm1406_vm13 = vweird.f32 %v3685_v0 }
 0x268   :  { %vm1420_vm14 = vweird.f32 %v1398_v23  ;;  %v1424_v52 = vand.u32 2147483647, %v1398_v23  ;;  %vm1407_vm1 = vmor %vm1405_vm0, %vm1406_vm13 }
 0x269   :  { %v1402_v44 = vsub.f32 1.0, %v1401_v39 }
 0x26a   :  { %vm1425_vm4 = vcmp.eq.f32.partialorder %v1424_v52, 8.507059e+37 }
 0x26b   :  { %v1403_v55 = vmul.f32 %v3685_v0, %v1402_v44 }
 0x26d   :  { %v3687_v34 = vpop.eup %3686  ;;  %v1404_v18 = vadd.f32 %v3685_v0, %v1403_v55 }
 0x26e   :  { %v1416_v14 = vmul.f32 %v3687_v34, %v1398_v23  ;;  %vm1421_vm11 = vweird.f32 %v3687_v34 }
 0x26f   :  { %vm1422_vm15 = vmor %vm1420_vm14, %vm1421_vm11 }
 0x270   :  { %v1417_v21 = vsub.f32 1.0, %v1416_v14  ;;  %v1325_v2 = vpop.f32.mrf.mxu0  ;;  %v1409_v14 = vand.u32 2147483647, %v1397_v19 }
 0x271   :  { %v1326_v10 = vadd.f32 %v1325_v2, %v1306_v51  ;;  %v1412_v2 = vor.u32 1.1754944e-38, %v1411_v58 }
 0x272   :  { %v1345_v11 = vpop.f32.mrf.mxu1  ;;  %v1418_v31 = vmul.f32 %v3687_v34, %v1417_v21  ;;  %v1427_v21 = vor.u32 1.1754944e-38, %v1426_v27  ;;  %vm1410_vm5 = vcmp.eq.f32.partialorder %v1409_v14, 8.507059e+37  ;;  %v5925_v14 = vld [vmem:[#allocation6 + $0x5f0] sm:$0xff] }
 0x273   :  { %v3524_v26 = vmul.f32 -1.442695, %v1326_v10  ;;  %v1346_v35 = vadd.f32 %v1345_v11, %v8861_v50 }
 0x274   :  { %v1419_v46 = vadd.f32 %v3687_v34, %v1418_v31 }
 0x275   :  { %3688 = vpow2.f32 %v3524_v26  ;;  %v1365_v24 = vpop.f32.mrf.mxu2 }
 0x276   :  { %v1366_v29 = vadd.f32 %v1365_v24, %v1346_v35  ;;  %v1423_v51 = vsel %vm1422_vm15, %v3687_v34, %v1419_v46  ;;  %v1408_v35 = vsel %vm1407_vm1, %v3685_v0, %v1404_v18 }
 0x277   :  { %v1385_v28 = vpop.f32.mrf.mxu3  ;;  %v1413_v55 = vsel %vm1410_vm5, %v1412_v2, %v1408_v35  ;;  %v5940_v35 = vld [vmem:[#allocation6 + $0x5d0] sm:$0xff]  ;;  %v5943_v2 = vld [vmem:[#allocation6 + $0x5d8] sm:$0xff] }
 0x278   :  { %v1386_v6 = vadd.f32 %v1385_v28, %v1366_v29  ;;  %v1428_v28 = vsel %vm1425_vm4, %v1427_v21, %v1423_v51  ;;  %v5934_v51 = vld [vmem:[#allocation6 + $0x1f8] sm:$0xff] }
 0x279   :  { %v1446_v23 = vmul.f32 %v1428_v28, %v5570_v49  ;;  %v5937_v21 = vld [vmem:[#allocation6 + $0x3d8] sm:$0xff] }
 0x27a   :  { %3690 = vtanh.f32 %v1386_v6  ;;  %v5946_v28 = vld [vmem:[#allocation6 + $0x1d8] sm:$0xff] }
 0x27b   :  { %v3689_v39 = vpop.eup %3688 }
 0x27c   :  { %v1399_v50 = vadd.f32 1.0, %v3689_v39  ;;  %v5920_v39 = vld [vmem:[#allocation6 + $0x3f8] sm:$0xff] }
 0x27e   :  { %3692 = vrcp.f32 %v1399_v50  ;;  %v1441_v31 = vand.u32 2147483648, %v1399_v50  ;;  %v1439_v18 = vand.u32 2147483647, %v1399_v50  ;;  %vm1435_vm7 = vweird.f32 %v1399_v50 }
 0x280   :  { %v3691_v29 = vpop.eup %3690  ;;  %v1442_v34 = vor.u32 1.1754944e-38, %v1441_v31  ;;  %vm1440_vm9 = vcmp.eq.f32.partialorder %v1439_v18, 8.507059e+37  ;;  %v5971_v31 = vld [vmem:[#allocation6 + $0x198] sm:$0xff]  ;;  %v5983_v18 = vld [vmem:[#allocation6 + $0x570] sm:$0xff] }
 0x281   :  { %v1447_v44 = vmul.f32 %v3691_v29, %v1413_v55  ;;  %v5949_v29 = vld [vmem:[#allocation6 + $0x3b8] sm:$0xff]  ;;  %v5952_v55 = vld [vmem:[#allocation6 + $0x5b0] sm:$0xff]  ;;  %8862 = vst [vmem:[#allocation36_spill] sm:$0xff] %v5983_v18 }
 0x283   :  { %v5904_v11 = vadd.f32 %v1447_v44, %v1446_v23  ;;  %v5955_v44 = vld [vmem:[#allocation6 + $0x5b8] sm:$0xff] }
 0x284   :  { %v3693_v10 = vpop.eup %3692  ;;  %v5958_v23 = vld [vmem:[#allocation6 + $0x1b8] sm:$0xff] }
 0x285   :  { %v1431_v26 = vmul.f32 %v3693_v10, %v1399_v50  ;;  %3694 = vtanh.f32 %v5904_v11  ;;  %vm1436_vm6 = vweird.f32 %v3693_v10  ;;  %v5928_v50 = vld [vmem:[#allocation6 + $0x5f8] sm:$0xff] }
 0x286   :  { %vm1437_vm8 = vmor %vm1435_vm7, %vm1436_vm6 }
 0x287   :  { %v1432_v19 = vsub.f32 1.0, %v1431_v26  ;;  %v5964_v26 = vld [vmem:[#allocation6 + $0x590] sm:$0xff] }
 0x289   :  { %v1433_v27 = vmul.f32 %v3693_v10, %v1432_v19  ;;  %v5967_v19 = vld [vmem:[#allocation6 + $0x598] sm:$0xff] }
 0x28b   :  { %v1434_v0 = vadd.f32 %v3693_v10, %v1433_v27  ;;  %v3695_v6 = vpop.eup %3694  ;;  %v5974_v27 = vld [vmem:[#allocation6 + $0x378] sm:$0xff] }
 0x28d   :  { %v1438_v24 = vsel %vm1437_vm8, %v3693_v10, %v1434_v0  ;;  %v5961_v10 = vld [vmem:[#allocation6 + $0x398] sm:$0xff] }
 0x28e   :  { %v1443_v46 = vsel %vm1440_vm9, %v1442_v34, %v1438_v24  ;;  %v5986_v0 = vld [vmem:[#allocation6 + $0x578] sm:$0xff] }
 0x28f   :  { %v5907_v49 = vmul.f32 %v3695_v6, %v1443_v46  ;;  %8863 = vst [vmem:[#allocation30_spill] sm:$0xff] %v5986_v0  ;;  %v5992_v34 = vld [vmem:[#allocation6 + $0x178] sm:$0xff]  ;;  %v5998_v6 = vld [vmem:[#allocation6 + $0x550] sm:$0xff] }
 0x290   :  { %8864 = vst [vmem:[#allocation31_spill] sm:$0xff] %v5992_v34  ;;  %v5995_v24 = vld [vmem:[#allocation6 + $0x358] sm:$0xff] }
 0x291   :  { %3529 = vmatmul.msk.f32.vlgmr.msrb.gmra.mxu2 %vm5004_vm12, %v5907_v49  ;;  %v5915_v58 = vsel %vm258_vm2, %v5907_v49, %v4984_v57  ;;  %v5918_v52 = vrot.slane %v5907_v49, 6  ;;  %8865 = vst [vmem:[#allocation33_spill] sm:$0xff] %v5995_v24  ;;  %v6001_v46 = vld [vmem:[#allocation6 + $0x558] sm:$0xff] }
 0x292   :  { %1675 = vmatpush.msrb.mxu2 %v5920_v39  ;;  %1491 = vmatmul.f32.vlgmr.msrb.gmra.mxu0 %v5915_v58  ;;  %8866 = vst [vmem:[#allocation44_spill] sm:$0xff] %v5998_v6 }
 0x293   :  { %1551 = vmatmul.f32.vlgmr.msrb.gmra.mxu3 %v5915_v58  ;;  %1635 = vmatpush.msrb.mxu0 %v5925_v14  ;;  %8867 = vst [vmem:[#allocation34_spill] sm:$0xff] %v6001_v46 }
 0x294   :  { %1695 = vmatpush.msrb.mxu3 %v5928_v50  ;;  %3527 = vmatmul.msk.f32.vlgmr.msrb.gmra.mxu1 %vm5004_vm12, %v5918_v52 }
 0x295   :  { %1655 = vmatpush.msrb.mxu1 %v5934_v51  ;;  %1676 = vmatpush.msrb.mxu2 %v5937_v21 }
 0x296   :  { %1636 = vmatpush.msrb.mxu0 %v5940_v35  ;;  %1696 = vmatpush.msrb.mxu3 %v5943_v2 }
 0x297   :  { %1656 = vmatpush.msrb.mxu1 %v5946_v28  ;;  %1677 = vmatpush.msrb.mxu2 %v5949_v29 }
 0x298   :  { %1637 = vmatpush.msrb.mxu0 %v5952_v55  ;;  %1697 = vmatpush.msrb.mxu3 %v5955_v44 }
 0x299   :  { %1657 = vmatpush.msrb.mxu1 %v5958_v23  ;;  %1678 = vmatpush.msrb.mxu2 %v5961_v10 }
 0x29a   :  { %1638 = vmatpush.msrb.mxu0 %v5964_v26  ;;  %1698 = vmatpush.msrb.mxu3 %v5967_v19 }
 0x29b   :  { %1611 = vmatmul.f32.vlgmr.msra.gmra.mxu2 %v5915_v58  ;;  %1658 = vmatpush.msrb.mxu1 %v5971_v31 }
 0x29c   :  { %1679 = vmatpush.msrb.mxu2 %v5974_v27  ;;  %3531 = vmatmul.msk.f32.vlgmr.msra.gmra.mxu0 %vm5004_vm12, %v5918_v52 }
 0x29d   :  { %3535 = vmatmul.msk.f32.vlgmr.msra.gmra.mxu3 %vm5004_vm12, %v5918_v52  ;;  %1639 = vmatpush.msrb.mxu0 %v5983_v18  ;;  %v6007_v18 = vld [vmem:[#allocation6 + $0x338] sm:$0xff] }
 0x29e   :  { %1699 = vmatpush.msrb.mxu3 %v5986_v0  ;;  %3533 = vmatmul.msk.f32.vlgmr.msra.gmra.mxu1 %vm5004_vm12, %v5907_v49  ;;  %v6004_v0 = vld [vmem:[#allocation6 + $0x158] sm:$0xff]  ;;  %8869 = vst [vmem:[#allocation37_spill] sm:$0xff] %v6007_v18 }
 0x29f   :  { %1659 = vmatpush.msrb.mxu1 %v5992_v34  ;;  %1680 = vmatpush.msrb.mxu2 %v5995_v24  ;;  %8868 = vst [vmem:[#allocation35_spill] sm:$0xff] %v6004_v0  ;;  %v6010_v34 = vld [vmem:[#allocation6 + $0x530] sm:$0xff]  ;;  %v6013_v24 = vld [vmem:[#allocation6 + $0x538] sm:$0xff] }
 0x2a0   :  { %1640 = vmatpush.msrb.mxu0 %v5998_v6  ;;  %1700 = vmatpush.msrb.mxu3 %v6001_v46  ;;  %8870 = vst [vmem:[#allocation45_spill] sm:$0xff] %v6010_v34  ;;  %v6016_v6 = vld [vmem:[#allocation6 + $0x138] sm:$0xff] }
 0x2a1   :  { %1660 = vmatpush.msrb.mxu1 %v6004_v0  ;;  %1681 = vmatpush.msrb.mxu2 %v6007_v18  ;;  %8871 = vst [vmem:[#allocation38_spill] sm:$0xff] %v6013_v24  ;;  %v6019_v46 = vld [vmem:[#allocation6 + $0x318] sm:$0xff]  ;;  %v6022_v0 = vld [vmem:[#allocation6 + $0x510] sm:$0xff] }
 0x2a2   :  { %1641 = vmatpush.msrb.mxu0 %v6010_v34  ;;  %1701 = vmatpush.msrb.mxu3 %v6013_v24  ;;  %8872 = vst [vmem:[#allocation43_spill] sm:$0xff] %v6016_v6  ;;  %v6025_v18 = vld [vmem:[#allocation6 + $0x518] sm:$0xff] }
 0x2a3   :  { %1661 = vmatpush.msrb.mxu1 %v6016_v6  ;;  %8873 = vst [vmem:[#allocation46_spill] sm:$0xff] %v6019_v46  ;;  %1682 = vmatpush.msrb.mxu2 %v6019_v46  ;;  %v6028_v34 = vld [vmem:[#allocation6 + $0x118] sm:$0xff]  ;;  %v6034_v6 = vld [vmem:[#allocation6 + $0x4f0] sm:$0xff] }
 0x2a4   :  { %8874 = vst [vmem:[#allocation47_spill] sm:$0xff] %v6022_v0  ;;  %1642 = vmatpush.msrb.mxu0 %v6022_v0  ;;  %1702 = vmatpush.msrb.mxu3 %v6025_v18  ;;  %v6031_v24 = vld [vmem:[#allocation6 + $0x2f8] sm:$0xff] }
 0x2a5   :  { %8875 = vst [vmem:[#allocation24_spill] sm:$0xff] %v6025_v18  ;;  %1662 = vmatpush.msrb.mxu1 %v6028_v34  ;;  %1683 = vmatpush.msrb.mxu2 %v6031_v24  ;;  %v6037_v46 = vld [vmem:[#allocation6 + $0x4f8] sm:$0xff] }
 0x2a6   :  { %8876 = vst [vmem:[#allocation25_spill] sm:$0xff] %v6028_v34  ;;  %1643 = vmatpush.msrb.mxu0 %v6034_v6  ;;  %1703 = vmatpush.msrb.mxu3 %v6037_v46  ;;  %v6040_v0 = vld [vmem:[#allocation6 + $0xf8] sm:$0xff]  ;;  %v6046_v34 = vld [vmem:[#allocation6 + $0x4d0] sm:$0xff] }
 0x2a7   :  { %8877 = vst [vmem:[#allocation66_spill] sm:$0xff] %v6031_v24  ;;  %1663 = vmatpush.msrb.mxu1 %v6040_v0  ;;  %v6043_v18 = vld [vmem:[#allocation6 + $0x2d8] sm:$0xff] }
 0x2a8   :  { %8878 = vst [vmem:[#allocation54_spill] sm:$0xff] %v6034_v6  ;;  %1684 = vmatpush.msrb.mxu2 %v6043_v18  ;;  %1644 = vmatpush.msrb.mxu0 %v6046_v34  ;;  %v6049_v24 = vld [vmem:[#allocation6 + $0x4d8] sm:$0xff] }
 0x2a9   :  { %8879 = vst [vmem:[#allocation55_spill] sm:$0xff] %v6037_v46  ;;  %1704 = vmatpush.msrb.mxu3 %v6049_v24  ;;  %v6052_v6 = vld [vmem:[#allocation6 + $0xd8] sm:$0xff] }
 0x2aa   :  { %8880 = vst [vmem:[#allocation56_spill] sm:$0xff] %v6040_v0  ;;  %1664 = vmatpush.msrb.mxu1 %v6052_v6  ;;  %v6055_v46 = vld [vmem:[#allocation6 + $0x2b8] sm:$0xff]  ;;  %v6058_v0 = vld [vmem:[#allocation6 + $0x4b0] sm:$0xff] }
 0x2ab   :  { %8881 = vst [vmem:[#allocation57_spill] sm:$0xff] %v6043_v18  ;;  %1685 = vmatpush.msrb.mxu2 %v6055_v46  ;;  %1645 = vmatpush.msrb.mxu0 %v6058_v0  ;;  %v6061_v18 = vld [vmem:[#allocation6 + $0x4b8] sm:$0xff] }
 0x2ac   :  { %8882 = vst [vmem:[#allocation58_spill] sm:$0xff] %v6046_v34  ;;  %1705 = vmatpush.msrb.mxu3 %v6061_v18  ;;  %v6064_v34 = vld [vmem:[#allocation6 + $0xb8] sm:$0xff] }
 0x2ad   :  { %8883 = vst [vmem:[#allocation59_spill] sm:$0xff] %v6049_v24  ;;  %1665 = vmatpush.msrb.mxu1 %v6064_v34  ;;  %v6067_v24 = vld [vmem:[#allocation6 + $0x298] sm:$0xff] }
 0x2ae   :  { %8884 = vst [vmem:[#allocation60_spill] sm:$0xff] %v6052_v6  ;;  %1686 = vmatpush.msrb.mxu2 %v6067_v24  ;;  %v6070_v6 = vld [vmem:[#allocation6 + $0x490] sm:$0xff] }
 0x2af   :  { %8885 = vst [vmem:[#allocation61_spill] sm:$0xff] %v6055_v46  ;;  %1646 = vmatpush.msrb.mxu0 %v6070_v6  ;;  %v6073_v46 = vld [vmem:[#allocation6 + $0x498] sm:$0xff] }
 0x2b0   :  { %8886 = vst [vmem:[#allocation62_spill] sm:$0xff] %v6058_v0  ;;  %1706 = vmatpush.msrb.mxu3 %v6073_v46  ;;  %v6076_v0 = vld [vmem:[#allocation6 + $0x98] sm:$0xff] }
 0x2b1   :  { %8887 = vst [vmem:[#allocation76_spill] sm:$0xff] %v6061_v18  ;;  %1666 = vmatpush.msrb.mxu1 %v6076_v0  ;;  %v6079_v18 = vld [vmem:[#allocation6 + $0x278] sm:$0xff] }
 0x2b2   :  { %8888 = vst [vmem:[#allocation63_spill] sm:$0xff] %v6064_v34  ;;  %1687 = vmatpush.msrb.mxu2 %v6079_v18  ;;  %v6082_v34 = vld [vmem:[#allocation6 + $0x470] sm:$0xff] }
 0x2b3   :  { %8889 = vst [vmem:[#allocation64_spill] sm:$0xff] %v6067_v24  ;;  %1647 = vmatpush.msrb.mxu0 %v6082_v34  ;;  %v6085_v24 = vld [vmem:[#allocation6 + $0x478] sm:$0xff] }
 0x2b4   :  { %8890 = vst [vmem:[#allocation65_spill] sm:$0xff] %v6070_v6  ;;  %1707 = vmatpush.msrb.mxu3 %v6085_v24  ;;  %v6088_v6 = vld [vmem:[#allocation6 + $0x78] sm:$0xff] }
 0x2b5   :  { %8891 = vst [vmem:[#allocation82_spill] sm:$0xff] %v6073_v46  ;;  %1667 = vmatpush.msrb.mxu1 %v6088_v6  ;;  %v6091_v46 = vld [vmem:[#allocation6 + $0x258] sm:$0xff] }
 0x2b6   :  { %8892 = vst [vmem:[#allocation67_spill] sm:$0xff] %v6076_v0  ;;  %1688 = vmatpush.msrb.mxu2 %v6091_v46  ;;  %v6094_v0 = vld [vmem:[#allocation6 + $0x450] sm:$0xff] }
 0x2b7   :  { %8893 = vst [vmem:[#allocation68_spill] sm:$0xff] %v6079_v18  ;;  %1648 = vmatpush.msrb.mxu0 %v6094_v0  ;;  %v6097_v18 = vld [vmem:[#allocation6 + $0x458] sm:$0xff] }
 0x2b8   :  { %8894 = vst [vmem:[#allocation69_spill] sm:$0xff] %v6082_v34  ;;  %1708 = vmatpush.msrb.mxu3 %v6097_v18  ;;  %v6100_v34 = vld [vmem:[#allocation6 + $0x58] sm:$0xff] }
 0x2b9   :  { %8895 = vst [vmem:[#allocation86_spill] sm:$0xff] %v6085_v24  ;;  %1668 = vmatpush.msrb.mxu1 %v6100_v34  ;;  %v6103_v24 = vld [vmem:[#allocation6 + $0x238] sm:$0xff] }
 0x2ba   :  { %8896 = vst [vmem:[#allocation70_spill] sm:$0xff] %v6088_v6  ;;  %1689 = vmatpush.msrb.mxu2 %v6103_v24  ;;  %v6106_v6 = vld [vmem:[#allocation6 + $0x430] sm:$0xff] }
 0x2bb   :  { %8897 = vst [vmem:[#allocation71_spill] sm:$0xff] %v6091_v46  ;;  %1649 = vmatpush.msrb.mxu0 %v6106_v6  ;;  %v6109_v46 = vld [vmem:[#allocation6 + $0x438] sm:$0xff] }
 0x2bc   :  { %8898 = vst [vmem:[#allocation72_spill] sm:$0xff] %v6094_v0  ;;  %1709 = vmatpush.msrb.mxu3 %v6109_v46  ;;  %v6112_v0 = vld [vmem:[#allocation6 + $0x38] sm:$0xff] }
 0x2bd   :  { %8899 = vst [vmem:[#allocation73_spill] sm:$0xff] %v6097_v18  ;;  %1669 = vmatpush.msrb.mxu1 %v6112_v0  ;;  %v6115_v18 = vld [vmem:[#allocation6 + $0x218] sm:$0xff] }
 0x2be   :  { %8900 = vst [vmem:[#allocation74_spill] sm:$0xff] %v6100_v34  ;;  %1690 = vmatpush.msrb.mxu2 %v6115_v18  ;;  %v6118_v34 = vld [vmem:[#allocation6 + $0x410] sm:$0xff] }
 0x2bf   :  { %8901 = vst [vmem:[#allocation75_spill] sm:$0xff] %v6106_v6  ;;  %1650 = vmatpush.msrb.mxu0 %v6118_v34  ;;  %3539 = vmatmul.msk.f32.vlgmr.msrb.gmra.mxu2 %vm5004_vm12, %v5918_v52  ;;  %v6124_v6 = vld [vmem:[#allocation6 + $0x418] sm:$0xff]  ;;  %v6140_v52 = vld [vmem:[#allocation6 + $0x1e0] sm:$0xff] }
 0x2c0   :  { %8902 = vst [vmem:[#allocation79_spill] sm:$0xff] %v6112_v0  ;;  %1710 = vmatpush.msrb.mxu3 %v6124_v6  ;;  %3537 = vmatmul.msk.f32.vlgmr.msrb.gmra.mxu0 %vm5004_vm12, %v5907_v49  ;;  %v6130_v0 = vld [vmem:[#allocation6 + $0x18] sm:$0xff] }
 0x2c1   :  { %8903 = vst [vmem:[#allocation80_spill] sm:$0xff] %v6115_v18  ;;  %1670 = vmatpush.msrb.mxu1 %v6130_v0  ;;  %3541 = vmatmul.msk.f32.vlgmr.msrb.gmra.mxu3 %vm5004_vm12, %v5907_v49  ;;  %v6146_v18 = vld [vmem:[#allocation6 + $0x3e0] sm:$0xff] }
 0x2c2   :  { %8904 = vst [vmem:[#allocation81_spill] sm:$0xff] %v6118_v34  ;;  %1671 = vmatmul.f32.vlgmr.msrb.gmra.mxu1 %v5915_v58  ;;  %v6137_v34 = vld [vmem:[#allocation6 + $0x5e0] sm:$0xff]  ;;  %1802 = vmatpush.msra.mxu0 %v6140_v52  ;;  %v6155_v58 = vld [vmem:[#allocation6 + $0x1c8] sm:$0xff] }
 0x2c3   :  { %8905 = vst [vmem:[#allocation83_spill] sm:$0xff] %v6124_v6  ;;  %1842 = vmatpush.msra.mxu2 %v6137_v34  ;;  %v6143_v6 = vld [vmem:[#allocation6 + $0x1e8] sm:$0xff]  ;;  %1822 = vmatpush.msra.mxu1 %v6146_v18  ;;  %v6152_v49 = vld [vmem:[#allocation6 + $0x1c0] sm:$0xff] }
 0x2c4   :  { %8906 = vst [vmem:[#allocation84_spill] sm:$0xff] %v6130_v0  ;;  %1862 = vmatpush.msra.mxu3 %v6143_v6  ;;  %v6149_v0 = vld [vmem:[#allocation6 + $0x5c0] sm:$0xff]  ;;  %1803 = vmatpush.msra.mxu0 %v6152_v49 }
 0x2c5   :  { %8907 = vst [vmem:[#allocation85_spill] sm:$0xff] %v6140_v52  ;;  %1843 = vmatpush.msra.mxu2 %v6149_v0  ;;  %v6158_v52 = vld [vmem:[#allocation6 + $0x3c0] sm:$0xff] }
 0x2c6   :  { %8908 = vst [vmem:[#allocation87_spill] sm:$0xff] %v6143_v6  ;;  %1863 = vmatpush.msra.mxu3 %v6155_v58  ;;  %1823 = vmatpush.msra.mxu1 %v6158_v52  ;;  %v6161_v6 = vld [vmem:[#allocation6 + $0x5a0] sm:$0xff] }
 0x2c7   :  { %8909 = vst [vmem:[#allocation88_spill] sm:$0xff] %v6146_v18  ;;  %1844 = vmatpush.msra.mxu2 %v6161_v6  ;;  %v6164_v18 = vld [vmem:[#allocation6 + $0x1a0] sm:$0xff] }
 0x2c8   :  { %8910 = vst [vmem:[#allocation89_spill] sm:$0xff] %v6149_v0  ;;  %1804 = vmatpush.msra.mxu0 %v6164_v18  ;;  %v6167_v0 = vld [vmem:[#allocation6 + $0x1a8] sm:$0xff] }
 0x2c9   :  { %8911 = vst [vmem:[#allocation92_spill] sm:$0xff] %v6152_v49  ;;  %1864 = vmatpush.msra.mxu3 %v6167_v0  ;;  %v6170_v49 = vld [vmem:[#allocation6 + $0x3a0] sm:$0xff] }
 0x2ca   :  { %8912 = vst [vmem:[#allocation93_spill] sm:$0xff] %v6155_v58  ;;  %1824 = vmatpush.msra.mxu1 %v6170_v49  ;;  %v6173_v58 = vld [vmem:[#allocation6 + $0x580] sm:$0xff] }
 0x2cb   :  { %8913 = vst [vmem:[#allocation94_spill] sm:$0xff] %v6158_v52  ;;  %1845 = vmatpush.msra.mxu2 %v6173_v58  ;;  %v6176_v52 = vld [vmem:[#allocation6 + $0x180] sm:$0xff] }
 0x2cc   :  { %8914 = vst [vmem:[#allocation95_spill] sm:$0xff] %v6161_v6  ;;  %1805 = vmatpush.msra.mxu0 %v6176_v52  ;;  %v6179_v6 = vld [vmem:[#allocation6 + $0x188] sm:$0xff] }
 0x2cd   :  { %8915 = vst [vmem:[#allocation96_spill] sm:$0xff] %v6164_v18  ;;  %1865 = vmatpush.msra.mxu3 %v6179_v6  ;;  %v6182_v18 = vld [vmem:[#allocation6 + $0x380] sm:$0xff] }
 0x2ce   :  { %8916 = vst [vmem:[#allocation99_spill] sm:$0xff] %v6167_v0  ;;  %1825 = vmatpush.msra.mxu1 %v6182_v18  ;;  %v6185_v0 = vld [vmem:[#allocation6 + $0x560] sm:$0xff] }
 0x2cf   :  { %8917 = vst [vmem:[#allocation109_spill] sm:$0xff] %v6170_v49  ;;  %1846 = vmatpush.msra.mxu2 %v6185_v0  ;;  %v6188_v49 = vld [vmem:[#allocation6 + $0x160] sm:$0xff] }
 0x2d0   :  { %8918 = vst [vmem:[#allocation100_spill] sm:$0xff] %v6173_v58  ;;  %1806 = vmatpush.msra.mxu0 %v6188_v49  ;;  %v6191_v58 = vld [vmem:[#allocation6 + $0x168] sm:$0xff] }
 0x2d1   :  { %8919 = vst [vmem:[#allocation101_spill] sm:$0xff] %v6176_v52  ;;  %1866 = vmatpush.msra.mxu3 %v6191_v58  ;;  %v6194_v52 = vld [vmem:[#allocation6 + $0x360] sm:$0xff] }
 0x2d2   :  { %8920 = vst [vmem:[#allocation102_spill] sm:$0xff] %v6179_v6  ;;  %1826 = vmatpush.msra.mxu1 %v6194_v52  ;;  %v6197_v6 = vld [vmem:[#allocation6 + $0x540] sm:$0xff] }
 0x2d3   :  { %8921 = vst [vmem:[#allocation103_spill] sm:$0xff] %v6182_v18  ;;  %1847 = vmatpush.msra.mxu2 %v6197_v6  ;;  %v6200_v18 = vld [vmem:[#allocation6 + $0x140] sm:$0xff] }
 0x2d4   :  { %8922 = vst [vmem:[#allocation104_spill] sm:$0xff] %v6185_v0  ;;  %1807 = vmatpush.msra.mxu0 %v6200_v18  ;;  %v6203_v0 = vld [vmem:[#allocation6 + $0x148] sm:$0xff] }
 0x2d5   :  { %8923 = vst [vmem:[#allocation105_spill] sm:$0xff] %v6188_v49  ;;  %1867 = vmatpush.msra.mxu3 %v6203_v0  ;;  %v6206_v49 = vld [vmem:[#allocation6 + $0x340] sm:$0xff] }
 0x2d6   :  { %8924 = vst [vmem:[#allocation118_spill] sm:$0xff] %v6191_v58  ;;  %1827 = vmatpush.msra.mxu1 %v6206_v49  ;;  %v6209_v58 = vld [vmem:[#allocation6 + $0x520] sm:$0xff] }
 0x2d7   :  { %8925 = vst [vmem:[#allocation106_spill] sm:$0xff] %v6194_v52  ;;  %1848 = vmatpush.msra.mxu2 %v6209_v58  ;;  %v6212_v52 = vld [vmem:[#allocation6 + $0x120] sm:$0xff] }
 0x2d8   :  { %8926 = vst [vmem:[#allocation107_spill] sm:$0xff] %v6197_v6  ;;  %1808 = vmatpush.msra.mxu0 %v6212_v52  ;;  %v6215_v6 = vld [vmem:[#allocation6 + $0x128] sm:$0xff] }
 0x2d9   :  { %8927 = vst [vmem:[#allocation108_spill] sm:$0xff] %v6200_v18  ;;  %1868 = vmatpush.msra.mxu3 %v6215_v6  ;;  %v6218_v18 = vld [vmem:[#allocation6 + $0x320] sm:$0xff] }
 0x2da   :  { %8928 = vst [vmem:[#allocation122_spill] sm:$0xff] %v6203_v0  ;;  %1828 = vmatpush.msra.mxu1 %v6218_v18  ;;  %v6221_v0 = vld [vmem:[#allocation6 + $0x500] sm:$0xff] }
 0x2db   :  { %8929 = vst [vmem:[#allocation110_spill] sm:$0xff] %v6206_v49  ;;  %1849 = vmatpush.msra.mxu2 %v6221_v0  ;;  %v6224_v49 = vld [vmem:[#allocation6 + $0x100] sm:$0xff] }
 0x2dc   :  { %8930 = vst [vmem:[#allocation113_spill] sm:$0xff] %v6209_v58  ;;  %1809 = vmatpush.msra.mxu0 %v6224_v49  ;;  %v6227_v58 = vld [vmem:[#allocation6 + $0x108] sm:$0xff] }
 0x2dd   :  { %8931 = vst [vmem:[#allocation114_spill] sm:$0xff] %v6212_v52  ;;  %1869 = vmatpush.msra.mxu3 %v6227_v58  ;;  %v6230_v52 = vld [vmem:[#allocation6 + $0x300] sm:$0xff] }
 0x2de   :  { %8932 = vst [vmem:[#allocation126_spill] sm:$0xff] %v6215_v6  ;;  %1829 = vmatpush.msra.mxu1 %v6230_v52  ;;  %v6233_v6 = vld [vmem:[#allocation6 + $0x4e0] sm:$0xff] }
 0x2df   :  { %8933 = vst [vmem:[#allocation115_spill] sm:$0xff] %v6218_v18  ;;  %1850 = vmatpush.msra.mxu2 %v6233_v6  ;;  %v6236_v18 = vld [vmem:[#allocation6 + $0xe0] sm:$0xff] }
 0x2e0   :  { %8934 = vst [vmem:[#allocation116_spill] sm:$0xff] %v6221_v0  ;;  %1810 = vmatpush.msra.mxu0 %v6236_v18  ;;  %v6239_v0 = vld [vmem:[#allocation6 + $0xe8] sm:$0xff] }
 0x2e1   :  { %8935 = vst [vmem:[#allocation117_spill] sm:$0xff] %v6224_v49  ;;  %1870 = vmatpush.msra.mxu3 %v6239_v0  ;;  %v6242_v49 = vld [vmem:[#allocation6 + $0x2e0] sm:$0xff] }
 0x2e2   :  { %8936 = vst [vmem:[#allocation119_spill] sm:$0xff] %v6227_v58  ;;  %1830 = vmatpush.msra.mxu1 %v6242_v49  ;;  %v6245_v58 = vld [vmem:[#allocation6 + $0x4c0] sm:$0xff] }
 0x2e3   :  { %8937 = vst [vmem:[#allocation120_spill] sm:$0xff] %v6230_v52  ;;  %1851 = vmatpush.msra.mxu2 %v6245_v58  ;;  %v6248_v52 = vld [vmem:[#allocation6 + $0xc0] sm:$0xff] }
 0x2e4   :  { %8938 = vst [vmem:[#allocation121_spill] sm:$0xff] %v6233_v6  ;;  %1811 = vmatpush.msra.mxu0 %v6248_v52  ;;  %v6251_v6 = vld [vmem:[#allocation6 + $0xc8] sm:$0xff] }
 0x2e5   :  { %8939 = vst [vmem:[#allocation123_spill] sm:$0xff] %v6236_v18  ;;  %1871 = vmatpush.msra.mxu3 %v6251_v6  ;;  %v6254_v18 = vld [vmem:[#allocation6 + $0x2c0] sm:$0xff] }
 0x2e6   :  { %8940 = vst [vmem:[#allocation124_spill] sm:$0xff] %v6239_v0  ;;  %1831 = vmatpush.msra.mxu1 %v6254_v18  ;;  %v6257_v0 = vld [vmem:[#allocation6 + $0x4a0] sm:$0xff] }
 0x2e7   :  { %8941 = vst [vmem:[#allocation125_spill] sm:$0xff] %v6242_v49  ;;  %1852 = vmatpush.msra.mxu2 %v6257_v0  ;;  %v6260_v49 = vld [vmem:[#allocation6 + $0xa0] sm:$0xff] }
 0x2e8   :  { %8942 = vst [vmem:[#allocation138_spill] sm:$0xff] %v6245_v58  ;;  %1812 = vmatpush.msra.mxu0 %v6260_v49  ;;  %v6263_v58 = vld [vmem:[#allocation6 + $0xa8] sm:$0xff] }
 0x2e9   :  { %8943 = vst [vmem:[#allocation127_spill] sm:$0xff] %v6248_v52  ;;  %1872 = vmatpush.msra.mxu3 %v6263_v58  ;;  %v6266_v52 = vld [vmem:[#allocation6 + $0x2a0] sm:$0xff] }
 0x2ea   :  { %8944 = vst [vmem:[#allocation130_spill] sm:$0xff] %v6251_v6  ;;  %1832 = vmatpush.msra.mxu1 %v6266_v52  ;;  %v6269_v6 = vld [vmem:[#allocation6 + $0x480] sm:$0xff] }
 0x2eb   :  { %8945 = vst [vmem:[#allocation131_spill] sm:$0xff] %v6254_v18  ;;  %1853 = vmatpush.msra.mxu2 %v6269_v6  ;;  %v6272_v18 = vld [vmem:[#allocation6 + $0x80] sm:$0xff] }
 0x2ec   :  { %8946 = vst [vmem:[#allocation142_spill] sm:$0xff] %v6257_v0  ;;  %1813 = vmatpush.msra.mxu0 %v6272_v18  ;;  %v6275_v0 = vld [vmem:[#allocation6 + $0x88] sm:$0xff] }
 0x2ed   :  { %8947 = vst [vmem:[#allocation132_spill] sm:$0xff] %v6260_v49  ;;  %1873 = vmatpush.msra.mxu3 %v6275_v0  ;;  %v6278_v49 = vld [vmem:[#allocation6 + $0x280] sm:$0xff] }
 0x2ee   :  { %8948 = vst [vmem:[#allocation133_spill] sm:$0xff] %v6263_v58  ;;  %1833 = vmatpush.msra.mxu1 %v6278_v49  ;;  %v6281_v58 = vld [vmem:[#allocation6 + $0x460] sm:$0xff] }
 0x2ef   :  { %8949 = vst [vmem:[#allocation134_spill] sm:$0xff] %v6266_v52  ;;  %1854 = vmatpush.msra.mxu2 %v6281_v58  ;;  %v6284_v52 = vld [vmem:[#allocation6 + $0x60] sm:$0xff] }
 0x2f0   :  { %8950 = vst [vmem:[#allocation146_spill] sm:$0xff] %v6269_v6  ;;  %1814 = vmatpush.msra.mxu0 %v6284_v52  ;;  %v6287_v6 = vld [vmem:[#allocation6 + $0x68] sm:$0xff] }
 0x2f1   :  { %8951 = vst [vmem:[#allocation135_spill] sm:$0xff] %v6272_v18  ;;  %1874 = vmatpush.msra.mxu3 %v6287_v6  ;;  %v6290_v18 = vld [vmem:[#allocation6 + $0x260] sm:$0xff] }
 0x2f2   :  { %8952 = vst [vmem:[#allocation136_spill] sm:$0xff] %v6275_v0  ;;  %1834 = vmatpush.msra.mxu1 %v6290_v18  ;;  %v6293_v0 = vld [vmem:[#allocation6 + $0x440] sm:$0xff] }
 0x2f3   :  { %8953 = vst [vmem:[#allocation137_spill] sm:$0xff] %v6278_v49  ;;  %1855 = vmatpush.msra.mxu2 %v6293_v0  ;;  %v6296_v49 = vld [vmem:[#allocation6 + $0x40] sm:$0xff] }
 0x2f4   :  { %8954 = vst [vmem:[#allocation150_spill] sm:$0xff] %v6281_v58  ;;  %1815 = vmatpush.msra.mxu0 %v6296_v49  ;;  %v6299_v58 = vld [vmem:[#allocation6 + $0x48] sm:$0xff] }
 0x2f5   :  { %8955 = vst [vmem:[#allocation139_spill] sm:$0xff] %v6284_v52  ;;  %1875 = vmatpush.msra.mxu3 %v6299_v58  ;;  %v6302_v52 = vld [vmem:[#allocation6 + $0x240] sm:$0xff] }
 0x2f6   :  { %8956 = vst [vmem:[#allocation140_spill] sm:$0xff] %v6287_v6  ;;  %1835 = vmatpush.msra.mxu1 %v6302_v52  ;;  %v6305_v6 = vld [vmem:[#allocation6 + $0x420] sm:$0xff] }
 0x2f7   :  { %8957 = vst [vmem:[#allocation141_spill] sm:$0xff] %v6290_v18  ;;  %1856 = vmatpush.msra.mxu2 %v6305_v6  ;;  %v6308_v18 = vld [vmem:[#allocation6 + $0x20] sm:$0xff] }
 0x2f8   :  { %8958 = vst [vmem:[#allocation154_spill] sm:$0xff] %v6293_v0  ;;  %1816 = vmatpush.msra.mxu0 %v6308_v18  ;;  %v6311_v0 = vld [vmem:[#allocation6 + $0x28] sm:$0xff] }
 0x2f9   :  { %8959 = vst [vmem:[#allocation143_spill] sm:$0xff] %v6296_v49  ;;  %1876 = vmatpush.msra.mxu3 %v6311_v0  ;;  %v6314_v49 = vld [vmem:[#allocation6 + $0x220] sm:$0xff] }
 0x2fa   :  { %8960 = vst [vmem:[#allocation144_spill] sm:$0xff] %v6299_v58  ;;  %1836 = vmatpush.msra.mxu1 %v6314_v49  ;;  %v6317_v58 = vld [vmem:[#allocation6 + $0x400] sm:$0xff] }
 0x2fb   :  { %8961 = vst [vmem:[#allocation145_spill] sm:$0xff] %v6302_v52  ;;  %1857 = vmatpush.msra.mxu2 %v6317_v58  ;;  %v6320_v52 = vld [vmem:[#allocation6] sm:$0xff] }
 0x2fc   :  { %8962 = vst [vmem:[#allocation158_spill] sm:$0xff] %v6305_v6  ;;  %1817 = vmatpush.msra.mxu0 %v6320_v52  ;;  %v6323_v6 = vld [vmem:[#allocation6 + $0x8] sm:$0xff] }
 0x2fd   :  { %8963 = vst [vmem:[#allocation147_spill] sm:$0xff] %v6308_v18  ;;  %1877 = vmatpush.msra.mxu3 %v6323_v6  ;;  %v6326_v18 = vld [vmem:[#allocation6 + $0x1f0] sm:$0xff] }
 0x2fe   :  { %8964 = vst [vmem:[#allocation148_spill] sm:$0xff] %v6311_v0  ;;  %1922 = vmatpush.msrb.mxu2 %v6326_v18  ;;  %v6329_v0 = vld [vmem:[#allocation6 + $0x200] sm:$0xff] }
 0x2ff   :  { %8965 = vst [vmem:[#allocation149_spill] sm:$0xff] %v6314_v49  ;;  %1837 = vmatpush.msra.mxu1 %v6329_v0  ;;  %v6332_v49 = vld [vmem:[#allocation6 + $0x3e8] sm:$0xff] }
 0x300   :  { %8966 = vst [vmem:[#allocation162_spill] sm:$0xff] %v6317_v58  ;;  %1882 = vmatpush.msrb.mxu0 %v6332_v49  ;;  %v6335_v58 = vld [vmem:[#allocation6 + $0x3f0] sm:$0xff]  ;;  %1923 = vmatpush.msrb.mxu2 %v5743_v48  ;;  %v6358_v48 = vld [vmem:[#allocation6 + $0x5a8] sm:$0xff] }
 0x301   :  { %8967 = vst [vmem:[#allocation151_spill] sm:$0xff] %v6320_v52  ;;  %1942 = vmatpush.msrb.mxu3 %v6335_v58  ;;  %v6338_v52 = vld [vmem:[#allocation6 + $0x5e8] sm:$0xff] }
 0x302   :  { %8968 = vst [vmem:[#allocation152_spill] sm:$0xff] %v6323_v6  ;;  %1902 = vmatpush.msrb.mxu1 %v6338_v52  ;;  %v6342_v6 = vld [vmem:[#allocation6 + $0x3c8] sm:$0xff]  ;;  %1924 = vmatpush.msrb.mxu2 %v5749_v37 }
 0x303   :  { %8969 = vst [vmem:[#allocation153_spill] sm:$0xff] %v6326_v18  ;;  %1883 = vmatpush.msrb.mxu0 %v6342_v6  ;;  %v6345_v18 = vld [vmem:[#allocation6 + $0x3d0] sm:$0xff]  ;;  %v6368_v37 = vld [vmem:[#allocation6 + $0x588] sm:$0xff] }
 0x304   :  { %8970 = vst [vmem:[#allocation166_spill] sm:$0xff] %v6329_v0  ;;  %1943 = vmatpush.msrb.mxu3 %v6345_v18  ;;  %v6348_v0 = vld [vmem:[#allocation6 + $0x5c8] sm:$0xff]  ;;  %1925 = vmatpush.msrb.mxu2 %v5755_v56 }
 0x305   :  { %8971 = vst [vmem:[#allocation155_spill] sm:$0xff] %v6335_v58  ;;  %1903 = vmatpush.msrb.mxu1 %v6348_v0  ;;  %v6352_v58 = vld [vmem:[#allocation6 + $0x3a8] sm:$0xff] }
 0x306   :  { %8972 = vst [vmem:[#allocation156_spill] sm:$0xff] %v6338_v52  ;;  %1884 = vmatpush.msrb.mxu0 %v6352_v58  ;;  %v6355_v52 = vld [vmem:[#allocation6 + $0x3b0] sm:$0xff]  ;;  %1926 = vmatpush.msrb.mxu2 %v5761_v53  ;;  %v6378_v56 = vld [vmem:[#allocation6 + $0x568] sm:$0xff] }
 0x307   :  { %8973 = vst [vmem:[#allocation168_spill] sm:$0xff] %v6345_v18  ;;  %1944 = vmatpush.msrb.mxu3 %v6355_v52  ;;  %1904 = vmatpush.msrb.mxu1 %v6358_v48  ;;  %v6362_v18 = vld [vmem:[#allocation6 + $0x388] sm:$0xff] }
 0x308   :  { %8974 = vst [vmem:[#allocation157_spill] sm:$0xff] %v6348_v0  ;;  %1885 = vmatpush.msrb.mxu0 %v6362_v18  ;;  %v6365_v0 = vld [vmem:[#allocation6 + $0x390] sm:$0xff]  ;;  %1927 = vmatpush.msrb.mxu2 %v5767_v41  ;;  %v8977_v53 = vld [vmem:[#allocation16_spill] sm:$0xff] }
 0x309   :  { %8975 = vst [vmem:[#allocation159_spill] sm:$0xff] %v6355_v52  ;;  %1945 = vmatpush.msrb.mxu3 %v6365_v0  ;;  %1905 = vmatpush.msrb.mxu1 %v6368_v37  ;;  %v6372_v52 = vld [vmem:[#allocation6 + $0x368] sm:$0xff]  ;;  %v8978_v41 = vld [vmem:[#allocation22_spill] sm:$0xff] }
 0x30a   :  { %8976 = vst [vmem:[#allocation160_spill] sm:$0xff] %v6358_v48  ;;  %1886 = vmatpush.msrb.mxu0 %v6372_v52  ;;  %v6375_v48 = vld [vmem:[#allocation6 + $0x370] sm:$0xff]  ;;  %1928 = vmatpush.msrb.mxu2 %v5779_v25  ;;  %v8982_v25 = vld [vmem:[#allocation28_spill] sm:$0xff] }
 0x30b   :  { %1946 = vmatpush.msrb.mxu3 %v6375_v48  ;;  %1906 = vmatpush.msrb.mxu1 %v6378_v56 }
 0x30c   :  { %1887 = vmatpush.msrb.mxu0 %v5770_v15  ;;  %1929 = vmatpush.msrb.mxu2 %v5791_v7  ;;  %v8979_v15 = vld [vmem:[#allocation17_spill] sm:$0xff]  ;;  %v8986_v7 = vld [vmem:[#allocation32_spill] sm:$0xff] }
 0x30d   :  { %1947 = vmatpush.msrb.mxu3 %v5773_v32  ;;  %1907 = vmatpush.msrb.mxu1 %v5776_v62  ;;  %v8980_v32 = vld [vmem:[#allocation18_spill] sm:$0xff]  ;;  %v8981_v62 = vld [vmem:[#allocation19_spill] sm:$0xff] }
 0x30e   :  { %1888 = vmatpush.msrb.mxu0 %v5782_v54  ;;  %1930 = vmatpush.msrb.mxu2 %v5803_v40  ;;  %v8983_v54 = vld [vmem:[#allocation20_spill] sm:$0xff] }
 0x30f   :  { %1948 = vmatpush.msrb.mxu3 %v5785_v42  ;;  %1908 = vmatpush.msrb.mxu1 %v5788_v45  ;;  %v8984_v42 = vld [vmem:[#allocation21_spill] sm:$0xff]  ;;  %v8985_v45 = vld [vmem:[#allocation23_spill] sm:$0xff]  ;;  %v1492_v40 = vpop.f32.mrf.mxu0 }
 0x310   :  { %1889 = vmatpush.msrb.mxu0 %v5794_v60  ;;  %1931 = vmatpush.msrb.mxu2 %v5815_v30  ;;  %v8987_v60 = vld [vmem:[#allocation26_spill] sm:$0xff] }
 0x311   :  { %1949 = vmatpush.msrb.mxu3 %v5797_v5  ;;  %1909 = vmatpush.msrb.mxu1 %v5800_v47  ;;  %v8988_v5 = vld [vmem:[#allocation27_spill] sm:$0xff]  ;;  %v8989_v47 = vld [vmem:[#allocation29_spill] sm:$0xff] }
 0x312   :  { %1890 = vmatpush.msrb.mxu0 %v5806_v17  ;;  %1932 = vmatpush.msrb.mxu2 %v5827_v22  ;;  %v8990_v17 = vld [vmem:[#allocation90_spill] sm:$0xff] }
 0x313   :  { %1950 = vmatpush.msrb.mxu3 %v5809_v61  ;;  %1910 = vmatpush.msrb.mxu1 %v5812_v36  ;;  %v1493_v61 = vadd.f32 %v1492_v40, %v8990_v17  ;;  %v1512_v36 = vpop.f32.mrf.mxu1 }
 0x314   :  { %1891 = vmatpush.msrb.mxu0 %v5818_v33  ;;  %1933 = vmatpush.msrb.mxu2 %v5839_v20  ;;  %v1532_v33 = vpop.f32.mrf.mxu2 }
 0x315   :  { %1951 = vmatpush.msrb.mxu3 %v5821_v59  ;;  %1911 = vmatpush.msrb.mxu1 %v5824_v16  ;;  %v1513_v30 = vadd.f32 %v1512_v36, %v1493_v61 }
 0x316   :  { %1892 = vmatpush.msrb.mxu0 %v5830_v38  ;;  %1934 = vmatpush.msrb.mxu2 %v5851_v9  ;;  %v1552_v16 = vpop.f32.mrf.mxu3  ;;  %v8991_v38 = vld [vmem:[#allocation91_spill] sm:$0xff] }
 0x317   :  { %1952 = vmatpush.msrb.mxu3 %v5833_v3  ;;  %1912 = vmatpush.msrb.mxu1 %v5836_v43  ;;  %v1533_v59 = vadd.f32 %v1532_v33, %v1513_v30  ;;  %v1553_v3 = vadd.f32 %v1552_v16, %v8991_v38  ;;  %v8993_v30 = vld [vmem:[#allocation42_spill] sm:$0xff] }
 0x318   :  { %1893 = vmatpush.msrb.mxu0 %v5842_v63  ;;  %1935 = vmatpush.msrb.mxu2 %v8978_v41 }
 0x319   :  { %1953 = vmatpush.msrb.mxu3 %v5845_v4  ;;  %1913 = vmatpush.msrb.mxu1 %v5848_v8  ;;  %v3542_v22 = vmul.f32 -1.442695, %v1533_v59  ;;  %v1572_v43 = vpop.f32.mrf.mxu0 }
 0x31a   :  { %1894 = vmatpush.msrb.mxu0 %v5854_v12  ;;  %1936 = vmatpush.msrb.mxu2 %v8982_v25  ;;  %v1573_v20 = vadd.f32 %v1572_v43, %v1553_v3 }
 0x31b   :  { %1954 = vmatpush.msrb.mxu3 %v5857_v13  ;;  %1914 = vmatpush.msrb.mxu1 %v8977_v53  ;;  %3696 = vpow2.f32 %v3542_v22  ;;  %v1592_v63 = vpop.f32.mrf.mxu1 }
 0x31c   :  { %1895 = vmatpush.msrb.mxu0 %v8979_v15  ;;  %1937 = vmatpush.msrb.mxu2 %v8986_v7  ;;  %v1593_v4 = vadd.f32 %v1592_v63, %v1573_v20 }
 0x31d   :  { %1955 = vmatpush.msrb.mxu3 %v8980_v32  ;;  %1915 = vmatpush.msrb.mxu1 %v8981_v62  ;;  %v8992_v32 = vld [vmem:[#allocation41_spill] sm:$0xff] }
 0x31e   :  { %1896 = vmatpush.msrb.mxu0 %v8983_v54  ;;  %v3543_v8 = vmul.f32 -1.442695, %v1593_v4  ;;  %v1612_v41 = vpop.f32.mrf.mxu2 }
 0x31f   :  { %1956 = vmatpush.msrb.mxu3 %v8984_v42  ;;  %1916 = vmatpush.msrb.mxu1 %v8985_v45  ;;  %v1613_v62 = vadd.f32 %v1612_v41, %v8992_v32 }
 0x320   :  { %1897 = vmatpush.msrb.mxu0 %v8987_v60  ;;  %3698 = vpow2.f32 %v3543_v8  ;;  %v1632_v25 = vpop.f32.mrf.mxu3 }
 0x321   :  { %1957 = vmatpush.msrb.mxu3 %v8988_v5  ;;  %1917 = vmatpush.msrb.mxu1 %v8989_v47  ;;  %v3697_v9 = vpop.eup %3696  ;;  %v1633_v7 = vadd.f32 %v1632_v25, %v1613_v62 }
 0x322   :  { %v1724_v12 = vadd.f32 1.0, %v3697_v9 }
 0x324   :  { %3700 = vrcp.f32 %v1724_v12  ;;  %v1738_v4 = vand.u32 2147483648, %v1724_v12  ;;  %vm1732_vm15 = vweird.f32 %v1724_v12 }
 0x326   :  { %v3699_v13 = vpop.eup %3698 }
 0x327   :  { %v1725_v53 = vadd.f32 1.0, %v3699_v13  ;;  %v1736_v13 = vand.u32 2147483647, %v1724_v12 }
 0x329   :  { %3702 = vrcp.f32 %v1725_v53  ;;  %v1753_v20 = vand.u32 2147483648, %v1725_v53  ;;  %vm1747_vm13 = vweird.f32 %v1725_v53  ;;  %v1751_v8 = vand.u32 2147483647, %v1725_v53 }
 0x32a   :  { %v3701_v15 = vpop.eup %3700  ;;  %vm1737_vm4 = vcmp.eq.f32.partialorder %v1736_v13, 8.507059e+37  ;;  %v9018_v13 = vld [vmem:[#allocation62_spill] sm:$0xff] }
 0x32b   :  { %v1728_v42 = vmul.f32 %v3701_v15, %v1724_v12  ;;  %vm1733_vm11 = vweird.f32 %v3701_v15  ;;  %v1754_v62 = vor.u32 1.1754944e-38, %v1753_v20  ;;  %vm1752_vm1 = vcmp.eq.f32.partialorder %v1751_v8, 8.507059e+37  ;;  %v9013_v20 = vld [vmem:[#allocation57_spill] sm:$0xff]  ;;  %v9016_v8 = vld [vmem:[#allocation60_spill] sm:$0xff] }
 0x32c   :  { %vm1734_vm0 = vmor %vm1732_vm15, %vm1733_vm11 }
 0x32d   :  { %v1729_v47 = vsub.f32 1.0, %v1728_v42  ;;  %v1739_v42 = vor.u32 1.1754944e-38, %v1738_v4  ;;  %v9015_v4 = vld [vmem:[#allocation59_spill] sm:$0xff] }
 0x32f   :  { %v3703_v54 = vpop.eup %3702  ;;  %v1730_v16 = vmul.f32 %v3701_v15, %v1729_v47 }
 0x330   :  { %v1743_v45 = vmul.f32 %v3703_v54, %v1725_v53  ;;  %vm1748_vm10 = vweird.f32 %v3703_v54 }
 0x331   :  { %v1731_v63 = vadd.f32 %v3701_v15, %v1730_v16  ;;  %vm1749_vm14 = vmor %vm1747_vm13, %vm1748_vm10 }
 0x332   :  { %v1744_v60 = vsub.f32 1.0, %v1743_v45 }
 0x333   :  { %v1735_v25 = vsel %vm1734_vm0, %v3701_v15, %v1731_v63  ;;  %v9014_v63 = vld [vmem:[#allocation58_spill] sm:$0xff] }
 0x334   :  { %v1745_v36 = vmul.f32 %v3703_v54, %v1744_v60  ;;  %v1740_v60 = vsel %vm1737_vm4, %v1739_v42, %v1735_v25  ;;  %v9022_v25 = vld [vmem:[#allocation65_spill] sm:$0xff]  ;;  %v9023_v42 = vld [vmem:[#allocation82_spill] sm:$0xff] }
 0x336   :  { %v1746_v43 = vadd.f32 %v3703_v54, %v1745_v36 }
 0x338   :  { %v1750_v32 = vsel %vm1749_vm14, %v3703_v54, %v1746_v43  ;;  %v9012_v43 = vld [vmem:[#allocation56_spill] sm:$0xff] }
 0x339   :  { %v1755_v45 = vsel %vm1752_vm1, %v1754_v62, %v1750_v32  ;;  %v9020_v32 = vld [vmem:[#allocation63_spill] sm:$0xff]  ;;  %v9021_v62 = vld [vmem:[#allocation64_spill] sm:$0xff] }
 0x33a   :  { %v1773_v53 = vmul.f32 %v1755_v45, %v5904_v11  ;;  %v9024_v45 = vld [vmem:[#allocation67_spill] sm:$0xff] }
 0x33d   :  { %v1652_v5 = vpop.f32.mrf.mxu0 }
 0x33e   :  { %v1653_v40 = vadd.f32 %v1652_v5, %v1633_v7 }
 0x33f   :  { %v1672_v17 = vpop.f32.mrf.mxu1 }
 0x340   :  { %v3544_v61 = vmul.f32 -1.442695, %v1653_v40  ;;  %v1673_v33 = vadd.f32 %v1672_v17, %v8993_v30 }
 0x342   :  { %3704 = vpow2.f32 %v3544_v61  ;;  %v1692_v59 = vpop.f32.mrf.mxu2 }
 0x343   :  { %v1693_v22 = vadd.f32 %v1692_v59, %v1673_v33 }
 0x344   :  { %v1712_v38 = vpop.f32.mrf.mxu3 }
 0x345   :  { %v1713_v3 = vadd.f32 %v1712_v38, %v1693_v22 }
 0x347   :  { %3706 = vtanh.f32 %v1713_v3  ;;  %v9011_v3 = vld [vmem:[#allocation55_spill] sm:$0xff] }
 0x348   :  { %v3705_v9 = vpop.eup %3704 }
 0x349   :  { %v1726_v41 = vadd.f32 1.0, %v3705_v9  ;;  %v9017_v9 = vld [vmem:[#allocation61_spill] sm:$0xff] }
 0x34b   :  { %3708 = vrcp.f32 %v1726_v41  ;;  %v1768_v61 = vand.u32 2147483648, %v1726_v41  ;;  %v1766_v15 = vand.u32 2147483647, %v1726_v41  ;;  %vm1762_vm6 = vweird.f32 %v1726_v41 }
 0x34d   :  { %v3707_v7 = vpop.eup %3706  ;;  %v1769_v30 = vor.u32 1.1754944e-38, %v1768_v61  ;;  %vm1767_vm8 = vcmp.eq.f32.partialorder %v1766_v15, 8.507059e+37  ;;  %v9032_v61 = vld [vmem:[#allocation74_spill] sm:$0xff]  ;;  %v9034_v15 = vld [vmem:[#allocation79_spill] sm:$0xff] }
 0x34e   :  { %v1774_v5 = vmul.f32 %v3707_v7, %v1740_v60  ;;  %v9025_v7 = vld [vmem:[#allocation68_spill] sm:$0xff]  ;;  %v9026_v60 = vld [vmem:[#allocation69_spill] sm:$0xff] }
 0x350   :  { %v6430_v40 = vadd.f32 %v1774_v5, %v1773_v53  ;;  %v9027_v5 = vld [vmem:[#allocation86_spill] sm:$0xff] }
 0x351   :  { %v3709_v47 = vpop.eup %3708  ;;  %v9028_v53 = vld [vmem:[#allocation70_spill] sm:$0xff] }
 0x352   :  { %v1758_v17 = vmul.f32 %v3709_v47, %v1726_v41  ;;  %3710 = vtanh.f32 %v6430_v40  ;;  %vm1763_vm5 = vweird.f32 %v3709_v47  ;;  %v9019_v41 = vld [vmem:[#allocation76_spill] sm:$0xff] }
 0x353   :  { %vm1764_vm7 = vmor %vm1762_vm6, %vm1763_vm5 }
 0x354   :  { %v1759_v12 = vsub.f32 1.0, %v1758_v17  ;;  %v9030_v17 = vld [vmem:[#allocation72_spill] sm:$0xff] }
 0x356   :  { %v1760_v54 = vmul.f32 %v3709_v47, %v1759_v12  ;;  %v9031_v12 = vld [vmem:[#allocation73_spill] sm:$0xff] }
 0x358   :  { %v1761_v36 = vadd.f32 %v3709_v47, %v1760_v54  ;;  %v3711_v59 = vpop.eup %3710  ;;  %v9033_v54 = vld [vmem:[#allocation75_spill] sm:$0xff] }
 0x35a   :  { %v1765_v33 = vsel %vm1764_vm7, %v3709_v47, %v1761_v36  ;;  %v9029_v47 = vld [vmem:[#allocation71_spill] sm:$0xff]  ;;  %v9035_v36 = vld [vmem:[#allocation80_spill] sm:$0xff] }
 0x35b   :  { %v1770_v16 = vsel %vm1767_vm8, %v1769_v30, %v1765_v33  ;;  %v9036_v30 = vld [vmem:[#allocation81_spill] sm:$0xff]  ;;  %v9037_v33 = vld [vmem:[#allocation83_spill] sm:$0xff] }
 0x35c   :  { %v6433_v11 = vmul.f32 %v3711_v59, %v1770_v16  ;;  %v9040_v59 = vld [vmem:[#allocation87_spill] sm:$0xff]  ;;  %v9041_v16 = vld [vmem:[#allocation88_spill] sm:$0xff] }
 0x35e   :  { %3549 = vmatmul.msk.f32.vlgmr.msra.gmra.mxu2 %vm5004_vm12, %v6433_v11  ;;  %v6441_v22 = vsel %vm258_vm2, %v6433_v11, %v4984_v57  ;;  %v6444_v38 = vrot.slane %v6433_v11, 6 }
 0x35f   :  { %2002 = vmatpush.msra.mxu2 %v5920_v39  ;;  %1818 = vmatmul.f32.vlgmr.msra.gmra.mxu0 %v6441_v22  ;;  %v8994_v39 = vld [vmem:[#allocation36_spill] sm:$0xff] }
 0x360   :  { %1878 = vmatmul.f32.vlgmr.msra.gmra.mxu3 %v6441_v22  ;;  %1962 = vmatpush.msra.mxu0 %v5925_v14  ;;  %v8995_v14 = vld [vmem:[#allocation30_spill] sm:$0xff] }
 0x361   :  { %2022 = vmatpush.msra.mxu3 %v5928_v50  ;;  %3547 = vmatmul.msk.f32.vlgmr.msra.gmra.mxu1 %vm5004_vm12, %v6444_v38  ;;  %v8996_v50 = vld [vmem:[#allocation31_spill] sm:$0xff] }
 0x362   :  { %1982 = vmatpush.msra.mxu1 %v5934_v51  ;;  %2003 = vmatpush.msra.mxu2 %v5937_v21  ;;  %v8997_v51 = vld [vmem:[#allocation33_spill] sm:$0xff]  ;;  %v8998_v21 = vld [vmem:[#allocation44_spill] sm:$0xff] }
 0x363   :  { %1963 = vmatpush.msra.mxu0 %v5940_v35  ;;  %2023 = vmatpush.msra.mxu3 %v5943_v2  ;;  %v8999_v35 = vld [vmem:[#allocation34_spill] sm:$0xff]  ;;  %v9000_v2 = vld [vmem:[#allocation35_spill] sm:$0xff] }
 0x364   :  { %1983 = vmatpush.msra.mxu1 %v5946_v28  ;;  %2004 = vmatpush.msra.mxu2 %v5949_v29  ;;  %v9001_v28 = vld [vmem:[#allocation37_spill] sm:$0xff] }
 0x365   :  { %1964 = vmatpush.msra.mxu0 %v5952_v55  ;;  %2024 = vmatpush.msra.mxu3 %v5955_v44  ;;  %v9002_v29 = vld [vmem:[#allocation45_spill] sm:$0xff]  ;;  %v9003_v55 = vld [vmem:[#allocation38_spill] sm:$0xff]  ;;  %v9004_v44 = vld [vmem:[#allocation43_spill] sm:$0xff] }
 0x366   :  { %1984 = vmatpush.msra.mxu1 %v5958_v23  ;;  %2005 = vmatpush.msra.mxu2 %v5961_v10  ;;  %v9005_v23 = vld [vmem:[#allocation46_spill] sm:$0xff]  ;;  %v9006_v10 = vld [vmem:[#allocation47_spill] sm:$0xff] }
 0x367   :  { %1965 = vmatpush.msra.mxu0 %v5964_v26  ;;  %2025 = vmatpush.msra.mxu3 %v5967_v19  ;;  %v9007_v26 = vld [vmem:[#allocation24_spill] sm:$0xff]  ;;  %v9008_v19 = vld [vmem:[#allocation25_spill] sm:$0xff] }
 0x368   :  { %1938 = vmatmul.f32.vlgmr.msrb.gmra.mxu2 %v6441_v22  ;;  %1985 = vmatpush.msra.mxu1 %v5971_v31  ;;  %v9009_v31 = vld [vmem:[#allocation66_spill] sm:$0xff] }
 0x369   :  { %2006 = vmatpush.msra.mxu2 %v5974_v27  ;;  %3551 = vmatmul.msk.f32.vlgmr.msrb.gmra.mxu0 %vm5004_vm12, %v6444_v38  ;;  %v9010_v27 = vld [vmem:[#allocation54_spill] sm:$0xff] }
 0x36a   :  { %3555 = vmatmul.msk.f32.vlgmr.msrb.gmra.mxu3 %vm5004_vm12, %v6444_v38  ;;  %1966 = vmatpush.msra.mxu0 %v8994_v39  ;;  %v9043_v39 = vld [vmem:[#allocation92_spill] sm:$0xff] }
 0x36b   :  { %2026 = vmatpush.msra.mxu3 %v8995_v14  ;;  %3553 = vmatmul.msk.f32.vlgmr.msrb.gmra.mxu1 %vm5004_vm12, %v6433_v11  ;;  %v9044_v14 = vld [vmem:[#allocation93_spill] sm:$0xff] }
 0x36c   :  { %1986 = vmatpush.msra.mxu1 %v8996_v50  ;;  %2007 = vmatpush.msra.mxu2 %v8997_v51  ;;  %v9045_v50 = vld [vmem:[#allocation94_spill] sm:$0xff]  ;;  %v9046_v51 = vld [vmem:[#allocation95_spill] sm:$0xff] }
 0x36d   :  { %1967 = vmatpush.msra.mxu0 %v8998_v21  ;;  %2027 = vmatpush.msra.mxu3 %v8999_v35  ;;  %v9050_v21 = vld [vmem:[#allocation100_spill] sm:$0xff]  ;;  %v9051_v35 = vld [vmem:[#allocation101_spill] sm:$0xff] }
 0x36e   :  { %1987 = vmatpush.msra.mxu1 %v9000_v2  ;;  %2008 = vmatpush.msra.mxu2 %v9001_v28  ;;  %v9052_v2 = vld [vmem:[#allocation102_spill] sm:$0xff]  ;;  %v9053_v28 = vld [vmem:[#allocation103_spill] sm:$0xff] }
 0x36f   :  { %1968 = vmatpush.msra.mxu0 %v9002_v29  ;;  %2028 = vmatpush.msra.mxu3 %v9003_v55  ;;  %v9054_v29 = vld [vmem:[#allocation104_spill] sm:$0xff]  ;;  %v9055_v55 = vld [vmem:[#allocation105_spill] sm:$0xff] }
 0x370   :  { %1988 = vmatpush.msra.mxu1 %v9004_v44  ;;  %2009 = vmatpush.msra.mxu2 %v9005_v23  ;;  %v9056_v44 = vld [vmem:[#allocation118_spill] sm:$0xff] }
 0x371   :  { %1969 = vmatpush.msra.mxu0 %v9006_v10  ;;  %2029 = vmatpush.msra.mxu3 %v9007_v26  ;;  %v9057_v23 = vld [vmem:[#allocation106_spill] sm:$0xff]  ;;  %v9058_v10 = vld [vmem:[#allocation107_spill] sm:$0xff]  ;;  %v9059_v26 = vld [vmem:[#allocation108_spill] sm:$0xff] }
 0x372   :  { %1989 = vmatpush.msra.mxu1 %v9008_v19  ;;  %2010 = vmatpush.msra.mxu2 %v9009_v31  ;;  %v9060_v19 = vld [vmem:[#allocation122_spill] sm:$0xff] }
 0x373   :  { %1970 = vmatpush.msra.mxu0 %v9010_v27  ;;  %2030 = vmatpush.msra.mxu3 %v9011_v3  ;;  %v9061_v31 = vld [vmem:[#allocation110_spill] sm:$0xff]  ;;  %v9062_v27 = vld [vmem:[#allocation113_spill] sm:$0xff] }
 0x374   :  { %1990 = vmatpush.msra.mxu1 %v9012_v43  ;;  %2011 = vmatpush.msra.mxu2 %v9013_v20  ;;  %v9063_v3 = vld [vmem:[#allocation114_spill] sm:$0xff]  ;;  %v9065_v20 = vld [vmem:[#allocation115_spill] sm:$0xff] }
 0x375   :  { %1971 = vmatpush.msra.mxu0 %v9014_v63  ;;  %2031 = vmatpush.msra.mxu3 %v9015_v4  ;;  %v9064_v43 = vld [vmem:[#allocation126_spill] sm:$0xff]  ;;  %v9066_v63 = vld [vmem:[#allocation116_spill] sm:$0xff]  ;;  %v9067_v4 = vld [vmem:[#allocation117_spill] sm:$0xff] }
 0x376   :  { %1991 = vmatpush.msra.mxu1 %v9016_v8  ;;  %2012 = vmatpush.msra.mxu2 %v9017_v9  ;;  %v9068_v8 = vld [vmem:[#allocation119_spill] sm:$0xff]  ;;  %v9069_v9 = vld [vmem:[#allocation120_spill] sm:$0xff] }
 0x377   :  { %1972 = vmatpush.msra.mxu0 %v9018_v13  ;;  %2032 = vmatpush.msra.mxu3 %v9019_v41  ;;  %v9070_v13 = vld [vmem:[#allocation121_spill] sm:$0xff]  ;;  %v9071_v41 = vld [vmem:[#allocation123_spill] sm:$0xff] }
 0x378   :  { %1992 = vmatpush.msra.mxu1 %v9020_v32  ;;  %2013 = vmatpush.msra.mxu2 %v9021_v62  ;;  %v9072_v32 = vld [vmem:[#allocation124_spill] sm:$0xff]  ;;  %v9073_v62 = vld [vmem:[#allocation125_spill] sm:$0xff] }
 0x379   :  { %1973 = vmatpush.msra.mxu0 %v9022_v25  ;;  %2033 = vmatpush.msra.mxu3 %v9023_v42  ;;  %v9074_v25 = vld [vmem:[#allocation138_spill] sm:$0xff]  ;;  %v9075_v42 = vld [vmem:[#allocation127_spill] sm:$0xff] }
 0x37a   :  { %1993 = vmatpush.msra.mxu1 %v9024_v45  ;;  %2014 = vmatpush.msra.mxu2 %v9025_v7  ;;  %v9076_v45 = vld [vmem:[#allocation130_spill] sm:$0xff]  ;;  %v9077_v7 = vld [vmem:[#allocation131_spill] sm:$0xff] }
 0x37b   :  { %1974 = vmatpush.msra.mxu0 %v9026_v60  ;;  %2034 = vmatpush.msra.mxu3 %v9027_v5  ;;  %v9078_v60 = vld [vmem:[#allocation142_spill] sm:$0xff]  ;;  %v9079_v5 = vld [vmem:[#allocation132_spill] sm:$0xff] }
 0x37c   :  { %1994 = vmatpush.msra.mxu1 %v9028_v53  ;;  %2015 = vmatpush.msra.mxu2 %v9029_v47  ;;  %v9080_v53 = vld [vmem:[#allocation133_spill] sm:$0xff]  ;;  %v9081_v47 = vld [vmem:[#allocation134_spill] sm:$0xff] }
 0x37d   :  { %1975 = vmatpush.msra.mxu0 %v9030_v17  ;;  %2035 = vmatpush.msra.mxu3 %v9031_v12  ;;  %v9082_v17 = vld [vmem:[#allocation146_spill] sm:$0xff]  ;;  %v9083_v12 = vld [vmem:[#allocation135_spill] sm:$0xff] }
 0x37e   :  { %1995 = vmatpush.msra.mxu1 %v9032_v61  ;;  %2016 = vmatpush.msra.mxu2 %v6103_v24  ;;  %v9038_v24 = vld [vmem:[#allocation84_spill] sm:$0xff] }
 0x37f   :  { %1976 = vmatpush.msra.mxu0 %v9033_v54  ;;  %2036 = vmatpush.msra.mxu3 %v6109_v46  ;;  %v9039_v46 = vld [vmem:[#allocation85_spill] sm:$0xff]  ;;  %v9084_v61 = vld [vmem:[#allocation136_spill] sm:$0xff] }
 0x380   :  { %1996 = vmatpush.msra.mxu1 %v9034_v15  ;;  %2017 = vmatpush.msra.mxu2 %v9035_v36  ;;  %v9085_v54 = vld [vmem:[#allocation137_spill] sm:$0xff]  ;;  %v9086_v15 = vld [vmem:[#allocation150_spill] sm:$0xff]  ;;  %v9087_v36 = vld [vmem:[#allocation139_spill] sm:$0xff] }
 0x381   :  { %1977 = vmatpush.msra.mxu0 %v9036_v30  ;;  %3559 = vmatmul.msk.f32.vlgmr.msra.gmra.mxu2 %vm5004_vm12, %v6444_v38  ;;  %v9042_v38 = vld [vmem:[#allocation89_spill] sm:$0xff]  ;;  %v9088_v30 = vld [vmem:[#allocation140_spill] sm:$0xff] }
 0x382   :  { %2037 = vmatpush.msra.mxu3 %v9037_v33  ;;  %3557 = vmatmul.msk.f32.vlgmr.msra.gmra.mxu0 %vm5004_vm12, %v6433_v11  ;;  %v9089_v33 = vld [vmem:[#allocation141_spill] sm:$0xff] }
 0x383   :  { %1997 = vmatpush.msra.mxu1 %v9038_v24  ;;  %3561 = vmatmul.msk.f32.vlgmr.msra.gmra.mxu3 %vm5004_vm12, %v6433_v11  ;;  %v9047_v11 = vld [vmem:[#allocation96_spill] sm:$0xff]  ;;  %v9090_v24 = vld [vmem:[#allocation154_spill] sm:$0xff] }
 0x384   :  { %1998 = vmatmul.f32.vlgmr.msra.gmra.mxu1 %v6441_v22  ;;  %2169 = vmatpush.msrb.mxu2 %v6137_v34  ;;  %v9048_v22 = vld [vmem:[#allocation99_spill] sm:$0xff]  ;;  %v9049_v34 = vld [vmem:[#allocation109_spill] sm:$0xff] }
 0x385   :  { %2129 = vmatpush.msrb.mxu0 %v9039_v46  ;;  %2189 = vmatpush.msrb.mxu3 %v9040_v59  ;;  %v9091_v46 = vld [vmem:[#allocation143_spill] sm:$0xff]  ;;  %v9092_v59 = vld [vmem:[#allocation144_spill] sm:$0xff] }
 0x386   :  { %2149 = vmatpush.msrb.mxu1 %v9041_v16  ;;  %2170 = vmatpush.msrb.mxu2 %v9042_v38  ;;  %v9093_v16 = vld [vmem:[#allocation145_spill] sm:$0xff]  ;;  %v9094_v38 = vld [vmem:[#allocation158_spill] sm:$0xff] }
 0x387   :  { %2130 = vmatpush.msrb.mxu0 %v9043_v39  ;;  %2190 = vmatpush.msrb.mxu3 %v9044_v14  ;;  %v9095_v39 = vld [vmem:[#allocation147_spill] sm:$0xff]  ;;  %v9096_v14 = vld [vmem:[#allocation148_spill] sm:$0xff] }
 0x388   :  { %2150 = vmatpush.msrb.mxu1 %v9045_v50  ;;  %2171 = vmatpush.msrb.mxu2 %v9046_v51  ;;  %v9097_v50 = vld [vmem:[#allocation149_spill] sm:$0xff]  ;;  %v9098_v51 = vld [vmem:[#allocation162_spill] sm:$0xff] }
 0x389   :  { %2131 = vmatpush.msrb.mxu0 %v9047_v11  ;;  %2191 = vmatpush.msrb.mxu3 %v9048_v22  ;;  %v9099_v11 = vld [vmem:[#allocation151_spill] sm:$0xff]  ;;  %v9100_v22 = vld [vmem:[#allocation152_spill] sm:$0xff] }
 0x38a   :  { %2151 = vmatpush.msrb.mxu1 %v9049_v34  ;;  %2172 = vmatpush.msrb.mxu2 %v9050_v21  ;;  %v9101_v34 = vld [vmem:[#allocation153_spill] sm:$0xff]  ;;  %v9102_v21 = vld [vmem:[#allocation166_spill] sm:$0xff] }
 0x38b   :  { %2132 = vmatpush.msrb.mxu0 %v9051_v35  ;;  %2192 = vmatpush.msrb.mxu3 %v9052_v2  ;;  %v9103_v35 = vld [vmem:[#allocation155_spill] sm:$0xff]  ;;  %v9104_v2 = vld [vmem:[#allocation156_spill] sm:$0xff] }
 0x38c   :  { %2152 = vmatpush.msrb.mxu1 %v9053_v28  ;;  %2173 = vmatpush.msrb.mxu2 %v9054_v29  ;;  %v6603_v28 = vld [vmem:[#allocation6 + $0x1d0] sm:$0xff]  ;;  %v9105_v29 = vld [vmem:[#allocation168_spill] sm:$0xff] }
 0x38d   :  { %2133 = vmatpush.msrb.mxu0 %v9055_v55  ;;  %2193 = vmatpush.msrb.mxu3 %v9056_v44  ;;  %v9106_v55 = vld [vmem:[#allocation157_spill] sm:$0xff] }
 0x38e   :  { %2153 = vmatpush.msrb.mxu1 %v9057_v23  ;;  %2174 = vmatpush.msrb.mxu2 %v9058_v10  ;;  %v6609_v44 = vld [vmem:[#allocation6 + $0x1b0] sm:$0xff]  ;;  %v9108_v23 = vld [vmem:[#allocation160_spill] sm:$0xff] }
 0x38f   :  { %2134 = vmatpush.msrb.mxu0 %v9059_v26  ;;  %2194 = vmatpush.msrb.mxu3 %v9060_v19  ;;  %v6615_v10 = vld [vmem:[#allocation6 + $0x190] sm:$0xff]  ;;  %v6630_v26 = vld [vmem:[#allocation6 + $0x348] sm:$0xff] }
 0x390   :  { %2154 = vmatpush.msrb.mxu1 %v9061_v31  ;;  %2175 = vmatpush.msrb.mxu2 %v9062_v27  ;;  %v6651_v19 = vld [vmem:[#allocation6 + $0x110] sm:$0xff]  ;;  %v6654_v31 = vld [vmem:[#allocation6 + $0x308] sm:$0xff] }
 0x391   :  { %2135 = vmatpush.msrb.mxu0 %v9063_v3  ;;  %2195 = vmatpush.msrb.mxu3 %v9064_v43  ;;  %v6657_v27 = vld [vmem:[#allocation6 + $0x310] sm:$0xff]  ;;  %v6660_v3 = vld [vmem:[#allocation6 + $0x508] sm:$0xff] }
 0x392   :  { %2155 = vmatpush.msrb.mxu1 %v9065_v20  ;;  %2176 = vmatpush.msrb.mxu2 %v9066_v63  ;;  %v6663_v43 = vld [vmem:[#allocation6 + $0xf0] sm:$0xff]  ;;  %v6666_v20 = vld [vmem:[#allocation6 + $0x2e8] sm:$0xff] }
 0x393   :  { %2136 = vmatpush.msrb.mxu0 %v9067_v4  ;;  %2196 = vmatpush.msrb.mxu3 %v9068_v8  ;;  %v6669_v63 = vld [vmem:[#allocation6 + $0x2f0] sm:$0xff]  ;;  %v6672_v4 = vld [vmem:[#allocation6 + $0x4e8] sm:$0xff] }
 0x394   :  { %2156 = vmatpush.msrb.mxu1 %v9069_v9  ;;  %2177 = vmatpush.msrb.mxu2 %v9070_v13  ;;  %v6675_v8 = vld [vmem:[#allocation6 + $0xd0] sm:$0xff]  ;;  %v6678_v9 = vld [vmem:[#allocation6 + $0x2c8] sm:$0xff] }
 0x395   :  { %2137 = vmatpush.msrb.mxu0 %v9071_v41  ;;  %2197 = vmatpush.msrb.mxu3 %v9072_v32  ;;  %v6681_v13 = vld [vmem:[#allocation6 + $0x2d0] sm:$0xff]  ;;  %v6684_v41 = vld [vmem:[#allocation6 + $0x4c8] sm:$0xff] }
 0x396   :  { %2157 = vmatpush.msrb.mxu1 %v9073_v62  ;;  %2178 = vmatpush.msrb.mxu2 %v9074_v25  ;;  %v6687_v32 = vld [vmem:[#allocation6 + $0xb0] sm:$0xff]  ;;  %v6690_v62 = vld [vmem:[#allocation6 + $0x2a8] sm:$0xff] }
 0x397   :  { %2138 = vmatpush.msrb.mxu0 %v9075_v42  ;;  %2198 = vmatpush.msrb.mxu3 %v9076_v45  ;;  %v6693_v25 = vld [vmem:[#allocation6 + $0x2b0] sm:$0xff]  ;;  %v6696_v42 = vld [vmem:[#allocation6 + $0x4a8] sm:$0xff] }
 0x398   :  { %2158 = vmatpush.msrb.mxu1 %v9077_v7  ;;  %2179 = vmatpush.msrb.mxu2 %v9078_v60  ;;  %v6699_v45 = vld [vmem:[#allocation6 + $0x90] sm:$0xff]  ;;  %v6702_v7 = vld [vmem:[#allocation6 + $0x288] sm:$0xff] }
 0x399   :  { %2139 = vmatpush.msrb.mxu0 %v9079_v5  ;;  %2199 = vmatpush.msrb.mxu3 %v9080_v53  ;;  %v6705_v60 = vld [vmem:[#allocation6 + $0x290] sm:$0xff]  ;;  %v6708_v5 = vld [vmem:[#allocation6 + $0x488] sm:$0xff] }
 0x39a   :  { %2159 = vmatpush.msrb.mxu1 %v9081_v47  ;;  %2180 = vmatpush.msrb.mxu2 %v9082_v17  ;;  %v6711_v53 = vld [vmem:[#allocation6 + $0x70] sm:$0xff]  ;;  %v6714_v47 = vld [vmem:[#allocation6 + $0x268] sm:$0xff] }
 0x39b   :  { %2140 = vmatpush.msrb.mxu0 %v9083_v12  ;;  %2200 = vmatpush.msrb.mxu3 %v9084_v61  ;;  %v6717_v17 = vld [vmem:[#allocation6 + $0x270] sm:$0xff]  ;;  %v6720_v12 = vld [vmem:[#allocation6 + $0x468] sm:$0xff] }
 0x39c   :  { %2160 = vmatpush.msrb.mxu1 %v9085_v54  ;;  %2181 = vmatpush.msrb.mxu2 %v9086_v15  ;;  %9109 = vst [vmem:[#allocation161_spill] sm:$0xff] %v6720_v12  ;;  %v6723_v61 = vld [vmem:[#allocation6 + $0x50] sm:$0xff]  ;;  %v6726_v54 = vld [vmem:[#allocation6 + $0x248] sm:$0xff] }
 0x39d   :  { %2141 = vmatpush.msrb.mxu0 %v9087_v36  ;;  %2201 = vmatpush.msrb.mxu3 %v9088_v30  ;;  %9110 = vst [vmem:[#allocation163_spill] sm:$0xff] %v6723_v61  ;;  %v6729_v15 = vld [vmem:[#allocation6 + $0x250] sm:$0xff]  ;;  %v6732_v36 = vld [vmem:[#allocation6 + $0x448] sm:$0xff] }
 0x39e   :  { %2161 = vmatpush.msrb.mxu1 %v9089_v33  ;;  %2182 = vmatpush.msrb.mxu2 %v9090_v24  ;;  %9111 = vst [vmem:[#allocation164_spill] sm:$0xff] %v6726_v54  ;;  %v6735_v30 = vld [vmem:[#allocation6 + $0x30] sm:$0xff]  ;;  %v6738_v33 = vld [vmem:[#allocation6 + $0x228] sm:$0xff] }
 0x39f   :  { %2142 = vmatpush.msrb.mxu0 %v9091_v46  ;;  %2202 = vmatpush.msrb.mxu3 %v9092_v59  ;;  %9112 = vst [vmem:[#allocation165_spill] sm:$0xff] %v6729_v15  ;;  %v6741_v24 = vld [vmem:[#allocation6 + $0x230] sm:$0xff]  ;;  %v6744_v46 = vld [vmem:[#allocation6 + $0x428] sm:$0xff] }
 0x3a0   :  { %2162 = vmatpush.msrb.mxu1 %v9093_v16  ;;  %2183 = vmatpush.msrb.mxu2 %v9094_v38  ;;  %9113 = vst [vmem:[#allocation167_spill] sm:$0xff] %v6732_v36  ;;  %v6747_v59 = vld [vmem:[#allocation6 + $0x10] sm:$0xff]  ;;  %v6750_v16 = vld [vmem:[#allocation6 + $0x208] sm:$0xff] }
 0x3a1   :  { %2143 = vmatpush.msrb.mxu0 %v9095_v39  ;;  %2203 = vmatpush.msrb.mxu3 %v9096_v14  ;;  %9114 = vst [vmem:[#allocation169_spill] sm:$0xff] %v6735_v30  ;;  %v6753_v38 = vld [vmem:[#allocation6 + $0x210] sm:$0xff]  ;;  %v6756_v39 = vld [vmem:[#allocation6 + $0x408] sm:$0xff] }
 0x3a2   :  { %2163 = vmatpush.msrb.mxu1 %v9097_v50  ;;  %2184 = vmatpush.msrb.mxu2 %v9098_v51  ;;  %9115 = vst [vmem:[#allocation170_spill] sm:$0xff] %v6738_v33  ;;  %v9122_v50 = vld [vmem:[#allocation97_spill] sm:$0xff] }
 0x3a3   :  { %2144 = vmatpush.msrb.mxu0 %v9099_v11  ;;  %2204 = vmatpush.msrb.mxu3 %v9100_v22  ;;  %9116 = vst [vmem:[#allocation171_spill] sm:$0xff] %v6741_v24 }
 0x3a4   :  { %2249 = vmatpush.msra.mxu2 %v9101_v34  ;;  %2164 = vmatpush.msrb.mxu1 %v9102_v21  ;;  %9117 = vst [vmem:[#allocation77_spill] sm:$0xff] %v6744_v46 }
 0x3a5   :  { %2209 = vmatpush.msra.mxu0 %v6332_v49  ;;  %2269 = vmatpush.msra.mxu3 %v9103_v35  ;;  %v9107_v49 = vld [vmem:[#allocation159_spill] sm:$0xff]  ;;  %9118 = vst [vmem:[#allocation78_spill] sm:$0xff] %v6747_v59 }
 0x3a6   :  { %2229 = vmatpush.msra.mxu1 %v9104_v2  ;;  %2250 = vmatpush.msra.mxu2 %v6603_v28  ;;  %9119 = vst [vmem:[#allocation39_spill] sm:$0xff] %v6750_v16 }
 0x3a7   :  { %2210 = vmatpush.msra.mxu0 %v6342_v6  ;;  %2270 = vmatpush.msra.mxu3 %v9105_v29  ;;  %v6621_v6 = vld [vmem:[#allocation6 + $0x170] sm:$0xff]  ;;  %9120 = vst [vmem:[#allocation40_spill] sm:$0xff] %v6753_v38 }
 0x3a8   :  { %2230 = vmatpush.msra.mxu1 %v9106_v55  ;;  %2251 = vmatpush.msra.mxu2 %v6609_v44  ;;  %9121 = vst [vmem:[#allocation16_spill] sm:$0xff] %v6756_v39  ;;  %v9123_v29 = vld [vmem:[#allocation98_spill] sm:$0xff] }
 0x3a9   :  { %2211 = vmatpush.msra.mxu0 %v6352_v58  ;;  %2271 = vmatpush.msra.mxu3 %v9107_v49  ;;  %v6627_v58 = vld [vmem:[#allocation6 + $0x150] sm:$0xff] }
 0x3aa   :  { %2231 = vmatpush.msra.mxu1 %v9108_v23  ;;  %2252 = vmatpush.msra.mxu2 %v6615_v10 }
 0x3ab   :  { %2212 = vmatpush.msra.mxu0 %v6362_v18  ;;  %2272 = vmatpush.msra.mxu3 %v6365_v0  ;;  %v6633_v18 = vld [vmem:[#allocation6 + $0x350] sm:$0xff]  ;;  %v6636_v0 = vld [vmem:[#allocation6 + $0x548] sm:$0xff] }
 0x3ac   :  { %2232 = vmatpush.msra.mxu1 %v6368_v37  ;;  %2253 = vmatpush.msra.mxu2 %v6621_v6  ;;  %v6645_v37 = vld [vmem:[#allocation6 + $0x330] sm:$0xff] }
 0x3ad   :  { %2213 = vmatpush.msra.mxu0 %v6372_v52  ;;  %2273 = vmatpush.msra.mxu3 %v6375_v48  ;;  %v6639_v52 = vld [vmem:[#allocation6 + $0x130] sm:$0xff]  ;;  %v6642_v48 = vld [vmem:[#allocation6 + $0x328] sm:$0xff] }
 0x3ae   :  { %2233 = vmatpush.msra.mxu1 %v6378_v56  ;;  %2254 = vmatpush.msra.mxu2 %v6627_v58  ;;  %v6648_v56 = vld [vmem:[#allocation6 + $0x528] sm:$0xff] }
 0x3af   :  { %2214 = vmatpush.msra.mxu0 %v6630_v26  ;;  %2274 = vmatpush.msra.mxu3 %v6633_v18 }
 0x3b0   :  { %2234 = vmatpush.msra.mxu1 %v6636_v0  ;;  %2255 = vmatpush.msra.mxu2 %v6639_v52 }
 0x3b1   :  { %2215 = vmatpush.msra.mxu0 %v6642_v48  ;;  %2275 = vmatpush.msra.mxu3 %v6645_v37 }
 0x3b2   :  { %2235 = vmatpush.msra.mxu1 %v6648_v56  ;;  %2256 = vmatpush.msra.mxu2 %v6651_v19 }
 0x3b3   :  { %2216 = vmatpush.msra.mxu0 %v6654_v31  ;;  %2276 = vmatpush.msra.mxu3 %v6657_v27 }
 0x3b4   :  { %2236 = vmatpush.msra.mxu1 %v6660_v3  ;;  %2257 = vmatpush.msra.mxu2 %v6663_v43 }
 0x3b5   :  { %2217 = vmatpush.msra.mxu0 %v6666_v20  ;;  %2277 = vmatpush.msra.mxu3 %v6669_v63 }
 0x3b6   :  { %2237 = vmatpush.msra.mxu1 %v6672_v4  ;;  %2258 = vmatpush.msra.mxu2 %v6675_v8 }
 0x3b7   :  { %2218 = vmatpush.msra.mxu0 %v6678_v9  ;;  %2278 = vmatpush.msra.mxu3 %v6681_v13 }
 0x3b8   :  { %2238 = vmatpush.msra.mxu1 %v6684_v41  ;;  %2259 = vmatpush.msra.mxu2 %v6687_v32 }
 0x3b9   :  { %2219 = vmatpush.msra.mxu0 %v6690_v62  ;;  %2279 = vmatpush.msra.mxu3 %v6693_v25 }
 0x3ba   :  { %2239 = vmatpush.msra.mxu1 %v6696_v42  ;;  %2260 = vmatpush.msra.mxu2 %v6699_v45 }
 0x3bb   :  { %2220 = vmatpush.msra.mxu0 %v6702_v7  ;;  %2280 = vmatpush.msra.mxu3 %v6705_v60 }
 0x3bc   :  { %2240 = vmatpush.msra.mxu1 %v6708_v5  ;;  %2261 = vmatpush.msra.mxu2 %v6711_v53 }
 0x3bd   :  { %2221 = vmatpush.msra.mxu0 %v6714_v47  ;;  %2281 = vmatpush.msra.mxu3 %v6717_v17 }
 0x3be   :  { %2241 = vmatpush.msra.mxu1 %v6720_v12  ;;  %2262 = vmatpush.msra.mxu2 %v6723_v61 }
 0x3bf   :  { %2222 = vmatpush.msra.mxu0 %v6726_v54  ;;  %2282 = vmatpush.msra.mxu3 %v6729_v15 }
 0x3c0   :  { %2242 = vmatpush.msra.mxu1 %v6732_v36  ;;  %2263 = vmatpush.msra.mxu2 %v6735_v30 }
 0x3c1   :  { %2223 = vmatpush.msra.mxu0 %v6738_v33  ;;  %2283 = vmatpush.msra.mxu3 %v6741_v24  ;;  %v9125_v33 = vld [vmem:[#allocation49_spill] sm:$0xff] }
 0x3c2   :  { %2243 = vmatpush.msra.mxu1 %v6744_v46  ;;  %2264 = vmatpush.msra.mxu2 %v6747_v59 }
 0x3c3   :  { %2224 = vmatpush.msra.mxu0 %v6750_v16  ;;  %2284 = vmatpush.msra.mxu3 %v6753_v38 }
 0x3c4   :  { %2244 = vmatpush.msra.mxu1 %v6756_v39 }
 0x3dc   :  { %v1819_v14 = vpop.f32.mrf.mxu0 }
 0x3dd   :  { %v1820_v51 = vadd.f32 %v1819_v14, %v9122_v50 }
 0x3de   :  { %v1839_v11 = vpop.f32.mrf.mxu1 }
 0x3df   :  { %v1840_v22 = vadd.f32 %v1839_v11, %v1820_v51  ;;  %v9124_v11 = vld [vmem:[#allocation48_spill] sm:$0xff] }
 0x3e1   :  { %v1859_v34 = vpop.f32.mrf.mxu2 }
 0x3e2   :  { %v1860_v21 = vadd.f32 %v1859_v34, %v1840_v22 }
 0x3e3   :  { %v1879_v35 = vpop.f32.mrf.mxu3 }
 0x3e4   :  { %v3562_v2 = vmul.f32 -1.442695, %v1860_v21  ;;  %v1880_v55 = vadd.f32 %v1879_v35, %v9123_v29 }
 0x3e6   :  { %3712 = vpow2.f32 %v3562_v2  ;;  %v1899_v49 = vpop.f32.mrf.mxu0 }
 0x3e7   :  { %v1900_v23 = vadd.f32 %v1899_v49, %v1880_v55 }
 0x3e8   :  { %v1919_v16 = vpop.f32.mrf.mxu1 }
 0x3e9   :  { %v1920_v38 = vadd.f32 %v1919_v16, %v1900_v23 }
 0x3eb   :  { %v3563_v59 = vmul.f32 -1.442695, %v1920_v38  ;;  %v1939_v50 = vpop.f32.mrf.mxu2 }
 0x3ec   :  { %v3713_v46 = vpop.eup %3712  ;;  %v1940_v22 = vadd.f32 %v1939_v50, %v9124_v11 }
 0x3ed   :  { %3714 = vpow2.f32 %v3563_v59  ;;  %v2051_v39 = vadd.f32 1.0, %v3713_v46  ;;  %v1959_v34 = vpop.f32.mrf.mxu3 }
 0x3ee   :  { %v1960_v29 = vadd.f32 %v1959_v34, %v1940_v22 }
 0x3ef   :  { %3716 = vrcp.f32 %v2051_v39  ;;  %v2065_v22 = vand.u32 2147483648, %v2051_v39  ;;  %vm2059_vm14 = vweird.f32 %v2051_v39 }
 0x3f3   :  { %v3715_v24 = vpop.eup %3714 }
 0x3f4   :  { %v2052_v14 = vadd.f32 1.0, %v3715_v24 }
 0x3f5   :  { %v3717_v51 = vpop.eup %3716 }
 0x3f6   :  { %3718 = vrcp.f32 %v2052_v14  ;;  %v2055_v35 = vmul.f32 %v3717_v51, %v2051_v39  ;;  %v2080_v61 = vand.u32 2147483648, %v2052_v14  ;;  %vm2060_vm10 = vweird.f32 %v3717_v51 }
 0x3f7   :  { %vm2074_vm11 = vweird.f32 %v2052_v14  ;;  %v2078_v34 = vand.u32 2147483647, %v2052_v14  ;;  %vm2061_vm15 = vmor %vm2059_vm14, %vm2060_vm10 }
 0x3f8   :  { %v2056_v16 = vsub.f32 1.0, %v2055_v35 }
 0x3f9   :  { %vm2079_vm0 = vcmp.eq.f32.partialorder %v2078_v34, 8.507059e+37 }
 0x3fa   :  { %v2057_v36 = vmul.f32 %v3717_v51, %v2056_v16 }
 0x3fc   :  { %v3719_v21 = vpop.eup %3718  ;;  %v2058_v12 = vadd.f32 %v3717_v51, %v2057_v36 }
 0x3fd   :  { %v2070_v2 = vmul.f32 %v3719_v21, %v2052_v14  ;;  %vm2075_vm9 = vweird.f32 %v3719_v21 }
 0x3fe   :  { %vm2076_vm13 = vmor %vm2074_vm11, %vm2075_vm9 }
 0x3ff   :  { %v2071_v55 = vsub.f32 1.0, %v2070_v2  ;;  %v1979_v49 = vpop.f32.mrf.mxu0  ;;  %v2063_v2 = vand.u32 2147483647, %v2051_v39 }
 0x400   :  { %v1980_v38 = vadd.f32 %v1979_v49, %v1960_v29  ;;  %v2066_v49 = vor.u32 1.1754944e-38, %v2065_v22 }
 0x401   :  { %v1999_v23 = vpop.f32.mrf.mxu1  ;;  %v2072_v46 = vmul.f32 %v3719_v21, %v2071_v55  ;;  %v2081_v55 = vor.u32 1.1754944e-38, %v2080_v61  ;;  %vm2064_vm1 = vcmp.eq.f32.partialorder %v2063_v2, 8.507059e+37  ;;  %v6785_v2 = vld [vmem:[#allocation6 + $0x5f0] sm:$0xff] }
 0x402   :  { %v3564_v59 = vmul.f32 -1.442695, %v1980_v38  ;;  %v2000_v30 = vadd.f32 %v1999_v23, %v9125_v33 }
 0x403   :  { %v2073_v11 = vadd.f32 %v3719_v21, %v2072_v46 }
 0x404   :  { %3720 = vpow2.f32 %v3564_v59  ;;  %v2019_v24 = vpop.f32.mrf.mxu2 }
 0x405   :  { %v2020_v15 = vadd.f32 %v2019_v24, %v2000_v30  ;;  %v2077_v29 = vsel %vm2076_vm13, %v3719_v21, %v2073_v11  ;;  %v2062_v30 = vsel %vm2061_vm15, %v3717_v51, %v2058_v12 }
 0x406   :  { %v2039_v54 = vpop.f32.mrf.mxu3  ;;  %v2067_v36 = vsel %vm2064_vm1, %v2066_v49, %v2062_v30  ;;  %v6800_v30 = vld [vmem:[#allocation6 + $0x5d0] sm:$0xff]  ;;  %v6803_v49 = vld [vmem:[#allocation6 + $0x5d8] sm:$0xff] }
 0x407   :  { %v2040_v50 = vadd.f32 %v2039_v54, %v2020_v15  ;;  %v2082_v54 = vsel %vm2079_vm0, %v2081_v55, %v2077_v29  ;;  %v6794_v29 = vld [vmem:[#allocation6 + $0x1f8] sm:$0xff] }
 0x408   :  { %v2100_v14 = vmul.f32 %v2082_v54, %v6430_v40  ;;  %v6797_v55 = vld [vmem:[#allocation6 + $0x3d8] sm:$0xff] }
 0x409   :  { %3722 = vtanh.f32 %v2040_v50  ;;  %v6806_v54 = vld [vmem:[#allocation6 + $0x1d8] sm:$0xff] }
 0x40a   :  { %v3721_v35 = vpop.eup %3720 }
 0x40b   :  { %v2053_v33 = vadd.f32 1.0, %v3721_v35  ;;  %v6780_v35 = vld [vmem:[#allocation6 + $0x3f8] sm:$0xff] }
 0x40d   :  { %3724 = vrcp.f32 %v2053_v33  ;;  %v2095_v46 = vand.u32 2147483648, %v2053_v33  ;;  %v2093_v12 = vand.u32 2147483647, %v2053_v33  ;;  %vm2089_vm5 = vweird.f32 %v2053_v33 }
 0x40f   :  { %v3723_v15 = vpop.eup %3722  ;;  %v2096_v21 = vor.u32 1.1754944e-38, %v2095_v46  ;;  %vm2094_vm7 = vcmp.eq.f32.partialorder %v2093_v12, 8.507059e+37  ;;  %v6831_v46 = vld [vmem:[#allocation6 + $0x198] sm:$0xff]  ;;  %v6843_v12 = vld [vmem:[#allocation6 + $0x570] sm:$0xff] }
 0x410   :  { %v2101_v16 = vmul.f32 %v3723_v15, %v2067_v36  ;;  %v6809_v15 = vld [vmem:[#allocation6 + $0x3b8] sm:$0xff]  ;;  %v6812_v36 = vld [vmem:[#allocation6 + $0x5b0] sm:$0xff]  ;;  %9126 = vst [vmem:[#allocation22_spill] sm:$0xff] %v6843_v12 }
 0x412   :  { %v6764_v23 = vadd.f32 %v2101_v16, %v2100_v14  ;;  %v6815_v16 = vld [vmem:[#allocation6 + $0x5b8] sm:$0xff] }
 0x413   :  { %v3725_v38 = vpop.eup %3724  ;;  %v6818_v14 = vld [vmem:[#allocation6 + $0x1b8] sm:$0xff] }
 0x414   :  { %v2085_v59 = vmul.f32 %v3725_v38, %v2053_v33  ;;  %3726 = vtanh.f32 %v6764_v23  ;;  %vm2090_vm4 = vweird.f32 %v3725_v38  ;;  %v6788_v33 = vld [vmem:[#allocation6 + $0x5f8] sm:$0xff] }
 0x415   :  { %vm2091_vm6 = vmor %vm2089_vm5, %vm2090_vm4 }
 0x416   :  { %v2086_v39 = vsub.f32 1.0, %v2085_v59  ;;  %v6824_v59 = vld [vmem:[#allocation6 + $0x590] sm:$0xff] }
 0x418   :  { %v2087_v61 = vmul.f32 %v3725_v38, %v2086_v39  ;;  %v6827_v39 = vld [vmem:[#allocation6 + $0x598] sm:$0xff] }
 0x41a   :  { %v2088_v51 = vadd.f32 %v3725_v38, %v2087_v61  ;;  %v3727_v50 = vpop.eup %3726  ;;  %v6834_v61 = vld [vmem:[#allocation6 + $0x378] sm:$0xff] }
 0x41c   :  { %v2092_v24 = vsel %vm2091_vm6, %v3725_v38, %v2088_v51  ;;  %v6821_v38 = vld [vmem:[#allocation6 + $0x398] sm:$0xff] }
 0x41d   :  { %v2097_v11 = vsel %vm2094_vm7, %v2096_v21, %v2092_v24  ;;  %v6846_v51 = vld [vmem:[#allocation6 + $0x578] sm:$0xff] }
 0x41e   :  { %v6767_v40 = vmul.f32 %v3727_v50, %v2097_v11  ;;  %9127 = vst [vmem:[#allocation17_spill] sm:$0xff] %v6846_v51  ;;  %v6852_v21 = vld [vmem:[#allocation6 + $0x178] sm:$0xff]  ;;  %v6858_v50 = vld [vmem:[#allocation6 + $0x550] sm:$0xff] }
 0x41f   :  { %9128 = vst [vmem:[#allocation18_spill] sm:$0xff] %v6852_v21  ;;  %v6855_v24 = vld [vmem:[#allocation6 + $0x358] sm:$0xff] }
 0x420   :  { %3569 = vmatmul.msk.f32.vlgmr.msrb.gmra.mxu2 %vm5004_vm12, %v6767_v40  ;;  %v6775_v22 = vsel %vm258_vm2, %v6767_v40, %v4984_v57  ;;  %v6778_v34 = vrot.slane %v6767_v40, 6  ;;  %9129 = vst [vmem:[#allocation19_spill] sm:$0xff] %v6855_v24  ;;  %v6861_v11 = vld [vmem:[#allocation6 + $0x558] sm:$0xff] }
 0x421   :  { %2329 = vmatpush.msrb.mxu2 %v6780_v35  ;;  %2145 = vmatmul.f32.vlgmr.msrb.gmra.mxu0 %v6775_v22  ;;  %9130 = vst [vmem:[#allocation28_spill] sm:$0xff] %v6858_v50 }
 0x422   :  { %2205 = vmatmul.f32.vlgmr.msrb.gmra.mxu3 %v6775_v22  ;;  %2289 = vmatpush.msrb.mxu0 %v6785_v2  ;;  %9131 = vst [vmem:[#allocation20_spill] sm:$0xff] %v6861_v11 }
 0x423   :  { %2349 = vmatpush.msrb.mxu3 %v6788_v33  ;;  %3567 = vmatmul.msk.f32.vlgmr.msrb.gmra.mxu1 %vm5004_vm12, %v6778_v34 }
 0x424   :  { %2309 = vmatpush.msrb.mxu1 %v6794_v29  ;;  %2330 = vmatpush.msrb.mxu2 %v6797_v55 }
 0x425   :  { %2290 = vmatpush.msrb.mxu0 %v6800_v30  ;;  %2350 = vmatpush.msrb.mxu3 %v6803_v49 }
 0x426   :  { %2310 = vmatpush.msrb.mxu1 %v6806_v54  ;;  %2331 = vmatpush.msrb.mxu2 %v6809_v15 }
 0x427   :  { %2291 = vmatpush.msrb.mxu0 %v6812_v36  ;;  %2351 = vmatpush.msrb.mxu3 %v6815_v16 }
 0x428   :  { %2311 = vmatpush.msrb.mxu1 %v6818_v14  ;;  %2332 = vmatpush.msrb.mxu2 %v6821_v38 }
 0x429   :  { %2292 = vmatpush.msrb.mxu0 %v6824_v59  ;;  %2352 = vmatpush.msrb.mxu3 %v6827_v39 }
 0x42a   :  { %2265 = vmatmul.f32.vlgmr.msra.gmra.mxu2 %v6775_v22  ;;  %2312 = vmatpush.msrb.mxu1 %v6831_v46 }
 0x42b   :  { %2333 = vmatpush.msrb.mxu2 %v6834_v61  ;;  %3571 = vmatmul.msk.f32.vlgmr.msra.gmra.mxu0 %vm5004_vm12, %v6778_v34 }
 0x42c   :  { %3575 = vmatmul.msk.f32.vlgmr.msra.gmra.mxu3 %vm5004_vm12, %v6778_v34  ;;  %2293 = vmatpush.msrb.mxu0 %v6843_v12  ;;  %v6867_v12 = vld [vmem:[#allocation6 + $0x338] sm:$0xff] }
 0x42d   :  { %2353 = vmatpush.msrb.mxu3 %v6846_v51  ;;  %3573 = vmatmul.msk.f32.vlgmr.msra.gmra.mxu1 %vm5004_vm12, %v6767_v40  ;;  %v6864_v51 = vld [vmem:[#allocation6 + $0x158] sm:$0xff]  ;;  %9133 = vst [vmem:[#allocation23_spill] sm:$0xff] %v6867_v12 }
 0x42e   :  { %2313 = vmatpush.msrb.mxu1 %v6852_v21  ;;  %2334 = vmatpush.msrb.mxu2 %v6855_v24  ;;  %9132 = vst [vmem:[#allocation21_spill] sm:$0xff] %v6864_v51  ;;  %v6870_v21 = vld [vmem:[#allocation6 + $0x530] sm:$0xff]  ;;  %v6873_v24 = vld [vmem:[#allocation6 + $0x538] sm:$0xff] }
 0x42f   :  { %2294 = vmatpush.msrb.mxu0 %v6858_v50  ;;  %2354 = vmatpush.msrb.mxu3 %v6861_v11  ;;  %9134 = vst [vmem:[#allocation32_spill] sm:$0xff] %v6870_v21  ;;  %v6876_v50 = vld [vmem:[#allocation6 + $0x138] sm:$0xff] }
 0x430   :  { %2314 = vmatpush.msrb.mxu1 %v6864_v51  ;;  %2335 = vmatpush.msrb.mxu2 %v6867_v12  ;;  %9135 = vst [vmem:[#allocation26_spill] sm:$0xff] %v6873_v24  ;;  %v6879_v11 = vld [vmem:[#allocation6 + $0x318] sm:$0xff]  ;;  %v6882_v51 = vld [vmem:[#allocation6 + $0x510] sm:$0xff] }
 0x431   :  { %2295 = vmatpush.msrb.mxu0 %v6870_v21  ;;  %2355 = vmatpush.msrb.mxu3 %v6873_v24  ;;  %9136 = vst [vmem:[#allocation27_spill] sm:$0xff] %v6876_v50  ;;  %v6885_v12 = vld [vmem:[#allocation6 + $0x518] sm:$0xff] }
 0x432   :  { %2315 = vmatpush.msrb.mxu1 %v6876_v50  ;;  %9137 = vst [vmem:[#allocation29_spill] sm:$0xff] %v6879_v11  ;;  %2336 = vmatpush.msrb.mxu2 %v6879_v11  ;;  %v6888_v21 = vld [vmem:[#allocation6 + $0x118] sm:$0xff]  ;;  %v6894_v50 = vld [vmem:[#allocation6 + $0x4f0] sm:$0xff] }
 0x433   :  { %9138 = vst [vmem:[#allocation90_spill] sm:$0xff] %v6882_v51  ;;  %2296 = vmatpush.msrb.mxu0 %v6882_v51  ;;  %2356 = vmatpush.msrb.mxu3 %v6885_v12  ;;  %v6891_v24 = vld [vmem:[#allocation6 + $0x2f8] sm:$0xff] }
 0x434   :  { %9139 = vst [vmem:[#allocation91_spill] sm:$0xff] %v6885_v12  ;;  %2316 = vmatpush.msrb.mxu1 %v6888_v21  ;;  %2337 = vmatpush.msrb.mxu2 %v6891_v24  ;;  %v6897_v11 = vld [vmem:[#allocation6 + $0x4f8] sm:$0xff] }
 0x435   :  { %9140 = vst [vmem:[#allocation41_spill] sm:$0xff] %v6888_v21  ;;  %2297 = vmatpush.msrb.mxu0 %v6894_v50  ;;  %2357 = vmatpush.msrb.mxu3 %v6897_v11  ;;  %v6900_v51 = vld [vmem:[#allocation6 + $0xf8] sm:$0xff]  ;;  %v6906_v21 = vld [vmem:[#allocation6 + $0x4d0] sm:$0xff] }
 0x436   :  { %9141 = vst [vmem:[#allocation42_spill] sm:$0xff] %v6891_v24  ;;  %2317 = vmatpush.msrb.mxu1 %v6900_v51  ;;  %v6903_v12 = vld [vmem:[#allocation6 + $0x2d8] sm:$0xff] }
 0x437   :  { %9142 = vst [vmem:[#allocation36_spill] sm:$0xff] %v6894_v50  ;;  %2338 = vmatpush.msrb.mxu2 %v6903_v12  ;;  %2298 = vmatpush.msrb.mxu0 %v6906_v21  ;;  %v6909_v24 = vld [vmem:[#allocation6 + $0x4d8] sm:$0xff] }
 0x438   :  { %9143 = vst [vmem:[#allocation30_spill] sm:$0xff] %v6897_v11  ;;  %2358 = vmatpush.msrb.mxu3 %v6909_v24  ;;  %v6912_v50 = vld [vmem:[#allocation6 + $0xd8] sm:$0xff] }
 0x439   :  { %9144 = vst [vmem:[#allocation31_spill] sm:$0xff] %v6900_v51  ;;  %2318 = vmatpush.msrb.mxu1 %v6912_v50  ;;  %v6915_v11 = vld [vmem:[#allocation6 + $0x2b8] sm:$0xff]  ;;  %v6918_v51 = vld [vmem:[#allocation6 + $0x4b0] sm:$0xff] }
 0x43a   :  { %9145 = vst [vmem:[#allocation33_spill] sm:$0xff] %v6903_v12  ;;  %2339 = vmatpush.msrb.mxu2 %v6915_v11  ;;  %2299 = vmatpush.msrb.mxu0 %v6918_v51  ;;  %v6921_v12 = vld [vmem:[#allocation6 + $0x4b8] sm:$0xff] }
 0x43b   :  { %9146 = vst [vmem:[#allocation44_spill] sm:$0xff] %v6906_v21  ;;  %2359 = vmatpush.msrb.mxu3 %v6921_v12  ;;  %v6924_v21 = vld [vmem:[#allocation6 + $0xb8] sm:$0xff] }
 0x43c   :  { %9147 = vst [vmem:[#allocation34_spill] sm:$0xff] %v6909_v24  ;;  %2319 = vmatpush.msrb.mxu1 %v6924_v21  ;;  %v6927_v24 = vld [vmem:[#allocation6 + $0x298] sm:$0xff] }
 0x43d   :  { %9148 = vst [vmem:[#allocation35_spill] sm:$0xff] %v6912_v50  ;;  %2340 = vmatpush.msrb.mxu2 %v6927_v24  ;;  %v6930_v50 = vld [vmem:[#allocation6 + $0x490] sm:$0xff] }
 0x43e   :  { %9149 = vst [vmem:[#allocation37_spill] sm:$0xff] %v6915_v11  ;;  %2300 = vmatpush.msrb.mxu0 %v6930_v50  ;;  %v6933_v11 = vld [vmem:[#allocation6 + $0x498] sm:$0xff] }
 0x43f   :  { %9150 = vst [vmem:[#allocation45_spill] sm:$0xff] %v6918_v51  ;;  %2360 = vmatpush.msrb.mxu3 %v6933_v11  ;;  %v6936_v51 = vld [vmem:[#allocation6 + $0x98] sm:$0xff] }
 0x440   :  { %9151 = vst [vmem:[#allocation38_spill] sm:$0xff] %v6921_v12  ;;  %2320 = vmatpush.msrb.mxu1 %v6936_v51  ;;  %v6939_v12 = vld [vmem:[#allocation6 + $0x278] sm:$0xff] }
 0x441   :  { %9152 = vst [vmem:[#allocation43_spill] sm:$0xff] %v6924_v21  ;;  %2341 = vmatpush.msrb.mxu2 %v6939_v12  ;;  %v6942_v21 = vld [vmem:[#allocation6 + $0x470] sm:$0xff] }
 0x442   :  { %9153 = vst [vmem:[#allocation46_spill] sm:$0xff] %v6927_v24  ;;  %2301 = vmatpush.msrb.mxu0 %v6942_v21  ;;  %v6945_v24 = vld [vmem:[#allocation6 + $0x478] sm:$0xff] }
 0x443   :  { %9154 = vst [vmem:[#allocation47_spill] sm:$0xff] %v6930_v50  ;;  %2361 = vmatpush.msrb.mxu3 %v6945_v24  ;;  %v6948_v50 = vld [vmem:[#allocation6 + $0x78] sm:$0xff] }
 0x444   :  { %9155 = vst [vmem:[#allocation24_spill] sm:$0xff] %v6933_v11  ;;  %2321 = vmatpush.msrb.mxu1 %v6948_v50  ;;  %v6951_v11 = vld [vmem:[#allocation6 + $0x258] sm:$0xff] }
 0x445   :  { %9156 = vst [vmem:[#allocation25_spill] sm:$0xff] %v6936_v51  ;;  %2342 = vmatpush.msrb.mxu2 %v6951_v11  ;;  %v6954_v51 = vld [vmem:[#allocation6 + $0x450] sm:$0xff] }
 0x446   :  { %9157 = vst [vmem:[#allocation66_spill] sm:$0xff] %v6939_v12  ;;  %2302 = vmatpush.msrb.mxu0 %v6954_v51  ;;  %v6957_v12 = vld [vmem:[#allocation6 + $0x458] sm:$0xff] }
 0x447   :  { %9158 = vst [vmem:[#allocation54_spill] sm:$0xff] %v6942_v21  ;;  %2362 = vmatpush.msrb.mxu3 %v6957_v12  ;;  %v6960_v21 = vld [vmem:[#allocation6 + $0x58] sm:$0xff] }
 0x448   :  { %9159 = vst [vmem:[#allocation55_spill] sm:$0xff] %v6945_v24  ;;  %2322 = vmatpush.msrb.mxu1 %v6960_v21  ;;  %v6963_v24 = vld [vmem:[#allocation6 + $0x238] sm:$0xff] }
 0x449   :  { %9160 = vst [vmem:[#allocation56_spill] sm:$0xff] %v6948_v50  ;;  %2343 = vmatpush.msrb.mxu2 %v6963_v24  ;;  %v6966_v50 = vld [vmem:[#allocation6 + $0x430] sm:$0xff] }
 0x44a   :  { %9161 = vst [vmem:[#allocation57_spill] sm:$0xff] %v6951_v11  ;;  %2303 = vmatpush.msrb.mxu0 %v6966_v50  ;;  %v6969_v11 = vld [vmem:[#allocation6 + $0x438] sm:$0xff] }
 0x44b   :  { %9162 = vst [vmem:[#allocation58_spill] sm:$0xff] %v6954_v51  ;;  %2363 = vmatpush.msrb.mxu3 %v6969_v11  ;;  %v6972_v51 = vld [vmem:[#allocation6 + $0x38] sm:$0xff] }
 0x44c   :  { %9163 = vst [vmem:[#allocation59_spill] sm:$0xff] %v6957_v12  ;;  %2323 = vmatpush.msrb.mxu1 %v6972_v51  ;;  %v6975_v12 = vld [vmem:[#allocation6 + $0x218] sm:$0xff] }
 0x44d   :  { %9164 = vst [vmem:[#allocation60_spill] sm:$0xff] %v6960_v21  ;;  %2344 = vmatpush.msrb.mxu2 %v6975_v12  ;;  %v6978_v21 = vld [vmem:[#allocation6 + $0x410] sm:$0xff] }
 0x44e   :  { %9165 = vst [vmem:[#allocation61_spill] sm:$0xff] %v6966_v50  ;;  %2304 = vmatpush.msrb.mxu0 %v6978_v21  ;;  %3579 = vmatmul.msk.f32.vlgmr.msrb.gmra.mxu2 %vm5004_vm12, %v6778_v34  ;;  %v6984_v50 = vld [vmem:[#allocation6 + $0x418] sm:$0xff]  ;;  %v7000_v34 = vld [vmem:[#allocation6 + $0x1e0] sm:$0xff] }
 0x44f   :  { %9166 = vst [vmem:[#allocation62_spill] sm:$0xff] %v6972_v51  ;;  %2364 = vmatpush.msrb.mxu3 %v6984_v50  ;;  %3577 = vmatmul.msk.f32.vlgmr.msrb.gmra.mxu0 %vm5004_vm12, %v6767_v40  ;;  %v6990_v51 = vld [vmem:[#allocation6 + $0x18] sm:$0xff] }
 0x450   :  { %9167 = vst [vmem:[#allocation76_spill] sm:$0xff] %v6975_v12  ;;  %2324 = vmatpush.msrb.mxu1 %v6990_v51  ;;  %3581 = vmatmul.msk.f32.vlgmr.msrb.gmra.mxu3 %vm5004_vm12, %v6767_v40  ;;  %v7006_v12 = vld [vmem:[#allocation6 + $0x3e0] sm:$0xff] }
 0x451   :  { %9168 = vst [vmem:[#allocation63_spill] sm:$0xff] %v6978_v21  ;;  %2325 = vmatmul.f32.vlgmr.msrb.gmra.mxu1 %v6775_v22  ;;  %v6997_v21 = vld [vmem:[#allocation6 + $0x5e0] sm:$0xff]  ;;  %2456 = vmatpush.msra.mxu0 %v7000_v34  ;;  %v7015_v22 = vld [vmem:[#allocation6 + $0x1c8] sm:$0xff] }
 0x452   :  { %9169 = vst [vmem:[#allocation64_spill] sm:$0xff] %v6984_v50  ;;  %2496 = vmatpush.msra.mxu2 %v6997_v21  ;;  %v7003_v50 = vld [vmem:[#allocation6 + $0x1e8] sm:$0xff]  ;;  %2476 = vmatpush.msra.mxu1 %v7006_v12  ;;  %v7012_v40 = vld [vmem:[#allocation6 + $0x1c0] sm:$0xff] }
 0x453   :  { %9170 = vst [vmem:[#allocation65_spill] sm:$0xff] %v6990_v51  ;;  %2516 = vmatpush.msra.mxu3 %v7003_v50  ;;  %v7009_v51 = vld [vmem:[#allocation6 + $0x5c0] sm:$0xff]  ;;  %2457 = vmatpush.msra.mxu0 %v7012_v40 }
 0x454   :  { %9171 = vst [vmem:[#allocation82_spill] sm:$0xff] %v7000_v34  ;;  %2497 = vmatpush.msra.mxu2 %v7009_v51  ;;  %v7018_v34 = vld [vmem:[#allocation6 + $0x3c0] sm:$0xff] }
 0x455   :  { %9172 = vst [vmem:[#allocation67_spill] sm:$0xff] %v7003_v50  ;;  %2517 = vmatpush.msra.mxu3 %v7015_v22  ;;  %2477 = vmatpush.msra.mxu1 %v7018_v34  ;;  %v7021_v50 = vld [vmem:[#allocation6 + $0x5a0] sm:$0xff] }
 0x456   :  { %9173 = vst [vmem:[#allocation68_spill] sm:$0xff] %v7006_v12  ;;  %2498 = vmatpush.msra.mxu2 %v7021_v50  ;;  %v7024_v12 = vld [vmem:[#allocation6 + $0x1a0] sm:$0xff] }
 0x457   :  { %9174 = vst [vmem:[#allocation69_spill] sm:$0xff] %v7009_v51  ;;  %2458 = vmatpush.msra.mxu0 %v7024_v12  ;;  %v7027_v51 = vld [vmem:[#allocation6 + $0x1a8] sm:$0xff] }
 0x458   :  { %9175 = vst [vmem:[#allocation86_spill] sm:$0xff] %v7012_v40  ;;  %2518 = vmatpush.msra.mxu3 %v7027_v51  ;;  %v7030_v40 = vld [vmem:[#allocation6 + $0x3a0] sm:$0xff] }
 0x459   :  { %9176 = vst [vmem:[#allocation70_spill] sm:$0xff] %v7015_v22  ;;  %2478 = vmatpush.msra.mxu1 %v7030_v40  ;;  %v7033_v22 = vld [vmem:[#allocation6 + $0x580] sm:$0xff] }
 0x45a   :  { %9177 = vst [vmem:[#allocation71_spill] sm:$0xff] %v7018_v34  ;;  %2499 = vmatpush.msra.mxu2 %v7033_v22  ;;  %v7036_v34 = vld [vmem:[#allocation6 + $0x180] sm:$0xff] }
 0x45b   :  { %9178 = vst [vmem:[#allocation72_spill] sm:$0xff] %v7021_v50  ;;  %2459 = vmatpush.msra.mxu0 %v7036_v34  ;;  %v7039_v50 = vld [vmem:[#allocation6 + $0x188] sm:$0xff] }
 0x45c   :  { %9179 = vst [vmem:[#allocation73_spill] sm:$0xff] %v7024_v12  ;;  %2519 = vmatpush.msra.mxu3 %v7039_v50  ;;  %v7042_v12 = vld [vmem:[#allocation6 + $0x380] sm:$0xff] }
 0x45d   :  { %9180 = vst [vmem:[#allocation74_spill] sm:$0xff] %v7027_v51  ;;  %2479 = vmatpush.msra.mxu1 %v7042_v12  ;;  %v7045_v51 = vld [vmem:[#allocation6 + $0x560] sm:$0xff] }
 0x45e   :  { %9181 = vst [vmem:[#allocation75_spill] sm:$0xff] %v7030_v40  ;;  %2500 = vmatpush.msra.mxu2 %v7045_v51  ;;  %v7048_v40 = vld [vmem:[#allocation6 + $0x160] sm:$0xff] }
 0x45f   :  { %9182 = vst [vmem:[#allocation79_spill] sm:$0xff] %v7033_v22  ;;  %2460 = vmatpush.msra.mxu0 %v7048_v40  ;;  %v7051_v22 = vld [vmem:[#allocation6 + $0x168] sm:$0xff] }
 0x460   :  { %9183 = vst [vmem:[#allocation80_spill] sm:$0xff] %v7036_v34  ;;  %2520 = vmatpush.msra.mxu3 %v7051_v22  ;;  %v7054_v34 = vld [vmem:[#allocation6 + $0x360] sm:$0xff] }
 0x461   :  { %9184 = vst [vmem:[#allocation81_spill] sm:$0xff] %v7039_v50  ;;  %2480 = vmatpush.msra.mxu1 %v7054_v34  ;;  %v7057_v50 = vld [vmem:[#allocation6 + $0x540] sm:$0xff] }
 0x462   :  { %9185 = vst [vmem:[#allocation83_spill] sm:$0xff] %v7042_v12  ;;  %2501 = vmatpush.msra.mxu2 %v7057_v50  ;;  %v7060_v12 = vld [vmem:[#allocation6 + $0x140] sm:$0xff] }
 0x463   :  { %9186 = vst [vmem:[#allocation84_spill] sm:$0xff] %v7045_v51  ;;  %2461 = vmatpush.msra.mxu0 %v7060_v12  ;;  %v7063_v51 = vld [vmem:[#allocation6 + $0x148] sm:$0xff] }
 0x464   :  { %9187 = vst [vmem:[#allocation85_spill] sm:$0xff] %v7048_v40  ;;  %2521 = vmatpush.msra.mxu3 %v7063_v51  ;;  %v7066_v40 = vld [vmem:[#allocation6 + $0x340] sm:$0xff] }
 0x465   :  { %9188 = vst [vmem:[#allocation87_spill] sm:$0xff] %v7051_v22  ;;  %2481 = vmatpush.msra.mxu1 %v7066_v40  ;;  %v7069_v22 = vld [vmem:[#allocation6 + $0x520] sm:$0xff] }
 0x466   :  { %9189 = vst [vmem:[#allocation88_spill] sm:$0xff] %v7054_v34  ;;  %2502 = vmatpush.msra.mxu2 %v7069_v22  ;;  %v7072_v34 = vld [vmem:[#allocation6 + $0x120] sm:$0xff] }
 0x467   :  { %9190 = vst [vmem:[#allocation89_spill] sm:$0xff] %v7057_v50  ;;  %2462 = vmatpush.msra.mxu0 %v7072_v34  ;;  %v7075_v50 = vld [vmem:[#allocation6 + $0x128] sm:$0xff] }
 0x468   :  { %9191 = vst [vmem:[#allocation92_spill] sm:$0xff] %v7060_v12  ;;  %2522 = vmatpush.msra.mxu3 %v7075_v50  ;;  %v7078_v12 = vld [vmem:[#allocation6 + $0x320] sm:$0xff] }
 0x469   :  { %9192 = vst [vmem:[#allocation93_spill] sm:$0xff] %v7063_v51  ;;  %2482 = vmatpush.msra.mxu1 %v7078_v12  ;;  %v7081_v51 = vld [vmem:[#allocation6 + $0x500] sm:$0xff] }
 0x46a   :  { %9193 = vst [vmem:[#allocation94_spill] sm:$0xff] %v7066_v40  ;;  %2503 = vmatpush.msra.mxu2 %v7081_v51  ;;  %v7084_v40 = vld [vmem:[#allocation6 + $0x100] sm:$0xff] }
 0x46b   :  { %9194 = vst [vmem:[#allocation95_spill] sm:$0xff] %v7069_v22  ;;  %2463 = vmatpush.msra.mxu0 %v7084_v40  ;;  %v7087_v22 = vld [vmem:[#allocation6 + $0x108] sm:$0xff] }
 0x46c   :  { %9195 = vst [vmem:[#allocation96_spill] sm:$0xff] %v7072_v34  ;;  %2523 = vmatpush.msra.mxu3 %v7087_v22  ;;  %v7090_v34 = vld [vmem:[#allocation6 + $0x300] sm:$0xff] }
 0x46d   :  { %9196 = vst [vmem:[#allocation99_spill] sm:$0xff] %v7075_v50  ;;  %2483 = vmatpush.msra.mxu1 %v7090_v34  ;;  %v7093_v50 = vld [vmem:[#allocation6 + $0x4e0] sm:$0xff] }
 0x46e   :  { %9197 = vst [vmem:[#allocation109_spill] sm:$0xff] %v7078_v12  ;;  %2504 = vmatpush.msra.mxu2 %v7093_v50  ;;  %v7096_v12 = vld [vmem:[#allocation6 + $0xe0] sm:$0xff] }
 0x46f   :  { %9198 = vst [vmem:[#allocation100_spill] sm:$0xff] %v7081_v51  ;;  %2464 = vmatpush.msra.mxu0 %v7096_v12  ;;  %v7099_v51 = vld [vmem:[#allocation6 + $0xe8] sm:$0xff] }
 0x470   :  { %9199 = vst [vmem:[#allocation101_spill] sm:$0xff] %v7084_v40  ;;  %2524 = vmatpush.msra.mxu3 %v7099_v51  ;;  %v7102_v40 = vld [vmem:[#allocation6 + $0x2e0] sm:$0xff] }
 0x471   :  { %9200 = vst [vmem:[#allocation102_spill] sm:$0xff] %v7087_v22  ;;  %2484 = vmatpush.msra.mxu1 %v7102_v40  ;;  %v7105_v22 = vld [vmem:[#allocation6 + $0x4c0] sm:$0xff] }
 0x472   :  { %9201 = vst [vmem:[#allocation103_spill] sm:$0xff] %v7090_v34  ;;  %2505 = vmatpush.msra.mxu2 %v7105_v22  ;;  %v7108_v34 = vld [vmem:[#allocation6 + $0xc0] sm:$0xff] }
 0x473   :  { %9202 = vst [vmem:[#allocation104_spill] sm:$0xff] %v7093_v50  ;;  %2465 = vmatpush.msra.mxu0 %v7108_v34  ;;  %v7111_v50 = vld [vmem:[#allocation6 + $0xc8] sm:$0xff] }
 0x474   :  { %9203 = vst [vmem:[#allocation105_spill] sm:$0xff] %v7096_v12  ;;  %2525 = vmatpush.msra.mxu3 %v7111_v50  ;;  %v7114_v12 = vld [vmem:[#allocation6 + $0x2c0] sm:$0xff] }
 0x475   :  { %9204 = vst [vmem:[#allocation118_spill] sm:$0xff] %v7099_v51  ;;  %2485 = vmatpush.msra.mxu1 %v7114_v12  ;;  %v7117_v51 = vld [vmem:[#allocation6 + $0x4a0] sm:$0xff] }
 0x476   :  { %9205 = vst [vmem:[#allocation106_spill] sm:$0xff] %v7102_v40  ;;  %2506 = vmatpush.msra.mxu2 %v7117_v51  ;;  %v7120_v40 = vld [vmem:[#allocation6 + $0xa0] sm:$0xff] }
 0x477   :  { %9206 = vst [vmem:[#allocation107_spill] sm:$0xff] %v7105_v22  ;;  %2466 = vmatpush.msra.mxu0 %v7120_v40  ;;  %v7123_v22 = vld [vmem:[#allocation6 + $0xa8] sm:$0xff] }
 0x478   :  { %9207 = vst [vmem:[#allocation108_spill] sm:$0xff] %v7108_v34  ;;  %2526 = vmatpush.msra.mxu3 %v7123_v22  ;;  %v7126_v34 = vld [vmem:[#allocation6 + $0x2a0] sm:$0xff] }
 0x479   :  { %9208 = vst [vmem:[#allocation122_spill] sm:$0xff] %v7111_v50  ;;  %2486 = vmatpush.msra.mxu1 %v7126_v34  ;;  %v7129_v50 = vld [vmem:[#allocation6 + $0x480] sm:$0xff] }
 0x47a   :  { %9209 = vst [vmem:[#allocation110_spill] sm:$0xff] %v7114_v12  ;;  %2507 = vmatpush.msra.mxu2 %v7129_v50  ;;  %v7132_v12 = vld [vmem:[#allocation6 + $0x80] sm:$0xff] }
 0x47b   :  { %9210 = vst [vmem:[#allocation113_spill] sm:$0xff] %v7117_v51  ;;  %2467 = vmatpush.msra.mxu0 %v7132_v12  ;;  %v7135_v51 = vld [vmem:[#allocation6 + $0x88] sm:$0xff] }
 0x47c   :  { %9211 = vst [vmem:[#allocation114_spill] sm:$0xff] %v7120_v40  ;;  %2527 = vmatpush.msra.mxu3 %v7135_v51  ;;  %v7138_v40 = vld [vmem:[#allocation6 + $0x280] sm:$0xff] }
 0x47d   :  { %9212 = vst [vmem:[#allocation126_spill] sm:$0xff] %v7123_v22  ;;  %2487 = vmatpush.msra.mxu1 %v7138_v40  ;;  %v7141_v22 = vld [vmem:[#allocation6 + $0x460] sm:$0xff] }
 0x47e   :  { %9213 = vst [vmem:[#allocation115_spill] sm:$0xff] %v7126_v34  ;;  %2508 = vmatpush.msra.mxu2 %v7141_v22  ;;  %v7144_v34 = vld [vmem:[#allocation6 + $0x60] sm:$0xff] }
 0x47f   :  { %9214 = vst [vmem:[#allocation116_spill] sm:$0xff] %v7129_v50  ;;  %2468 = vmatpush.msra.mxu0 %v7144_v34  ;;  %v7147_v50 = vld [vmem:[#allocation6 + $0x68] sm:$0xff] }
 0x480   :  { %9215 = vst [vmem:[#allocation117_spill] sm:$0xff] %v7132_v12  ;;  %2528 = vmatpush.msra.mxu3 %v7147_v50  ;;  %v7150_v12 = vld [vmem:[#allocation6 + $0x260] sm:$0xff] }
 0x481   :  { %9216 = vst [vmem:[#allocation119_spill] sm:$0xff] %v7135_v51  ;;  %2488 = vmatpush.msra.mxu1 %v7150_v12  ;;  %v7153_v51 = vld [vmem:[#allocation6 + $0x440] sm:$0xff] }
 0x482   :  { %9217 = vst [vmem:[#allocation120_spill] sm:$0xff] %v7138_v40  ;;  %2509 = vmatpush.msra.mxu2 %v7153_v51  ;;  %v7156_v40 = vld [vmem:[#allocation6 + $0x40] sm:$0xff] }
 0x483   :  { %9218 = vst [vmem:[#allocation121_spill] sm:$0xff] %v7141_v22  ;;  %2469 = vmatpush.msra.mxu0 %v7156_v40  ;;  %v7159_v22 = vld [vmem:[#allocation6 + $0x48] sm:$0xff] }
 0x484   :  { %9219 = vst [vmem:[#allocation123_spill] sm:$0xff] %v7144_v34  ;;  %2529 = vmatpush.msra.mxu3 %v7159_v22  ;;  %v7162_v34 = vld [vmem:[#allocation6 + $0x240] sm:$0xff] }
 0x485   :  { %9220 = vst [vmem:[#allocation124_spill] sm:$0xff] %v7147_v50  ;;  %2489 = vmatpush.msra.mxu1 %v7162_v34  ;;  %v7165_v50 = vld [vmem:[#allocation6 + $0x420] sm:$0xff] }
 0x486   :  { %9221 = vst [vmem:[#allocation125_spill] sm:$0xff] %v7150_v12  ;;  %2510 = vmatpush.msra.mxu2 %v7165_v50  ;;  %v7168_v12 = vld [vmem:[#allocation6 + $0x20] sm:$0xff] }
 0x487   :  { %9222 = vst [vmem:[#allocation138_spill] sm:$0xff] %v7153_v51  ;;  %2470 = vmatpush.msra.mxu0 %v7168_v12  ;;  %v7171_v51 = vld [vmem:[#allocation6 + $0x28] sm:$0xff] }
 0x488   :  { %9223 = vst [vmem:[#allocation127_spill] sm:$0xff] %v7156_v40  ;;  %2530 = vmatpush.msra.mxu3 %v7171_v51  ;;  %v7174_v40 = vld [vmem:[#allocation6 + $0x220] sm:$0xff] }
 0x489   :  { %9224 = vst [vmem:[#allocation130_spill] sm:$0xff] %v7159_v22  ;;  %2490 = vmatpush.msra.mxu1 %v7174_v40  ;;  %v7177_v22 = vld [vmem:[#allocation6 + $0x400] sm:$0xff] }
 0x48a   :  { %9225 = vst [vmem:[#allocation131_spill] sm:$0xff] %v7162_v34  ;;  %2511 = vmatpush.msra.mxu2 %v7177_v22  ;;  %v7180_v34 = vld [vmem:[#allocation6] sm:$0xff] }
 0x48b   :  { %9226 = vst [vmem:[#allocation142_spill] sm:$0xff] %v7165_v50  ;;  %2471 = vmatpush.msra.mxu0 %v7180_v34  ;;  %v7183_v50 = vld [vmem:[#allocation6 + $0x8] sm:$0xff] }
 0x48c   :  { %9227 = vst [vmem:[#allocation132_spill] sm:$0xff] %v7168_v12  ;;  %2531 = vmatpush.msra.mxu3 %v7183_v50  ;;  %v7186_v12 = vld [vmem:[#allocation6 + $0x1f0] sm:$0xff] }
 0x48d   :  { %9228 = vst [vmem:[#allocation133_spill] sm:$0xff] %v7171_v51  ;;  %2576 = vmatpush.msrb.mxu2 %v7186_v12  ;;  %v7189_v51 = vld [vmem:[#allocation6 + $0x200] sm:$0xff] }
 0x48e   :  { %9229 = vst [vmem:[#allocation134_spill] sm:$0xff] %v7174_v40  ;;  %2491 = vmatpush.msra.mxu1 %v7189_v51  ;;  %v7192_v40 = vld [vmem:[#allocation6 + $0x3e8] sm:$0xff] }
 0x48f   :  { %9230 = vst [vmem:[#allocation146_spill] sm:$0xff] %v7177_v22  ;;  %2536 = vmatpush.msrb.mxu0 %v7192_v40  ;;  %v7195_v22 = vld [vmem:[#allocation6 + $0x3f0] sm:$0xff]  ;;  %2577 = vmatpush.msrb.mxu2 %v6603_v28  ;;  %v7218_v28 = vld [vmem:[#allocation6 + $0x5a8] sm:$0xff] }
 0x490   :  { %9231 = vst [vmem:[#allocation135_spill] sm:$0xff] %v7180_v34  ;;  %2596 = vmatpush.msrb.mxu3 %v7195_v22  ;;  %v7198_v34 = vld [vmem:[#allocation6 + $0x5e8] sm:$0xff] }
 0x491   :  { %9232 = vst [vmem:[#allocation136_spill] sm:$0xff] %v7183_v50  ;;  %2556 = vmatpush.msrb.mxu1 %v7198_v34  ;;  %v7202_v50 = vld [vmem:[#allocation6 + $0x3c8] sm:$0xff]  ;;  %2578 = vmatpush.msrb.mxu2 %v6609_v44 }
 0x492   :  { %9233 = vst [vmem:[#allocation137_spill] sm:$0xff] %v7186_v12  ;;  %2537 = vmatpush.msrb.mxu0 %v7202_v50  ;;  %v7205_v12 = vld [vmem:[#allocation6 + $0x3d0] sm:$0xff]  ;;  %v7228_v44 = vld [vmem:[#allocation6 + $0x588] sm:$0xff] }
 0x493   :  { %9234 = vst [vmem:[#allocation150_spill] sm:$0xff] %v7189_v51  ;;  %2597 = vmatpush.msrb.mxu3 %v7205_v12  ;;  %v7208_v51 = vld [vmem:[#allocation6 + $0x5c8] sm:$0xff]  ;;  %2579 = vmatpush.msrb.mxu2 %v6615_v10 }
 0x494   :  { %9235 = vst [vmem:[#allocation139_spill] sm:$0xff] %v7195_v22  ;;  %2557 = vmatpush.msrb.mxu1 %v7208_v51  ;;  %v7212_v22 = vld [vmem:[#allocation6 + $0x3a8] sm:$0xff] }
 0x495   :  { %9236 = vst [vmem:[#allocation140_spill] sm:$0xff] %v7198_v34  ;;  %2538 = vmatpush.msrb.mxu0 %v7212_v22  ;;  %v7215_v34 = vld [vmem:[#allocation6 + $0x3b0] sm:$0xff]  ;;  %2580 = vmatpush.msrb.mxu2 %v6621_v6  ;;  %v7238_v10 = vld [vmem:[#allocation6 + $0x568] sm:$0xff] }
 0x496   :  { %9237 = vst [vmem:[#allocation141_spill] sm:$0xff] %v7205_v12  ;;  %2598 = vmatpush.msrb.mxu3 %v7215_v34  ;;  %2558 = vmatpush.msrb.mxu1 %v7218_v28  ;;  %v7222_v12 = vld [vmem:[#allocation6 + $0x388] sm:$0xff] }
 0x497   :  { %9238 = vst [vmem:[#allocation154_spill] sm:$0xff] %v7208_v51  ;;  %2539 = vmatpush.msrb.mxu0 %v7222_v12  ;;  %v7225_v51 = vld [vmem:[#allocation6 + $0x390] sm:$0xff]  ;;  %2581 = vmatpush.msrb.mxu2 %v6627_v58  ;;  %v9242_v58 = vld [vmem:[#allocation163_spill] sm:$0xff] }
 0x498   :  { %9239 = vst [vmem:[#allocation143_spill] sm:$0xff] %v7215_v34  ;;  %2599 = vmatpush.msrb.mxu3 %v7225_v51  ;;  %2559 = vmatpush.msrb.mxu1 %v7228_v44  ;;  %v7232_v34 = vld [vmem:[#allocation6 + $0x368] sm:$0xff] }
 0x499   :  { %9240 = vst [vmem:[#allocation144_spill] sm:$0xff] %v7218_v28  ;;  %2540 = vmatpush.msrb.mxu0 %v7232_v34  ;;  %v7235_v28 = vld [vmem:[#allocation6 + $0x370] sm:$0xff]  ;;  %2582 = vmatpush.msrb.mxu2 %v6639_v52 }
 0x49a   :  { %2600 = vmatpush.msrb.mxu3 %v7235_v28  ;;  %2560 = vmatpush.msrb.mxu1 %v7238_v10  ;;  %v9241_v6 = vld [vmem:[#allocation161_spill] sm:$0xff] }
 0x49b   :  { %2541 = vmatpush.msrb.mxu0 %v6630_v26  ;;  %2583 = vmatpush.msrb.mxu2 %v6651_v19  ;;  %v9243_v26 = vld [vmem:[#allocation164_spill] sm:$0xff]  ;;  %v9246_v52 = vld [vmem:[#allocation169_spill] sm:$0xff]  ;;  %v9250_v19 = vld [vmem:[#allocation78_spill] sm:$0xff] }
 0x49c   :  { %2601 = vmatpush.msrb.mxu3 %v6633_v18  ;;  %2561 = vmatpush.msrb.mxu1 %v6636_v0  ;;  %v9244_v18 = vld [vmem:[#allocation165_spill] sm:$0xff]  ;;  %v9245_v0 = vld [vmem:[#allocation167_spill] sm:$0xff] }
 0x49d   :  { %2542 = vmatpush.msrb.mxu0 %v6642_v48  ;;  %2584 = vmatpush.msrb.mxu2 %v6663_v43  ;;  %v9247_v48 = vld [vmem:[#allocation170_spill] sm:$0xff] }
 0x49e   :  { %2602 = vmatpush.msrb.mxu3 %v6645_v37  ;;  %2562 = vmatpush.msrb.mxu1 %v6648_v56  ;;  %v9248_v37 = vld [vmem:[#allocation171_spill] sm:$0xff]  ;;  %v9249_v56 = vld [vmem:[#allocation77_spill] sm:$0xff]  ;;  %v2146_v43 = vpop.f32.mrf.mxu0 }
 0x49f   :  { %2543 = vmatpush.msrb.mxu0 %v6654_v31  ;;  %2585 = vmatpush.msrb.mxu2 %v6675_v8  ;;  %v9251_v31 = vld [vmem:[#allocation39_spill] sm:$0xff] }
 0x4a0   :  { %2603 = vmatpush.msrb.mxu3 %v6657_v27  ;;  %2563 = vmatpush.msrb.mxu1 %v6660_v3  ;;  %v9252_v27 = vld [vmem:[#allocation40_spill] sm:$0xff] }
 0x4a1   :  { %2544 = vmatpush.msrb.mxu0 %v6666_v20  ;;  %2586 = vmatpush.msrb.mxu2 %v6687_v32  ;;  %v9253_v3 = vld [vmem:[#allocation16_spill] sm:$0xff]  ;;  %v9254_v20 = vld [vmem:[#allocation111_spill] sm:$0xff] }
 0x4a2   :  { %2604 = vmatpush.msrb.mxu3 %v6669_v63  ;;  %2564 = vmatpush.msrb.mxu1 %v6672_v4  ;;  %v2147_v63 = vadd.f32 %v2146_v43, %v9254_v20  ;;  %v2166_v4 = vpop.f32.mrf.mxu1 }
 0x4a3   :  { %2545 = vmatpush.msrb.mxu0 %v6678_v9  ;;  %2587 = vmatpush.msrb.mxu2 %v6699_v45  ;;  %v2186_v9 = vpop.f32.mrf.mxu2 }
 0x4a4   :  { %2605 = vmatpush.msrb.mxu3 %v6681_v13  ;;  %2565 = vmatpush.msrb.mxu1 %v6684_v41  ;;  %v2167_v8 = vadd.f32 %v2166_v4, %v2147_v63 }
 0x4a5   :  { %2546 = vmatpush.msrb.mxu0 %v6690_v62  ;;  %2588 = vmatpush.msrb.mxu2 %v6711_v53  ;;  %v2206_v41 = vpop.f32.mrf.mxu3  ;;  %v9255_v62 = vld [vmem:[#allocation112_spill] sm:$0xff] }
 0x4a6   :  { %2606 = vmatpush.msrb.mxu3 %v6693_v25  ;;  %2566 = vmatpush.msrb.mxu1 %v6696_v42  ;;  %v2187_v13 = vadd.f32 %v2186_v9, %v2167_v8  ;;  %v2207_v25 = vadd.f32 %v2206_v41, %v9255_v62  ;;  %v9257_v8 = vld [vmem:[#allocation51_spill] sm:$0xff] }
 0x4a7   :  { %2547 = vmatpush.msrb.mxu0 %v6702_v7  ;;  %2589 = vmatpush.msrb.mxu2 %v9242_v58 }
 0x4a8   :  { %2607 = vmatpush.msrb.mxu3 %v6705_v60  ;;  %2567 = vmatpush.msrb.mxu1 %v6708_v5  ;;  %v3582_v32 = vmul.f32 -1.442695, %v2187_v13  ;;  %v2226_v42 = vpop.f32.mrf.mxu0 }
 0x4a9   :  { %2548 = vmatpush.msrb.mxu0 %v6714_v47  ;;  %2590 = vmatpush.msrb.mxu2 %v9246_v52  ;;  %v2227_v45 = vadd.f32 %v2226_v42, %v2207_v25 }
 0x4aa   :  { %2608 = vmatpush.msrb.mxu3 %v6717_v17  ;;  %2568 = vmatpush.msrb.mxu1 %v9241_v6  ;;  %3728 = vpow2.f32 %v3582_v32  ;;  %v2246_v7 = vpop.f32.mrf.mxu1 }
 0x4ab   :  { %2549 = vmatpush.msrb.mxu0 %v9243_v26  ;;  %2591 = vmatpush.msrb.mxu2 %v9250_v19  ;;  %v2247_v60 = vadd.f32 %v2246_v7, %v2227_v45 }
 0x4ac   :  { %2609 = vmatpush.msrb.mxu3 %v9244_v18  ;;  %2569 = vmatpush.msrb.mxu1 %v9245_v0  ;;  %v9256_v18 = vld [vmem:[#allocation50_spill] sm:$0xff] }
 0x4ad   :  { %2550 = vmatpush.msrb.mxu0 %v9247_v48  ;;  %v3583_v5 = vmul.f32 -1.442695, %v2247_v60  ;;  %v2266_v58 = vpop.f32.mrf.mxu2 }
 0x4ae   :  { %2610 = vmatpush.msrb.mxu3 %v9248_v37  ;;  %2570 = vmatpush.msrb.mxu1 %v9249_v56  ;;  %v2267_v0 = vadd.f32 %v2266_v58, %v9256_v18 }
 0x4af   :  { %2551 = vmatpush.msrb.mxu0 %v9251_v31  ;;  %3730 = vpow2.f32 %v3583_v5  ;;  %v2286_v52 = vpop.f32.mrf.mxu3 }
 0x4b0   :  { %2611 = vmatpush.msrb.mxu3 %v9252_v27  ;;  %2571 = vmatpush.msrb.mxu1 %v9253_v3  ;;  %v3729_v53 = vpop.eup %3728  ;;  %v2287_v19 = vadd.f32 %v2286_v52, %v2267_v0 }
 0x4b1   :  { %v2378_v47 = vadd.f32 1.0, %v3729_v53 }
 0x4b3   :  { %3732 = vrcp.f32 %v2378_v47  ;;  %v2392_v60 = vand.u32 2147483648, %v2378_v47  ;;  %vm2386_vm13 = vweird.f32 %v2378_v47 }
 0x4b5   :  { %v3731_v17 = vpop.eup %3730 }
 0x4b6   :  { %v2379_v6 = vadd.f32 1.0, %v3731_v17  ;;  %v2390_v17 = vand.u32 2147483647, %v2378_v47 }
 0x4b8   :  { %3734 = vrcp.f32 %v2379_v6  ;;  %v2407_v45 = vand.u32 2147483648, %v2379_v6  ;;  %vm2401_vm10 = vweird.f32 %v2379_v6  ;;  %v2405_v5 = vand.u32 2147483647, %v2379_v6 }
 0x4b9   :  { %v3733_v26 = vpop.eup %3732  ;;  %vm2391_vm0 = vcmp.eq.f32.partialorder %v2390_v17, 8.507059e+37  ;;  %v9282_v17 = vld [vmem:[#allocation45_spill] sm:$0xff] }
 0x4ba   :  { %v2382_v37 = vmul.f32 %v3733_v26, %v2378_v47  ;;  %vm2387_vm9 = vweird.f32 %v3733_v26  ;;  %v2408_v0 = vor.u32 1.1754944e-38, %v2407_v45  ;;  %vm2406_vm15 = vcmp.eq.f32.partialorder %v2405_v5, 8.507059e+37  ;;  %v9277_v45 = vld [vmem:[#allocation33_spill] sm:$0xff]  ;;  %v9280_v5 = vld [vmem:[#allocation35_spill] sm:$0xff] }
 0x4bb   :  { %vm2388_vm14 = vmor %vm2386_vm13, %vm2387_vm9 }
 0x4bc   :  { %v2383_v3 = vsub.f32 1.0, %v2382_v37  ;;  %v2393_v37 = vor.u32 1.1754944e-38, %v2392_v60  ;;  %v9279_v60 = vld [vmem:[#allocation34_spill] sm:$0xff] }
 0x4be   :  { %v3735_v48 = vpop.eup %3734  ;;  %v2384_v41 = vmul.f32 %v3733_v26, %v2383_v3 }
 0x4bf   :  { %v2397_v56 = vmul.f32 %v3735_v48, %v2379_v6  ;;  %vm2402_vm8 = vweird.f32 %v3735_v48 }
 0x4c0   :  { %v2385_v7 = vadd.f32 %v3733_v26, %v2384_v41  ;;  %vm2403_vm11 = vmor %vm2401_vm10, %vm2402_vm8 }
 0x4c1   :  { %v2398_v31 = vsub.f32 1.0, %v2397_v56 }
 0x4c2   :  { %v2389_v52 = vsel %vm2388_vm14, %v3733_v26, %v2385_v7  ;;  %v9278_v7 = vld [vmem:[#allocation44_spill] sm:$0xff] }
 0x4c3   :  { %v2399_v4 = vmul.f32 %v3735_v48, %v2398_v31  ;;  %v2394_v31 = vsel %vm2391_vm0, %v2393_v37, %v2389_v52  ;;  %v9286_v52 = vld [vmem:[#allocation47_spill] sm:$0xff]  ;;  %v9287_v37 = vld [vmem:[#allocation24_spill] sm:$0xff] }
 0x4c5   :  { %v2400_v42 = vadd.f32 %v3735_v48, %v2399_v4 }
 0x4c7   :  { %v2404_v18 = vsel %vm2403_vm11, %v3735_v48, %v2400_v42  ;;  %v9276_v42 = vld [vmem:[#allocation31_spill] sm:$0xff] }
 0x4c8   :  { %v2409_v56 = vsel %vm2406_vm15, %v2408_v0, %v2404_v18  ;;  %v9284_v18 = vld [vmem:[#allocation43_spill] sm:$0xff]  ;;  %v9285_v0 = vld [vmem:[#allocation46_spill] sm:$0xff] }
 0x4c9   :  { %v2427_v6 = vmul.f32 %v2409_v56, %v6764_v23  ;;  %v9288_v56 = vld [vmem:[#allocation25_spill] sm:$0xff] }
 0x4cc   :  { %v2306_v27 = vpop.f32.mrf.mxu0 }
 0x4cd   :  { %v2307_v43 = vadd.f32 %v2306_v27, %v2287_v19 }
 0x4ce   :  { %v2326_v20 = vpop.f32.mrf.mxu1 }
 0x4cf   :  { %v3584_v63 = vmul.f32 -1.442695, %v2307_v43  ;;  %v2327_v9 = vadd.f32 %v2326_v20, %v9257_v8 }
 0x4d1   :  { %3736 = vpow2.f32 %v3584_v63  ;;  %v2346_v13 = vpop.f32.mrf.mxu2 }
 0x4d2   :  { %v2347_v32 = vadd.f32 %v2346_v13, %v2327_v9 }
 0x4d3   :  { %v2366_v62 = vpop.f32.mrf.mxu3 }
 0x4d4   :  { %v2367_v25 = vadd.f32 %v2366_v62, %v2347_v32 }
 0x4d6   :  { %3738 = vtanh.f32 %v2367_v25  ;;  %v9275_v25 = vld [vmem:[#allocation30_spill] sm:$0xff] }
 0x4d7   :  { %v3737_v53 = vpop.eup %3736 }
 0x4d8   :  { %v2380_v58 = vadd.f32 1.0, %v3737_v53  ;;  %v9281_v53 = vld [vmem:[#allocation37_spill] sm:$0xff] }
 0x4da   :  { %3740 = vrcp.f32 %v2380_v58  ;;  %v2422_v63 = vand.u32 2147483648, %v2380_v58  ;;  %v2420_v26 = vand.u32 2147483647, %v2380_v58  ;;  %vm2416_vm4 = vweird.f32 %v2380_v58 }
 0x4dc   :  { %v3739_v19 = vpop.eup %3738  ;;  %v2423_v8 = vor.u32 1.1754944e-38, %v2422_v63  ;;  %vm2421_vm6 = vcmp.eq.f32.partialorder %v2420_v26, 8.507059e+37  ;;  %v9296_v63 = vld [vmem:[#allocation60_spill] sm:$0xff]  ;;  %v9298_v26 = vld [vmem:[#allocation62_spill] sm:$0xff] }
 0x4dd   :  { %v2428_v27 = vmul.f32 %v3739_v19, %v2394_v31  ;;  %v9289_v19 = vld [vmem:[#allocation66_spill] sm:$0xff] }
 0x4de   :  { %v9290_v31 = vld [vmem:[#allocation54_spill] sm:$0xff] }
 0x4df   :  { %v7290_v43 = vadd.f32 %v2428_v27, %v2427_v6  ;;  %v9291_v27 = vld [vmem:[#allocation55_spill] sm:$0xff]  ;;  %v9292_v6 = vld [vmem:[#allocation56_spill] sm:$0xff] }
 0x4e0   :  { %v3741_v3 = vpop.eup %3740 }
 0x4e1   :  { %v2412_v20 = vmul.f32 %v3741_v3, %v2380_v58  ;;  %3742 = vtanh.f32 %v7290_v43  ;;  %vm2417_vm1 = vweird.f32 %v3741_v3  ;;  %v9283_v58 = vld [vmem:[#allocation38_spill] sm:$0xff] }
 0x4e2   :  { %vm2418_vm5 = vmor %vm2416_vm4, %vm2417_vm1 }
 0x4e3   :  { %v2413_v47 = vsub.f32 1.0, %v2412_v20  ;;  %v9294_v20 = vld [vmem:[#allocation58_spill] sm:$0xff] }
 0x4e5   :  { %v2414_v48 = vmul.f32 %v3741_v3, %v2413_v47  ;;  %v9295_v47 = vld [vmem:[#allocation59_spill] sm:$0xff] }
 0x4e7   :  { %v2415_v4 = vadd.f32 %v3741_v3, %v2414_v48  ;;  %v3743_v13 = vpop.eup %3742  ;;  %v9297_v48 = vld [vmem:[#allocation61_spill] sm:$0xff] }
 0x4e9   :  { %v2419_v9 = vsel %vm2418_vm5, %v3741_v3, %v2415_v4  ;;  %v9293_v3 = vld [vmem:[#allocation57_spill] sm:$0xff]  ;;  %v9299_v4 = vld [vmem:[#allocation76_spill] sm:$0xff] }
 0x4ea   :  { %v2424_v41 = vsel %vm2421_vm6, %v2423_v8, %v2419_v9  ;;  %v9300_v8 = vld [vmem:[#allocation63_spill] sm:$0xff]  ;;  %v9301_v9 = vld [vmem:[#allocation64_spill] sm:$0xff] }
 0x4eb   :  { %v7293_v23 = vmul.f32 %v3743_v13, %v2424_v41  ;;  %v9304_v13 = vld [vmem:[#allocation67_spill] sm:$0xff]  ;;  %v9305_v41 = vld [vmem:[#allocation68_spill] sm:$0xff] }
 0x4ed   :  { %3589 = vmatmul.msk.f32.vlgmr.msra.gmra.mxu2 %vm5004_vm12, %v7293_v23  ;;  %v7301_v32 = vsel %vm258_vm2, %v7293_v23, %v4984_v57  ;;  %v7304_v62 = vrot.slane %v7293_v23, 6 }
 0x4ee   :  { %2656 = vmatpush.msra.mxu2 %v6780_v35  ;;  %2472 = vmatmul.f32.vlgmr.msra.gmra.mxu0 %v7301_v32  ;;  %v9258_v35 = vld [vmem:[#allocation22_spill] sm:$0xff] }
 0x4ef   :  { %2532 = vmatmul.f32.vlgmr.msra.gmra.mxu3 %v7301_v32  ;;  %2616 = vmatpush.msra.mxu0 %v6785_v2  ;;  %v9259_v2 = vld [vmem:[#allocation17_spill] sm:$0xff] }
 0x4f0   :  { %2676 = vmatpush.msra.mxu3 %v6788_v33  ;;  %3587 = vmatmul.msk.f32.vlgmr.msra.gmra.mxu1 %vm5004_vm12, %v7304_v62  ;;  %v9260_v33 = vld [vmem:[#allocation18_spill] sm:$0xff] }
 0x4f1   :  { %2636 = vmatpush.msra.mxu1 %v6794_v29  ;;  %2657 = vmatpush.msra.mxu2 %v6797_v55  ;;  %v9261_v29 = vld [vmem:[#allocation19_spill] sm:$0xff]  ;;  %v9262_v55 = vld [vmem:[#allocation28_spill] sm:$0xff] }
 0x4f2   :  { %2617 = vmatpush.msra.mxu0 %v6800_v30  ;;  %2677 = vmatpush.msra.mxu3 %v6803_v49  ;;  %v9263_v30 = vld [vmem:[#allocation20_spill] sm:$0xff]  ;;  %v9264_v49 = vld [vmem:[#allocation21_spill] sm:$0xff] }
 0x4f3   :  { %2637 = vmatpush.msra.mxu1 %v6806_v54  ;;  %2658 = vmatpush.msra.mxu2 %v6809_v15  ;;  %v9265_v54 = vld [vmem:[#allocation23_spill] sm:$0xff]  ;;  %v9266_v15 = vld [vmem:[#allocation32_spill] sm:$0xff] }
 0x4f4   :  { %2618 = vmatpush.msra.mxu0 %v6812_v36  ;;  %2678 = vmatpush.msra.mxu3 %v6815_v16  ;;  %v9267_v36 = vld [vmem:[#allocation26_spill] sm:$0xff]  ;;  %v9268_v16 = vld [vmem:[#allocation27_spill] sm:$0xff] }
 0x4f5   :  { %2638 = vmatpush.msra.mxu1 %v6818_v14  ;;  %2659 = vmatpush.msra.mxu2 %v6821_v38  ;;  %v9269_v14 = vld [vmem:[#allocation29_spill] sm:$0xff]  ;;  %v9270_v38 = vld [vmem:[#allocation90_spill] sm:$0xff] }
 0x4f6   :  { %2619 = vmatpush.msra.mxu0 %v6824_v59  ;;  %2679 = vmatpush.msra.mxu3 %v6827_v39  ;;  %v9271_v59 = vld [vmem:[#allocation91_spill] sm:$0xff]  ;;  %v9272_v39 = vld [vmem:[#allocation41_spill] sm:$0xff] }
 0x4f7   :  { %2592 = vmatmul.f32.vlgmr.msrb.gmra.mxu2 %v7301_v32  ;;  %2639 = vmatpush.msra.mxu1 %v6831_v46  ;;  %v9273_v46 = vld [vmem:[#allocation42_spill] sm:$0xff] }
 0x4f8   :  { %2660 = vmatpush.msra.mxu2 %v6834_v61  ;;  %3591 = vmatmul.msk.f32.vlgmr.msrb.gmra.mxu0 %vm5004_vm12, %v7304_v62  ;;  %v9274_v61 = vld [vmem:[#allocation36_spill] sm:$0xff] }
 0x4f9   :  { %3595 = vmatmul.msk.f32.vlgmr.msrb.gmra.mxu3 %vm5004_vm12, %v7304_v62  ;;  %2620 = vmatpush.msra.mxu0 %v9258_v35  ;;  %v9307_v35 = vld [vmem:[#allocation86_spill] sm:$0xff] }
 0x4fa   :  { %2680 = vmatpush.msra.mxu3 %v9259_v2  ;;  %3593 = vmatmul.msk.f32.vlgmr.msrb.gmra.mxu1 %vm5004_vm12, %v7293_v23  ;;  %v9308_v2 = vld [vmem:[#allocation70_spill] sm:$0xff] }
 0x4fb   :  { %2640 = vmatpush.msra.mxu1 %v9260_v33  ;;  %2661 = vmatpush.msra.mxu2 %v9261_v29  ;;  %v9309_v33 = vld [vmem:[#allocation71_spill] sm:$0xff]  ;;  %v9310_v29 = vld [vmem:[#allocation72_spill] sm:$0xff] }
 0x4fc   :  { %2621 = vmatpush.msra.mxu0 %v9262_v55  ;;  %2681 = vmatpush.msra.mxu3 %v9263_v30  ;;  %v9314_v55 = vld [vmem:[#allocation79_spill] sm:$0xff]  ;;  %v9315_v30 = vld [vmem:[#allocation80_spill] sm:$0xff] }
 0x4fd   :  { %2641 = vmatpush.msra.mxu1 %v9264_v49  ;;  %2662 = vmatpush.msra.mxu2 %v9265_v54  ;;  %v9316_v49 = vld [vmem:[#allocation81_spill] sm:$0xff]  ;;  %v9317_v54 = vld [vmem:[#allocation83_spill] sm:$0xff] }
 0x4fe   :  { %2622 = vmatpush.msra.mxu0 %v9266_v15  ;;  %2682 = vmatpush.msra.mxu3 %v9267_v36  ;;  %v9318_v15 = vld [vmem:[#allocation84_spill] sm:$0xff]  ;;  %v9319_v36 = vld [vmem:[#allocation85_spill] sm:$0xff] }
 0x4ff   :  { %2642 = vmatpush.msra.mxu1 %v9268_v16  ;;  %2663 = vmatpush.msra.mxu2 %v9269_v14  ;;  %v9320_v16 = vld [vmem:[#allocation87_spill] sm:$0xff]  ;;  %v9321_v14 = vld [vmem:[#allocation88_spill] sm:$0xff] }
 0x500   :  { %2623 = vmatpush.msra.mxu0 %v9270_v38  ;;  %2683 = vmatpush.msra.mxu3 %v9271_v59  ;;  %v9322_v38 = vld [vmem:[#allocation89_spill] sm:$0xff]  ;;  %v9323_v59 = vld [vmem:[#allocation92_spill] sm:$0xff] }
 0x501   :  { %2643 = vmatpush.msra.mxu1 %v9272_v39  ;;  %2664 = vmatpush.msra.mxu2 %v9273_v46  ;;  %v9324_v39 = vld [vmem:[#allocation93_spill] sm:$0xff]  ;;  %v9325_v46 = vld [vmem:[#allocation94_spill] sm:$0xff] }
 0x502   :  { %2624 = vmatpush.msra.mxu0 %v9274_v61  ;;  %2684 = vmatpush.msra.mxu3 %v9275_v25  ;;  %v9326_v61 = vld [vmem:[#allocation95_spill] sm:$0xff]  ;;  %v9327_v25 = vld [vmem:[#allocation96_spill] sm:$0xff] }
 0x503   :  { %2644 = vmatpush.msra.mxu1 %v9276_v42  ;;  %2665 = vmatpush.msra.mxu2 %v9277_v45  ;;  %v9328_v42 = vld [vmem:[#allocation99_spill] sm:$0xff]  ;;  %v9329_v45 = vld [vmem:[#allocation109_spill] sm:$0xff] }
 0x504   :  { %2625 = vmatpush.msra.mxu0 %v9278_v7  ;;  %2685 = vmatpush.msra.mxu3 %v9279_v60  ;;  %v9330_v7 = vld [vmem:[#allocation100_spill] sm:$0xff]  ;;  %v9331_v60 = vld [vmem:[#allocation101_spill] sm:$0xff] }
 0x505   :  { %2645 = vmatpush.msra.mxu1 %v9280_v5  ;;  %2666 = vmatpush.msra.mxu2 %v9281_v53  ;;  %v9332_v5 = vld [vmem:[#allocation102_spill] sm:$0xff]  ;;  %v9333_v53 = vld [vmem:[#allocation103_spill] sm:$0xff] }
 0x506   :  { %2626 = vmatpush.msra.mxu0 %v9282_v17  ;;  %2686 = vmatpush.msra.mxu3 %v9283_v58  ;;  %v9334_v17 = vld [vmem:[#allocation104_spill] sm:$0xff]  ;;  %v9335_v58 = vld [vmem:[#allocation105_spill] sm:$0xff] }
 0x507   :  { %2646 = vmatpush.msra.mxu1 %v9284_v18  ;;  %2667 = vmatpush.msra.mxu2 %v9285_v0  ;;  %v9336_v18 = vld [vmem:[#allocation118_spill] sm:$0xff] }
 0x508   :  { %2627 = vmatpush.msra.mxu0 %v9286_v52  ;;  %2687 = vmatpush.msra.mxu3 %v9287_v37  ;;  %v9337_v0 = vld [vmem:[#allocation106_spill] sm:$0xff]  ;;  %v9338_v52 = vld [vmem:[#allocation107_spill] sm:$0xff]  ;;  %v9339_v37 = vld [vmem:[#allocation108_spill] sm:$0xff] }
 0x509   :  { %2647 = vmatpush.msra.mxu1 %v9288_v56  ;;  %2668 = vmatpush.msra.mxu2 %v9289_v19  ;;  %v9340_v56 = vld [vmem:[#allocation122_spill] sm:$0xff] }
 0x50a   :  { %2628 = vmatpush.msra.mxu0 %v9290_v31  ;;  %2688 = vmatpush.msra.mxu3 %v9291_v27  ;;  %v9341_v19 = vld [vmem:[#allocation110_spill] sm:$0xff]  ;;  %v9342_v31 = vld [vmem:[#allocation113_spill] sm:$0xff] }
 0x50b   :  { %2648 = vmatpush.msra.mxu1 %v9292_v6  ;;  %2669 = vmatpush.msra.mxu2 %v9293_v3  ;;  %v9343_v27 = vld [vmem:[#allocation114_spill] sm:$0xff]  ;;  %v9345_v3 = vld [vmem:[#allocation115_spill] sm:$0xff] }
 0x50c   :  { %2629 = vmatpush.msra.mxu0 %v9294_v20  ;;  %2689 = vmatpush.msra.mxu3 %v9295_v47  ;;  %v9344_v6 = vld [vmem:[#allocation126_spill] sm:$0xff]  ;;  %v9346_v20 = vld [vmem:[#allocation116_spill] sm:$0xff]  ;;  %v9347_v47 = vld [vmem:[#allocation117_spill] sm:$0xff] }
 0x50d   :  { %2649 = vmatpush.msra.mxu1 %v9296_v63  ;;  %2670 = vmatpush.msra.mxu2 %v6963_v24  ;;  %v9302_v24 = vld [vmem:[#allocation65_spill] sm:$0xff]  ;;  %v9348_v63 = vld [vmem:[#allocation119_spill] sm:$0xff] }
 0x50e   :  { %2630 = vmatpush.msra.mxu0 %v9297_v48  ;;  %2690 = vmatpush.msra.mxu3 %v6969_v11  ;;  %v9303_v11 = vld [vmem:[#allocation82_spill] sm:$0xff]  ;;  %v9349_v48 = vld [vmem:[#allocation120_spill] sm:$0xff] }
 0x50f   :  { %2650 = vmatpush.msra.mxu1 %v9298_v26  ;;  %2671 = vmatpush.msra.mxu2 %v9299_v4  ;;  %v9350_v26 = vld [vmem:[#allocation121_spill] sm:$0xff]  ;;  %v9351_v4 = vld [vmem:[#allocation123_spill] sm:$0xff] }
 0x510   :  { %2631 = vmatpush.msra.mxu0 %v9300_v8  ;;  %3599 = vmatmul.msk.f32.vlgmr.msra.gmra.mxu2 %vm5004_vm12, %v7304_v62  ;;  %v9306_v62 = vld [vmem:[#allocation69_spill] sm:$0xff]  ;;  %v9352_v8 = vld [vmem:[#allocation124_spill] sm:$0xff] }
 0x511   :  { %2691 = vmatpush.msra.mxu3 %v9301_v9  ;;  %3597 = vmatmul.msk.f32.vlgmr.msra.gmra.mxu0 %vm5004_vm12, %v7293_v23  ;;  %v9353_v9 = vld [vmem:[#allocation125_spill] sm:$0xff] }
 0x512   :  { %2651 = vmatpush.msra.mxu1 %v9302_v24  ;;  %3601 = vmatmul.msk.f32.vlgmr.msra.gmra.mxu3 %vm5004_vm12, %v7293_v23  ;;  %v9311_v23 = vld [vmem:[#allocation73_spill] sm:$0xff]  ;;  %v9354_v24 = vld [vmem:[#allocation138_spill] sm:$0xff] }
 0x513   :  { %2652 = vmatmul.f32.vlgmr.msra.gmra.mxu1 %v7301_v32  ;;  %2823 = vmatpush.msrb.mxu2 %v6997_v21  ;;  %v9312_v32 = vld [vmem:[#allocation74_spill] sm:$0xff]  ;;  %v9313_v21 = vld [vmem:[#allocation75_spill] sm:$0xff] }
 0x514   :  { %2783 = vmatpush.msrb.mxu0 %v9303_v11  ;;  %2843 = vmatpush.msrb.mxu3 %v9304_v13  ;;  %v9355_v11 = vld [vmem:[#allocation127_spill] sm:$0xff]  ;;  %v9356_v13 = vld [vmem:[#allocation130_spill] sm:$0xff] }
 0x515   :  { %2803 = vmatpush.msrb.mxu1 %v9305_v41  ;;  %2824 = vmatpush.msrb.mxu2 %v9306_v62  ;;  %v9357_v41 = vld [vmem:[#allocation131_spill] sm:$0xff]  ;;  %v9358_v62 = vld [vmem:[#allocation142_spill] sm:$0xff] }
 0x516   :  { %2784 = vmatpush.msrb.mxu0 %v9307_v35  ;;  %2844 = vmatpush.msrb.mxu3 %v9308_v2  ;;  %v9359_v35 = vld [vmem:[#allocation132_spill] sm:$0xff]  ;;  %v9360_v2 = vld [vmem:[#allocation133_spill] sm:$0xff] }
 0x517   :  { %2804 = vmatpush.msrb.mxu1 %v9309_v33  ;;  %2825 = vmatpush.msrb.mxu2 %v9310_v29  ;;  %v9361_v33 = vld [vmem:[#allocation134_spill] sm:$0xff] }
 0x518   :  { %2785 = vmatpush.msrb.mxu0 %v9311_v23  ;;  %2845 = vmatpush.msrb.mxu3 %v9312_v32  ;;  %v9362_v29 = vld [vmem:[#allocation146_spill] sm:$0xff]  ;;  %v9363_v23 = vld [vmem:[#allocation135_spill] sm:$0xff]  ;;  %v9364_v32 = vld [vmem:[#allocation136_spill] sm:$0xff] }
 0x519   :  { %2805 = vmatpush.msrb.mxu1 %v9313_v21  ;;  %2826 = vmatpush.msrb.mxu2 %v9314_v55  ;;  %v9365_v21 = vld [vmem:[#allocation137_spill] sm:$0xff]  ;;  %v9366_v55 = vld [vmem:[#allocation150_spill] sm:$0xff] }
 0x51a   :  { %2786 = vmatpush.msrb.mxu0 %v9315_v30  ;;  %2846 = vmatpush.msrb.mxu3 %v9316_v49  ;;  %v9367_v30 = vld [vmem:[#allocation139_spill] sm:$0xff]  ;;  %v9368_v49 = vld [vmem:[#allocation140_spill] sm:$0xff] }
 0x51b   :  { %2806 = vmatpush.msrb.mxu1 %v9317_v54  ;;  %2827 = vmatpush.msrb.mxu2 %v9318_v15  ;;  %v7463_v54 = vld [vmem:[#allocation6 + $0x1d0] sm:$0xff] }
 0x51c   :  { %2787 = vmatpush.msrb.mxu0 %v9319_v36  ;;  %2847 = vmatpush.msrb.mxu3 %v9320_v16  ;;  %v9369_v15 = vld [vmem:[#allocation141_spill] sm:$0xff]  ;;  %v9370_v36 = vld [vmem:[#allocation154_spill] sm:$0xff] }
 0x51d   :  { %2807 = vmatpush.msrb.mxu1 %v9321_v14  ;;  %2828 = vmatpush.msrb.mxu2 %v9322_v38  ;;  %v7469_v16 = vld [vmem:[#allocation6 + $0x1b0] sm:$0xff]  ;;  %v9372_v14 = vld [vmem:[#allocation144_spill] sm:$0xff] }
 0x51e   :  { %2788 = vmatpush.msrb.mxu0 %v9323_v59  ;;  %2848 = vmatpush.msrb.mxu3 %v9324_v39  ;;  %v7475_v38 = vld [vmem:[#allocation6 + $0x190] sm:$0xff]  ;;  %v7490_v59 = vld [vmem:[#allocation6 + $0x348] sm:$0xff] }
 0x51f   :  { %2808 = vmatpush.msrb.mxu1 %v9325_v46  ;;  %2829 = vmatpush.msrb.mxu2 %v9326_v61  ;;  %v7511_v39 = vld [vmem:[#allocation6 + $0x110] sm:$0xff]  ;;  %v7514_v46 = vld [vmem:[#allocation6 + $0x308] sm:$0xff] }
 0x520   :  { %2789 = vmatpush.msrb.mxu0 %v9327_v25  ;;  %2849 = vmatpush.msrb.mxu3 %v9328_v42  ;;  %v7517_v61 = vld [vmem:[#allocation6 + $0x310] sm:$0xff]  ;;  %v7520_v25 = vld [vmem:[#allocation6 + $0x508] sm:$0xff] }
 0x521   :  { %2809 = vmatpush.msrb.mxu1 %v9329_v45  ;;  %2830 = vmatpush.msrb.mxu2 %v9330_v7  ;;  %v7523_v42 = vld [vmem:[#allocation6 + $0xf0] sm:$0xff]  ;;  %v7526_v45 = vld [vmem:[#allocation6 + $0x2e8] sm:$0xff] }
 0x522   :  { %2790 = vmatpush.msrb.mxu0 %v9331_v60  ;;  %2850 = vmatpush.msrb.mxu3 %v9332_v5  ;;  %v7529_v7 = vld [vmem:[#allocation6 + $0x2f0] sm:$0xff]  ;;  %v7532_v60 = vld [vmem:[#allocation6 + $0x4e8] sm:$0xff] }
 0x523   :  { %2810 = vmatpush.msrb.mxu1 %v9333_v53  ;;  %2831 = vmatpush.msrb.mxu2 %v9334_v17  ;;  %v7535_v5 = vld [vmem:[#allocation6 + $0xd0] sm:$0xff]  ;;  %v7538_v53 = vld [vmem:[#allocation6 + $0x2c8] sm:$0xff] }
 0x524   :  { %2791 = vmatpush.msrb.mxu0 %v9335_v58  ;;  %2851 = vmatpush.msrb.mxu3 %v9336_v18  ;;  %v7541_v17 = vld [vmem:[#allocation6 + $0x2d0] sm:$0xff]  ;;  %v7544_v58 = vld [vmem:[#allocation6 + $0x4c8] sm:$0xff] }
 0x525   :  { %2811 = vmatpush.msrb.mxu1 %v9337_v0  ;;  %2832 = vmatpush.msrb.mxu2 %v9338_v52  ;;  %v7547_v18 = vld [vmem:[#allocation6 + $0xb0] sm:$0xff]  ;;  %v7550_v0 = vld [vmem:[#allocation6 + $0x2a8] sm:$0xff] }
 0x526   :  { %2792 = vmatpush.msrb.mxu0 %v9339_v37  ;;  %2852 = vmatpush.msrb.mxu3 %v9340_v56  ;;  %v7553_v52 = vld [vmem:[#allocation6 + $0x2b0] sm:$0xff]  ;;  %v7556_v37 = vld [vmem:[#allocation6 + $0x4a8] sm:$0xff] }
 0x527   :  { %2812 = vmatpush.msrb.mxu1 %v9341_v19  ;;  %2833 = vmatpush.msrb.mxu2 %v9342_v31  ;;  %v7559_v56 = vld [vmem:[#allocation6 + $0x90] sm:$0xff]  ;;  %v7562_v19 = vld [vmem:[#allocation6 + $0x288] sm:$0xff] }
 0x528   :  { %2793 = vmatpush.msrb.mxu0 %v9343_v27  ;;  %2853 = vmatpush.msrb.mxu3 %v9344_v6  ;;  %v7565_v31 = vld [vmem:[#allocation6 + $0x290] sm:$0xff]  ;;  %v7568_v27 = vld [vmem:[#allocation6 + $0x488] sm:$0xff] }
 0x529   :  { %2813 = vmatpush.msrb.mxu1 %v9345_v3  ;;  %2834 = vmatpush.msrb.mxu2 %v9346_v20  ;;  %v7571_v6 = vld [vmem:[#allocation6 + $0x70] sm:$0xff]  ;;  %v7574_v3 = vld [vmem:[#allocation6 + $0x268] sm:$0xff] }
 0x52a   :  { %2794 = vmatpush.msrb.mxu0 %v9347_v47  ;;  %2854 = vmatpush.msrb.mxu3 %v9348_v63  ;;  %v7577_v20 = vld [vmem:[#allocation6 + $0x270] sm:$0xff]  ;;  %v7580_v47 = vld [vmem:[#allocation6 + $0x468] sm:$0xff] }
 0x52b   :  { %2814 = vmatpush.msrb.mxu1 %v9349_v48  ;;  %2835 = vmatpush.msrb.mxu2 %v9350_v26  ;;  %9373 = vst [vmem:[#allocation145_spill] sm:$0xff] %v7580_v47  ;;  %v7583_v63 = vld [vmem:[#allocation6 + $0x50] sm:$0xff]  ;;  %v7586_v48 = vld [vmem:[#allocation6 + $0x248] sm:$0xff] }
 0x52c   :  { %2795 = vmatpush.msrb.mxu0 %v9351_v4  ;;  %2855 = vmatpush.msrb.mxu3 %v9352_v8  ;;  %9374 = vst [vmem:[#allocation158_spill] sm:$0xff] %v7583_v63  ;;  %v7589_v26 = vld [vmem:[#allocation6 + $0x250] sm:$0xff]  ;;  %v7592_v4 = vld [vmem:[#allocation6 + $0x448] sm:$0xff] }
 0x52d   :  { %2815 = vmatpush.msrb.mxu1 %v9353_v9  ;;  %2836 = vmatpush.msrb.mxu2 %v9354_v24  ;;  %9375 = vst [vmem:[#allocation147_spill] sm:$0xff] %v7586_v48  ;;  %v7595_v8 = vld [vmem:[#allocation6 + $0x30] sm:$0xff]  ;;  %v7598_v9 = vld [vmem:[#allocation6 + $0x228] sm:$0xff] }
 0x52e   :  { %2796 = vmatpush.msrb.mxu0 %v9355_v11  ;;  %2856 = vmatpush.msrb.mxu3 %v9356_v13  ;;  %9376 = vst [vmem:[#allocation148_spill] sm:$0xff] %v7589_v26  ;;  %v7601_v24 = vld [vmem:[#allocation6 + $0x230] sm:$0xff]  ;;  %v7604_v11 = vld [vmem:[#allocation6 + $0x428] sm:$0xff] }
 0x52f   :  { %2816 = vmatpush.msrb.mxu1 %v9357_v41  ;;  %2837 = vmatpush.msrb.mxu2 %v9358_v62  ;;  %9377 = vst [vmem:[#allocation149_spill] sm:$0xff] %v7592_v4  ;;  %v7607_v13 = vld [vmem:[#allocation6 + $0x10] sm:$0xff]  ;;  %v7610_v41 = vld [vmem:[#allocation6 + $0x208] sm:$0xff] }
 0x530   :  { %2797 = vmatpush.msrb.mxu0 %v9359_v35  ;;  %2857 = vmatpush.msrb.mxu3 %v9360_v2  ;;  %9378 = vst [vmem:[#allocation162_spill] sm:$0xff] %v7595_v8  ;;  %v7613_v62 = vld [vmem:[#allocation6 + $0x210] sm:$0xff]  ;;  %v7616_v35 = vld [vmem:[#allocation6 + $0x408] sm:$0xff] }
 0x531   :  { %2817 = vmatpush.msrb.mxu1 %v9361_v33  ;;  %2838 = vmatpush.msrb.mxu2 %v9362_v29  ;;  %9379 = vst [vmem:[#allocation151_spill] sm:$0xff] %v7598_v9  ;;  %v9386_v33 = vld [vmem:[#allocation128_spill] sm:$0xff] }
 0x532   :  { %2798 = vmatpush.msrb.mxu0 %v9363_v23  ;;  %2858 = vmatpush.msrb.mxu3 %v9364_v32  ;;  %9380 = vst [vmem:[#allocation152_spill] sm:$0xff] %v7601_v24 }
 0x533   :  { %2903 = vmatpush.msra.mxu2 %v9365_v21  ;;  %2818 = vmatpush.msrb.mxu1 %v9366_v55  ;;  %9381 = vst [vmem:[#allocation153_spill] sm:$0xff] %v7604_v11 }
 0x534   :  { %2863 = vmatpush.msra.mxu0 %v7192_v40  ;;  %2923 = vmatpush.msra.mxu3 %v9367_v30  ;;  %v9371_v40 = vld [vmem:[#allocation143_spill] sm:$0xff]  ;;  %9382 = vst [vmem:[#allocation166_spill] sm:$0xff] %v7607_v13 }
 0x535   :  { %2883 = vmatpush.msra.mxu1 %v9368_v49  ;;  %2904 = vmatpush.msra.mxu2 %v7463_v54  ;;  %9383 = vst [vmem:[#allocation155_spill] sm:$0xff] %v7610_v41 }
 0x536   :  { %2864 = vmatpush.msra.mxu0 %v7202_v50  ;;  %2924 = vmatpush.msra.mxu3 %v9369_v15  ;;  %v7481_v50 = vld [vmem:[#allocation6 + $0x170] sm:$0xff]  ;;  %9384 = vst [vmem:[#allocation156_spill] sm:$0xff] %v7613_v62 }
 0x537   :  { %2884 = vmatpush.msra.mxu1 %v9370_v36  ;;  %2905 = vmatpush.msra.mxu2 %v7469_v16  ;;  %9385 = vst [vmem:[#allocation168_spill] sm:$0xff] %v7616_v35  ;;  %v9387_v15 = vld [vmem:[#allocation129_spill] sm:$0xff] }
 0x538   :  { %2865 = vmatpush.msra.mxu0 %v7212_v22  ;;  %2925 = vmatpush.msra.mxu3 %v9371_v40  ;;  %v7487_v22 = vld [vmem:[#allocation6 + $0x150] sm:$0xff] }
 0x539   :  { %2885 = vmatpush.msra.mxu1 %v9372_v14  ;;  %2906 = vmatpush.msra.mxu2 %v7475_v38 }
 0x53a   :  { %2866 = vmatpush.msra.mxu0 %v7222_v12  ;;  %2926 = vmatpush.msra.mxu3 %v7225_v51  ;;  %v7493_v12 = vld [vmem:[#allocation6 + $0x350] sm:$0xff]  ;;  %v7496_v51 = vld [vmem:[#allocation6 + $0x548] sm:$0xff] }
 0x53b   :  { %2886 = vmatpush.msra.mxu1 %v7228_v44  ;;  %2907 = vmatpush.msra.mxu2 %v7481_v50  ;;  %v7505_v44 = vld [vmem:[#allocation6 + $0x330] sm:$0xff] }
 0x53c   :  { %2867 = vmatpush.msra.mxu0 %v7232_v34  ;;  %2927 = vmatpush.msra.mxu3 %v7235_v28  ;;  %v7499_v34 = vld [vmem:[#allocation6 + $0x130] sm:$0xff]  ;;  %v7502_v28 = vld [vmem:[#allocation6 + $0x328] sm:$0xff] }
 0x53d   :  { %2887 = vmatpush.msra.mxu1 %v7238_v10  ;;  %2908 = vmatpush.msra.mxu2 %v7487_v22  ;;  %v7508_v10 = vld [vmem:[#allocation6 + $0x528] sm:$0xff] }
 0x53e   :  { %2868 = vmatpush.msra.mxu0 %v7490_v59  ;;  %2928 = vmatpush.msra.mxu3 %v7493_v12 }
 0x53f   :  { %2888 = vmatpush.msra.mxu1 %v7496_v51  ;;  %2909 = vmatpush.msra.mxu2 %v7499_v34 }
 0x540   :  { %2869 = vmatpush.msra.mxu0 %v7502_v28  ;;  %2929 = vmatpush.msra.mxu3 %v7505_v44 }
 0x541   :  { %2889 = vmatpush.msra.mxu1 %v7508_v10  ;;  %2910 = vmatpush.msra.mxu2 %v7511_v39 }
 0x542   :  { %2870 = vmatpush.msra.mxu0 %v7514_v46  ;;  %2930 = vmatpush.msra.mxu3 %v7517_v61 }
 0x543   :  { %2890 = vmatpush.msra.mxu1 %v7520_v25  ;;  %2911 = vmatpush.msra.mxu2 %v7523_v42 }
 0x544   :  { %2871 = vmatpush.msra.mxu0 %v7526_v45  ;;  %2931 = vmatpush.msra.mxu3 %v7529_v7 }
 0x545   :  { %2891 = vmatpush.msra.mxu1 %v7532_v60  ;;  %2912 = vmatpush.msra.mxu2 %v7535_v5 }
 0x546   :  { %2872 = vmatpush.msra.mxu0 %v7538_v53  ;;  %2932 = vmatpush.msra.mxu3 %v7541_v17 }
 0x547   :  { %2892 = vmatpush.msra.mxu1 %v7544_v58  ;;  %2913 = vmatpush.msra.mxu2 %v7547_v18 }
 0x548   :  { %2873 = vmatpush.msra.mxu0 %v7550_v0  ;;  %2933 = vmatpush.msra.mxu3 %v7553_v52 }
 0x549   :  { %2893 = vmatpush.msra.mxu1 %v7556_v37  ;;  %2914 = vmatpush.msra.mxu2 %v7559_v56 }
 0x54a   :  { %2874 = vmatpush.msra.mxu0 %v7562_v19  ;;  %2934 = vmatpush.msra.mxu3 %v7565_v31 }
 0x54b   :  { %2894 = vmatpush.msra.mxu1 %v7568_v27  ;;  %2915 = vmatpush.msra.mxu2 %v7571_v6 }
 0x54c   :  { %2875 = vmatpush.msra.mxu0 %v7574_v3  ;;  %2935 = vmatpush.msra.mxu3 %v7577_v20 }
 0x54d   :  { %2895 = vmatpush.msra.mxu1 %v7580_v47  ;;  %2916 = vmatpush.msra.mxu2 %v7583_v63 }
 0x54e   :  { %2876 = vmatpush.msra.mxu0 %v7586_v48  ;;  %2936 = vmatpush.msra.mxu3 %v7589_v26 }
 0x54f   :  { %2896 = vmatpush.msra.mxu1 %v7592_v4  ;;  %2917 = vmatpush.msra.mxu2 %v7595_v8 }
 0x550   :  { %2877 = vmatpush.msra.mxu0 %v7598_v9  ;;  %2937 = vmatpush.msra.mxu3 %v7601_v24  ;;  %v9389_v9 = vld [vmem:[#allocation53_spill] sm:$0xff] }
 0x551   :  { %2897 = vmatpush.msra.mxu1 %v7604_v11  ;;  %2918 = vmatpush.msra.mxu2 %v7607_v13 }
 0x552   :  { %2878 = vmatpush.msra.mxu0 %v7610_v41  ;;  %2938 = vmatpush.msra.mxu3 %v7613_v62 }
 0x553   :  { %2898 = vmatpush.msra.mxu1 %v7616_v35 }
 0x56b   :  { %v2473_v2 = vpop.f32.mrf.mxu0 }
 0x56c   :  { %v2474_v29 = vadd.f32 %v2473_v2, %v9386_v33 }
 0x56d   :  { %v2493_v23 = vpop.f32.mrf.mxu1 }
 0x56e   :  { %v2494_v32 = vadd.f32 %v2493_v23, %v2474_v29  ;;  %v9388_v23 = vld [vmem:[#allocation52_spill] sm:$0xff] }
 0x570   :  { %v2513_v21 = vpop.f32.mrf.mxu2 }
 0x571   :  { %v2514_v55 = vadd.f32 %v2513_v21, %v2494_v32 }
 0x572   :  { %v2533_v30 = vpop.f32.mrf.mxu3 }
 0x573   :  { %v3602_v49 = vmul.f32 -1.442695, %v2514_v55  ;;  %v2534_v36 = vadd.f32 %v2533_v30, %v9387_v15 }
 0x575   :  { %3744 = vpow2.f32 %v3602_v49  ;;  %v2553_v40 = vpop.f32.mrf.mxu0 }
 0x576   :  { %v2554_v14 = vadd.f32 %v2553_v40, %v2534_v36 }
 0x577   :  { %v2573_v41 = vpop.f32.mrf.mxu1 }
 0x578   :  { %v2574_v62 = vadd.f32 %v2573_v41, %v2554_v14 }
 0x57a   :  { %v3603_v13 = vmul.f32 -1.442695, %v2574_v62  ;;  %v2593_v33 = vpop.f32.mrf.mxu2 }
 0x57b   :  { %v3745_v11 = vpop.eup %3744  ;;  %v2594_v32 = vadd.f32 %v2593_v33, %v9388_v23 }
 0x57c   :  { %3746 = vpow2.f32 %v3603_v13  ;;  %v2705_v35 = vadd.f32 1.0, %v3745_v11  ;;  %v2613_v21 = vpop.f32.mrf.mxu3 }
 0x57d   :  { %v2614_v15 = vadd.f32 %v2613_v21, %v2594_v32 }
 0x57e   :  { %3748 = vrcp.f32 %v2705_v35  ;;  %v2719_v32 = vand.u32 2147483648, %v2705_v35  ;;  %vm2713_vm11 = vweird.f32 %v2705_v35 }
 0x582   :  { %v3747_v24 = vpop.eup %3746 }
 0x583   :  { %v2706_v2 = vadd.f32 1.0, %v3747_v24 }
 0x584   :  { %v3749_v29 = vpop.eup %3748 }
 0x585   :  { %3750 = vrcp.f32 %v2706_v2  ;;  %v2709_v30 = vmul.f32 %v3749_v29, %v2705_v35  ;;  %v2734_v63 = vand.u32 2147483648, %v2706_v2  ;;  %vm2714_vm8 = vweird.f32 %v3749_v29 }
 0x586   :  { %vm2728_vm9 = vweird.f32 %v2706_v2  ;;  %v2732_v21 = vand.u32 2147483647, %v2706_v2  ;;  %vm2715_vm13 = vmor %vm2713_vm11, %vm2714_vm8 }
 0x587   :  { %v2710_v41 = vsub.f32 1.0, %v2709_v30 }
 0x588   :  { %vm2733_vm14 = vcmp.eq.f32.partialorder %v2732_v21, 8.507059e+37 }
 0x589   :  { %v2711_v4 = vmul.f32 %v3749_v29, %v2710_v41 }
 0x58b   :  { %v3751_v55 = vpop.eup %3750  ;;  %v2712_v47 = vadd.f32 %v3749_v29, %v2711_v4 }
 0x58c   :  { %v2724_v49 = vmul.f32 %v3751_v55, %v2706_v2  ;;  %vm2729_vm7 = vweird.f32 %v3751_v55 }
 0x58d   :  { %vm2730_vm10 = vmor %vm2728_vm9, %vm2729_vm7 }
 0x58e   :  { %v2725_v36 = vsub.f32 1.0, %v2724_v49  ;;  %v2633_v40 = vpop.f32.mrf.mxu0  ;;  %v2717_v49 = vand.u32 2147483647, %v2705_v35 }
 0x58f   :  { %v2634_v62 = vadd.f32 %v2633_v40, %v2614_v15  ;;  %v2720_v40 = vor.u32 1.1754944e-38, %v2719_v32 }
 0x590   :  { %v2653_v14 = vpop.f32.mrf.mxu1  ;;  %v2726_v11 = vmul.f32 %v3751_v55, %v2725_v36  ;;  %v2735_v36 = vor.u32 1.1754944e-38, %v2734_v63  ;;  %vm2718_vm15 = vcmp.eq.f32.partialorder %v2717_v49, 8.507059e+37  ;;  %v7645_v49 = vld [vmem:[#allocation6 + $0x5f0] sm:$0xff] }
 0x591   :  { %v3604_v13 = vmul.f32 -1.442695, %v2634_v62  ;;  %v2654_v8 = vadd.f32 %v2653_v14, %v9389_v9 }
 0x592   :  { %v2727_v23 = vadd.f32 %v3751_v55, %v2726_v11 }
 0x593   :  { %3752 = vpow2.f32 %v3604_v13  ;;  %v2673_v24 = vpop.f32.mrf.mxu2 }
 0x594   :  { %v2674_v26 = vadd.f32 %v2673_v24, %v2654_v8  ;;  %v2731_v15 = vsel %vm2730_vm10, %v3751_v55, %v2727_v23  ;;  %v2716_v8 = vsel %vm2715_vm13, %v3749_v29, %v2712_v47 }
 0x595   :  { %v2693_v48 = vpop.f32.mrf.mxu3  ;;  %v2721_v4 = vsel %vm2718_vm15, %v2720_v40, %v2716_v8  ;;  %v7660_v8 = vld [vmem:[#allocation6 + $0x5d0] sm:$0xff]  ;;  %v7663_v40 = vld [vmem:[#allocation6 + $0x5d8] sm:$0xff] }
 0x596   :  { %v2694_v33 = vadd.f32 %v2693_v48, %v2674_v26  ;;  %v2736_v48 = vsel %vm2733_vm14, %v2735_v36, %v2731_v15  ;;  %v7654_v15 = vld [vmem:[#allocation6 + $0x1f8] sm:$0xff] }
 0x597   :  { %v2754_v2 = vmul.f32 %v2736_v48, %v7290_v43  ;;  %v7657_v36 = vld [vmem:[#allocation6 + $0x3d8] sm:$0xff] }
 0x598   :  { %3754 = vtanh.f32 %v2694_v33  ;;  %v7666_v48 = vld [vmem:[#allocation6 + $0x1d8] sm:$0xff] }
 0x599   :  { %v3753_v30 = vpop.eup %3752 }
 0x59a   :  { %v2707_v9 = vadd.f32 1.0, %v3753_v30  ;;  %v7640_v30 = vld [vmem:[#allocation6 + $0x3f8] sm:$0xff] }
 0x59c   :  { %3756 = vrcp.f32 %v2707_v9  ;;  %v2749_v11 = vand.u32 2147483648, %v2707_v9  ;;  %v2747_v47 = vand.u32 2147483647, %v2707_v9  ;;  %vm2743_vm1 = vweird.f32 %v2707_v9 }
 0x59e   :  { %v3755_v26 = vpop.eup %3754  ;;  %v2750_v55 = vor.u32 1.1754944e-38, %v2749_v11  ;;  %vm2748_vm5 = vcmp.eq.f32.partialorder %v2747_v47, 8.507059e+37  ;;  %v7691_v11 = vld [vmem:[#allocation6 + $0x198] sm:$0xff]  ;;  %v7703_v47 = vld [vmem:[#allocation6 + $0x570] sm:$0xff] }
 0x59f   :  { %v2755_v41 = vmul.f32 %v3755_v26, %v2721_v4  ;;  %v7669_v26 = vld [vmem:[#allocation6 + $0x3b8] sm:$0xff]  ;;  %v7672_v4 = vld [vmem:[#allocation6 + $0x5b0] sm:$0xff]  ;;  %9390 = vst [vmem:[#allocation157_spill] sm:$0xff] %v7691_v11 }
 0x5a0   :  { %9392 = vst [vmem:[#allocation160_spill] sm:$0xff] %v7703_v47 }
 0x5a1   :  { %v7624_v14 = vadd.f32 %v2755_v41, %v2754_v2  ;;  %v7675_v41 = vld [vmem:[#allocation6 + $0x5b8] sm:$0xff] }
 0x5a2   :  { %v3757_v62 = vpop.eup %3756  ;;  %v7678_v2 = vld [vmem:[#allocation6 + $0x1b8] sm:$0xff] }
 0x5a3   :  { %v2739_v13 = vmul.f32 %v3757_v62, %v2707_v9  ;;  %3758 = vtanh.f32 %v7624_v14  ;;  %vm2744_vm0 = vweird.f32 %v3757_v62  ;;  %v7648_v9 = vld [vmem:[#allocation6 + $0x5f8] sm:$0xff] }
 0x5a4   :  { %vm2745_vm4 = vmor %vm2743_vm1, %vm2744_vm0 }
 0x5a5   :  { %v2740_v35 = vsub.f32 1.0, %v2739_v13  ;;  %v7684_v13 = vld [vmem:[#allocation6 + $0x590] sm:$0xff] }
 0x5a7   :  { %v2741_v63 = vmul.f32 %v3757_v62, %v2740_v35  ;;  %v7687_v35 = vld [vmem:[#allocation6 + $0x598] sm:$0xff] }
 0x5a9   :  { %v2742_v29 = vadd.f32 %v3757_v62, %v2741_v63  ;;  %v3759_v33 = vpop.eup %3758  ;;  %v7694_v63 = vld [vmem:[#allocation6 + $0x378] sm:$0xff] }
 0x5aa   :  { %9391 = vst [vmem:[#allocation159_spill] sm:$0xff] %v7694_v63 }
 0x5ab   :  { %v2746_v24 = vsel %vm2745_vm4, %v3757_v62, %v2742_v29  ;;  %v7681_v62 = vld [vmem:[#allocation6 + $0x398] sm:$0xff] }
 0x5ac   :  { %v2751_v23 = vsel %vm2748_vm5, %v2750_v55, %v2746_v24  ;;  %v7706_v29 = vld [vmem:[#allocation6 + $0x578] sm:$0xff] }
 0x5ad   :  { %v7627_v43 = vmul.f32 %v3759_v33, %v2751_v23  ;;  %9393 = vst [vmem:[#allocation97_spill] sm:$0xff] %v7706_v29  ;;  %v7712_v55 = vld [vmem:[#allocation6 + $0x178] sm:$0xff]  ;;  %v7718_v33 = vld [vmem:[#allocation6 + $0x550] sm:$0xff] }
 0x5ae   :  { %9394 = vst [vmem:[#allocation98_spill] sm:$0xff] %v7712_v55  ;;  %v7715_v24 = vld [vmem:[#allocation6 + $0x358] sm:$0xff] }
 0x5af   :  { %3609 = vmatmul.msk.f32.vlgmr.msrb.gmra.mxu2 %vm5004_vm12, %v7627_v43  ;;  %v7635_v32 = vsel %vm258_vm2, %v7627_v43, %v4984_v57  ;;  %v7638_v21 = vrot.slane %v7627_v43, 6  ;;  %9395 = vst [vmem:[#allocation48_spill] sm:$0xff] %v7715_v24  ;;  %v7721_v23 = vld [vmem:[#allocation6 + $0x558] sm:$0xff] }
 0x5b0   :  { %2983 = vmatpush.msrb.mxu2 %v7640_v30  ;;  %2799 = vmatmul.f32.vlgmr.msrb.gmra.mxu0 %v7635_v32  ;;  %9396 = vst [vmem:[#allocation49_spill] sm:$0xff] %v7718_v33 }
 0x5b1   :  { %2859 = vmatmul.f32.vlgmr.msrb.gmra.mxu3 %v7635_v32  ;;  %2943 = vmatpush.msrb.mxu0 %v7645_v49  ;;  %9397 = vst [vmem:[#allocation161_spill] sm:$0xff] %v7721_v23 }
 0x5b2   :  { %3003 = vmatpush.msrb.mxu3 %v7648_v9  ;;  %3607 = vmatmul.msk.f32.vlgmr.msrb.gmra.mxu1 %vm5004_vm12, %v7638_v21 }
 0x5b3   :  { %2963 = vmatpush.msrb.mxu1 %v7654_v15  ;;  %2984 = vmatpush.msrb.mxu2 %v7657_v36 }
 0x5b4   :  { %2944 = vmatpush.msrb.mxu0 %v7660_v8  ;;  %3004 = vmatpush.msrb.mxu3 %v7663_v40 }
 0x5b5   :  { %2964 = vmatpush.msrb.mxu1 %v7666_v48  ;;  %2985 = vmatpush.msrb.mxu2 %v7669_v26 }
 0x5b6   :  { %2945 = vmatpush.msrb.mxu0 %v7672_v4  ;;  %3005 = vmatpush.msrb.mxu3 %v7675_v41 }
 0x5b7   :  { %2965 = vmatpush.msrb.mxu1 %v7678_v2  ;;  %2986 = vmatpush.msrb.mxu2 %v7681_v62 }
 0x5b8   :  { %2946 = vmatpush.msrb.mxu0 %v7684_v13  ;;  %3006 = vmatpush.msrb.mxu3 %v7687_v35 }
 0x5b9   :  { %2919 = vmatmul.f32.vlgmr.msra.gmra.mxu2 %v7635_v32  ;;  %2966 = vmatpush.msrb.mxu1 %v7691_v11  ;;  %v4376_v11 = vld [vmem:[#allocation6 + $0x5a0] sm:$0xff] }
 0x5ba   :  { %2987 = vmatpush.msrb.mxu2 %v7694_v63  ;;  %3611 = vmatmul.msk.f32.vlgmr.msra.gmra.mxu0 %vm5004_vm12, %v7638_v21  ;;  %v4374_v63 = vld [vmem:[#allocation6 + $0x1c8] sm:$0xff] }
 0x5bb   :  { %3615 = vmatmul.msk.f32.vlgmr.msra.gmra.mxu3 %vm5004_vm12, %v7638_v21  ;;  %2947 = vmatpush.msrb.mxu0 %v7703_v47  ;;  %v7727_v47 = vld [vmem:[#allocation6 + $0x338] sm:$0xff] }
 0x5bc   :  { %3007 = vmatpush.msrb.mxu3 %v7706_v29  ;;  %3613 = vmatmul.msk.f32.vlgmr.msra.gmra.mxu1 %vm5004_vm12, %v7627_v43  ;;  %v7724_v29 = vld [vmem:[#allocation6 + $0x158] sm:$0xff]  ;;  %9399 = vst [vmem:[#allocation164_spill] sm:$0xff] %v7727_v47 }
 0x5bd   :  { %2967 = vmatpush.msrb.mxu1 %v7712_v55  ;;  %2988 = vmatpush.msrb.mxu2 %v7715_v24  ;;  %9398 = vst [vmem:[#allocation163_spill] sm:$0xff] %v7724_v29  ;;  %v7730_v55 = vld [vmem:[#allocation6 + $0x530] sm:$0xff]  ;;  %v7733_v24 = vld [vmem:[#allocation6 + $0x538] sm:$0xff] }
 0x5be   :  { %2948 = vmatpush.msrb.mxu0 %v7718_v33  ;;  %3008 = vmatpush.msrb.mxu3 %v7721_v23  ;;  %9400 = vst [vmem:[#allocation165_spill] sm:$0xff] %v7730_v55  ;;  %v7736_v33 = vld [vmem:[#allocation6 + $0x138] sm:$0xff] }
 0x5bf   :  { %2968 = vmatpush.msrb.mxu1 %v7724_v29  ;;  %2989 = vmatpush.msrb.mxu2 %v7727_v47  ;;  %9401 = vst [vmem:[#allocation167_spill] sm:$0xff] %v7733_v24  ;;  %v7739_v23 = vld [vmem:[#allocation6 + $0x318] sm:$0xff]  ;;  %v7742_v29 = vld [vmem:[#allocation6 + $0x510] sm:$0xff] }
 0x5c0   :  { %2949 = vmatpush.msrb.mxu0 %v7730_v55  ;;  %3009 = vmatpush.msrb.mxu3 %v7733_v24  ;;  %9402 = vst [vmem:[#allocation169_spill] sm:$0xff] %v7736_v33  ;;  %v7745_v47 = vld [vmem:[#allocation6 + $0x518] sm:$0xff] }
 0x5c1   :  { %2969 = vmatpush.msrb.mxu1 %v7736_v33  ;;  %9403 = vst [vmem:[#allocation170_spill] sm:$0xff] %v7739_v23  ;;  %2990 = vmatpush.msrb.mxu2 %v7739_v23  ;;  %v7748_v55 = vld [vmem:[#allocation6 + $0x118] sm:$0xff]  ;;  %v7754_v33 = vld [vmem:[#allocation6 + $0x4f0] sm:$0xff] }
 0x5c2   :  { %9404 = vst [vmem:[#allocation171_spill] sm:$0xff] %v7742_v29  ;;  %2950 = vmatpush.msrb.mxu0 %v7742_v29  ;;  %3010 = vmatpush.msrb.mxu3 %v7745_v47  ;;  %v7751_v24 = vld [vmem:[#allocation6 + $0x2f8] sm:$0xff] }
 0x5c3   :  { %9405 = vst [vmem:[#allocation77_spill] sm:$0xff] %v7745_v47  ;;  %2970 = vmatpush.msrb.mxu1 %v7748_v55  ;;  %2991 = vmatpush.msrb.mxu2 %v7751_v24  ;;  %v7757_v23 = vld [vmem:[#allocation6 + $0x4f8] sm:$0xff] }
 0x5c4   :  { %9406 = vst [vmem:[#allocation78_spill] sm:$0xff] %v7748_v55  ;;  %2951 = vmatpush.msrb.mxu0 %v7754_v33  ;;  %3011 = vmatpush.msrb.mxu3 %v7757_v23  ;;  %v7760_v29 = vld [vmem:[#allocation6 + $0xf8] sm:$0xff]  ;;  %v7766_v55 = vld [vmem:[#allocation6 + $0x4d0] sm:$0xff] }
 0x5c5   :  { %9407 = vst [vmem:[#allocation39_spill] sm:$0xff] %v7751_v24  ;;  %2971 = vmatpush.msrb.mxu1 %v7760_v29  ;;  %v7763_v47 = vld [vmem:[#allocation6 + $0x2d8] sm:$0xff] }
 0x5c6   :  { %9408 = vst [vmem:[#allocation40_spill] sm:$0xff] %v7754_v33  ;;  %2992 = vmatpush.msrb.mxu2 %v7763_v47  ;;  %2952 = vmatpush.msrb.mxu0 %v7766_v55  ;;  %v7769_v24 = vld [vmem:[#allocation6 + $0x4d8] sm:$0xff] }
 0x5c7   :  { %9409 = vst [vmem:[#allocation16_spill] sm:$0xff] %v7757_v23  ;;  %3012 = vmatpush.msrb.mxu3 %v7769_v24  ;;  %v7772_v33 = vld [vmem:[#allocation6 + $0xd8] sm:$0xff] }
 0x5c8   :  { %9410 = vst [vmem:[#allocation111_spill] sm:$0xff] %v7760_v29  ;;  %2972 = vmatpush.msrb.mxu1 %v7772_v33  ;;  %v7775_v23 = vld [vmem:[#allocation6 + $0x2b8] sm:$0xff]  ;;  %v7778_v29 = vld [vmem:[#allocation6 + $0x4b0] sm:$0xff] }
 0x5c9   :  { %9411 = vst [vmem:[#allocation112_spill] sm:$0xff] %v7763_v47  ;;  %2993 = vmatpush.msrb.mxu2 %v7775_v23  ;;  %2953 = vmatpush.msrb.mxu0 %v7778_v29  ;;  %v7781_v47 = vld [vmem:[#allocation6 + $0x4b8] sm:$0xff] }
 0x5ca   :  { %9412 = vst [vmem:[#allocation50_spill] sm:$0xff] %v7766_v55  ;;  %3013 = vmatpush.msrb.mxu3 %v7781_v47  ;;  %v7784_v55 = vld [vmem:[#allocation6 + $0xb8] sm:$0xff] }
 0x5cb   :  { %9413 = vst [vmem:[#allocation51_spill] sm:$0xff] %v7769_v24  ;;  %2973 = vmatpush.msrb.mxu1 %v7784_v55  ;;  %v7787_v24 = vld [vmem:[#allocation6 + $0x298] sm:$0xff] }
 0x5cc   :  { %9414 = vst [vmem:[#allocation22_spill] sm:$0xff] %v7772_v33  ;;  %2994 = vmatpush.msrb.mxu2 %v7787_v24  ;;  %v7790_v33 = vld [vmem:[#allocation6 + $0x490] sm:$0xff] }
 0x5cd   :  { %9415 = vst [vmem:[#allocation17_spill] sm:$0xff] %v7775_v23  ;;  %2954 = vmatpush.msrb.mxu0 %v7790_v33  ;;  %v7793_v23 = vld [vmem:[#allocation6 + $0x498] sm:$0xff] }
 0x5ce   :  { %9416 = vst [vmem:[#allocation18_spill] sm:$0xff] %v7778_v29  ;;  %3014 = vmatpush.msrb.mxu3 %v7793_v23  ;;  %v7796_v29 = vld [vmem:[#allocation6 + $0x98] sm:$0xff] }
 0x5cf   :  { %9417 = vst [vmem:[#allocation19_spill] sm:$0xff] %v7781_v47  ;;  %2974 = vmatpush.msrb.mxu1 %v7796_v29  ;;  %v7799_v47 = vld [vmem:[#allocation6 + $0x278] sm:$0xff] }
 0x5d0   :  { %9418 = vst [vmem:[#allocation28_spill] sm:$0xff] %v7784_v55  ;;  %2995 = vmatpush.msrb.mxu2 %v7799_v47  ;;  %v7802_v55 = vld [vmem:[#allocation6 + $0x470] sm:$0xff] }
 0x5d1   :  { %9419 = vst [vmem:[#allocation20_spill] sm:$0xff] %v7787_v24  ;;  %2955 = vmatpush.msrb.mxu0 %v7802_v55  ;;  %v7805_v24 = vld [vmem:[#allocation6 + $0x478] sm:$0xff] }
 0x5d2   :  { %9420 = vst [vmem:[#allocation21_spill] sm:$0xff] %v7790_v33  ;;  %3015 = vmatpush.msrb.mxu3 %v7805_v24  ;;  %v7808_v33 = vld [vmem:[#allocation6 + $0x78] sm:$0xff] }
 0x5d3   :  { %9421 = vst [vmem:[#allocation23_spill] sm:$0xff] %v7793_v23  ;;  %2975 = vmatpush.msrb.mxu1 %v7808_v33  ;;  %v7811_v23 = vld [vmem:[#allocation6 + $0x258] sm:$0xff] }
 0x5d4   :  { %9422 = vst [vmem:[#allocation32_spill] sm:$0xff] %v7796_v29  ;;  %2996 = vmatpush.msrb.mxu2 %v7811_v23  ;;  %v7814_v29 = vld [vmem:[#allocation6 + $0x450] sm:$0xff] }
 0x5d5   :  { %9423 = vst [vmem:[#allocation26_spill] sm:$0xff] %v7799_v47  ;;  %2956 = vmatpush.msrb.mxu0 %v7814_v29  ;;  %v7817_v47 = vld [vmem:[#allocation6 + $0x458] sm:$0xff] }
 0x5d6   :  { %9424 = vst [vmem:[#allocation27_spill] sm:$0xff] %v7802_v55  ;;  %3016 = vmatpush.msrb.mxu3 %v7817_v47  ;;  %v7820_v55 = vld [vmem:[#allocation6 + $0x58] sm:$0xff] }
 0x5d7   :  { %9425 = vst [vmem:[#allocation29_spill] sm:$0xff] %v7805_v24  ;;  %2976 = vmatpush.msrb.mxu1 %v7820_v55  ;;  %v7823_v24 = vld [vmem:[#allocation6 + $0x238] sm:$0xff] }
 0x5d8   :  { %9426 = vst [vmem:[#allocation90_spill] sm:$0xff] %v7808_v33  ;;  %2997 = vmatpush.msrb.mxu2 %v7823_v24  ;;  %v7826_v33 = vld [vmem:[#allocation6 + $0x430] sm:$0xff] }
 0x5d9   :  { %9427 = vst [vmem:[#allocation91_spill] sm:$0xff] %v7811_v23  ;;  %2957 = vmatpush.msrb.mxu0 %v7826_v33  ;;  %v7829_v23 = vld [vmem:[#allocation6 + $0x438] sm:$0xff] }
 0x5da   :  { %9428 = vst [vmem:[#allocation41_spill] sm:$0xff] %v7814_v29  ;;  %3017 = vmatpush.msrb.mxu3 %v7829_v23  ;;  %v7832_v29 = vld [vmem:[#allocation6 + $0x38] sm:$0xff] }
 0x5db   :  { %9429 = vst [vmem:[#allocation42_spill] sm:$0xff] %v7817_v47  ;;  %2977 = vmatpush.msrb.mxu1 %v7832_v29  ;;  %v7835_v47 = vld [vmem:[#allocation6 + $0x218] sm:$0xff] }
 0x5dc   :  { %9430 = vst [vmem:[#allocation36_spill] sm:$0xff] %v7820_v55  ;;  %2998 = vmatpush.msrb.mxu2 %v7835_v47  ;;  %v7838_v55 = vld [vmem:[#allocation6 + $0x410] sm:$0xff] }
 0x5dd   :  { %9431 = vst [vmem:[#allocation30_spill] sm:$0xff] %v7823_v24  ;;  %2958 = vmatpush.msrb.mxu0 %v7838_v55  ;;  %3619 = vmatmul.msk.f32.vlgmr.msrb.gmra.mxu2 %vm5004_vm12, %v7638_v21  ;;  %v4369_v21 = vld [vmem:[#allocation6 + $0x1e0] sm:$0xff] }
 0x5de   :  { %9432 = vst [vmem:[#allocation31_spill] sm:$0xff] %v7826_v33  ;;  %v7844_v33 = vld [vmem:[#allocation6 + $0x418] sm:$0xff]  ;;  %3617 = vmatmul.msk.f32.vlgmr.msrb.gmra.mxu0 %vm5004_vm12, %v7627_v43  ;;  %v4373_v24 = vld [vmem:[#allocation6 + $0x1c0] sm:$0xff] }
 0x5df   :  { %9433 = vst [vmem:[#allocation33_spill] sm:$0xff] %v7829_v23  ;;  %3018 = vmatpush.msrb.mxu3 %v7844_v33  ;;  %3110 = vmatpush.msra.mxu0 %v4369_v21  ;;  %v4372_v23 = vld [vmem:[#allocation6 + $0x5c0] sm:$0xff] }
 0x5e0   :  { %9434 = vst [vmem:[#allocation44_spill] sm:$0xff] %v7832_v29  ;;  %v7850_v29 = vld [vmem:[#allocation6 + $0x18] sm:$0xff]  ;;  %3621 = vmatmul.msk.f32.vlgmr.msrb.gmra.mxu3 %vm5004_vm12, %v7627_v43  ;;  %v4377_v43 = vld [vmem:[#allocation6 + $0x1a0] sm:$0xff] }
 0x5e1   :  { %9435 = vst [vmem:[#allocation34_spill] sm:$0xff] %v7835_v47  ;;  %2978 = vmatpush.msrb.mxu1 %v7850_v29  ;;  %v4370_v47 = vld [vmem:[#allocation6 + $0x1e8] sm:$0xff]  ;;  %3111 = vmatpush.msra.mxu0 %v4373_v24  ;;  %v4380_v21 = vld [vmem:[#allocation6 + $0x580] sm:$0xff] }
 0x5e2   :  { %9436 = vst [vmem:[#allocation35_spill] sm:$0xff] %v7838_v55  ;;  %2979 = vmatmul.f32.vlgmr.msrb.gmra.mxu1 %v7635_v32  ;;  %v4368_v55 = vld [vmem:[#allocation6 + $0x5e0] sm:$0xff]  ;;  %3170 = vmatpush.msra.mxu3 %v4370_v47  ;;  %v4378_v32 = vld [vmem:[#allocation6 + $0x1a8] sm:$0xff] }
 0x5e3   :  { %9437 = vst [vmem:[#allocation37_spill] sm:$0xff] %v7844_v33  ;;  %3150 = vmatpush.msra.mxu2 %v4368_v55  ;;  %v4371_v33 = vld [vmem:[#allocation6 + $0x3e0] sm:$0xff]  ;;  %3112 = vmatpush.msra.mxu0 %v4377_v43 }
 0x5e4   :  { %9438 = vst [vmem:[#allocation45_spill] sm:$0xff] %v7850_v29  ;;  %3130 = vmatpush.msra.mxu1 %v4371_v33  ;;  %3171 = vmatpush.msra.mxu3 %v4374_v63  ;;  %v4375_v29 = vld [vmem:[#allocation6 + $0x3c0] sm:$0xff]  ;;  %v4382_v33 = vld [vmem:[#allocation6 + $0x188] sm:$0xff] }
 0x5e5   :  { %3151 = vmatpush.msra.mxu2 %v4372_v23  ;;  %v4379_v55 = vld [vmem:[#allocation6 + $0x3a0] sm:$0xff] }
 0x5e6   :  { %3131 = vmatpush.msra.mxu1 %v4375_v29  ;;  %3172 = vmatpush.msra.mxu3 %v4378_v32  ;;  %v4381_v47 = vld [vmem:[#allocation6 + $0x180] sm:$0xff]  ;;  %v4386_v29 = vld [vmem:[#allocation6 + $0x168] sm:$0xff] }
 0x5e7   :  { %3152 = vmatpush.msra.mxu2 %v4376_v11  ;;  %3113 = vmatpush.msra.mxu0 %v4381_v47  ;;  %v4383_v23 = vld [vmem:[#allocation6 + $0x380] sm:$0xff] }
 0x5e8   :  { %3132 = vmatpush.msra.mxu1 %v4379_v55  ;;  %3173 = vmatpush.msra.mxu3 %v4382_v33  ;;  %v4384_v24 = vld [vmem:[#allocation6 + $0x560] sm:$0xff]  ;;  %v4390_v55 = vld [vmem:[#allocation6 + $0x148] sm:$0xff] }
 0x5e9   :  { %3153 = vmatpush.msra.mxu2 %v4380_v21  ;;  %v4385_v63 = vld [vmem:[#allocation6 + $0x160] sm:$0xff] }
 0x5ea   :  { %3133 = vmatpush.msra.mxu1 %v4383_v23  ;;  %3114 = vmatpush.msra.mxu0 %v4385_v63  ;;  %v4387_v11 = vld [vmem:[#allocation6 + $0x360] sm:$0xff]  ;;  %v4394_v23 = vld [vmem:[#allocation6 + $0x128] sm:$0xff] }
 0x5eb   :  { %3154 = vmatpush.msra.mxu2 %v4384_v24  ;;  %3174 = vmatpush.msra.mxu3 %v4386_v29  ;;  %v4388_v43 = vld [vmem:[#allocation6 + $0x540] sm:$0xff] }
 0x5ec   :  { %3134 = vmatpush.msra.mxu1 %v4387_v11  ;;  %v4389_v32 = vld [vmem:[#allocation6 + $0x140] sm:$0xff]  ;;  %v4398_v11 = vld [vmem:[#allocation6 + $0x108] sm:$0xff] }
 0x5ed   :  { %3155 = vmatpush.msra.mxu2 %v4388_v43  ;;  %3115 = vmatpush.msra.mxu0 %v4389_v32  ;;  %v4391_v21 = vld [vmem:[#allocation6 + $0x340] sm:$0xff] }
 0x5ee   :  { %3175 = vmatpush.msra.mxu3 %v4390_v55  ;;  %3135 = vmatpush.msra.mxu1 %v4391_v21  ;;  %v4392_v47 = vld [vmem:[#allocation6 + $0x520] sm:$0xff]  ;;  %v4402_v21 = vld [vmem:[#allocation6 + $0xe8] sm:$0xff] }
 0x5ef   :  { %3156 = vmatpush.msra.mxu2 %v4392_v47  ;;  %v4393_v33 = vld [vmem:[#allocation6 + $0x120] sm:$0xff] }
 0x5f0   :  { %3116 = vmatpush.msra.mxu0 %v4393_v33  ;;  %3176 = vmatpush.msra.mxu3 %v4394_v23  ;;  %v4395_v24 = vld [vmem:[#allocation6 + $0x320] sm:$0xff] }
 0x5f1   :  { %3136 = vmatpush.msra.mxu1 %v4395_v24  ;;  %v4396_v63 = vld [vmem:[#allocation6 + $0x500] sm:$0xff]  ;;  %v4406_v24 = vld [vmem:[#allocation6 + $0xc8] sm:$0xff] }
 0x5f2   :  { %3157 = vmatpush.msra.mxu2 %v4396_v63  ;;  %v4397_v29 = vld [vmem:[#allocation6 + $0x100] sm:$0xff]  ;;  %3177 = vmatpush.msra.mxu3 %v4398_v11 }
 0x5f3   :  { %3117 = vmatpush.msra.mxu0 %v4397_v29  ;;  %v4399_v43 = vld [vmem:[#allocation6 + $0x300] sm:$0xff] }
 0x5f4   :  { %3137 = vmatpush.msra.mxu1 %v4399_v43  ;;  %v4400_v32 = vld [vmem:[#allocation6 + $0x4e0] sm:$0xff]  ;;  %3178 = vmatpush.msra.mxu3 %v4402_v21  ;;  %v4410_v43 = vld [vmem:[#allocation6 + $0xa8] sm:$0xff] }
 0x5f5   :  { %3158 = vmatpush.msra.mxu2 %v4400_v32  ;;  %v4401_v55 = vld [vmem:[#allocation6 + $0xe0] sm:$0xff] }
 0x5f6   :  { %3118 = vmatpush.msra.mxu0 %v4401_v55  ;;  %v4403_v47 = vld [vmem:[#allocation6 + $0x2e0] sm:$0xff]  ;;  %3179 = vmatpush.msra.mxu3 %v4406_v24 }
 0x5f7   :  { %3138 = vmatpush.msra.mxu1 %v4403_v47  ;;  %v4404_v33 = vld [vmem:[#allocation6 + $0x4c0] sm:$0xff]  ;;  %v4414_v47 = vld [vmem:[#allocation6 + $0x88] sm:$0xff] }
 0x5f8   :  { %3159 = vmatpush.msra.mxu2 %v4404_v33  ;;  %v4405_v23 = vld [vmem:[#allocation6 + $0xc0] sm:$0xff]  ;;  %3180 = vmatpush.msra.mxu3 %v4410_v43 }
 0x5f9   :  { %3119 = vmatpush.msra.mxu0 %v4405_v23  ;;  %v4407_v63 = vld [vmem:[#allocation6 + $0x2c0] sm:$0xff] }
 0x5fa   :  { %3139 = vmatpush.msra.mxu1 %v4407_v63  ;;  %v4408_v29 = vld [vmem:[#allocation6 + $0x4a0] sm:$0xff]  ;;  %3181 = vmatpush.msra.mxu3 %v4414_v47  ;;  %v4418_v63 = vld [vmem:[#allocation6 + $0x68] sm:$0xff] }
 0x5fb   :  { %3160 = vmatpush.msra.mxu2 %v4408_v29  ;;  %v4409_v11 = vld [vmem:[#allocation6 + $0xa0] sm:$0xff] }
 0x5fc   :  { %3120 = vmatpush.msra.mxu0 %v4409_v11  ;;  %v4411_v32 = vld [vmem:[#allocation6 + $0x2a0] sm:$0xff]  ;;  %3182 = vmatpush.msra.mxu3 %v4418_v63 }
 0x5fd   :  { %3140 = vmatpush.msra.mxu1 %v4411_v32  ;;  %v4412_v55 = vld [vmem:[#allocation6 + $0x480] sm:$0xff]  ;;  %v4422_v32 = vld [vmem:[#allocation6 + $0x48] sm:$0xff] }
 0x5fe   :  { %3161 = vmatpush.msra.mxu2 %v4412_v55  ;;  %v4413_v21 = vld [vmem:[#allocation6 + $0x80] sm:$0xff]  ;;  %3183 = vmatpush.msra.mxu3 %v4422_v32  ;;  %v4433_v32 = vld [vmem:[#allocation6 + $0x3e8] sm:$0xff] }
 0x5ff   :  { %3121 = vmatpush.msra.mxu0 %v4413_v21  ;;  %v4415_v33 = vld [vmem:[#allocation6 + $0x280] sm:$0xff] }
 0x600   :  { %3141 = vmatpush.msra.mxu1 %v4415_v33  ;;  %v4416_v23 = vld [vmem:[#allocation6 + $0x460] sm:$0xff]  ;;  %v4426_v33 = vld [vmem:[#allocation6 + $0x28] sm:$0xff] }
 0x601   :  { %3162 = vmatpush.msra.mxu2 %v4416_v23  ;;  %v4417_v24 = vld [vmem:[#allocation6 + $0x60] sm:$0xff]  ;;  %3184 = vmatpush.msra.mxu3 %v4426_v33  ;;  %v4437_v33 = vld [vmem:[#allocation6 + $0x3d0] sm:$0xff] }
 0x602   :  { %3122 = vmatpush.msra.mxu0 %v4417_v24  ;;  %v4419_v29 = vld [vmem:[#allocation6 + $0x260] sm:$0xff] }
 0x603   :  { %3142 = vmatpush.msra.mxu1 %v4419_v29  ;;  %v4420_v11 = vld [vmem:[#allocation6 + $0x440] sm:$0xff]  ;;  %v4430_v29 = vld [vmem:[#allocation6 + $0x8] sm:$0xff] }
 0x604   :  { %3163 = vmatpush.msra.mxu2 %v4420_v11  ;;  %v4421_v43 = vld [vmem:[#allocation6 + $0x40] sm:$0xff]  ;;  %3185 = vmatpush.msra.mxu3 %v4430_v29  ;;  %v4431_v11 = vld [vmem:[#allocation6 + $0x1f0] sm:$0xff]  ;;  %v4441_v29 = vld [vmem:[#allocation6 + $0x5a8] sm:$0xff] }
 0x605   :  { %3123 = vmatpush.msra.mxu0 %v4421_v43  ;;  %v4423_v55 = vld [vmem:[#allocation6 + $0x240] sm:$0xff] }
 0x606   :  { %3143 = vmatpush.msra.mxu1 %v4423_v55  ;;  %v4424_v21 = vld [vmem:[#allocation6 + $0x420] sm:$0xff]  ;;  %v4434_v55 = vld [vmem:[#allocation6 + $0x3f0] sm:$0xff] }
 0x607   :  { %3164 = vmatpush.msra.mxu2 %v4424_v21  ;;  %v4425_v47 = vld [vmem:[#allocation6 + $0x20] sm:$0xff]  ;;  %3250 = vmatpush.msrb.mxu3 %v4434_v55  ;;  %v4435_v21 = vld [vmem:[#allocation6 + $0x5e8] sm:$0xff]  ;;  %v4446_v55 = vld [vmem:[#allocation6 + $0x370] sm:$0xff] }
 0x608   :  { %3124 = vmatpush.msra.mxu0 %v4425_v47  ;;  %v4427_v23 = vld [vmem:[#allocation6 + $0x220] sm:$0xff]  ;;  %v4436_v47 = vld [vmem:[#allocation6 + $0x3c8] sm:$0xff] }
 0x609   :  { %3144 = vmatpush.msra.mxu1 %v4427_v23  ;;  %v4428_v24 = vld [vmem:[#allocation6 + $0x400] sm:$0xff]  ;;  %3251 = vmatpush.msrb.mxu3 %v4437_v33  ;;  %v4438_v23 = vld [vmem:[#allocation6 + $0x5c8] sm:$0xff] }
 0x60a   :  { %3165 = vmatpush.msra.mxu2 %v4428_v24  ;;  %v4429_v63 = vld [vmem:[#allocation6] sm:$0xff]  ;;  %v4439_v24 = vld [vmem:[#allocation6 + $0x3a8] sm:$0xff] }
 0x60b   :  { %3125 = vmatpush.msra.mxu0 %v4429_v63  ;;  %v4432_v43 = vld [vmem:[#allocation6 + $0x200] sm:$0xff]  ;;  %v4440_v63 = vld [vmem:[#allocation6 + $0x3b0] sm:$0xff]  ;;  %v2777_v33 = vld.sshfl [vmem:[#allocation1 + $0x10] sm:$0xff pattern:$0x75316420] }
 0x60c   :  { %3230 = vmatpush.msrb.mxu2 %v4431_v11  ;;  %3145 = vmatpush.msra.mxu1 %v4432_v43  ;;  %v4442_v11 = vld [vmem:[#allocation6 + $0x388] sm:$0xff]  ;;  %v4443_v43 = vld [vmem:[#allocation6 + $0x390] sm:$0xff] }
 0x60d   :  { %3190 = vmatpush.msrb.mxu0 %v4433_v32  ;;  %3252 = vmatpush.msrb.mxu3 %v4440_v63  ;;  %v4445_v32 = vld [vmem:[#allocation6 + $0x368] sm:$0xff] }
 0x60e   :  { %3210 = vmatpush.msrb.mxu1 %v4435_v21  ;;  %3231 = vmatpush.msrb.mxu2 %v7463_v54  ;;  %v4444_v54 = vld [vmem:[#allocation6 + $0x588] sm:$0xff] }
 0x60f   :  { %3191 = vmatpush.msrb.mxu0 %v4436_v47  ;;  %3253 = vmatpush.msrb.mxu3 %v4443_v43 }
 0x610   :  { %3211 = vmatpush.msrb.mxu1 %v4438_v23  ;;  %3232 = vmatpush.msrb.mxu2 %v7469_v16  ;;  %v4447_v16 = vld [vmem:[#allocation6 + $0x568] sm:$0xff] }
 0x611   :  { %3192 = vmatpush.msrb.mxu0 %v4439_v24  ;;  %3254 = vmatpush.msrb.mxu3 %v4446_v55 }
 0x612   :  { %3212 = vmatpush.msrb.mxu1 %v4441_v29  ;;  %3233 = vmatpush.msrb.mxu2 %v7475_v38  ;;  %v9439_v38 = vld [vmem:[#allocation145_spill] sm:$0xff] }
 0x613   :  { %3193 = vmatpush.msrb.mxu0 %v4442_v11  ;;  %3255 = vmatpush.msrb.mxu3 %v7493_v12  ;;  %v9443_v12 = vld [vmem:[#allocation149_spill] sm:$0xff] }
 0x614   :  { %3213 = vmatpush.msrb.mxu1 %v4444_v54  ;;  %3234 = vmatpush.msrb.mxu2 %v7481_v50  ;;  %v9440_v50 = vld [vmem:[#allocation158_spill] sm:$0xff] }
 0x615   :  { %3194 = vmatpush.msrb.mxu0 %v4445_v32  ;;  %3256 = vmatpush.msrb.mxu3 %v7505_v44  ;;  %v9447_v44 = vld [vmem:[#allocation153_spill] sm:$0xff] }
 0x616   :  { %3214 = vmatpush.msrb.mxu1 %v4447_v16  ;;  %3235 = vmatpush.msrb.mxu2 %v7487_v22  ;;  %v9441_v22 = vld [vmem:[#allocation147_spill] sm:$0xff] }
 0x617   :  { %3195 = vmatpush.msrb.mxu0 %v7490_v59  ;;  %3257 = vmatpush.msrb.mxu3 %v7517_v61  ;;  %v9442_v59 = vld [vmem:[#allocation148_spill] sm:$0xff] }
 0x618   :  { %3215 = vmatpush.msrb.mxu1 %v7496_v51  ;;  %3236 = vmatpush.msrb.mxu2 %v7499_v34  ;;  %v9444_v51 = vld [vmem:[#allocation162_spill] sm:$0xff]  ;;  %v9445_v34 = vld [vmem:[#allocation151_spill] sm:$0xff]  ;;  %v9451_v61 = vld [vmem:[#allocation168_spill] sm:$0xff] }
 0x619   :  { %3196 = vmatpush.msrb.mxu0 %v7502_v28  ;;  %3258 = vmatpush.msrb.mxu3 %v7529_v7  ;;  %v9446_v28 = vld [vmem:[#allocation152_spill] sm:$0xff] }
 0x61a   :  { %3216 = vmatpush.msrb.mxu1 %v7508_v10  ;;  %3237 = vmatpush.msrb.mxu2 %v7511_v39  ;;  %v9448_v10 = vld [vmem:[#allocation166_spill] sm:$0xff]  ;;  %v9449_v39 = vld [vmem:[#allocation155_spill] sm:$0xff] }
 0x61b   :  { %3197 = vmatpush.msrb.mxu0 %v7514_v46  ;;  %3259 = vmatpush.msrb.mxu3 %v7541_v17  ;;  %v9450_v46 = vld [vmem:[#allocation156_spill] sm:$0xff] }
 0x61c   :  { %3217 = vmatpush.msrb.mxu1 %v7520_v25  ;;  %3238 = vmatpush.msrb.mxu2 %v7523_v42  ;;  %v2775_v25 = vld.sshfl [vmem:[#allocation1] sm:$0xff pattern:$0x75316420]  ;;  %v2776_v17 = vld.sshfl [vmem:[#allocation1 + $0x8] sm:$0xff pattern:$0x75316420] }
 0x61d   :  { %3198 = vmatpush.msrb.mxu0 %v7526_v45  ;;  %3260 = vmatpush.msrb.mxu3 %v7553_v52 }
 0x61e   :  { %3218 = vmatpush.msrb.mxu1 %v7532_v60  ;;  %3239 = vmatpush.msrb.mxu2 %v7535_v5 }
 0x61f   :  { %3199 = vmatpush.msrb.mxu0 %v7538_v53  ;;  %3261 = vmatpush.msrb.mxu3 %v7565_v31 }
 0x620   :  { %3219 = vmatpush.msrb.mxu1 %v7544_v58  ;;  %3240 = vmatpush.msrb.mxu2 %v7547_v18 }
 0x621   :  { %3200 = vmatpush.msrb.mxu0 %v7550_v0  ;;  %3262 = vmatpush.msrb.mxu3 %v7577_v20 }
 0x622   :  { %3220 = vmatpush.msrb.mxu1 %v7556_v37  ;;  %3241 = vmatpush.msrb.mxu2 %v7559_v56 }
 0x623   :  { %3201 = vmatpush.msrb.mxu0 %v7562_v19  ;;  %3263 = vmatpush.msrb.mxu3 %v9442_v59 }
 0x624   :  { %3221 = vmatpush.msrb.mxu1 %v7568_v27  ;;  %3242 = vmatpush.msrb.mxu2 %v7571_v6 }
 0x625   :  { %3202 = vmatpush.msrb.mxu0 %v7574_v3  ;;  %3264 = vmatpush.msrb.mxu3 %v9446_v28 }
 0x626   :  { %3222 = vmatpush.msrb.mxu1 %v9439_v38  ;;  %3243 = vmatpush.msrb.mxu2 %v9440_v50 }
 0x627   :  { %3203 = vmatpush.msrb.mxu0 %v9441_v22  ;;  %3265 = vmatpush.msrb.mxu3 %v9450_v46  ;;  %v2778_v22 = vld.sshfl [vmem:[#allocation1 + $0x18] sm:$0xff pattern:$0x75316420] }
 0x628   :  { %3223 = vmatpush.msrb.mxu1 %v9443_v12  ;;  %3244 = vmatpush.msrb.mxu2 %v9444_v51 }
 0x629   :  { %3204 = vmatpush.msrb.mxu0 %v9445_v34 }
 0x62a   :  { %3224 = vmatpush.msrb.mxu1 %v9447_v44  ;;  %3245 = vmatpush.msrb.mxu2 %v9448_v10 }
 0x62b   :  { %3205 = vmatpush.msrb.mxu0 %v9449_v39 }
 0x62c   :  { %3225 = vmatpush.msrb.mxu1 %v9451_v61 }
 0x62d   :  { %v2800_v42 = vpop.f32.mrf.mxu0 }
 0x62e   :  { %v2801_v45 = vadd.f32 %v2800_v42, %v2775_v25 }
 0x62f   :  { %v2820_v7 = vpop.f32.mrf.mxu1 }
 0x630   :  { %v2821_v60 = vadd.f32 %v2820_v7, %v2801_v45 }
 0x632   :  { %v2840_v5 = vpop.f32.mrf.mxu2 }
 0x633   :  { %v2841_v53 = vadd.f32 %v2840_v5, %v2821_v60 }
 0x634   :  { %v2860_v58 = vpop.f32.mrf.mxu3 }
 0x635   :  { %v3622_v18 = vmul.f32 -1.442695, %v2841_v53  ;;  %v2861_v0 = vadd.f32 %v2860_v58, %v2776_v17 }
 0x637   :  { %3760 = vpow2.f32 %v3622_v18  ;;  %v2880_v52 = vpop.f32.mrf.mxu0 }
 0x638   :  { %v2881_v37 = vadd.f32 %v2880_v52, %v2861_v0 }
 0x639   :  { %v2900_v56 = vpop.f32.mrf.mxu1 }
 0x63a   :  { %v2901_v19 = vadd.f32 %v2900_v56, %v2881_v37 }
 0x63c   :  { %v3623_v31 = vmul.f32 -1.442695, %v2901_v19  ;;  %v2920_v21 = vpop.f32.mrf.mxu2 }
 0x63d   :  { %v3761_v27 = vpop.eup %3760  ;;  %v2921_v23 = vadd.f32 %v2920_v21, %v2777_v33 }
 0x63e   :  { %3762 = vpow2.f32 %v3623_v31  ;;  %v3032_v6 = vadd.f32 1.0, %v3761_v27  ;;  %v2940_v24 = vpop.f32.mrf.mxu3 }
 0x63f   :  { %v2941_v43 = vadd.f32 %v2940_v24, %v2921_v23 }
 0x640   :  { %3764 = vrcp.f32 %v3032_v6  ;;  %v3046_v25 = vand.u32 2147483648, %v3032_v6  ;;  %vm3040_vm10 = vweird.f32 %v3032_v6  ;;  %v3044_v7 = vand.u32 2147483647, %v3032_v6 }
 0x642   :  { %v3047_v58 = vor.u32 1.1754944e-38, %v3046_v25  ;;  %vm3045_vm14 = vcmp.eq.f32.partialorder %v3044_v7, 8.507059e+37  ;;  %v9482_v25 = vld [vmem:[#allocation28_spill] sm:$0xff]  ;;  %v9485_v7 = vld [vmem:[#allocation23_spill] sm:$0xff] }
 0x644   :  { %v3763_v3 = vpop.eup %3762 }
 0x645   :  { %v3033_v20 = vadd.f32 1.0, %v3763_v3 }
 0x646   :  { %v3765_v47 = vpop.eup %3764 }
 0x647   :  { %3766 = vrcp.f32 %v3033_v20  ;;  %v3036_v29 = vmul.f32 %v3765_v47, %v3032_v6  ;;  %v3061_v46 = vand.u32 2147483648, %v3033_v20  ;;  %vm3041_vm7 = vweird.f32 %v3765_v47 }
 0x648   :  { %vm3055_vm8 = vweird.f32 %v3033_v20  ;;  %v3059_v42 = vand.u32 2147483647, %v3033_v20  ;;  %vm3042_vm11 = vmor %vm3040_vm10, %vm3041_vm7 }
 0x649   :  { %v3037_v55 = vsub.f32 1.0, %v3036_v29  ;;  %v3062_v53 = vor.u32 1.1754944e-38, %v3061_v46  ;;  %v9480_v46 = vld [vmem:[#allocation18_spill] sm:$0xff] }
 0x64a   :  { %vm3060_vm13 = vcmp.eq.f32.partialorder %v3059_v42, 8.507059e+37  ;;  %v9483_v42 = vld [vmem:[#allocation20_spill] sm:$0xff] }
 0x64b   :  { %v3038_v34 = vmul.f32 %v3765_v47, %v3037_v55  ;;  %v9467_v55 = vld [vmem:[#allocation170_spill] sm:$0xff] }
 0x64d   :  { %v3767_v63 = vpop.eup %3766  ;;  %v3039_v61 = vadd.f32 %v3765_v47, %v3038_v34  ;;  %v9475_v34 = vld [vmem:[#allocation112_spill] sm:$0xff] }
 0x64e   :  { %v3051_v11 = vmul.f32 %v3767_v63, %v3033_v20  ;;  %vm3056_vm6 = vweird.f32 %v3767_v63 }
 0x64f   :  { %vm3057_vm9 = vmor %vm3055_vm8, %vm3056_vm6  ;;  %v3043_v17 = vsel %vm3042_vm11, %v3765_v47, %v3039_v61  ;;  %v9481_v61 = vld [vmem:[#allocation19_spill] sm:$0xff] }
 0x650   :  { %v3052_v54 = vsub.f32 1.0, %v3051_v11  ;;  %v3048_v52 = vsel %vm3045_vm14, %v3047_v58, %v3043_v17  ;;  %v9489_v17 = vld [vmem:[#allocation29_spill] sm:$0xff]  ;;  %v9490_v58 = vld [vmem:[#allocation90_spill] sm:$0xff] }
 0x652   :  { %v3053_v59 = vmul.f32 %v3767_v63, %v3052_v54  ;;  %v9465_v54 = vld [vmem:[#allocation167_spill] sm:$0xff] }
 0x654   :  { %v3054_v39 = vadd.f32 %v3767_v63, %v3053_v59  ;;  %v9472_v59 = vld [vmem:[#allocation40_spill] sm:$0xff] }
 0x656   :  { %v3058_v5 = vsel %vm3057_vm9, %v3767_v63, %v3054_v39  ;;  %v9479_v39 = vld [vmem:[#allocation17_spill] sm:$0xff] }
 0x657   :  { %v3063_v18 = vsel %vm3060_vm13, %v3062_v53, %v3058_v5  ;;  %v9487_v5 = vld [vmem:[#allocation26_spill] sm:$0xff]  ;;  %v9488_v53 = vld [vmem:[#allocation27_spill] sm:$0xff] }
 0x658   :  { %v3081_v56 = vmul.f32 %v3063_v18, %v7624_v14  ;;  %v9491_v18 = vld [vmem:[#allocation91_spill] sm:$0xff] }
 0x65b   :  { %v2960_v32 = vpop.f32.mrf.mxu0 }
 0x65c   :  { %v2961_v16 = vadd.f32 %v2960_v32, %v2941_v43  ;;  %v9464_v43 = vld [vmem:[#allocation165_spill] sm:$0xff] }
 0x65d   :  { %v9466_v32 = vld [vmem:[#allocation169_spill] sm:$0xff] }
 0x65e   :  { %v3624_v50 = vmul.f32 -1.442695, %v2961_v16  ;;  %v9468_v16 = vld [vmem:[#allocation171_spill] sm:$0xff] }
 0x65f   :  { %v2980_v38 = vpop.f32.mrf.mxu1 }
 0x660   :  { %v2981_v12 = vadd.f32 %v2980_v38, %v2778_v22  ;;  %3768 = vpow2.f32 %v3624_v50  ;;  %v3000_v51 = vpop.f32.mrf.mxu2  ;;  %v9469_v38 = vld [vmem:[#allocation77_spill] sm:$0xff]  ;;  %v9470_v50 = vld [vmem:[#allocation78_spill] sm:$0xff]  ;;  %v9471_v22 = vld [vmem:[#allocation39_spill] sm:$0xff] }
 0x662   :  { %v3001_v28 = vadd.f32 %v3000_v51, %v2981_v12  ;;  %v9473_v12 = vld [vmem:[#allocation16_spill] sm:$0xff]  ;;  %v9474_v51 = vld [vmem:[#allocation111_spill] sm:$0xff] }
 0x663   :  { %v3020_v44 = vpop.f32.mrf.mxu3 }
 0x664   :  { %v3021_v10 = vadd.f32 %v3020_v44, %v3001_v28  ;;  %v9476_v28 = vld [vmem:[#allocation50_spill] sm:$0xff]  ;;  %v9477_v44 = vld [vmem:[#allocation51_spill] sm:$0xff] }
 0x666   :  { %3770 = vtanh.f32 %v3021_v10  ;;  %v3769_v45 = vpop.eup %3768  ;;  %v9478_v10 = vld [vmem:[#allocation22_spill] sm:$0xff] }
 0x667   :  { %v3034_v60 = vadd.f32 1.0, %v3769_v45  ;;  %v9484_v45 = vld [vmem:[#allocation21_spill] sm:$0xff] }
 0x669   :  { %3772 = vrcp.f32 %v3034_v60  ;;  %v3076_v3 = vand.u32 2147483648, %v3034_v60  ;;  %v3074_v21 = vand.u32 2147483647, %v3034_v60  ;;  %vm3070_vm0 = vweird.f32 %v3034_v60 }
 0x66b   :  { %v3077_v33 = vor.u32 1.1754944e-38, %v3076_v3  ;;  %vm3075_vm4 = vcmp.eq.f32.partialorder %v3074_v21, 8.507059e+37  ;;  %v9499_v3 = vld [vmem:[#allocation34_spill] sm:$0xff]  ;;  %v9501_v21 = vld [vmem:[#allocation37_spill] sm:$0xff] }
 0x66c   :  { %v3771_v0 = vpop.eup %3770 }
 0x66d   :  { %v3082_v37 = vmul.f32 %v3771_v0, %v3048_v52  ;;  %v9492_v0 = vld [vmem:[#allocation41_spill] sm:$0xff]  ;;  %v9493_v52 = vld [vmem:[#allocation42_spill] sm:$0xff] }
 0x66f   :  { %v3773_v19 = vpop.eup %3772  ;;  %v7906_v31 = vadd.f32 %v3082_v37, %v3081_v56  ;;  %v9494_v37 = vld [vmem:[#allocation36_spill] sm:$0xff]  ;;  %v9495_v56 = vld [vmem:[#allocation30_spill] sm:$0xff] }
 0x670   :  { %v3066_v27 = vmul.f32 %v3773_v19, %v3034_v60  ;;  %vm3071_vm15 = vweird.f32 %v3773_v19  ;;  %v9486_v60 = vld [vmem:[#allocation32_spill] sm:$0xff] }
 0x671   :  { %3774 = vtanh.f32 %v7906_v31  ;;  %vm3072_vm1 = vmor %vm3070_vm0, %vm3071_vm15  ;;  %vm3454_vm15 = vcmask 76802  }
 0x672   :  { %v3067_v6 = vsub.f32 1.0, %v3066_v27  ;;  %v9497_v27 = vld [vmem:[#allocation33_spill] sm:$0xff] }
 0x674   :  { %v3068_v20 = vmul.f32 %v3773_v19, %v3067_v6  ;;  %v9498_v6 = vld [vmem:[#allocation44_spill] sm:$0xff] }
 0x676   :  { %v3069_v47 = vadd.f32 %v3773_v19, %v3068_v20  ;;  %v9500_v20 = vld [vmem:[#allocation35_spill] sm:$0xff] }
 0x677   :  { %v3775_v24 = vpop.eup %3774 }
 0x678   :  { %v3073_v23 = vsel %vm3072_vm1, %v3773_v19, %v3069_v47  ;;  %v9496_v19 = vld [vmem:[#allocation31_spill] sm:$0xff]  ;;  %v9502_v47 = vld [vmem:[#allocation45_spill] sm:$0xff] }
 0x679   :  { %v3078_v63 = vsel %vm3075_vm4, %v3077_v33, %v3073_v23  ;;  %v9503_v33 = vld [vmem:[#allocation15_spill] sm:$0xff] }
 0x67a   :  { %v7909_v14 = vmul.f32 %v3775_v24, %v3078_v63  ;;  %v534_v23 = vsel %vm258_vm2, 0.0, %v9503_v33  ;;  %v9504_v63 = vld [vmem:[#allocation14_spill] sm:$0xff] }
 0x67b   :  { %v540_v24 = vrot.slane %v534_v23, 4 }
 0x67c   :  { %3629 = vmatmul.msk.f32.vlgmr.msra.gmra.mxu2 %vm5004_vm12, %v7909_v14  ;;  %v7917_v29 = vsel %vm258_vm2, %v7909_v14, %v4984_v57  ;;  %v7920_v11 = vrot.slane %v7909_v14, 6  ;;  %v9452_v57 = vld [vmem:[#allocation12_spill] sm:$0xff] }
 0x67d   :  { %3310 = vmatpush.msra.mxu2 %v7640_v30  ;;  %3126 = vmatmul.f32.vlgmr.msra.gmra.mxu0 %v7917_v29  ;;  %v531_v30 = vsel %vm258_vm2, 0.0, %v9452_v57 }
 0x67e   :  { %3186 = vmatmul.f32.vlgmr.msra.gmra.mxu3 %v7917_v29  ;;  %3270 = vmatpush.msra.mxu0 %v7645_v49  ;;  %v9453_v49 = vld [vmem:[#allocation13_spill] sm:$0xff] }
 0x67f   :  { %3330 = vmatpush.msra.mxu3 %v7648_v9  ;;  %3627 = vmatmul.msk.f32.vlgmr.msra.gmra.mxu1 %vm5004_vm12, %v7920_v11  ;;  %v532_v9 = vsel %vm258_vm2, 0.0, %v9453_v49 }
 0x680   :  { %3290 = vmatpush.msra.mxu1 %v7654_v15  ;;  %3311 = vmatpush.msra.mxu2 %v7657_v36  ;;  %v539_v15 = vrot.slane %v532_v9, 4 }
 0x681   :  { %3271 = vmatpush.msra.mxu0 %v7660_v8  ;;  %3331 = vmatpush.msra.mxu3 %v7663_v40  ;;  %v9454_v8 = vld [vmem:[#allocation157_spill] sm:$0xff]  ;;  %v9455_v40 = vld [vmem:[#allocation159_spill] sm:$0xff] }
 0x682   :  { %3291 = vmatpush.msra.mxu1 %v7666_v48  ;;  %3312 = vmatpush.msra.mxu2 %v7669_v26  ;;  %v541_v36 = vsel %vm269_vm3, %v531_v30, %v539_v15  ;;  %v9456_v48 = vld [vmem:[#allocation160_spill] sm:$0xff]  ;;  %v9457_v26 = vld [vmem:[#allocation97_spill] sm:$0xff] }
 0x683   :  { %3272 = vmatpush.msra.mxu0 %v7672_v4  ;;  %3332 = vmatpush.msra.mxu3 %v7675_v41  ;;  %3099 = vst [vmem:[#allocation1] ss:$2 sm:$0xff] %v541_v36  ;;  %v9458_v4 = vld [vmem:[#allocation98_spill] sm:$0xff]  ;;  %v9459_v41 = vld [vmem:[#allocation48_spill] sm:$0xff] }
 0x684   :  { %3292 = vmatpush.msra.mxu1 %v7678_v2  ;;  %3313 = vmatpush.msra.mxu2 %v7681_v62  ;;  %v9460_v2 = vld [vmem:[#allocation49_spill] sm:$0xff] }
 0x685   :  { %3273 = vmatpush.msra.mxu0 %v7684_v13  ;;  %3333 = vmatpush.msra.mxu3 %v7687_v35  ;;  %v9461_v62 = vld [vmem:[#allocation161_spill] sm:$0xff]  ;;  %v9462_v13 = vld [vmem:[#allocation163_spill] sm:$0xff]  ;;  %v9463_v35 = vld [vmem:[#allocation164_spill] sm:$0xff] }
 0x686   :  { %3246 = vmatmul.f32.vlgmr.msrb.gmra.mxu2 %v7917_v29  ;;  %3293 = vmatpush.msra.mxu1 %v9454_v8 }
 0x687   :  { %3314 = vmatpush.msra.mxu2 %v9455_v40  ;;  %3631 = vmatmul.msk.f32.vlgmr.msrb.gmra.mxu0 %vm5004_vm12, %v7920_v11 }
 0x688   :  { %3635 = vmatmul.msk.f32.vlgmr.msrb.gmra.mxu3 %vm5004_vm12, %v7920_v11  ;;  %3274 = vmatpush.msra.mxu0 %v9456_v48  ;;  %v3427_v48 = vld [vmem:[%s8088_s5 + $0x70] sm:$0xff] }
 0x689   :  { %3334 = vmatpush.msra.mxu3 %v9457_v26  ;;  %3633 = vmatmul.msk.f32.vlgmr.msrb.gmra.mxu1 %vm5004_vm12, %v7909_v14 }
 0x68a   :  { %3294 = vmatpush.msra.mxu1 %v9458_v4  ;;  %3315 = vmatpush.msra.mxu2 %v9459_v41  ;;  %v3102_v30 = vld.sshfl [vmem:[#allocation1] sm:$0xff pattern:$0x75316420]  ;;  %v3103_v1 = vld.sshfl [vmem:[#allocation1 + $0x8] sm:$0xff pattern:$0x75316420] }
 0x68b   :  { %3275 = vmatpush.msra.mxu0 %v9460_v2  ;;  %3335 = vmatpush.msra.mxu3 %v9461_v62  ;;  %v3426_v41 = vld [vmem:[%s8088_s5 + $0x68] sm:$0xff] }
 0x68c   :  { %3295 = vmatpush.msra.mxu1 %v9462_v13  ;;  %3316 = vmatpush.msra.mxu2 %v9463_v35  ;;  %v3425_v13 = vld [vmem:[%s8088_s5 + $0x60] sm:$0xff] }
 0x68d   :  { %3276 = vmatpush.msra.mxu0 %v9464_v43  ;;  %3336 = vmatpush.msra.mxu3 %v9465_v54  ;;  %v3424_v54 = vld [vmem:[%s8088_s5 + $0x58] sm:$0xff] }
 0x68e   :  { %3296 = vmatpush.msra.mxu1 %v9466_v32  ;;  %3317 = vmatpush.msra.mxu2 %v9467_v55  ;;  %v3423_v55 = vld [vmem:[%s8088_s5 + $0x50] sm:$0xff] }
 0x68f   :  { %3277 = vmatpush.msra.mxu0 %v9468_v16  ;;  %3337 = vmatpush.msra.mxu3 %v9469_v38  ;;  %v3422_v38 = vld [vmem:[%s8088_s5 + $0x48] sm:$0xff] }
 0x690   :  { %3297 = vmatpush.msra.mxu1 %v9470_v50  ;;  %3318 = vmatpush.msra.mxu2 %v9471_v22  ;;  %v3421_v22 = vld [vmem:[%s8088_s5 + $0x40] sm:$0xff] }
 0x691   :  { %3278 = vmatpush.msra.mxu0 %v9472_v59  ;;  %3338 = vmatpush.msra.mxu3 %v9473_v12  ;;  %v3420_v59 = vld [vmem:[%s8088_s5 + $0x38] sm:$0xff] }
 0x692   :  { %3298 = vmatpush.msra.mxu1 %v9474_v51  ;;  %3319 = vmatpush.msra.mxu2 %v9475_v34  ;;  %v3419_v51 = vld [vmem:[%s8088_s5 + $0x30] sm:$0xff] }
 0x693   :  { %3279 = vmatpush.msra.mxu0 %v9476_v28  ;;  %3339 = vmatpush.msra.mxu3 %v9477_v44  ;;  %v3418_v28 = vld [vmem:[%s8088_s5 + $0x28] sm:$0xff] }
 0x694   :  { %3299 = vmatpush.msra.mxu1 %v9478_v10  ;;  %3320 = vmatpush.msra.mxu2 %v9479_v39  ;;  %v3417_v39 = vld [vmem:[%s8088_s5 + $0x20] sm:$0xff] }
 0x695   :  { %3280 = vmatpush.msra.mxu0 %v9480_v46  ;;  %3340 = vmatpush.msra.mxu3 %v9481_v61  ;;  %v3416_v46 = vld [vmem:[%s8088_s5 + $0x18] sm:$0xff] }
 0x696   :  { %3300 = vmatpush.msra.mxu1 %v9482_v25  ;;  %3321 = vmatpush.msra.mxu2 %v9483_v42  ;;  %v3415_v25 = vld [vmem:[%s8088_s5 + $0x10] sm:$0xff] }
 0x697   :  { %3281 = vmatpush.msra.mxu0 %v9484_v45  ;;  %3341 = vmatpush.msra.mxu3 %v9485_v7  ;;  %v3414_v7 = vld [vmem:[%s8088_s5 + $0x8] sm:$0xff] }
 0x698   :  { %3301 = vmatpush.msra.mxu1 %v9486_v60  ;;  %3322 = vmatpush.msra.mxu2 %v9487_v5 }
 0x699   :  { %3282 = vmatpush.msra.mxu0 %v9488_v53  ;;  %3342 = vmatpush.msra.mxu3 %v9489_v17  ;;  %v3413_v17 = vld [vmem:[%s8088_s5] sm:$0xff] }
 0x69a   :  { %3302 = vmatpush.msra.mxu1 %v9490_v58  ;;  %3323 = vmatpush.msra.mxu2 %v9491_v18 }
 0x69b   :  { %3283 = vmatpush.msra.mxu0 %v9492_v0  ;;  %3343 = vmatpush.msra.mxu3 %v9493_v52 }
 0x69c   :  { %3303 = vmatpush.msra.mxu1 %v9494_v37  ;;  %3324 = vmatpush.msra.mxu2 %v9495_v56 }
 0x69d   :  { %3284 = vmatpush.msra.mxu0 %v9496_v19  ;;  %3344 = vmatpush.msra.mxu3 %v9497_v27 }
 0x69e   :  { %3304 = vmatpush.msra.mxu1 %v9498_v6  ;;  %3325 = vmatpush.msra.mxu2 %v9499_v3 }
 0x69f   :  { %3285 = vmatpush.msra.mxu0 %v9500_v20  ;;  %3639 = vmatmul.msk.f32.vlgmr.msra.gmra.mxu2 %vm5004_vm12, %v7920_v11  ;;  %v533_v11 = vsel %vm258_vm2, 0.0, %v9504_v63 }
 0x6a0   :  { %3345 = vmatpush.msra.mxu3 %v9501_v21  ;;  %3637 = vmatmul.msk.f32.vlgmr.msra.gmra.mxu0 %vm5004_vm12, %v7909_v14  ;;  %v542_v57 = vsel %vm269_vm3, %v533_v11, %v540_v24 }
 0x6a1   :  { %3305 = vmatpush.msra.mxu1 %v9502_v47  ;;  %3641 = vmatmul.msk.f32.vlgmr.msra.gmra.mxu3 %vm5004_vm12, %v7909_v14  ;;  %3101 = vst [vmem:[#allocation1 + $0x10] ss:$2 sm:$0xff] %v542_v57  ;;  %v3428_v14 = vld [vmem:[%s8088_s5 + $0x78] sm:$0xff] }
 0x6a2   :  { %3306 = vmatmul.f32.vlgmr.msra.gmra.mxu1 %v7917_v29  ;;  %3429 = vmatpush.msrb.mxu0 %v3428_v14 }
 0x6a4   :  { %3430 = vmatpush.msrb.mxu0 %v3427_v48 }
 0x6a6   :  { %3431 = vmatpush.msrb.mxu0 %v3426_v41 }
 0x6a8   :  { %3432 = vmatpush.msrb.mxu0 %v3425_v13  ;;  %v3104_v44 = vld.sshfl [vmem:[#allocation1 + $0x10] sm:$0xff pattern:$0x75316420]  ;;  %v3105_v56 = vld.sshfl [vmem:[#allocation1 + $0x18] sm:$0xff pattern:$0x75316420] }
 0x6aa   :  { %3433 = vmatpush.msrb.mxu0 %v3424_v54 }
 0x6ac   :  { %3434 = vmatpush.msrb.mxu0 %v3423_v55 }
 0x6ae   :  { %3435 = vmatpush.msrb.mxu0 %v3422_v38 }
 0x6b0   :  { %3436 = vmatpush.msrb.mxu0 %v3421_v22 }
 0x6b2   :  { %3437 = vmatpush.msrb.mxu0 %v3420_v59 }
 0x6b4   :  { %3438 = vmatpush.msrb.mxu0 %v3419_v51 }
 0x6b6   :  { %3439 = vmatpush.msrb.mxu0 %v3418_v28 }
 0x6b8   :  { %3440 = vmatpush.msrb.mxu0 %v3417_v39 }
 0x6ba   :  { %3441 = vmatpush.msrb.mxu0 %v3416_v46 }
 0x6bc   :  { %3442 = vmatpush.msrb.mxu0 %v3415_v25 }
 0x6be   :  { %3443 = vmatpush.msrb.mxu0 %v3414_v7 }
 0x6c0   :  { %3444 = vmatpush.msrb.mxu0 %v3413_v17 }
 0x6fa   :  { %v3127_v49 = vpop.f32.mrf.mxu0 }
 0x6fb   :  { %v3128_v9 = vadd.f32 %v3127_v49, %v3102_v30 }
 0x6fc   :  { %v3147_v15 = vpop.f32.mrf.mxu1 }
 0x6fd   :  { %v3148_v36 = vadd.f32 %v3147_v15, %v3128_v9 }
 0x6ff   :  { %v3167_v8 = vpop.f32.mrf.mxu2 }
 0x700   :  { %v3168_v29 = vadd.f32 %v3167_v8, %v3148_v36 }
 0x701   :  { %v3187_v40 = vpop.f32.mrf.mxu3 }
 0x702   :  { %v3642_v26 = vmul.f32 -1.442695, %v3168_v29  ;;  %v3188_v4 = vadd.f32 %v3187_v40, %v3103_v1 }
 0x704   :  { %3776 = vpow2.f32 %v3642_v26  ;;  %v3207_v2 = vpop.f32.mrf.mxu0 }
 0x705   :  { %v3208_v62 = vadd.f32 %v3207_v2, %v3188_v4 }
 0x706   :  { %v3227_v35 = vpop.f32.mrf.mxu1 }
 0x707   :  { %v3228_v43 = vadd.f32 %v3227_v35, %v3208_v62 }
 0x709   :  { %v3643_v32 = vmul.f32 -1.442695, %v3228_v43  ;;  %v3247_v10 = vpop.f32.mrf.mxu2 }
 0x70a   :  { %v3777_v16 = vpop.eup %3776  ;;  %v3248_v42 = vadd.f32 %v3247_v10, %v3104_v44 }
 0x70b   :  { %3778 = vpow2.f32 %v3643_v32  ;;  %v8042_v50 = vadd.f32 1.0, %v3777_v16  ;;  %v3267_v45 = vpop.f32.mrf.mxu3 }
 0x70c   :  { %v3268_v58 = vadd.f32 %v3267_v45, %v3248_v42 }
 0x70d   :  { %3780 = vrcp.f32 %v8042_v50  ;;  %v3373_v57 = vand.u32 2147483648, %v8042_v50  ;;  %vm3367_vm6 = vweird.f32 %v8042_v50  ;;  %v3371_v9 = vand.u32 2147483647, %v8042_v50 }
 0x70f   :  { %v3374_v14 = vor.u32 1.1754944e-38, %v3373_v57  ;;  %vm3372_vm9 = vcmp.eq.f32.partialorder %v3371_v9, 8.507059e+37 }
 0x711   :  { %v3779_v12 = vpop.eup %3778 }
 0x712   :  { %v3360_v34 = vadd.f32 1.0, %v3779_v12 }
 0x713   :  { %v3781_v61 = vpop.eup %3780 }
 0x714   :  { %3782 = vrcp.f32 %v3360_v34  ;;  %v3363_v5 = vmul.f32 %v3781_v61, %v8042_v50  ;;  %v3388_v63 = vand.u32 2147483648, %v3360_v34  ;;  %vm3368_vm3 = vweird.f32 %v3781_v61 }
 0x715   :  { %vm3382_vm12 = vweird.f32 %v3360_v34  ;;  %v3386_v30 = vand.u32 2147483647, %v3360_v34  ;;  %vm3369_vm7 = vmor %vm3367_vm6, %vm3368_vm3 }
 0x716   :  { %v3364_v52 = vsub.f32 1.0, %v3363_v5  ;;  %v3389_v8 = vor.u32 1.1754944e-38, %v3388_v63 }
 0x717   :  { %vm3387_vm8 = vcmp.eq.f32.partialorder %v3386_v30, 8.507059e+37 }
 0x718   :  { %v3365_v21 = vmul.f32 %v3781_v61, %v3364_v52 }
 0x71a   :  { %v3783_v60 = vpop.eup %3782  ;;  %v3366_v11 = vadd.f32 %v3781_v61, %v3365_v21 }
 0x71b   :  { %v3378_v53 = vmul.f32 %v3783_v60, %v3360_v34  ;;  %vm3383_vm2 = vweird.f32 %v3783_v60 }
 0x71c   :  { %vm3384_vm5 = vmor %vm3382_vm12, %vm3383_vm2  ;;  %v3370_v1 = vsel %vm3369_vm7, %v3781_v61, %v3366_v11 }
 0x71d   :  { %v3379_v18 = vsub.f32 1.0, %v3378_v53  ;;  %v3287_v0 = vpop.f32.mrf.mxu0  ;;  %v3375_v48 = vsel %vm3372_vm9, %v3374_v14, %v3370_v1 }
 0x71e   :  { %v3288_v37 = vadd.f32 %v3287_v0, %v3268_v58 }
 0x71f   :  { %v3307_v19 = vpop.f32.mrf.mxu1  ;;  %v3380_v6 = vmul.f32 %v3783_v60, %v3379_v18 }
 0x720   :  { %v3644_v27 = vmul.f32 -1.442695, %v3288_v37  ;;  %v3308_v3 = vadd.f32 %v3307_v19, %v3105_v56 }
 0x721   :  { %v3381_v24 = vadd.f32 %v3783_v60, %v3380_v6 }
 0x722   :  { %3784 = vpow2.f32 %v3644_v27  ;;  %v3327_v20 = vpop.f32.mrf.mxu2 }
 0x723   :  { %v3328_v47 = vadd.f32 %v3327_v20, %v3308_v3  ;;  %v3385_v36 = vsel %vm3384_vm5, %v3783_v60, %v3381_v24 }
 0x724   :  { %v3347_v33 = vpop.f32.mrf.mxu3  ;;  %v3390_v29 = vsel %vm3387_vm8, %v3389_v8, %v3385_v36 }
 0x725   :  { %v3348_v23 = vadd.f32 %v3347_v33, %v3328_v47  ;;  %v3408_v4 = vmul.f32 %v3390_v29, %v7906_v31  ;;  %v3651_v31 = vld [vmem:[%s8089_s6] ss:$0 sm:$0xff] }
 0x727   :  { %3786 = vtanh.f32 %v3348_v23 }
 0x728   :  { %v3785_v49 = vpop.eup %3784 }
 0x729   :  { %v3361_v15 = vadd.f32 1.0, %v3785_v49 }
 0x72b   :  { %3788 = vrcp.f32 %v3361_v15  ;;  %v3403_v35 = vand.u32 2147483648, %v3361_v15  ;;  %v3401_v54 = vand.u32 2147483647, %v3361_v15  ;;  %vm3397_vm11 = vweird.f32 %v3361_v15 }
 0x72d   :  { %v3787_v40 = vpop.eup %3786  ;;  %v3404_v55 = vor.u32 1.1754944e-38, %v3403_v35  ;;  %vm3402_vm14 = vcmp.eq.f32.partialorder %v3401_v54, 8.507059e+37 }
 0x72e   :  { %v3409_v26 = vmul.f32 %v3787_v40, %v3375_v48 }
 0x730   :  { %v3410_v2 = vadd.f32 %v3409_v26, %v3408_v4 }
 0x731   :  { %v3789_v41 = vpop.eup %3788 }
 0x732   :  { %v3393_v62 = vmul.f32 %v3789_v41, %v3361_v15  ;;  %3790 = vtanh.f32 %v3410_v2  ;;  %vm3398_vm10 = vweird.f32 %v3789_v41 }
 0x733   :  { %vm3399_vm13 = vmor %vm3397_vm11, %vm3398_vm10 }
 0x734   :  { %v3394_v13 = vsub.f32 1.0, %v3393_v62 }
 0x736   :  { %v3395_v43 = vmul.f32 %v3789_v41, %v3394_v13 }
 0x738   :  { %v3396_v32 = vadd.f32 %v3789_v41, %v3395_v43  ;;  %v3791_v38 = vpop.eup %3790 }
 0x73a   :  { %v3400_v16 = vsel %vm3399_vm13, %v3789_v41, %v3396_v32 }
 0x73b   :  { %v3405_v50 = vsel %vm3402_vm14, %v3404_v55, %v3400_v16 }
 0x73c   :  { %v3412_v22 = vmul.f32 %v3791_v38, %v3405_v50 }
 0x73e   :  { %3445 = vmatmul.f32.vlgmr.msrb.gmra.mxu0 %v3412_v22 }
 0x7bb   :  { %v3446_v59 = vpop.f32.mrf.mxu0 }
 0x7bc   :  { %v3453_v12 = vadd.f32 %v3651_v31, %v3446_v59 }
 0x7be   :  { %3455 = vst.msk [vmem:[#allocation8 - $0x2] sm:$0xc] %vm3454_vm15, %v3453_v12 }
 0x7bf   :  { %3466 = dma.vmem_to_hbm [thread:$0]  %s3462_s22, 32, %s3464_s25, [#allocation5]  }
 0x7c0   :  { %4524 = dma.done.wait [#allocation5], 32  }
 0x7c1   :  { %4525 = vsyncadd [#allocation5], 4294967264 }
 0x7c2   :  { %3471 = vsyncpa [#allocation4], 1 }
 0x7c3   :  { %3472 = vsyncpa [#allocation7], 1 }
 0x7c4   :  { %3473 = vsyncpa [#allocation5], 1 }

</bundles_post_ra>
